<compile_context>
chip_gen: v5e
topology: v5e:2x2
jax: 0.10.0
libtpu: 0.0.40
codegen_flags: <defaults>
</compile_context>

<pallas_src>
import jax
import jax.numpy as jnp
import numpy as np
from jax.experimental import pallas as pl
from jax.experimental.pallas import tpu as pltpu

POOL_K = 5
POOL_S = 3
CONV_OUT = 128          # 1x1 conv output channels (fixed by the module: 2048 = 128*4*4)


def _round_up(x, m):
    return ((x + m - 1) // m) * m


def _vmem_capacity_bytes():
    try:
        return int(pltpu.get_tpu_info().vmem_capacity_bytes)
    except Exception:
        return 128 * 1024 * 1024   # conservative default (v5e/v6e)


def _pick_batch_tile(n, cin, hw, ncp, resident_weight_bytes, vmem_capacity_bytes):
    """Largest batch tile whose double-buffered input+output blocks plus the
    single-buffered resident weights fit ~3/4 of this chip's physical VMEM
    (≈96 MiB on v5e/v6e, ≈48 MiB on v7x).  Accounts for lane padding of the
    H*W dim (e.g. 196 -> 256).  If the tile is smaller than the batch it must
    be a multiple of 8 so the output block stays sublane-aligned."""
    budget = (vmem_capacity_bytes * 3) // 4
    hw_pad = _round_up(hw, 128)
    per_sample = 2 * cin * hw_pad * 4 + 2 * ncp * 4      # x block + out block, double-buffered
    avail = budget - resident_weight_bytes - (1 << 20)   # 1 MiB slack for compiler scratch
    cap = max(8, avail // max(per_sample, 1))
    # v7x (64 MiB VMEM, 2 TensorCores): keep >= 2 grid steps so ("parallel",)
    # can actually split the batch across both cores.
    if vmem_capacity_bytes <= 96 * 1024 * 1024 and n >= 16:
        cap = min(cap, _round_up(pl.cdiv(n, 2), 8))
    cap = min(cap, 256)
    if n <= cap:
        return n
    return max(8, (cap // 8) * 8)


# ----------------------------------------------------------------------------
# Fused kernel: AvgPool(5,3) + Conv1x1 + BN(eval) + ReLU + FC1 + ReLU + FC2
# ----------------------------------------------------------------------------
def inception_aux_kernel(x_ref, pt_ref, wcs_ref, shift_ref, w1_ref, b1_ref,
                         w2_ref, b2_ref, o_ref):
    # x_ref:     (TN, Cin, H*W)       f32, NCHW with spatial flattened (lane dim = H*W)
    # pt_ref:    (16, H*W)            f32, pooling matrix (row k = one 5x5 window, 1/25)
    # wcs_ref:   (Cin, 128)           f32, conv_w^T * bn_scale
    # shift_ref: (1, 128)             f32, bn_beta + (conv_bias - bn_mean) * bn_scale
    # w1_ref:    (16*128, hidden)     bf16, fc1 weight, row = k*128 + co  (NCHW flatten folded)
    # b1_ref:    (1, hidden)          f32
    # w2_ref:    (hidden, NCP)        bf16, fc2 weight^T zero-padded to NCP (multiple of 128)
    # b2_ref:    (1, NCP)             f32, zero-padded
    # o_ref:     (TN, NCP)            f32
    tn, cin, hw = x_ref.shape
    n_pos = pt_ref.shape[0]                                    # 16 pooled positions

    # --- AvgPool(5,3): one MXU contraction over the H*W lane dim (no broadcast).
    pooled = jnp.einsum("kj,ncj->nkc", pt_ref[...], x_ref[...],
                        preferred_element_type=jnp.float32)    # (TN, 16, Cin)

    # --- 1x1 conv + folded eval-BatchNorm + ReLU, all 16 positions in one matmul.
    a = jnp.dot(pooled.reshape(tn * n_pos, cin), wcs_ref[...],
                preferred_element_type=jnp.float32)            # (TN*16, 128)
    a = jnp.maximum(a + shift_ref[...], 0.0)

    # --- fc1 as ONE (TN, 2048) @ (2048, 1024) matmul; the flatten permutation is
    #     already folded into w1_ref, so this reshape is the only relayout needed.
    a2d = a.reshape(tn, n_pos * CONV_OUT).astype(jnp.bfloat16)  # (TN, 2048), k-major/co-minor
    h = jnp.maximum(jnp.dot(a2d, w1_ref[...],
                            preferred_element_type=jnp.float32) + b1_ref[...], 0.0)

    # Dropout(p=0.7): identity in eval mode.
    # TODO(synk): training-mode dropout randomness not implemented.

    # --- fc2 into a lane-dense (padded) class dim.
    o_ref[...] = jnp.dot(h.astype(jnp.bfloat16), w2_ref[...],
                         preferred_element_type=jnp.float32) + b2_ref[...]


# ----------------------------------------------------------------------------
# One-time parameter preparation (fold BN, permute fc1, cast to bf16, pad fc2)
# ----------------------------------------------------------------------------
def prepare_params(params, h, w, eps=1e-5):
    cin = params["conv_w"].shape[1]
    hidden, feat = params["fc1_w"].shape
    num_classes = params["fc2_w"].shape[0]
    h_out = (h - POOL_K) // POOL_S + 1
    w_out = (w - POOL_K) // POOL_S + 1
    n_pos = h_out * w_out
    assert n_pos * CONV_OUT == feat, "fc1 in-features must equal 128 * pooled spatial"

    scale = params["bn_gamma"] / jnp.sqrt(params["bn_var"] + eps)          # (128,)
    shift = params["bn_beta"] + (params["conv_b"] - params["bn_mean"]) * scale
    wcs = params["conv_w"].reshape(CONV_OUT, cin).T * scale[None, :]        # (Cin, 128)

    # Constant pooling matrix: pt[k, j] = 1/25 if spatial j is inside window k.
    pt = np.zeros((n_pos, h * w), np.float32)
    inv = 1.0 / (POOL_K * POOL_K)
    for i in range(h_out):
        for j in range(w_out):
            for di in range(POOL_K):
                for dj in range(POOL_K):
                    pt[i * w_out + j, (POOL_S * i + di) * w + (POOL_S * j + dj)] = inv

    # fc1_w[o, co*n_pos + k] -> w1p[k*128 + co, o]  (folds the NCHW flatten order so the
    # kernel's (TN, 16, 128) -> (TN, 2048) reshape lines up with the weight rows).
    w1p = jnp.transpose(params["fc1_w"].reshape(hidden, CONV_OUT, n_pos),
                        (2, 1, 0)).reshape(n_pos * CONV_OUT, hidden)

    ncp = _round_up(num_classes, 128)
    w2 = jnp.zeros((hidden, ncp), jnp.float32).at[:, :num_classes].set(params["fc2_w"].T)
    b2 = jnp.zeros((1, ncp), jnp.float32).at[:, :num_classes].set(params["fc2_b"][None, :])

    prep = {
        "pt": jnp.asarray(pt),
        "wcs": wcs.astype(jnp.float32),
        "shift": shift.reshape(1, CONV_OUT).astype(jnp.float32),
        "w1p": w1p.astype(jnp.bfloat16),
        "b1": params["fc1_b"].reshape(1, hidden).astype(jnp.float32),
        "w2": w2.astype(jnp.bfloat16),
        "b2": b2,
    }
    return prep, num_classes


# ----------------------------------------------------------------------------
# Wrapper: batch-tiled grid, single-buffered resident weights, padded-lane output
# ----------------------------------------------------------------------------
def inception_aux_forward(x_nchw, prep, num_classes, tn_override=None):
    n, cin, h, w = x_nchw.shape
    hw = h * w
    n_pos = prep["pt"].shape[0]
    hidden = prep["b1"].shape[1]
    ncp = prep["w2"].shape[1]

    resident = sum(int(v.size) * v.dtype.itemsize for v in prep.values())
    vmem_cap = _vmem_capacity_bytes()
    budget = (vmem_cap * 3) // 4            # ~96 MiB on v5e/v6e, ~48 MiB on v7x
    tn = tn_override if tn_override is not None else _pick_batch_tile(
        n, cin, hw, ncp, resident, vmem_cap)
    nb = pl.cdiv(n, tn)

    x3 = x_nchw.reshape(n, cin, hw)         # contiguous NCHW reshape: free

    flops = 2 * n * (n_pos * hw * cin               # pooling matmul
                     + n_pos * cin * CONV_OUT       # 1x1 conv
                     + n_pos * CONV_OUT * hidden    # fc1
                     + hidden * ncp)                # fc2
    bytes_accessed = int(n * cin * hw * 4 + n * ncp * 4 + resident)

    resident_spec = dict(pipeline_mode=pl.Buffered(1))   # fetched once, one buffer

    out = pl.pallas_call(
        inception_aux_kernel,
        out_shape=jax.ShapeDtypeStruct((n, ncp), jnp.float32),
        grid_spec=pltpu.PrefetchScalarGridSpec(
            num_scalar_prefetch=0,
            grid=(nb,),
            in_specs=[
                pl.BlockSpec((tn, cin, hw), lambda b: (b, 0, 0)),               # x (batch-tiled)
                pl.BlockSpec((n_pos, hw), lambda b: (0, 0), **resident_spec),   # pooling matrix
                pl.BlockSpec((cin, CONV_OUT), lambda b: (0, 0), **resident_spec),      # conv*bn
                pl.BlockSpec((1, CONV_OUT), lambda b: (0, 0), **resident_spec),        # bn shift
                pl.BlockSpec((n_pos * CONV_OUT, hidden), lambda b: (0, 0), **resident_spec),  # fc1
                pl.BlockSpec((1, hidden), lambda b: (0, 0), **resident_spec),          # fc1 bias
                pl.BlockSpec((hidden, ncp), lambda b: (0, 0), **resident_spec),        # fc2
                pl.BlockSpec((1, ncp), lambda b: (0, 0), **resident_spec),             # fc2 bias
            ],
            out_specs=pl.BlockSpec((tn, ncp), lambda b: (b, 0)),
        ),
        compiler_params=pltpu.CompilerParams(
            dimension_semantics=("parallel",),
            vmem_limit_bytes=int(budget)),
        cost_estimate=pl.CostEstimate(flops=flops, transcendentals=0,
                                      bytes_accessed=bytes_accessed),
    )(x3, prep["pt"], prep["wcs"], prep["shift"], prep["w1p"], prep["b1"],
      prep["w2"], prep["b2"])
    return out[:, :num_classes]


# ----------------------------------------------------------------------------
# Plain-JAX fp32 reference (PyTorch eval-mode semantics) for a sanity check.
# ----------------------------------------------------------------------------
def reference_forward(x, params):
    n, c, h, w = x.shape
    eps = 1e-5
    h_out = (h - POOL_K) // POOL_S + 1
    w_out = (w - POOL_K) // POOL_S + 1
    pooled = jnp.stack(
        [jnp.stack(
            [x[:, :, POOL_S * i:POOL_S * i + POOL_K,
                     POOL_S * j:POOL_S * j + POOL_K].mean(axis=(2, 3))
             for j in range(w_out)], axis=-1)
         for i in range(h_out)], axis=-2)                                   # (N,C,4,4)
    conv = (jnp.einsum("oc,nchw->nohw", params["conv_w"].reshape(CONV_OUT, c), pooled)
            + params["conv_b"][None, :, None, None])
    bn = ((conv - params["bn_mean"][None, :, None, None])
          / jnp.sqrt(params["bn_var"] + eps)[None, :, None, None]
          * params["bn_gamma"][None, :, None, None]
          + params["bn_beta"][None, :, None, None])
    a = jnp.maximum(bn, 0.0)
    flat = a.reshape(n, -1)
    h1 = jnp.maximum(flat @ params["fc1_w"].T + params["fc1_b"], 0.0)
    return h1 @ params["fc2_w"].T + params["fc2_b"]


def make_params(key, in_channels, num_classes):
    ks = jax.random.split(key, 10)
    feat = CONV_OUT * 4 * 4  # 2048
    return {
        "conv_w": 0.2 * jax.random.normal(ks[0], (CONV_OUT, in_channels, 1, 1), jnp.float32),
        "conv_b": 0.1 * jax.random.normal(ks[1], (CONV_OUT,), jnp.float32),
        "bn_gamma": 1.0 + 0.1 * jax.random.normal(ks[2], (CONV_OUT,), jnp.float32),
        "bn_beta": 0.1 * jax.random.normal(ks[3], (CONV_OUT,), jnp.float32),
        "bn_mean": 0.1 * jax.random.normal(ks[4], (CONV_OUT,), jnp.float32),
        "bn_var": jax.random.uniform(ks[5], (CONV_OUT,), jnp.float32, 0.5, 1.5),
        "fc1_w": 0.02 * jax.random.normal(ks[6], (1024, feat), jnp.float32),
        "fc1_b": 0.02 * jax.random.normal(ks[7], (1024,), jnp.float32),
        "fc2_w": 0.05 * jax.random.normal(ks[8], (num_classes, 1024), jnp.float32),
        "fc2_b": 0.05 * jax.random.normal(ks[9], (num_classes,), jnp.float32),
    }


def _check(out, ref, tag):
    # fc1/fc2 weights are stored bf16 (f32 accumulation): expected error is O(1e-3)
    # absolute; a layout/permutation bug would be O(1), so this still catches those.
    if not np.allclose(np.asarray(out), np.asarray(ref), rtol=1e-2, atol=1e-2):
        err = float(np.max(np.abs(np.asarray(out) - np.asarray(ref))))
        raise AssertionError(f"[{tag}] Pallas output does not match JAX reference "
                             f"(max abs err {err:.3e})")


if __name__ == "__main__":
    batch, in_channels, spatial, num_classes = 2, 4, 14, 10   # 14x14 -> avgpool(5,3) -> 4x4
    key = jax.random.PRNGKey(0)
    kx, kp, kx2 = jax.random.split(key, 3)
    x = jax.random.normal(kx, (batch, in_channels, spatial, spatial), jnp.float32)
    params = make_params(kp, in_channels, num_classes)

    prep, nc = prepare_params(params, spatial, spatial)
    fwd = jax.jit(inception_aux_forward, static_argnums=(2, 3))

    # 1) Single-tile path (tn == n).
    out = jax.block_until_ready(fwd(x, prep, nc, None))
    assert out.shape == (batch, num_classes), out.shape
    _check(out, reference_forward(x, params), "single-tile")

    # 2) Tail-masking path: n=9 with tn forced to 8 (nb=2, last block partially valid).
    x9 = jax.random.normal(kx2, (9, in_channels, spatial, spatial), jnp.float32)
    out9 = jax.block_until_ready(fwd(x9, prep, nc, 8))
    assert out9.shape == (9, num_classes), out9.shape
    _check(out9, reference_forward(x9, params), "tail-masked")

    print("KERNEL_OK")
</pallas_src>

<mosaic_0001>
module attributes {stable_mosaic.version = 11 : i64} {
  func.func @inception_aux_kernel(%arg0: i32, %arg1: memref<2x4x196xf32, #tpu.memory_space<vmem>>, %arg2: memref<16x196xf32, #tpu.memory_space<vmem>>, %arg3: memref<4x128xf32, #tpu.memory_space<vmem>>, %arg4: memref<1x128xf32, #tpu.memory_space<vmem>>, %arg5: memref<2048x1024xbf16, #tpu.memory_space<vmem>>, %arg6: memref<1x1024xf32, #tpu.memory_space<vmem>>, %arg7: memref<1024x128xbf16, #tpu.memory_space<vmem>>, %arg8: memref<1x128xf32, #tpu.memory_space<vmem>>, %arg9: memref<2x128xf32, #tpu.memory_space<vmem>>) attributes {dimension_semantics = [#tpu.dimension_semantics<parallel>], iteration_bounds = array<i64: 1>, scalar_prefetch = 0 : i64, scratch_operands = 0 : i64, tpu.core_type = #tpu.core_type<tc>, window_params = [{transform_indices = @transform_0, window_bounds = array<i64: 2, 4, 196>}, {pipeline_mode = #tpu.pipeline_mode<synchronous>, transform_indices = @transform_1, window_bounds = array<i64: 16, 196>}, {pipeline_mode = #tpu.pipeline_mode<synchronous>, transform_indices = @transform_2, window_bounds = array<i64: 4, 128>}, {pipeline_mode = #tpu.pipeline_mode<synchronous>, transform_indices = @transform_3, window_bounds = array<i64: 1, 128>}, {pipeline_mode = #tpu.pipeline_mode<synchronous>, transform_indices = @transform_4, window_bounds = array<i64: 2048, 1024>}, {pipeline_mode = #tpu.pipeline_mode<synchronous>, transform_indices = @transform_5, window_bounds = array<i64: 1, 1024>}, {pipeline_mode = #tpu.pipeline_mode<synchronous>, transform_indices = @transform_6, window_bounds = array<i64: 1024, 128>}, {pipeline_mode = #tpu.pipeline_mode<synchronous>, transform_indices = @transform_7, window_bounds = array<i64: 1, 128>}, {transform_indices = @transform_8, window_bounds = array<i64: 2, 128>}]} {
    %c0 = arith.constant 0 : index
    %c0_0 = arith.constant 0 : index
    %0 = vector.load %arg2[%c0, %c0_0] : memref<16x196xf32, #tpu.memory_space<vmem>>, vector<16x196xf32>
    %c0_1 = arith.constant 0 : index
    %c0_2 = arith.constant 0 : index
    %c0_3 = arith.constant 0 : index
    %1 = vector.load %arg1[%c0_1, %c0_2, %c0_3] : memref<2x4x196xf32, #tpu.memory_space<vmem>>, vector<2x4x196xf32>
    "tpu.trace_start"() <{level = 10 : i32, message = "kj,ncj->nkc"}> : () -> ()
    %cst = arith.constant dense<0.000000e+00> : vector<2x4x16xf32>
    %2 = tpu.matmul %1, %0, %cst {dimension_numbers = #tpu.dot_dimension_numbers<[2], [1], [0, 1], [0], [0, 0, 0, 1, 1, 0], [], []>} : vector<2x4x196xf32>, vector<16x196xf32>, vector<2x4x16xf32> -> vector<2x4x16xf32>
    %3 = tpu.transpose %2, [0, 2, 1] : vector<2x4x16xf32> -> vector<2x16x4xf32>
    "tpu.trace_stop"() : () -> ()
    %4 = vector.shape_cast %3 : vector<2x16x4xf32> to vector<32x4xf32>
    %c0_4 = arith.constant 0 : index
    %c0_5 = arith.constant 0 : index
    %5 = vector.load %arg3[%c0_4, %c0_5] : memref<4x128xf32, #tpu.memory_space<vmem>>, vector<4x128xf32>
    %cst_6 = arith.constant dense<0.000000e+00> : vector<32x128xf32>
    %6 = tpu.matmul %4, %5, %cst_6 {dimension_numbers = #tpu.dot_dimension_numbers<[1], [0], [0], [1], [0, 0, 1, 1], [], []>} : vector<32x4xf32>, vector<4x128xf32>, vector<32x128xf32> -> vector<32x128xf32>
    %c0_7 = arith.constant 0 : index
    %c0_8 = arith.constant 0 : index
    %7 = vector.load %arg4[%c0_7, %c0_8] : memref<1x128xf32, #tpu.memory_space<vmem>>, vector<1x128xf32>
    %8 = vector.broadcast %7 : vector<1x128xf32> to vector<32x128xf32>
    %9 = arith.addf %6, %8 : vector<32x128xf32>
    %cst_9 = arith.constant 0.000000e+00 : f32
    %10 = vector.broadcast %cst_9 : f32 to vector<32x128xf32>
    %11 = arith.maximumf %9, %10 : vector<32x128xf32>
    %12 = vector.shape_cast %11 : vector<32x128xf32> to vector<2x2048xf32>
    %13 = arith.truncf %12 : vector<2x2048xf32> to vector<2x2048xbf16>
    %c0_10 = arith.constant 0 : index
    %c0_11 = arith.constant 0 : index
    %14 = vector.load %arg5[%c0_10, %c0_11] : memref<2048x1024xbf16, #tpu.memory_space<vmem>>, vector<2048x1024xbf16>
    %cst_12 = arith.constant dense<0.000000e+00> : vector<2x1024xf32>
    %15 = tpu.matmul %13, %14, %cst_12 {dimension_numbers = #tpu.dot_dimension_numbers<[1], [0], [0], [1], [0, 0, 1, 1], [], []>} : vector<2x2048xbf16>, vector<2048x1024xbf16>, vector<2x1024xf32> -> vector<2x1024xf32>
    %c0_13 = arith.constant 0 : index
    %c0_14 = arith.constant 0 : index
    %16 = vector.load %arg6[%c0_13, %c0_14] : memref<1x1024xf32, #tpu.memory_space<vmem>>, vector<1x1024xf32>
    %17 = vector.broadcast %16 : vector<1x1024xf32> to vector<2x1024xf32>
    %18 = arith.addf %15, %17 : vector<2x1024xf32>
    %cst_15 = arith.constant 0.000000e+00 : f32
    %19 = vector.broadcast %cst_15 : f32 to vector<2x1024xf32>
    %20 = arith.maximumf %18, %19 : vector<2x1024xf32>
    %21 = arith.truncf %20 : vector<2x1024xf32> to vector<2x1024xbf16>
    %c0_16 = arith.constant 0 : index
    %c0_17 = arith.constant 0 : index
    %22 = vector.load %arg7[%c0_16, %c0_17] : memref<1024x128xbf16, #tpu.memory_space<vmem>>, vector<1024x128xbf16>
    %cst_18 = arith.constant dense<0.000000e+00> : vector<2x128xf32>
    %23 = tpu.matmul %21, %22, %cst_18 {dimension_numbers = #tpu.dot_dimension_numbers<[1], [0], [0], [1], [0, 0, 1, 1], [], []>} : vector<2x1024xbf16>, vector<1024x128xbf16>, vector<2x128xf32> -> vector<2x128xf32>
    %c0_19 = arith.constant 0 : index
    %c0_20 = arith.constant 0 : index
    %24 = vector.load %arg8[%c0_19, %c0_20] : memref<1x128xf32, #tpu.memory_space<vmem>>, vector<1x128xf32>
    %25 = vector.broadcast %24 : vector<1x128xf32> to vector<2x128xf32>
    %26 = arith.addf %23, %25 : vector<2x128xf32>
    %c0_21 = arith.constant 0 : index
    %c0_22 = arith.constant 0 : index
    %27 = vector.load %arg9[%c0_21, %c0_22] : memref<2x128xf32, #tpu.memory_space<vmem>>, vector<2x128xf32>
    tpu.vector_store %arg9[%c0_21, %c0_22], %26 {strides = array<i32>} : memref<2x128xf32, #tpu.memory_space<vmem>>, vector<2x128xf32>,
    return
  }
  func.func @transform_0(%arg0: i32) -> (i32, i32, i32) {
    %c0_i32 = arith.constant 0 : i32
    %c0_i32_0 = arith.constant 0 : i32
    %c0_i32_1 = arith.constant 0 : i32
    return %arg0, %c0_i32, %c0_i32_0 : i32, i32, i32
  }
  func.func @transform_1(%arg0: i32) -> (i32, i32) {
    %c0_i32 = arith.constant 0 : i32
    %c0_i32_0 = arith.constant 0 : i32
    %c0_i32_1 = arith.constant 0 : i32
    return %c0_i32, %c0_i32_0 : i32, i32
  }
  func.func @transform_2(%arg0: i32) -> (i32, i32) {
    %c0_i32 = arith.constant 0 : i32
    %c0_i32_0 = arith.constant 0 : i32
    %c0_i32_1 = arith.constant 0 : i32
    return %c0_i32, %c0_i32_0 : i32, i32
  }
  func.func @transform_3(%arg0: i32) -> (i32, i32) {
    %c0_i32 = arith.constant 0 : i32
    %c0_i32_0 = arith.constant 0 : i32
    %c0_i32_1 = arith.constant 0 : i32
    return %c0_i32, %c0_i32_0 : i32, i32
  }
  func.func @transform_4(%arg0: i32) -> (i32, i32) {
    %c0_i32 = arith.constant 0 : i32
    %c0_i32_0 = arith.constant 0 : i32
    %c0_i32_1 = arith.constant 0 : i32
    return %c0_i32, %c0_i32_0 : i32, i32
  }
  func.func @transform_5(%arg0: i32) -> (i32, i32) {
    %c0_i32 = arith.constant 0 : i32
    %c0_i32_0 = arith.constant 0 : i32
    %c0_i32_1 = arith.constant 0 : i32
    return %c0_i32, %c0_i32_0 : i32, i32
  }
  func.func @transform_6(%arg0: i32) -> (i32, i32) {
    %c0_i32 = arith.constant 0 : i32
    %c0_i32_0 = arith.constant 0 : i32
    %c0_i32_1 = arith.constant 0 : i32
    return %c0_i32, %c0_i32_0 : i32, i32
  }
  func.func @transform_7(%arg0: i32) -> (i32, i32) {
    %c0_i32 = arith.constant 0 : i32
    %c0_i32_0 = arith.constant 0 : i32
    %c0_i32_1 = arith.constant 0 : i32
    return %c0_i32, %c0_i32_0 : i32, i32
  }
  func.func @transform_8(%arg0: i32) -> (i32, i32) {
    %c0_i32 = arith.constant 0 : i32
    %c0_i32_0 = arith.constant 0 : i32
    return %arg0, %c0_i32 : i32, i32
  }
}

</mosaic_0001>

<bundles_post_ra>
// kernel: inception_aux_forward.1
= control target key start
LH: loop header
LB: loop body
LE: loop exit
PB: predicated region body
PF: predicated region fallthrough
CT: control target
= control target key end

     0   :  { %13 = vsyncpa [#allocation3], 0  ;;  %s14916_s0 = inlined_call_operand.vmem [shape: f32[2,4,196], index: 0, kind: input, shape index: {}]   ;;  %s14917_s1 = inlined_call_operand.hbm [shape: f32[16,196], index: 1, kind: input, shape index: {}]   ;;  %s14918_s2 = inlined_call_operand.hbm [shape: f32[4,128], index: 2, kind: input, shape index: {}]   ;;  %s14919_s3 = inlined_call_operand.hbm [shape: f32[1,128], index: 3, kind: input, shape index: {}]   ;;  %s14920_s4 = inlined_call_operand.hbm [shape: bf16[2048,1024], index: 4, kind: input, shape index: {}]   ;;  %s14921_s5 = inlined_call_operand.hbm [shape: f32[1,1024], index: 5, kind: input, shape index: {}]   ;;  %s14922_s6 = inlined_call_operand.hbm [shape: bf16[1024,128], index: 6, kind: input, shape index: {}]   ;;  %s14923_s7 = inlined_call_operand.hbm [shape: f32[1,128], index: 7, kind: input, shape index: {}]   ;;  %s14924_s8 = inlined_call_operand.hbm [shape: f32[2,128], index: 8, kind: output, shape index: {}]  }
   0x1   :  { %14 = vsyncpa [#allocation6], 0 }
   0x2   :  { %15 = vsyncpa [#allocation9], 0 }
   0x3   :  { %16 = vsyncpa [#allocation12], 0  ;;  %s38_s29 = sshll.u32 %s14918_s2, 4  ;;  %s39_s29 = int_to_ptr.hbm [resolvable:$true] %s38_s29 }
   0x4   :  { %17 = vsyncpa [#allocation4], 0  ;;  %s14528_s30 = smov [#allocation5]   ;;  %s59_s12 = sshll.u32 %s14920_s4, 4  ;;  %s60_s12 = int_to_ptr.hbm [resolvable:$true] %s59_s12 }
   0x5   :  { %s40_s9 = sshll.u32 %s14528_s30, 4  ;;  %s14529_s13 = smov [#allocation8]   ;;  %s41_s9 = int_to_ptr.vmem [resolvable:$true] %s40_s9 }
   0x6   :  { %43 = dma.hbm_to_vmem [thread:$0]  %s39_s29, 64, %s41_s9, [#allocation6]  }
   0x7   :  { %s61_s14 = sshll.u32 %s14529_s13, 4  ;;  %s14530_s15 = smov 512   ;;  %s62_s14 = int_to_ptr.vmem [resolvable:$true] %s61_s14 }
   0x8   :  { %s14531_s16 = smov 32   ;;  %s83_s2 = sshll.u32 %s14922_s6, 4  ;;  %s84_s2 = int_to_ptr.hbm [resolvable:$true] %s83_s2 }
   0x9   :  { %67 = dma.hbm_to_vmem [thread:$0]  %s60_s12, 131072, %s62_s14, [#allocation9], %s14530_s15, %s14530_s15, %s14531_s16  }
   0xa   :  { %s14532_s19 = smov [#allocation11]   ;;  %s24_s4 = sshll.u32 %s14917_s1, 4  ;;  %s25_s4 = int_to_ptr.hbm [resolvable:$true] %s24_s4 }
   0xb   :  { %s85_s20 = sshll.u32 %s14532_s19, 4  ;;  %s14533_s23 = smov 64   ;;  %s86_s20 = int_to_ptr.vmem [resolvable:$true] %s85_s20 }
   0xc   :  { %s14534_s24 = smov 4   ;;  %s14535_s25 = smov [#allocation2]  }
   0xd   :  { %91 = dma.hbm_to_vmem [thread:$0]  %s84_s2, 8192, %s86_s20, [#allocation12], %s14533_s23, %s14533_s23, %s14534_s24  }
   0xe   :  { %s26_s26 = sshll.u32 %s14535_s25, 4  ;;  %s14536_s27 = smov 256   ;;  %s27_s26 = int_to_ptr.vmem [resolvable:$true] %s26_s26 }
   0xf   :  { %s14537_s28 = smov 16   ;;  %s49_s30 = sshll.u32 %s14919_s3, 4  ;;  %s50_s30 = int_to_ptr.hbm [resolvable:$true] %s49_s30 }
  0x10   :  { %32 = dma.hbm_to_vmem [thread:$0]  %s25_s4, 512, %s27_s26, [#allocation3], %s14536_s27, %s14536_s27, %s14537_s28  }
  0x11   :  { %s14538_s9 = smov [#allocation7]   ;;  %s73_s12 = sshll.u32 %s14921_s5, 4  ;;  %s74_s12 = int_to_ptr.hbm [resolvable:$true] %s73_s12 }
  0x12   :  { %s51_s10 = sshll.u32 %s14538_s9, 4  ;;  %s14539_s13 = smov [#allocation10]   ;;  %s52_s10 = int_to_ptr.vmem [resolvable:$true] %s51_s10 }
  0x13   :  { %54 = dma.hbm_to_vmem [thread:$0]  %s50_s30, 16, %s52_s10, [#allocation6]  }
  0x14   :  { %s75_s14 = sshll.u32 %s14539_s13, 4  ;;  %s97_s17 = sshll.u32 %s14923_s7, 4  ;;  %s76_s14 = int_to_ptr.vmem [resolvable:$true] %s75_s14  ;;  %s98_s17 = int_to_ptr.hbm [resolvable:$true] %s97_s17 }
  0x15   :  { %78 = dma.hbm_to_vmem [thread:$0]  %s74_s12, 128, %s76_s14, [#allocation9]  }
  0x16   :  { %s14540_s3 = smov [#allocation13]  }
  0x17   :  { %s99_s18 = sshll.u32 %s14540_s3, 4  ;;  %s100_s18 = int_to_ptr.vmem [resolvable:$true] %s99_s18 }
  0x18   :  { %102 = dma.hbm_to_vmem [thread:$0]  %s98_s17, 16, %s100_s18, [#allocation12]  }
  0x19   :  { %14518 = dma.done.wait [#allocation3], 512  }
  0x1a   :  { %14519 = vsyncadd [#allocation3], 4294966784 }
  0x1b   :  { %14520 = dma.done.wait [#allocation6], 80  }
  0x1c   :  { %14521 = vsyncadd [#allocation6], 4294967216 }
  0x1d   :  { %14522 = dma.done.wait [#allocation9], 131200  }
  0x1e   :  { %14523 = vsyncadd [#allocation9], 4294836096 }
  0x1f   :  { %14524 = dma.done.wait [#allocation12], 8208  }
  0x20   :  { %14525 = vsyncadd [#allocation12], 4294959088  ;;  %vm145_vm0 = vcmask 556032   ;;  %v133_v0 = vld [vmem:[#allocation2 + $0x10] sm:$0xff]  ;;  %v134_v1 = vld [vmem:[#allocation2 + $0x18] sm:$0xff]  ;;  %vm279_vm1 = vcmask 1043456  }
  0x21   :  { %v131_v2 = vld [vmem:[#allocation2] sm:$0xff]  ;;  %168 = vmatpush.xpose.msra.mxu0 %v133_v0  ;;  %8856 = vmatpush.xpose.msk.msra.mxu1 %vm145_vm0, %v134_v1  ;;  %v132_v3 = vld [vmem:[#allocation2 + $0x8] sm:$0xff]  ;;  %v135_v4 = vld [vmem:[%s14916_s0] sm:$0xff]  ;;  %vm266_vm2 = vcmask 31744   ;;  %s8843_s4 = sshll.u32 %s14924_s8, 4  ;;  %s8844_s4 = int_to_ptr.hbm [resolvable:$true] %s8843_s4 }
  0x22   :  { %v136_v5 = vld [vmem:[%s14916_s0 + $0x8] sm:$0xff]  ;;  %139 = vst [vmem:[#allocation1] ss:$2 sm:$0xff] %v135_v4  ;;  %s14541_s0 = smov [#allocation14]  }
  0x23   :  { %141 = vst [vmem:[#allocation1 + $0x1] ss:$2 sm:$0xff] %v136_v5  ;;  %v261_v8 = vld [vmem:[#allocation5] sm:$0xf]  ;;  %v9090_v13 = vld [vmem:[#allocation8 + $0x1c0] sm:$0xf] }
  0x24   :  { %8859 = vmatpush.msk.msra.mxu2 %vm279_vm1, %v261_v8  ;;  %v13276_v14 = vld [vmem:[#allocation8 + $0x1dc] sm:$0xf0]  ;;  %s8841_s20 = sshll.u32 %s14541_s0, 4  ;;  %s8842_s20 = int_to_ptr.vmem [resolvable:$true] %s8841_s20 }
  0x25   :  { %169 = vmatpush.xpose.msra.mxu0 %v131_v2  ;;  %8857 = vmatpush.xpose.msk.msra.mxu1 %vm145_vm0, %v132_v3  ;;  %v9346_v15 = vld [vmem:[#allocation8 + $0x3c0] sm:$0xf]  ;;  %v9091_v16 = vor.u32 %v13276_v14, %v9090_v13 }
  0x26   :  { %v13340_v17 = vld [vmem:[#allocation8 + $0x3dc] sm:$0xf0] }
  0x27   :  { %v9602_v18 = vld [vmem:[#allocation8 + $0x5c0] sm:$0xf]  ;;  %v9347_v20 = vor.u32 %v13340_v17, %v9346_v15  ;;  %6535 = vmatpush.bf16.msra.mxu3 %v9091_v16 }
  0x28   :  { %v13404_v19 = vld [vmem:[#allocation8 + $0x5dc] sm:$0xf0] }
  0x29   :  { %v9603_v21 = vor.u32 %v13404_v19, %v9602_v18  ;;  %v9858_v22 = vld [vmem:[#allocation8 + $0x7c0] sm:$0xf]  ;;  %6548 = vmatpush.bf16.msrb.mxu2 %v9347_v20 }
  0x2a   :  { %v142_v6 = vld.sshfl [vmem:[#allocation1] sm:$0xff pattern:$0x75316420]  ;;  %v143_v7 = vld.sshfl [vmem:[#allocation1 + $0x8] sm:$0xff pattern:$0x75316420] }
  0x2b   :  { %170 = vmatmul.f32.vlgmr.msra.gmra.mxu0 %v142_v6  ;;  %8858 = vmatmul.msk.f32.vlgmr.msra.gmra.mxu1 %vm145_vm0, %v143_v7  ;;  %v13468_v23 = vld [vmem:[#allocation8 + $0x7dc] sm:$0xf0] }
  0x2c   :  { %v9058_v24 = vld [vmem:[#allocation8 + $0x180] sm:$0xf]  ;;  %v9859_v25 = vor.u32 %v13468_v23, %v9858_v22  ;;  %6561 = vmatpush.bf16.msrb.mxu0 %v9603_v21 }
  0x2d   :  { %v13268_v26 = vld [vmem:[#allocation8 + $0x19c] sm:$0xf0] }
  0x2e   :  { %v9314_v27 = vld [vmem:[#allocation8 + $0x380] sm:$0xf]  ;;  %v9059_v29 = vor.u32 %v13268_v26, %v9058_v24  ;;  %6574 = vmatpush.bf16.msrb.mxu1 %v9859_v25 }
  0x2f   :  { %v13332_v28 = vld [vmem:[#allocation8 + $0x39c] sm:$0xf0] }
  0x30   :  { %v9570_v30 = vld [vmem:[#allocation8 + $0x580] sm:$0xf]  ;;  %v9315_v33 = vor.u32 %v13332_v28, %v9314_v27  ;;  %6536 = vmatpush.bf16.msra.mxu3 %v9059_v29 }
  0x31   :  { %v13396_v31 = vld [vmem:[#allocation8 + $0x59c] sm:$0xf0] }
  0x32   :  { %v9826_v32 = vld [vmem:[#allocation8 + $0x780] sm:$0xf]  ;;  %v9571_v34 = vor.u32 %v13396_v31, %v9570_v30  ;;  %6549 = vmatpush.bf16.msrb.mxu2 %v9315_v33 }
  0x33   :  { %v13460_v35 = vld [vmem:[#allocation8 + $0x79c] sm:$0xf0] }
  0x34   :  { %v9026_v36 = vld [vmem:[#allocation8 + $0x140] sm:$0xf]  ;;  %v9827_v38 = vor.u32 %v13460_v35, %v9826_v32  ;;  %6562 = vmatpush.bf16.msrb.mxu0 %v9571_v34 }
  0x35   :  { %v13260_v37 = vld [vmem:[#allocation8 + $0x15c] sm:$0xf0] }
  0x36   :  { %v9282_v39 = vld [vmem:[#allocation8 + $0x340] sm:$0xf]  ;;  %v9027_v43 = vor.u32 %v13260_v37, %v9026_v36  ;;  %6575 = vmatpush.bf16.msrb.mxu1 %v9827_v38 }
  0x37   :  { %v13324_v40 = vld [vmem:[#allocation8 + $0x35c] sm:$0xf0] }
  0x38   :  { %v9538_v41 = vld [vmem:[#allocation8 + $0x540] sm:$0xf]  ;;  %v9283_v50 = vor.u32 %v13324_v40, %v9282_v39  ;;  %6537 = vmatpush.bf16.msra.mxu3 %v9027_v43 }
  0x39   :  { %v13388_v44 = vld [vmem:[#allocation8 + $0x55c] sm:$0xf0] }
  0x3a   :  { %v9794_v45 = vld [vmem:[#allocation8 + $0x740] sm:$0xf]  ;;  %v9539_v47 = vor.u32 %v13388_v44, %v9538_v41  ;;  %6550 = vmatpush.bf16.msrb.mxu2 %v9283_v50 }
  0x3b   :  { %v13452_v46 = vld [vmem:[#allocation8 + $0x75c] sm:$0xf0] }
  0x3c   :  { %v8994_v48 = vld [vmem:[#allocation8 + $0x100] sm:$0xf]  ;;  %v9795_v51 = vor.u32 %v13452_v46, %v9794_v45  ;;  %6563 = vmatpush.bf16.msrb.mxu0 %v9539_v47 }
  0x3d   :  { %v13252_v49 = vld [vmem:[#allocation8 + $0x11c] sm:$0xf0] }
  0x3e   :  { %v9250_v52 = vld [vmem:[#allocation8 + $0x300] sm:$0xf]  ;;  %v8995_v58 = vor.u32 %v13252_v49, %v8994_v48  ;;  %6576 = vmatpush.bf16.msrb.mxu1 %v9795_v51 }
  0x3f   :  { %v9506_v53 = vld [vmem:[#allocation8 + $0x500] sm:$0xf] }
  0x40   :  { %v13380_v54 = vld [vmem:[#allocation8 + $0x51c] sm:$0xf0]  ;;  %6538 = vmatpush.bf16.msra.mxu3 %v8995_v58 }
  0x41   :  { %v13316_v55 = vld [vmem:[#allocation8 + $0x31c] sm:$0xf0]  ;;  %v9507_v59 = vor.u32 %v13380_v54, %v9506_v53 }
  0x42   :  { %v9762_v56 = vld [vmem:[#allocation8 + $0x700] sm:$0xf]  ;;  %v9251_v62 = vor.u32 %v13316_v55, %v9250_v52 }
  0x43   :  { %v13444_v57 = vld [vmem:[#allocation8 + $0x71c] sm:$0xf0]  ;;  %6564 = vmatpush.bf16.msrb.mxu0 %v9507_v59 }
  0x44   :  { %v8962_v60 = vld [vmem:[#allocation8 + $0xc0] sm:$0xf]  ;;  %v9763_v63 = vor.u32 %v13444_v57, %v9762_v56  ;;  %6551 = vmatpush.bf16.msrb.mxu2 %v9251_v62 }
  0x45   :  { %v13244_v61 = vld [vmem:[#allocation8 + $0xdc] sm:$0xf0] }
  0x46   :  { %v9218_v0 = vld [vmem:[#allocation8 + $0x2c0] sm:$0xf]  ;;  %v8963_v7 = vor.u32 %v13244_v61, %v8962_v60  ;;  %6577 = vmatpush.bf16.msrb.mxu1 %v9763_v63 }
  0x47   :  { %v9474_v1 = vld [vmem:[#allocation8 + $0x4c0] sm:$0xf] }
  0x48   :  { %v13372_v2 = vld [vmem:[#allocation8 + $0x4dc] sm:$0xf0]  ;;  %6539 = vmatpush.bf16.msra.mxu3 %v8963_v7 }
  0x49   :  { %v13308_v3 = vld [vmem:[#allocation8 + $0x2dc] sm:$0xf0]  ;;  %v9475_v8 = vor.u32 %v13372_v2, %v9474_v1 }
  0x4a   :  { %v9730_v4 = vld [vmem:[#allocation8 + $0x6c0] sm:$0xf] }
  0x4b   :  { %v13436_v5 = vld [vmem:[#allocation8 + $0x6dc] sm:$0xf0]  ;;  %6565 = vmatpush.bf16.msrb.mxu0 %v9475_v8 }
  0x4c   :  { %v9186_v13 = vld [vmem:[#allocation8 + $0x280] sm:$0xf] }
  0x4d   :  { %v9442_v14 = vld [vmem:[#allocation8 + $0x480] sm:$0xf] }
  0x4e   :  { %v13364_v15 = vld [vmem:[#allocation8 + $0x49c] sm:$0xf0] }
  0x4f   :  { %v13300_v16 = vld [vmem:[#allocation8 + $0x29c] sm:$0xf0]  ;;  %v9443_v20 = vor.u32 %v13364_v15, %v9442_v14 }
  0x50   :  { %v9698_v17 = vld [vmem:[#allocation8 + $0x680] sm:$0xf]  ;;  %v9187_v23 = vor.u32 %v13300_v16, %v9186_v13 }
  0x51   :  { %v13428_v18 = vld [vmem:[#allocation8 + $0x69c] sm:$0xf0]  ;;  %6566 = vmatpush.bf16.msrb.mxu0 %v9443_v20 }
  0x52   :  { %v8898_v21 = vld [vmem:[#allocation8 + $0x40] sm:$0xf]  ;;  %v9699_v24 = vor.u32 %v13428_v18, %v9698_v17 }
  0x53   :  { %v13228_v22 = vld [vmem:[#allocation8 + $0x5c] sm:$0xf0] }
  0x54   :  { %v9154_v25 = vld [vmem:[#allocation8 + $0x240] sm:$0xf]  ;;  %v8899_v32 = vor.u32 %v13228_v22, %v8898_v21 }
  0x55   :  { %v9410_v26 = vld [vmem:[#allocation8 + $0x440] sm:$0xf] }
  0x56   :  { %v13356_v27 = vld [vmem:[#allocation8 + $0x45c] sm:$0xf0] }
  0x57   :  { %v13292_v28 = vld [vmem:[#allocation8 + $0x25c] sm:$0xf0]  ;;  %v9411_v33 = vor.u32 %v13356_v27, %v9410_v26 }
  0x58   :  { %v9666_v29 = vld [vmem:[#allocation8 + $0x640] sm:$0xf]  ;;  %v9155_v34 = vor.u32 %v13292_v28, %v9154_v25 }
  0x59   :  { %v13420_v30 = vld [vmem:[#allocation8 + $0x65c] sm:$0xf0]  ;;  %6567 = vmatpush.bf16.msrb.mxu0 %v9411_v33 }
  0x5a   :  { %v9667_v35 = vor.u32 %v13420_v30, %v9666_v29  ;;  %v8866_v37 = vld [vmem:[#allocation8] sm:$0xf] }
  0x5b   :  { %v13220_v38 = vld [vmem:[#allocation8 + $0x1c] sm:$0xf0] }
  0x5c   :  { %v9122_v39 = vld [vmem:[#allocation8 + $0x200] sm:$0xf]  ;;  %v8867_v40 = vor.u32 %v13220_v38, %v8866_v37 }
  0x5d   :  { %v13284_v41 = vld [vmem:[#allocation8 + $0x21c] sm:$0xf0] }
  0x5e   :  { %v13348_v43 = vld [vmem:[#allocation8 + $0x41c] sm:$0xf0]  ;;  %v9123_v44 = vor.u32 %v13284_v41, %v9122_v39 }
  0x5f   :  { %v9634_v46 = vld [vmem:[#allocation8 + $0x600] sm:$0xf] }
  0x60   :  { %v13412_v47 = vld [vmem:[#allocation8 + $0x61c] sm:$0xf0] }
  0x61   :  { %v10114_v48 = vld [vmem:[#allocation8 + $0x9c0] sm:$0xf]  ;;  %v9635_v49 = vor.u32 %v13412_v47, %v9634_v46 }
  0x62   :  { %v13532_v50 = vld [vmem:[#allocation8 + $0x9dc] sm:$0xf0] }
  0x63   :  { %v10370_v51 = vld [vmem:[#allocation8 + $0xbc0] sm:$0xf]  ;;  %v10115_v53 = vor.u32 %v13532_v50, %v10114_v48 }
  0x64   :  { %v13596_v52 = vld [vmem:[#allocation8 + $0xbdc] sm:$0xf0] }
  0x65   :  { %v10371_v54 = vor.u32 %v13596_v52, %v10370_v51  ;;  %v10626_v55 = vld [vmem:[#allocation8 + $0xdc0] sm:$0xf] }
  0x66   :  { %v13660_v56 = vld [vmem:[#allocation8 + $0xddc] sm:$0xf0] }
  0x67   :  { %v10882_v57 = vld [vmem:[#allocation8 + $0xfc0] sm:$0xf]  ;;  %v10627_v58 = vor.u32 %v13660_v56, %v10626_v55 }
  0x68   :  { %v13724_v59 = vld [vmem:[#allocation8 + $0xfdc] sm:$0xf0] }
  0x69   :  { %v10082_v60 = vld [vmem:[#allocation8 + $0x980] sm:$0xf]  ;;  %v10883_v62 = vor.u32 %v13724_v59, %v10882_v57 }
  0x6a   :  { %v13524_v61 = vld [vmem:[#allocation8 + $0x99c] sm:$0xf0] }
  0x6b   :  { %v10083_v63 = vor.u32 %v13524_v61, %v10082_v60  ;;  %v13588_v1 = vld [vmem:[#allocation8 + $0xb9c] sm:$0xf0] }
  0x6c   :  { %v10594_v2 = vld [vmem:[#allocation8 + $0xd80] sm:$0xf] }
  0x6d   :  { %v13580_v13 = vld [vmem:[#allocation8 + $0xb5c] sm:$0xf0] }
  0x6e   :  { %v10562_v14 = vld [vmem:[#allocation8 + $0xd40] sm:$0xf] }
  0x6f   :  { %v13644_v15 = vld [vmem:[#allocation8 + $0xd5c] sm:$0xf0] }
  0x70   :  { %v10563_v17 = vor.u32 %v13644_v15, %v10562_v14  ;;  %v10818_v18 = vld [vmem:[#allocation8 + $0xf40] sm:$0xf] }
  0x71   :  { %v10018_v21 = vld [vmem:[#allocation8 + $0x900] sm:$0xf] }
  0x72   :  { %v13508_v22 = vld [vmem:[#allocation8 + $0x91c] sm:$0xf0] }
  0x73   :  { %v13572_v25 = vld [vmem:[#allocation8 + $0xb1c] sm:$0xf0] }
  0x74   :  { %v10530_v26 = vld [vmem:[#allocation8 + $0xd00] sm:$0xf] }
  0x75   :  { %v13636_v27 = vld [vmem:[#allocation8 + $0xd1c] sm:$0xf0] }
  0x76   :  { %v10531_v29 = vor.u32 %v13636_v27, %v10530_v26  ;;  %v10786_v30 = vld [vmem:[#allocation8 + $0xf00] sm:$0xf] }
  0x77   :  { %v9986_v33 = vld [vmem:[#allocation8 + $0x8c0] sm:$0xf] }
  0x78   :  { %v13564_v37 = vld [vmem:[#allocation8 + $0xadc] sm:$0xf0] }
  0x79   :  { %v10498_v38 = vld [vmem:[#allocation8 + $0xcc0] sm:$0xf] }
  0x7a   :  { %v13628_v39 = vld [vmem:[#allocation8 + $0xcdc] sm:$0xf0] }
  0x7b   :  { %v10499_v41 = vor.u32 %v13628_v39, %v10498_v38  ;;  %v13492_v46 = vld [vmem:[#allocation8 + $0x89c] sm:$0xf0] }
  0x7c   :  { %v10210_v47 = vld [vmem:[#allocation8 + $0xa80] sm:$0xf] }
  0x7d   :  { %v10466_v50 = vld [vmem:[#allocation8 + $0xc80] sm:$0xf] }
  0x7e   :  { %v13620_v51 = vld [vmem:[#allocation8 + $0xc9c] sm:$0xf0] }
  0x7f   :  { %v13684_v55 = vld [vmem:[#allocation8 + $0xe9c] sm:$0xf0] }
  0x80   :  { %v9922_v57 = vld [vmem:[#allocation8 + $0x840] sm:$0xf] }
  0x81   :  { %v10178_v59 = vld [vmem:[#allocation8 + $0xa40] sm:$0xf] }
  0x82   :  { %v13548_v61 = vld [vmem:[#allocation8 + $0xa5c] sm:$0xf0] }
  0x83   :  { %v10658_v15 = vld [vmem:[#allocation8 + $0xe00] sm:$0xf] }
  0x84   :  { %v11138_v26 = vld [vmem:[#allocation8 + $0x11c0] sm:$0xf] }
  0xa8   :  { %v171_v9 = vpop.f32.mrf.mxu0  ;;  %v191_v10 = vpop.f32.mrf.mxu1 }
  0xa9   :  { %v192_v11 = vadd.f32 %v191_v10, %v171_v9  ;;  %v8930_v9 = vld [vmem:[#allocation8 + $0x80] sm:$0xf] }
  0xaa   :  { %v13236_v10 = vld [vmem:[#allocation8 + $0x9c] sm:$0xf0] }
  0xab   :  { %197 = vxpose.xlu0.b32.start.end [1/1] (short) (narrow) %v192_v11, 16  ;;  %v195_v12 = vrot.slane %v192_v11, 4  ;;  %v9219_v11 = vor.u32 %v13308_v3, %v9218_v0  ;;  %v8931_v19 = vor.u32 %v13236_v10, %v8930_v9  ;;  %v10338_v0 = vld [vmem:[#allocation8 + $0xb80] sm:$0xf] }
  0xac   :  { %v10339_v3 = vor.u32 %v13588_v1, %v10338_v0  ;;  %v10050_v9 = vld [vmem:[#allocation8 + $0x940] sm:$0xf]  ;;  %v10179_v0 = vor.u32 %v13548_v61, %v10178_v59 }
  0xad   :  { %6552 = vmatpush.bf16.msrb.mxu2 %v9219_v11  ;;  %6540 = vmatpush.bf16.msra.mxu3 %v8931_v19  ;;  %v13516_v10 = vld [vmem:[#allocation8 + $0x95c] sm:$0xf0] }
  0xae   :  { %v10306_v11 = vld [vmem:[#allocation8 + $0xb40] sm:$0xf] }
  0xaf   :  { %v10307_v16 = vor.u32 %v13580_v13, %v10306_v11  ;;  %v13708_v19 = vld [vmem:[#allocation8 + $0xf5c] sm:$0xf0] }
  0xb0   :  { %v10819_v20 = vor.u32 %v13708_v19, %v10818_v18  ;;  %v13604_v11 = vld [vmem:[#allocation8 + $0xc1c] sm:$0xf0] }
  0xb1   :  { %6553 = vmatpush.bf16.msrb.mxu2 %v9187_v23  ;;  %6541 = vmatpush.bf16.msra.mxu3 %v8899_v32  ;;  %v10274_v23 = vld [vmem:[#allocation8 + $0xb00] sm:$0xf] }
  0xb2   :  { %v10275_v28 = vor.u32 %v13572_v25, %v10274_v23  ;;  %v13972_v61 = vld [vmem:[#allocation8 + $0x179c] sm:$0xf0] }
  0xb5   :  { %6554 = vmatpush.bf16.msrb.mxu2 %v9155_v34  ;;  %6542 = vmatpush.bf16.msra.mxu3 %v8867_v40  ;;  %v13500_v34 = vld [vmem:[#allocation8 + $0x8dc] sm:$0xf0] }
  0xb9   :  { %6555 = vmatpush.bf16.msrb.mxu2 %v9123_v44  ;;  %6587 = vmatpush.bf16.msrb.mxu3 %v10115_v53  ;;  %v10467_v53 = vor.u32 %v13620_v51, %v10466_v50  ;;  %v11618_v51 = vld [vmem:[#allocation8 + $0x1580] sm:$0xf] }
  0xbb   :  { %229 = vxpose.xlu0.b32.start.end [1/1] (short) (narrow) %v195_v12, 16  ;;  %v9731_v12 = vor.u32 %v13436_v5, %v9730_v4  ;;  %v13652_v4 = vld [vmem:[#allocation8 + $0xd9c] sm:$0xf0] }
  0xbc   :  { %v10850_v5 = vld [vmem:[#allocation8 + $0xf80] sm:$0xf]  ;;  %v10595_v7 = vor.u32 %v13652_v4, %v10594_v2 }
  0xbd   :  { %6578 = vmatpush.bf16.msrb.mxu1 %v9731_v12  ;;  %6588 = vmatpush.bf16.msrb.mxu3 %v10083_v63  ;;  %v10051_v12 = vor.u32 %v13516_v10, %v10050_v9  ;;  %v13612_v63 = vld [vmem:[#allocation8 + $0xc5c] sm:$0xf0] }
  0xbe   :  { %v10690_v2 = vld [vmem:[#allocation8 + $0xe40] sm:$0xf] }
  0xbf   :  { %v13540_v9 = vld [vmem:[#allocation8 + $0xa1c] sm:$0xf0] }
  0xc0   :  { %v10402_v10 = vld [vmem:[#allocation8 + $0xc00] sm:$0xf] }
  0xc1   :  { %6579 = vmatpush.bf16.msrb.mxu1 %v9699_v24  ;;  %6589 = vmatpush.bf16.msrb.mxu3 %v10051_v12  ;;  %v10019_v24 = vor.u32 %v13508_v22, %v10018_v21  ;;  %v14319_v12 = vld [vmem:[#allocation7] ss:$0 sm:$0xff]  ;;  %v10403_v14 = vor.u32 %v13604_v11, %v10402_v10 }
  0xc5   :  { %6580 = vmatpush.bf16.msrb.mxu1 %v9667_v35  ;;  %v10242_v35 = vld [vmem:[#allocation8 + $0xac0] sm:$0xf]  ;;  %6590 = vmatpush.bf16.msrb.mxu3 %v10019_v24 }
  0xc6   :  { %v10243_v40 = vor.u32 %v13564_v37, %v10242_v35  ;;  %v13980_v35 = vld [vmem:[#allocation8 + $0x17dc] sm:$0xf0] }
  0xc9   :  { %6581 = vmatpush.bf16.msrb.mxu1 %v9635_v49  ;;  %v13556_v49 = vld [vmem:[#allocation8 + $0xa9c] sm:$0xf0] }
  0xca   :  { %v10211_v52 = vor.u32 %v13556_v49, %v10210_v47 }
  0xcd   :  { %6626 = vmatpush.bf16.msra.mxu1 %v10883_v62  ;;  %v10434_v62 = vld [vmem:[#allocation8 + $0xc40] sm:$0xf] }
  0xce   :  { %v10435_v1 = vor.u32 %v13612_v63, %v10434_v62 }
 0x14f   :  { %v213_v42 = vpop.trf.xlu0 }
 0x150   :  { %8860 = vmatmul.msk.f32.vlgmr.msra.gmra.mxu2 %vm266_vm2, %v213_v42  ;;  %v9378_v42 = vld [vmem:[#allocation8 + $0x400] sm:$0xf] }
 0x151   :  { %v9379_v45 = vor.u32 %v13348_v43, %v9378_v42  ;;  %6600 = vmatpush.bf16.msra.mxu2 %v10371_v54  ;;  %v10754_v42 = vld [vmem:[#allocation8 + $0xec0] sm:$0xf] }
 0x152   :  { %v13692_v43 = vld [vmem:[#allocation8 + $0xedc] sm:$0xf0] }
 0x153   :  { %6568 = vmatpush.bf16.msrb.mxu0 %v9379_v45  ;;  %v10755_v44 = vor.u32 %v13692_v43, %v10754_v42  ;;  %v9954_v45 = vld [vmem:[#allocation8 + $0x880] sm:$0xf] }
 0x154   :  { %v9955_v48 = vor.u32 %v13492_v46, %v9954_v45  ;;  %v10722_v54 = vld [vmem:[#allocation8 + $0xe80] sm:$0xf] }
 0x155   :  { %6601 = vmatpush.bf16.msra.mxu2 %v10339_v3  ;;  %v10723_v56 = vor.u32 %v13684_v55, %v10722_v54  ;;  %v13676_v3 = vld [vmem:[#allocation8 + $0xe5c] sm:$0xf0] }
 0x156   :  { %v10691_v4 = vor.u32 %v13676_v3, %v10690_v2  ;;  %v11106_v42 = vld [vmem:[#allocation8 + $0x1180] sm:$0xf] }
 0x157   :  { %v214_v6 = vpop.trf.xlu0  ;;  %6613 = vmatpush.bf16.msra.mxu0 %v10627_v58  ;;  %v13484_v58 = vld [vmem:[#allocation8 + $0x85c] sm:$0xf0] }
 0x158   :  { %8861 = vmatmul.msk.f32.gmra.mxu2 %vm266_vm2, %v214_v6  ;;  %v13716_v6 = vld [vmem:[#allocation8 + $0xf9c] sm:$0xf0]  ;;  %v9923_v60 = vor.u32 %v13484_v58, %v9922_v57 }
 0x159   :  { %v10851_v8 = vor.u32 %v13716_v6, %v10850_v5  ;;  %6602 = vmatpush.bf16.msra.mxu2 %v10307_v16  ;;  %v9890_v5 = vld [vmem:[#allocation8 + $0x800] sm:$0xf] }
 0x15a   :  { %v13476_v6 = vld [vmem:[#allocation8 + $0x81c] sm:$0xf0] }
 0x15b   :  { %6614 = vmatpush.bf16.msra.mxu0 %v10595_v7  ;;  %6627 = vmatpush.bf16.msra.mxu1 %v10851_v8  ;;  %v10146_v7 = vld [vmem:[#allocation8 + $0xa00] sm:$0xf]  ;;  %v9891_v8 = vor.u32 %v13476_v6, %v9890_v5 }
 0x15c   :  { %v10147_v13 = vor.u32 %v13540_v9, %v10146_v7  ;;  %v13668_v16 = vld [vmem:[#allocation8 + $0xe1c] sm:$0xf0] }
 0x15d   :  { %6603 = vmatpush.bf16.msra.mxu2 %v10275_v28  ;;  %v13780_v43 = vld [vmem:[#allocation8 + $0x119c] sm:$0xf0] }
 0x15e   :  { %v13844_v45 = vld [vmem:[#allocation8 + $0x139c] sm:$0xf0]  ;;  %v11107_v62 = vor.u32 %v13780_v43, %v11106_v42 }
 0x15f   :  { %v245_v31 = vpop.trf.xlu0  ;;  %6615 = vmatpush.bf16.msra.mxu0 %v10563_v17  ;;  %6628 = vmatpush.bf16.msra.mxu1 %v10819_v20  ;;  %v10659_v17 = vor.u32 %v13668_v16, %v10658_v15  ;;  %v13908_v57 = vld [vmem:[#allocation8 + $0x159c] sm:$0xf0] }
 0x160   :  { %8862 = vmatmul.msk.f32.gmra.mxu2 %vm266_vm2, %v245_v31  ;;  %v13700_v31 = vld [vmem:[#allocation8 + $0xf1c] sm:$0xf0]  ;;  %v11619_v2 = vor.u32 %v13908_v57, %v11618_v51 }
 0x161   :  { %v10787_v32 = vor.u32 %v13700_v31, %v10786_v30  ;;  %6604 = vmatpush.bf16.msra.mxu2 %v10243_v40  ;;  %v11394_v30 = vld [vmem:[#allocation8 + $0x13c0] sm:$0xf] }
 0x162   :  { %v13852_v31 = vld [vmem:[#allocation8 + $0x13dc] sm:$0xf0] }
 0x163   :  { %6616 = vmatpush.bf16.msra.mxu0 %v10531_v29  ;;  %6629 = vmatpush.bf16.msra.mxu1 %v10787_v32  ;;  %v13788_v29 = vld [vmem:[#allocation8 + $0x11dc] sm:$0xf0] }
 0x164   :  { %v11650_v32 = vld [vmem:[#allocation8 + $0x15c0] sm:$0xf]  ;;  %v11139_v40 = vor.u32 %v13788_v29, %v11138_v26 }
 0x165   :  { %6605 = vmatpush.bf16.msra.mxu2 %v10211_v52  ;;  %v13836_v5 = vld [vmem:[#allocation8 + $0x135c] sm:$0xf0] }
 0x166   :  { %v11586_v6 = vld [vmem:[#allocation8 + $0x1540] sm:$0xf] }
 0x167   :  { %v246_v36 = vpop.trf.xlu0  ;;  %6617 = vmatpush.bf16.msra.mxu0 %v10499_v41  ;;  %6630 = vmatpush.bf16.msra.mxu1 %v10755_v44  ;;  %v11395_v41 = vor.u32 %v13852_v31, %v11394_v30  ;;  %v11362_v44 = vld [vmem:[#allocation8 + $0x1380] sm:$0xf] }
 0x168   :  { %8863 = vmatmul.msk.f32.gmra.mxu2 %vm266_vm2, %v246_v36  ;;  %v9987_v36 = vor.u32 %v13500_v34, %v9986_v33  ;;  %v13916_v33 = vld [vmem:[#allocation8 + $0x15dc] sm:$0xf0]  ;;  %v11363_v63 = vor.u32 %v13844_v45, %v11362_v44 }
 0x169   :  { %6606 = vmatpush.bf16.msra.mxu2 %v10179_v0  ;;  %v11906_v34 = vld [vmem:[#allocation8 + $0x17c0] sm:$0xf]  ;;  %v11651_v55 = vor.u32 %v13916_v33, %v11650_v32 }
 0x16a   :  { %6591 = vmatpush.bf16.msrb.mxu3 %v9987_v36  ;;  %v11074_v0 = vld [vmem:[#allocation8 + $0x1140] sm:$0xf] }
 0x16b   :  { %6618 = vmatpush.bf16.msra.mxu0 %v10467_v53  ;;  %6631 = vmatpush.bf16.msra.mxu1 %v10723_v56  ;;  %v11907_v56 = vor.u32 %v13980_v35, %v11906_v34  ;;  %v13900_v7 = vld [vmem:[#allocation8 + $0x155c] sm:$0xf0] }
 0x16c   :  { %v13964_v9 = vld [vmem:[#allocation8 + $0x175c] sm:$0xf0] }
 0x16d   :  { %6607 = vmatpush.bf16.msra.mxu2 %v10147_v13  ;;  %v13764_v13 = vld [vmem:[#allocation8 + $0x111c] sm:$0xf0] }
 0x16e   :  { %6592 = vmatpush.bf16.msrb.mxu3 %v9955_v48  ;;  %v11298_v16 = vld [vmem:[#allocation8 + $0x1300] sm:$0xf] }
 0x16f   :  { %6619 = vmatpush.bf16.msra.mxu0 %v10435_v1  ;;  %6632 = vmatpush.bf16.msra.mxu1 %v10691_v4  ;;  %v13772_v1 = vld [vmem:[#allocation8 + $0x115c] sm:$0xf0] }
 0x170   :  { %v11330_v4 = vld [vmem:[#allocation8 + $0x1340] sm:$0xf]  ;;  %v11075_v10 = vor.u32 %v13772_v1, %v11074_v0 }
 0x171   :  { %v11331_v11 = vor.u32 %v13836_v5, %v11330_v4  ;;  %v11266_v26 = vld [vmem:[#allocation8 + $0x12c0] sm:$0xf] }
 0x172   :  { %6593 = vmatpush.bf16.msrb.mxu3 %v9923_v60  ;;  %v11874_v60 = vld [vmem:[#allocation8 + $0x1780] sm:$0xf] }
 0x173   :  { %6620 = vmatpush.bf16.msra.mxu0 %v10403_v14  ;;  %6633 = vmatpush.bf16.msra.mxu1 %v10659_v17  ;;  %v11875_v3 = vor.u32 %v13972_v61, %v11874_v60  ;;  %v11587_v14 = vor.u32 %v13900_v7, %v11586_v6  ;;  %v13828_v17 = vld [vmem:[#allocation8 + $0x131c] sm:$0xf0] }
 0x174   :  { %v11522_v30 = vld [vmem:[#allocation8 + $0x14c0] sm:$0xf] }
 0x175   :  { %v13884_v31 = vld [vmem:[#allocation8 + $0x14dc] sm:$0xf0] }
 0x176   :  { %6594 = vmatpush.bf16.msrb.mxu3 %v9891_v8  ;;  %v11842_v8 = vld [vmem:[#allocation8 + $0x1740] sm:$0xf] }
 0x177   :  { %v11843_v15 = vor.u32 %v13964_v9, %v11842_v8  ;;  %v11778_v32 = vld [vmem:[#allocation8 + $0x16c0] sm:$0xf] }
 0x178   :  { %v13948_v33 = vld [vmem:[#allocation8 + $0x16dc] sm:$0xf0] }
 0x179   :  { %v11779_v43 = vor.u32 %v13948_v33, %v11778_v32  ;;  %v11234_v44 = vld [vmem:[#allocation8 + $0x1280] sm:$0xf] }
 0x17a   :  { %v13812_v45 = vld [vmem:[#allocation8 + $0x129c] sm:$0xf0] }
 0x17b   :  { %v11746_v51 = vld [vmem:[#allocation8 + $0x1680] sm:$0xf] }
 0x17c   :  { %v13740_v57 = vld [vmem:[#allocation8 + $0x105c] sm:$0xf0] }
 0x17d   :  { %v11202_v60 = vld [vmem:[#allocation8 + $0x1240] sm:$0xf] }
 0x17e   :  { %v13804_v61 = vld [vmem:[#allocation8 + $0x125c] sm:$0xf0] }
 0x17f   :  { %v11714_v0 = vld [vmem:[#allocation8 + $0x1640] sm:$0xf]  ;;  %v11203_v4 = vor.u32 %v13804_v61, %v11202_v60 }
 0x180   :  { %v13932_v1 = vld [vmem:[#allocation8 + $0x165c] sm:$0xf0] }
 0x181   :  { %v13732_v5 = vld [vmem:[#allocation8 + $0x101c] sm:$0xf0]  ;;  %v11715_v9 = vor.u32 %v13932_v1, %v11714_v0 }
 0x182   :  { %v11170_v6 = vld [vmem:[#allocation8 + $0x1200] sm:$0xf] }
 0x183   :  { %v13796_v7 = vld [vmem:[#allocation8 + $0x121c] sm:$0xf0] }
 0x184   :  { %v12642_v32 = vld [vmem:[#allocation8 + $0x1d80] sm:$0xf] }
 0x185   :  { %v14164_v33 = vld [vmem:[#allocation8 + $0x1d9c] sm:$0xf0] }
 0x186   :  { %v12354_v60 = vld [vmem:[#allocation8 + $0x1b40] sm:$0xf] }
 0x187   :  { %v14092_v61 = vld [vmem:[#allocation8 + $0x1b5c] sm:$0xf0] }
 0x188   :  { %v12866_v0 = vld [vmem:[#allocation8 + $0x1f40] sm:$0xf] }
 0x189   :  { %v14220_v1 = vld [vmem:[#allocation8 + $0x1f5c] sm:$0xf0] }
 0x1d3   :  { %v300_v18 = vpop.f32.mrf.mxu2 }
 0x1d4   :  { %v301_v19 = vadd.f32 %v14319_v12, %v300_v18  ;;  %v11554_v18 = vld [vmem:[#allocation8 + $0x1500] sm:$0xf] }
 0x1d6   :  { %v312_v20 = vmax.f32 %v301_v19, 0.0  ;;  %v13892_v19 = vld [vmem:[#allocation8 + $0x151c] sm:$0xf0] }
 0x1d8   :  { %320 = vst [vmem:[#allocation1] ss:$9 sm:$0xff] %v312_v20  ;;  %v11810_v20 = vld [vmem:[#allocation8 + $0x1700] sm:$0xf] }
 0x1db   :  { %v303_v21 = vpop.f32.mrf.mxu2 }
 0x1dc   :  { %v304_v27 = vadd.f32 %v14319_v12, %v303_v21  ;;  %v13956_v21 = vld [vmem:[#allocation8 + $0x171c] sm:$0xf0] }
 0x1dd   :  { %v11811_v29 = vor.u32 %v13956_v21, %v11810_v20  ;;  %v11171_v20 = vor.u32 %v13796_v7, %v11170_v6  ;;  %v14172_v21 = vld [vmem:[#allocation8 + $0x1ddc] sm:$0xf0]  ;;  %v12867_v7 = vor.u32 %v14220_v1, %v12866_v0 }
 0x1de   :  { %v313_v46 = vmax.f32 %v304_v27, 0.0  ;;  %v13820_v27 = vld [vmem:[#allocation8 + $0x12dc] sm:$0xf0] }
 0x1df   :  { %v11267_v35 = vor.u32 %v13820_v27, %v11266_v26  ;;  %v12130_v26 = vld [vmem:[#allocation8 + $0x1980] sm:$0xf] }
 0x1e0   :  { %v14036_v27 = vld [vmem:[#allocation8 + $0x199c] sm:$0xf0] }
 0x1e1   :  { %v13988_v1 = vld [vmem:[#allocation8 + $0x181c] sm:$0xf0] }
 0x1e3   :  { %v306_v22 = vpop.f32.mrf.mxu2 }
 0x1e4   :  { %v307_v23 = vadd.f32 %v14319_v12, %v306_v22  ;;  %v11010_v22 = vld [vmem:[#allocation8 + $0x10c0] sm:$0xf] }
 0x1e6   :  { %v314_v24 = vmax.f32 %v307_v23, 0.0 }
 0x1e8   :  { %322 = vst [vmem:[#allocation1 + $0x1] ss:$9 sm:$0xff] %v314_v24  ;;  %v11299_v24 = vor.u32 %v13828_v17, %v11298_v16  ;;  %v12418_v16 = vld [vmem:[#allocation8 + $0x1bc0] sm:$0xf] }
 0x1e9   :  { %v14108_v17 = vld [vmem:[#allocation8 + $0x1bdc] sm:$0xf0] }
 0x1eb   :  { %v309_v25 = vpop.f32.mrf.mxu2 }
 0x1ec   :  { %v310_v28 = vadd.f32 %v14319_v12, %v309_v25  ;;  %v11042_v12 = vld [vmem:[#allocation8 + $0x1100] sm:$0xf] }
 0x1ed   :  { %v11043_v23 = vor.u32 %v13764_v13, %v11042_v12  ;;  %v13756_v25 = vld [vmem:[#allocation8 + $0x10dc] sm:$0xf0] }
 0x1ee   :  { %v315_v36 = vmax.f32 %v310_v28, 0.0  ;;  %v11555_v28 = vor.u32 %v13892_v19, %v11554_v18  ;;  %v11011_v34 = vor.u32 %v13756_v25, %v11010_v22  ;;  %v11682_v12 = vld [vmem:[#allocation8 + $0x1600] sm:$0xf] }
 0x1ef   :  { %v323_v37 = vld [vmem:[#allocation1] sm:$0xff]  ;;  %v324_v38 = vld [vmem:[#allocation1 + $0x9] sm:$0xff]  ;;  %v325_v39 = vld [vmem:[#allocation1 + $0x12] sm:$0xff] }
 0x1f0   :  { %v14621_v47 = vpack.c.bf16 %v323_v37, %v323_v37  ;;  %v14623_v48 = vpack.c.bf16 %v324_v38, %v324_v38  ;;  %v14625_v49 = vpack.c.bf16 %v325_v39, %v325_v39  ;;  %v326_v50 = vld [vmem:[#allocation1 + $0x1b] sm:$0xff]  ;;  %v14627_v52 = vld [vmem:[#allocation1 + $0x24] sm:$0xff]  ;;  %v14629_v53 = vld [vmem:[#allocation1 + $0x2d] sm:$0xff]  ;;  %v11523_v38 = vor.u32 %v13884_v31, %v11522_v30 }
 0x1f1   :  { %v14631_v54 = vpack.c.bf16 %v326_v50, %v326_v50  ;;  %v14633_v58 = vld [vmem:[#allocation1 + $0x36] sm:$0xff]  ;;  %v14635_v59 = vld [vmem:[#allocation1 + $0x3f] sm:$0xff]  ;;  %v14647_v37 = vpack.c.bf16 %v14629_v53, %v14629_v53  ;;  %v10978_v39 = vld [vmem:[#allocation8 + $0x1080] sm:$0xf]  ;;  %v12419_v30 = vor.u32 %v14108_v17, %v12418_v16 }
 0x1f2   :  { %6543 = vmatmul.bf16.vlgmr.msra.gmra.mxu3 %v14621_v47  ;;  %6556 = vmatmul.bf16.vlgmr.msrb.gmra.mxu2 %v14623_v48  ;;  %331 = vst [vmem:[#allocation1] ss:$9 sm:$0xff] %v313_v46  ;;  %v14655_v42 = vpack.c.bf16 %v14635_v59, %v14635_v59  ;;  %v11490_v46 = vld [vmem:[#allocation8 + $0x1480] sm:$0xf] }
 0x1f3   :  { %6569 = vmatmul.bf16.vlgmr.msrb.gmra.mxu0 %v14625_v49  ;;  %6582 = vmatmul.bf16.vlgmr.msrb.gmra.mxu1 %v14631_v54  ;;  %332 = vst [vmem:[#allocation1 + $0x1] ss:$9 sm:$0xff] %v315_v36  ;;  %v14643_v36 = vpack.c.bf16 %v14627_v52, %v14627_v52  ;;  %v13876_v50 = vld [vmem:[#allocation8 + $0x149c] sm:$0xf0] }
 0x1f4   :  { %6639 = vmatpush.bf16.msra.mxu3 %v11139_v40  ;;  %6652 = vmatpush.bf16.msrb.mxu2 %v11395_v41  ;;  %v13748_v40 = vld [vmem:[#allocation8 + $0x109c] sm:$0xf0]  ;;  %v14651_v41 = vpack.c.bf16 %v14633_v58, %v14633_v58  ;;  %v11491_v58 = vor.u32 %v13876_v50, %v11490_v46  ;;  %v12131_v46 = vor.u32 %v14036_v27, %v12130_v26 }
 0x1f5   :  { %6665 = vmatpush.bf16.msrb.mxu0 %v11651_v55  ;;  %6678 = vmatpush.bf16.msrb.mxu1 %v11907_v56  ;;  %v13940_v52 = vld [vmem:[#allocation8 + $0x169c] sm:$0xf0]  ;;  %v10979_v53 = vor.u32 %v13748_v40, %v10978_v39  ;;  %v11235_v55 = vor.u32 %v13812_v45, %v11234_v44 }
 0x1f6   :  { %v10946_v56 = vld [vmem:[#allocation8 + $0x1040] sm:$0xf]  ;;  %v11747_v59 = vor.u32 %v13940_v52, %v11746_v51 }
 0x1f7   :  { %v13924_v13 = vld [vmem:[#allocation8 + $0x161c] sm:$0xf0] }
 0x1f8   :  { %6640 = vmatpush.bf16.msra.mxu3 %v11107_v62  ;;  %6653 = vmatpush.bf16.msrb.mxu2 %v11363_v63  ;;  %v11458_v62 = vld [vmem:[#allocation8 + $0x1440] sm:$0xf]  ;;  %v11683_v25 = vor.u32 %v13924_v13, %v11682_v12 }
 0x1f9   :  { %6666 = vmatpush.bf16.msrb.mxu0 %v11619_v2  ;;  %6679 = vmatpush.bf16.msrb.mxu1 %v11875_v3  ;;  %v13868_v63 = vld [vmem:[#allocation8 + $0x145c] sm:$0xf0]  ;;  %v10947_v3 = vor.u32 %v13740_v57, %v10946_v56 }
 0x1fa   :  { %v10914_v2 = vld [vmem:[#allocation8 + $0x1000] sm:$0xf]  ;;  %v11459_v8 = vor.u32 %v13868_v63, %v11458_v62  ;;  %v336_v44 = vld [vmem:[#allocation1 + $0x1b] sm:$0xff] }
 0x1fb   :  { %v12674_v18 = vld [vmem:[#allocation8 + $0x1dc0] sm:$0xf]  ;;  %v10915_v19 = vor.u32 %v13732_v5, %v10914_v2 }
 0x1fc   :  { %6641 = vmatpush.bf16.msra.mxu3 %v11075_v10  ;;  %6654 = vmatpush.bf16.msrb.mxu2 %v11331_v11  ;;  %v11426_v10 = vld [vmem:[#allocation8 + $0x1400] sm:$0xf] }
 0x1fd   :  { %6667 = vmatpush.bf16.msrb.mxu0 %v11587_v14  ;;  %6680 = vmatpush.bf16.msrb.mxu1 %v11843_v15  ;;  %v13860_v11 = vld [vmem:[#allocation8 + $0x141c] sm:$0xf0] }
 0x1fe   :  { %v12162_v14 = vld [vmem:[#allocation8 + $0x19c0] sm:$0xf] }
 0x1ff   :  { %v14044_v15 = vld [vmem:[#allocation8 + $0x19dc] sm:$0xf0] }
 0x200   :  { %6642 = vmatpush.bf16.msra.mxu3 %v11043_v23  ;;  %6655 = vmatpush.bf16.msrb.mxu2 %v11299_v24  ;;  %v12930_v22 = vld [vmem:[#allocation8 + $0x1fc0] sm:$0xf]  ;;  %v11427_v24 = vor.u32 %v13860_v11, %v11426_v10 }
 0x201   :  { %6668 = vmatpush.bf16.msrb.mxu0 %v11555_v28  ;;  %6681 = vmatpush.bf16.msrb.mxu1 %v11811_v29  ;;  %v14236_v23 = vld [vmem:[#allocation8 + $0x1fdc] sm:$0xf0]  ;;  %v12163_v29 = vor.u32 %v14044_v15, %v12162_v14 }
 0x202   :  { %6595 = vmatmul.bf16.vlgmr.msrb.gmra.mxu3 %v14643_v36  ;;  %6608 = vmatmul.bf16.vlgmr.msra.gmra.mxu2 %v14647_v37  ;;  %v12386_v28 = vld [vmem:[#allocation8 + $0x1b80] sm:$0xf] }
 0x203   :  { %6621 = vmatmul.bf16.vlgmr.msra.gmra.mxu0 %v14651_v41  ;;  %6634 = vmatmul.bf16.vlgmr.msra.gmra.mxu1 %v14655_v42  ;;  %v14100_v31 = vld [vmem:[#allocation8 + $0x1b9c] sm:$0xf0] }
 0x204   :  { %6643 = vmatpush.bf16.msra.mxu3 %v11011_v34  ;;  %6656 = vmatpush.bf16.msrb.mxu2 %v11267_v35  ;;  %v12675_v34 = vor.u32 %v14172_v21, %v12674_v18  ;;  %v12931_v35 = vor.u32 %v14236_v23, %v12930_v22  ;;  %v334_v39 = vld [vmem:[#allocation1 + $0x9] sm:$0xff]  ;;  %v12387_v50 = vor.u32 %v14100_v31, %v12386_v28 }
 0x205   :  { %6669 = vmatpush.bf16.msrb.mxu0 %v11523_v38  ;;  %6682 = vmatpush.bf16.msrb.mxu1 %v11779_v43  ;;  %v333_v38 = vld [vmem:[#allocation1] sm:$0xff]  ;;  %v12898_v40 = vld [vmem:[#allocation8 + $0x1f80] sm:$0xf]  ;;  %v335_v43 = vld [vmem:[#allocation1 + $0x12] sm:$0xff]  ;;  %v14663_v52 = vpack.c.bf16 %v334_v39, %v334_v39 }
 0x206   :  { %v14228_v45 = vld [vmem:[#allocation8 + $0x1f9c] sm:$0xf0]  ;;  %v14661_v51 = vpack.c.bf16 %v333_v38, %v333_v38  ;;  %v14665_v57 = vpack.c.bf16 %v335_v43, %v335_v43 }
 0x207   :  { %v14028_v56 = vld [vmem:[#allocation8 + $0x195c] sm:$0xf0] }
 0x208   :  { %6644 = vmatpush.bf16.msra.mxu3 %v10979_v53  ;;  %6657 = vmatpush.bf16.msrb.mxu2 %v11235_v55  ;;  %v12643_v53 = vor.u32 %v14164_v33, %v12642_v32  ;;  %v12098_v55 = vld [vmem:[#allocation8 + $0x1940] sm:$0xf] }
 0x209   :  { %6670 = vmatpush.bf16.msrb.mxu0 %v11491_v58  ;;  %6683 = vmatpush.bf16.msrb.mxu1 %v11747_v59  ;;  %v14667_v58 = vpack.c.bf16 %v336_v44, %v336_v44  ;;  %v12899_v59 = vor.u32 %v14228_v45, %v12898_v40  ;;  %v12610_v62 = vld [vmem:[#allocation8 + $0x1d40] sm:$0xf]  ;;  %v12099_v2 = vor.u32 %v14028_v56, %v12098_v55 }
 0x20a   :  { %v14156_v63 = vld [vmem:[#allocation8 + $0x1d5c] sm:$0xf0] }
 0x20b   :  { %v14020_v5 = vld [vmem:[#allocation8 + $0x191c] sm:$0xf0]  ;;  %v12611_v6 = vor.u32 %v14156_v63, %v12610_v62 }
 0x20c   :  { %6645 = vmatpush.bf16.msra.mxu3 %v10947_v3  ;;  %6658 = vmatpush.bf16.msrb.mxu2 %v11203_v4  ;;  %v12355_v3 = vor.u32 %v14092_v61, %v12354_v60  ;;  %v12066_v4 = vld [vmem:[#allocation8 + $0x1900] sm:$0xf] }
 0x20d   :  { %6671 = vmatpush.bf16.msrb.mxu0 %v11459_v8  ;;  %6684 = vmatpush.bf16.msrb.mxu1 %v11715_v9  ;;  %v12322_v8 = vld [vmem:[#allocation8 + $0x1b00] sm:$0xf]  ;;  %v12067_v14 = vor.u32 %v14020_v5, %v12066_v4 }
 0x20e   :  { %v14084_v9 = vld [vmem:[#allocation8 + $0x1b1c] sm:$0xf0] }
 0x20f   :  { %v12578_v10 = vld [vmem:[#allocation8 + $0x1d00] sm:$0xf]  ;;  %v12323_v15 = vor.u32 %v14084_v9, %v12322_v8 }
 0x210   :  { %6646 = vmatpush.bf16.msra.mxu3 %v10915_v19  ;;  %6659 = vmatpush.bf16.msrb.mxu2 %v11171_v20  ;;  %v14148_v11 = vld [vmem:[#allocation8 + $0x1d1c] sm:$0xf0] }
 0x211   :  { %6672 = vmatpush.bf16.msrb.mxu0 %v11427_v24  ;;  %6685 = vmatpush.bf16.msrb.mxu1 %v11683_v25  ;;  %v12834_v12 = vld [vmem:[#allocation8 + $0x1f00] sm:$0xf]  ;;  %v12579_v18 = vor.u32 %v14148_v11, %v12578_v10  ;;  %v13272_v10 = vld [vmem:[#allocation8 + $0x1c4] sm:$0xf] }
 0x212   :  { %v14212_v13 = vld [vmem:[#allocation8 + $0x1f1c] sm:$0xf0]  ;;  %v9092_v11 = vld [vmem:[#allocation8 + $0x1e0] sm:$0xf0] }
 0x213   :  { %6647 = vmatmul.bf16.vlgmr.msra.gmra.mxu3 %v14661_v51  ;;  %6660 = vmatmul.bf16.vlgmr.msrb.gmra.mxu2 %v14663_v52  ;;  %v12034_v16 = vld [vmem:[#allocation8 + $0x18c0] sm:$0xf]  ;;  %v12835_v19 = vor.u32 %v14212_v13, %v12834_v12  ;;  %v13336_v12 = vld [vmem:[#allocation8 + $0x3c4] sm:$0xf] }
 0x214   :  { %6691 = vmatpush.bf16.msrb.mxu3 %v12163_v29  ;;  %6704 = vmatpush.bf16.msra.mxu2 %v12419_v30  ;;  %v14012_v17 = vld [vmem:[#allocation8 + $0x18dc] sm:$0xf0]  ;;  %v9348_v13 = vld [vmem:[#allocation8 + $0x3e0] sm:$0xf0] }
 0x215   :  { %6717 = vmatpush.bf16.msra.mxu0 %v12675_v34  ;;  %6730 = vmatpush.bf16.msra.mxu1 %v12931_v35  ;;  %v12290_v20 = vld [vmem:[#allocation8 + $0x1ac0] sm:$0xf]  ;;  %v12035_v26 = vor.u32 %v14012_v17, %v12034_v16  ;;  %v9604_v17 = vld [vmem:[#allocation8 + $0x5e0] sm:$0xf0] }
 0x216   :  { %6673 = vmatmul.bf16.vlgmr.msrb.gmra.mxu0 %v14665_v57  ;;  %6686 = vmatmul.bf16.vlgmr.msrb.gmra.mxu1 %v14667_v58  ;;  %v14076_v21 = vld [vmem:[#allocation8 + $0x1adc] sm:$0xf0] }
 0x217   :  { %v12546_v22 = vld [vmem:[#allocation8 + $0x1cc0] sm:$0xf]  ;;  %v12291_v27 = vor.u32 %v14076_v21, %v12290_v20 }
 0x218   :  { %6692 = vmatpush.bf16.msrb.mxu3 %v12131_v46  ;;  %6705 = vmatpush.bf16.msra.mxu2 %v12387_v50  ;;  %v14140_v23 = vld [vmem:[#allocation8 + $0x1cdc] sm:$0xf0] }
 0x219   :  { %6718 = vmatpush.bf16.msra.mxu0 %v12643_v53  ;;  %6731 = vmatpush.bf16.msra.mxu1 %v12899_v59  ;;  %v12802_v24 = vld [vmem:[#allocation8 + $0x1ec0] sm:$0xf]  ;;  %v12547_v30 = vor.u32 %v14140_v23, %v12546_v22  ;;  %v337_v22 = vld [vmem:[#allocation1 + $0x24] sm:$0xff] }
 0x21a   :  { %v14204_v25 = vld [vmem:[#allocation8 + $0x1edc] sm:$0xf0] }
 0x21b   :  { %v12002_v28 = vld [vmem:[#allocation8 + $0x1880] sm:$0xf]  ;;  %v12803_v31 = vor.u32 %v14204_v25, %v12802_v24  ;;  %v339_v24 = vld [vmem:[#allocation1 + $0x36] sm:$0xff]  ;;  %v9095_v25 = vor.u32 %v13272_v10, %v9092_v11  ;;  %v13376_v10 = vld [vmem:[#allocation8 + $0x504] sm:$0xf] }
 0x21c   :  { %6693 = vmatpush.bf16.msrb.mxu3 %v12099_v2  ;;  %6706 = vmatpush.bf16.msra.mxu2 %v12355_v3  ;;  %v14004_v29 = vld [vmem:[#allocation8 + $0x189c] sm:$0xf0]  ;;  %v9508_v11 = vld [vmem:[#allocation8 + $0x520] sm:$0xf0] }
 0x21d   :  { %6719 = vmatpush.bf16.msra.mxu0 %v12611_v6  ;;  %6732 = vmatpush.bf16.msra.mxu1 %v12867_v7  ;;  %v12258_v32 = vld [vmem:[#allocation8 + $0x1a80] sm:$0xf]  ;;  %v12003_v40 = vor.u32 %v14004_v29, %v12002_v28  ;;  %v13264_v28 = vld [vmem:[#allocation8 + $0x184] sm:$0xf] }
 0x21e   :  { %v14068_v33 = vld [vmem:[#allocation8 + $0x1a9c] sm:$0xf0]  ;;  %v9060_v29 = vld [vmem:[#allocation8 + $0x1a0] sm:$0xf0] }
 0x21f   :  { %v12514_v34 = vld [vmem:[#allocation8 + $0x1c80] sm:$0xf]  ;;  %v12259_v43 = vor.u32 %v14068_v33, %v12258_v32  ;;  %v13328_v32 = vld [vmem:[#allocation8 + $0x384] sm:$0xf] }
 0x220   :  { %6694 = vmatpush.bf16.msrb.mxu3 %v12067_v14  ;;  %6707 = vmatpush.bf16.msra.mxu2 %v12323_v15  ;;  %v14132_v35 = vld [vmem:[#allocation8 + $0x1c9c] sm:$0xf0]  ;;  %v13400_v14 = vld [vmem:[#allocation8 + $0x5c4] sm:$0xf] }
 0x221   :  { %6720 = vmatpush.bf16.msra.mxu0 %v12579_v18  ;;  %6733 = vmatpush.bf16.msra.mxu1 %v12835_v19  ;;  %v12770_v38 = vld [vmem:[#allocation8 + $0x1e80] sm:$0xf]  ;;  %v12515_v46 = vor.u32 %v14132_v35, %v12514_v34  ;;  %v13464_v18 = vld [vmem:[#allocation8 + $0x7c4] sm:$0xf] }
 0x222   :  { %v14196_v39 = vld [vmem:[#allocation8 + $0x1e9c] sm:$0xf0]  ;;  %v9860_v19 = vld [vmem:[#allocation8 + $0x7e0] sm:$0xf0] }
 0x223   :  { %v11970_v44 = vld [vmem:[#allocation8 + $0x1840] sm:$0xf]  ;;  %v12771_v50 = vor.u32 %v14196_v39, %v12770_v38  ;;  %v9316_v33 = vld [vmem:[#allocation8 + $0x3a0] sm:$0xf0] }
 0x224   :  { %6695 = vmatpush.bf16.msrb.mxu3 %v12035_v26  ;;  %6708 = vmatpush.bf16.msra.mxu2 %v12291_v27  ;;  %v13996_v45 = vld [vmem:[#allocation8 + $0x185c] sm:$0xf0]  ;;  %v9351_v26 = vor.u32 %v13336_v12, %v9348_v13  ;;  %v340_v27 = vld [vmem:[#allocation1 + $0x3f] sm:$0xff]  ;;  %v13392_v34 = vld [vmem:[#allocation8 + $0x584] sm:$0xf] }
 0x225   :  { %6721 = vmatpush.bf16.msra.mxu0 %v12547_v30  ;;  %6734 = vmatpush.bf16.msra.mxu1 %v12803_v31  ;;  %v12226_v53 = vld [vmem:[#allocation8 + $0x1a40] sm:$0xf]  ;;  %v11971_v63 = vor.u32 %v13996_v45, %v11970_v44  ;;  %v9607_v30 = vor.u32 %v13400_v14, %v9604_v17  ;;  %v9863_v31 = vor.u32 %v13464_v18, %v9860_v19  ;;  %v9572_v35 = vld [vmem:[#allocation8 + $0x5a0] sm:$0xf0] }
 0x226   :  { %v14060_v55 = vld [vmem:[#allocation8 + $0x1a5c] sm:$0xf0]  ;;  %v13456_v38 = vld [vmem:[#allocation8 + $0x784] sm:$0xf]  ;;  %v14677_v44 = vpack.c.bf16 %v339_v24, %v339_v24  ;;  %v9063_v45 = vor.u32 %v13264_v28, %v9060_v29  ;;  %v9511_v18 = vor.u32 %v13376_v10, %v9508_v11 }
 0x227   :  { %v12482_v56 = vld [vmem:[#allocation8 + $0x1c40] sm:$0xf]  ;;  %v12227_v0 = vor.u32 %v14060_v55, %v12226_v53  ;;  %v9828_v39 = vld [vmem:[#allocation8 + $0x7a0] sm:$0xf0]  ;;  %v14679_v55 = vpack.c.bf16 %v340_v27, %v340_v27 }
 0x228   :  { %v14124_v59 = vld [vmem:[#allocation8 + $0x1c5c] sm:$0xf0]  ;;  %6696 = vmatpush.bf16.msrb.mxu3 %v12003_v40  ;;  %6709 = vmatpush.bf16.msra.mxu2 %v12259_v43  ;;  %v14673_v40 = vpack.c.bf16 %v337_v22, %v337_v22  ;;  %v9028_v53 = vld [vmem:[#allocation8 + $0x160] sm:$0xf0] }
 0x229   :  { %v12738_v60 = vld [vmem:[#allocation8 + $0x1e40] sm:$0xf]  ;;  %6722 = vmatpush.bf16.msra.mxu0 %v12515_v46  ;;  %6735 = vmatpush.bf16.msra.mxu1 %v12771_v50  ;;  %v12483_v4 = vor.u32 %v14124_v59, %v12482_v56  ;;  %v9319_v46 = vor.u32 %v13328_v32, %v9316_v33  ;;  %v13256_v50 = vld [vmem:[#allocation8 + $0x144] sm:$0xf]  ;;  %v9575_v56 = vor.u32 %v13392_v34, %v9572_v35 }
 0x22a   :  { %v14188_v61 = vld [vmem:[#allocation8 + $0x1e5c] sm:$0xf0]  ;;  %v9831_v59 = vor.u32 %v13456_v38, %v9828_v39  ;;  %v13440_v12 = vld [vmem:[#allocation8 + $0x704] sm:$0xf] }
 0x22b   :  { %v11938_v62 = vld [vmem:[#allocation8 + $0x1800] sm:$0xf]  ;;  %v12739_v5 = vor.u32 %v14188_v61, %v12738_v60  ;;  %v13320_v60 = vld [vmem:[#allocation8 + $0x344] sm:$0xf] }
 0x22c   :  { %v12194_v2 = vld [vmem:[#allocation8 + $0x1a00] sm:$0xf]  ;;  %6697 = vmatpush.bf16.msrb.mxu3 %v11971_v63  ;;  %6710 = vmatpush.bf16.msra.mxu2 %v12227_v0  ;;  %v11939_v15 = vor.u32 %v13988_v1, %v11938_v62  ;;  %v9284_v61 = vld [vmem:[#allocation8 + $0x360] sm:$0xf0] }
 0x22d   :  { %v14052_v3 = vld [vmem:[#allocation8 + $0x1a1c] sm:$0xf0]  ;;  %6723 = vmatpush.bf16.msra.mxu0 %v12483_v4  ;;  %6736 = vmatpush.bf16.msra.mxu1 %v12739_v5  ;;  %v13384_v62 = vld [vmem:[#allocation8 + $0x544] sm:$0xf] }
 0x22e   :  { %v12450_v6 = vld [vmem:[#allocation8 + $0x1c00] sm:$0xf]  ;;  %v12195_v16 = vor.u32 %v14052_v3, %v12194_v2  ;;  %v9540_v63 = vld [vmem:[#allocation8 + $0x560] sm:$0xf0]  ;;  %v9031_v2 = vor.u32 %v13256_v50, %v9028_v53  ;;  %v9287_v3 = vor.u32 %v13320_v60, %v9284_v61 }
 0x22f   :  { %v14116_v7 = vld [vmem:[#allocation8 + $0x1c1c] sm:$0xf0]  ;;  %v13448_v0 = vld [vmem:[#allocation8 + $0x744] sm:$0xf] }
 0x230   :  { %v12706_v8 = vld [vmem:[#allocation8 + $0x1e00] sm:$0xf]  ;;  %v12451_v20 = vor.u32 %v14116_v7, %v12450_v6  ;;  %6698 = vmatpush.bf16.msrb.mxu3 %v11939_v15  ;;  %6711 = vmatpush.bf16.msra.mxu2 %v12195_v16  ;;  %v9796_v1 = vld [vmem:[#allocation8 + $0x760] sm:$0xf0]  ;;  %v9543_v6 = vor.u32 %v13384_v62, %v9540_v63 }
 0x231   :  { %v14180_v9 = vld [vmem:[#allocation8 + $0x1e1c] sm:$0xf0]  ;;  %v13248_v4 = vld [vmem:[#allocation8 + $0x104] sm:$0xf]  ;;  %v9799_v7 = vor.u32 %v13448_v0, %v9796_v1 }
 0x232   :  { %v12707_v21 = vor.u32 %v14180_v9, %v12706_v8  ;;  %v338_v23 = vld [vmem:[#allocation1 + $0x2d] sm:$0xff]  ;;  %6724 = vmatpush.bf16.msra.mxu0 %v12451_v20 }
 0x233   :  { %v14675_v43 = vpack.c.bf16 %v338_v23, %v338_v23  ;;  %6699 = vmatmul.bf16.vlgmr.msrb.gmra.mxu3 %v14673_v40  ;;  %v8996_v5 = vld [vmem:[#allocation8 + $0x120] sm:$0xf0] }
 0x234   :  { %6737 = vmatpush.bf16.msra.mxu1 %v12707_v21  ;;  %6743 = vmatpush.bf16.msra.mxu3 %v9095_v25  ;;  %v13312_v8 = vld [vmem:[#allocation8 + $0x304] sm:$0xf]  ;;  %v8999_v14 = vor.u32 %v13248_v4, %v8996_v5 }
 0x235   :  { %6756 = vmatpush.bf16.msrb.mxu2 %v9351_v26  ;;  %6725 = vmatmul.bf16.vlgmr.msra.gmra.mxu0 %v14677_v44  ;;  %v9252_v9 = vld [vmem:[#allocation8 + $0x320] sm:$0xf0] }
 0x236   :  { %6769 = vmatpush.bf16.msrb.mxu0 %v9607_v30  ;;  %6712 = vmatmul.bf16.vlgmr.msra.gmra.mxu2 %v14675_v43  ;;  %v9764_v13 = vld [vmem:[#allocation8 + $0x720] sm:$0xf0]  ;;  %v9255_v15 = vor.u32 %v13312_v8, %v9252_v9 }
 0x237   :  { %6738 = vmatmul.bf16.vlgmr.msra.gmra.mxu1 %v14679_v55  ;;  %v13240_v16 = vld [vmem:[#allocation8 + $0xc4] sm:$0xf]  ;;  %v9767_v19 = vor.u32 %v13440_v12, %v9764_v13 }
 0x238   :  { %6782 = vmatpush.bf16.msrb.mxu1 %v9863_v31  ;;  %6744 = vmatpush.bf16.msra.mxu3 %v9063_v45  ;;  %v8964_v17 = vld [vmem:[#allocation8 + $0xe0] sm:$0xf0] }
 0x239   :  { %6757 = vmatpush.bf16.msrb.mxu2 %v9319_v46  ;;  %v13304_v20 = vld [vmem:[#allocation8 + $0x2c4] sm:$0xf]  ;;  %v8967_v26 = vor.u32 %v13240_v16, %v8964_v17 }
 0x23a   :  { %6770 = vmatpush.bf16.msrb.mxu0 %v9575_v56  ;;  %v9220_v21 = vld [vmem:[#allocation8 + $0x2e0] sm:$0xf0] }
 0x23b   :  { %v13368_v22 = vld [vmem:[#allocation8 + $0x4c4] sm:$0xf]  ;;  %v9223_v27 = vor.u32 %v13304_v20, %v9220_v21 }
 0x23c   :  { %6783 = vmatpush.bf16.msrb.mxu1 %v9831_v59  ;;  %6745 = vmatpush.bf16.msra.mxu3 %v9031_v2  ;;  %v9476_v23 = vld [vmem:[#allocation8 + $0x4e0] sm:$0xf0] }
 0x23d   :  { %6758 = vmatpush.bf16.msrb.mxu2 %v9287_v3  ;;  %v13432_v24 = vld [vmem:[#allocation8 + $0x6c4] sm:$0xf]  ;;  %v9479_v30 = vor.u32 %v13368_v22, %v9476_v23 }
 0x23e   :  { %6771 = vmatpush.bf16.msrb.mxu0 %v9543_v6  ;;  %v9732_v25 = vld [vmem:[#allocation8 + $0x6e0] sm:$0xf0] }
 0x23f   :  { %v13232_v28 = vld [vmem:[#allocation8 + $0x84] sm:$0xf]  ;;  %v9735_v31 = vor.u32 %v13432_v24, %v9732_v25 }
 0x240   :  { %6784 = vmatpush.bf16.msrb.mxu1 %v9799_v7  ;;  %6746 = vmatpush.bf16.msra.mxu3 %v8999_v14  ;;  %v8932_v29 = vld [vmem:[#allocation8 + $0xa0] sm:$0xf0] }
 0x241   :  { %6759 = vmatpush.bf16.msrb.mxu2 %v9255_v15  ;;  %v13296_v32 = vld [vmem:[#allocation8 + $0x284] sm:$0xf]  ;;  %v8935_v45 = vor.u32 %v13232_v28, %v8932_v29 }
 0x242   :  { %6772 = vmatpush.bf16.msrb.mxu0 %v9511_v18  ;;  %v9188_v33 = vld [vmem:[#allocation8 + $0x2a0] sm:$0xf0] }
 0x243   :  { %v13360_v34 = vld [vmem:[#allocation8 + $0x484] sm:$0xf]  ;;  %v9191_v46 = vor.u32 %v13296_v32, %v9188_v33 }
 0x244   :  { %6785 = vmatpush.bf16.msrb.mxu1 %v9767_v19  ;;  %v9444_v35 = vld [vmem:[#allocation8 + $0x4a0] sm:$0xf0]  ;;  %6747 = vmatpush.bf16.msra.mxu3 %v8967_v26 }
 0x245   :  { %v13424_v38 = vld [vmem:[#allocation8 + $0x684] sm:$0xf]  ;;  %6760 = vmatpush.bf16.msrb.mxu2 %v9223_v27  ;;  %v9447_v56 = vor.u32 %v13360_v34, %v9444_v35 }
 0x246   :  { %v9700_v39 = vld [vmem:[#allocation8 + $0x6a0] sm:$0xf0]  ;;  %6773 = vmatpush.bf16.msrb.mxu0 %v9479_v30 }
 0x247   :  { %v13224_v50 = vld [vmem:[#allocation8 + $0x44] sm:$0xf]  ;;  %v9703_v59 = vor.u32 %v13424_v38, %v9700_v39 }
 0x248   :  { %v8900_v53 = vld [vmem:[#allocation8 + $0x60] sm:$0xf0]  ;;  %6786 = vmatpush.bf16.msrb.mxu1 %v9735_v31  ;;  %6748 = vmatpush.bf16.msra.mxu3 %v8935_v45 }
 0x249   :  { %v13288_v60 = vld [vmem:[#allocation8 + $0x244] sm:$0xf]  ;;  %6761 = vmatpush.bf16.msrb.mxu2 %v9191_v46  ;;  %v8903_v3 = vor.u32 %v13224_v50, %v8900_v53 }
 0x24a   :  { %v9156_v61 = vld [vmem:[#allocation8 + $0x260] sm:$0xf0]  ;;  %6774 = vmatpush.bf16.msrb.mxu0 %v9447_v56 }
 0x24b   :  { %v13352_v62 = vld [vmem:[#allocation8 + $0x444] sm:$0xf]  ;;  %v9159_v4 = vor.u32 %v13288_v60, %v9156_v61 }
 0x24c   :  { %v9412_v63 = vld [vmem:[#allocation8 + $0x460] sm:$0xf0]  ;;  %6787 = vmatpush.bf16.msrb.mxu1 %v9703_v59  ;;  %6749 = vmatpush.bf16.msra.mxu3 %v8903_v3 }
 0x24d   :  { %v13416_v0 = vld [vmem:[#allocation8 + $0x644] sm:$0xf]  ;;  %v9415_v8 = vor.u32 %v13352_v62, %v9412_v63  ;;  %6762 = vmatpush.bf16.msrb.mxu2 %v9159_v4 }
 0x24e   :  { %v9668_v1 = vld [vmem:[#allocation8 + $0x660] sm:$0xf0] }
 0x24f   :  { %v13216_v2 = vld [vmem:[#allocation8 + $0x4] sm:$0xf]  ;;  %v9671_v9 = vor.u32 %v13416_v0, %v9668_v1  ;;  %6775 = vmatpush.bf16.msrb.mxu0 %v9415_v8 }
 0x250   :  { %v8868_v5 = vld [vmem:[#allocation8 + $0x20] sm:$0xf0] }
 0x251   :  { %v13280_v6 = vld [vmem:[#allocation8 + $0x204] sm:$0xf]  ;;  %v8871_v19 = vor.u32 %v13216_v2, %v8868_v5  ;;  %6788 = vmatpush.bf16.msrb.mxu1 %v9671_v9 }
 0x252   :  { %v9124_v7 = vld [vmem:[#allocation8 + $0x220] sm:$0xf0] }
 0x253   :  { %v13344_v10 = vld [vmem:[#allocation8 + $0x404] sm:$0xf]  ;;  %v9127_v20 = vor.u32 %v13280_v6, %v9124_v7  ;;  %6750 = vmatpush.bf16.msra.mxu3 %v8871_v19 }
 0x254   :  { %v9380_v11 = vld [vmem:[#allocation8 + $0x420] sm:$0xf0] }
 0x255   :  { %v13408_v12 = vld [vmem:[#allocation8 + $0x604] sm:$0xf]  ;;  %v9383_v24 = vor.u32 %v13344_v10, %v9380_v11  ;;  %6763 = vmatpush.bf16.msrb.mxu2 %v9127_v20 }
 0x256   :  { %v9636_v13 = vld [vmem:[#allocation8 + $0x620] sm:$0xf0]  ;;  %6751 = vmatmul.bf16.vlgmr.msra.gmra.mxu3 %v14621_v47 }
 0x257   :  { %v13528_v14 = vld [vmem:[#allocation8 + $0x9c4] sm:$0xf]  ;;  %v9639_v25 = vor.u32 %v13408_v12, %v9636_v13  ;;  %6776 = vmatpush.bf16.msrb.mxu0 %v9383_v24 }
 0x258   :  { %v10116_v15 = vld [vmem:[#allocation8 + $0x9e0] sm:$0xf0]  ;;  %6764 = vmatmul.bf16.vlgmr.msrb.gmra.mxu2 %v14623_v48 }
 0x259   :  { %v13592_v16 = vld [vmem:[#allocation8 + $0xbc4] sm:$0xf]  ;;  %v10119_v26 = vor.u32 %v13528_v14, %v10116_v15  ;;  %6789 = vmatpush.bf16.msrb.mxu1 %v9639_v25 }
 0x25a   :  { %v10372_v17 = vld [vmem:[#allocation8 + $0xbe0] sm:$0xf0]  ;;  %6777 = vmatmul.bf16.vlgmr.msrb.gmra.mxu0 %v14625_v49 }
 0x25b   :  { %v13656_v18 = vld [vmem:[#allocation8 + $0xdc4] sm:$0xf]  ;;  %v10375_v27 = vor.u32 %v13592_v16, %v10372_v17  ;;  %6795 = vmatpush.bf16.msrb.mxu3 %v10119_v26 }
 0x25c   :  { %v10628_v21 = vld [vmem:[#allocation8 + $0xde0] sm:$0xf0]  ;;  %6790 = vmatmul.bf16.vlgmr.msrb.gmra.mxu1 %v14631_v54 }
 0x25d   :  { %v13720_v22 = vld [vmem:[#allocation8 + $0xfc4] sm:$0xf]  ;;  %v10631_v30 = vor.u32 %v13656_v18, %v10628_v21  ;;  %6808 = vmatpush.bf16.msra.mxu2 %v10375_v27 }
 0x25e   :  { %v10884_v23 = vld [vmem:[#allocation8 + $0xfe0] sm:$0xf0] }
 0x25f   :  { %v13520_v28 = vld [vmem:[#allocation8 + $0x984] sm:$0xf]  ;;  %v10887_v31 = vor.u32 %v13720_v22, %v10884_v23  ;;  %6821 = vmatpush.bf16.msra.mxu0 %v10631_v30 }
 0x260   :  { %v10084_v29 = vld [vmem:[#allocation8 + $0x9a0] sm:$0xf0] }
 0x261   :  { %v13584_v32 = vld [vmem:[#allocation8 + $0xb84] sm:$0xf]  ;;  %v10087_v45 = vor.u32 %v13520_v28, %v10084_v29  ;;  %6834 = vmatpush.bf16.msra.mxu1 %v10887_v31 }
 0x262   :  { %v10340_v33 = vld [vmem:[#allocation8 + $0xba0] sm:$0xf0] }
 0x263   :  { %v13648_v34 = vld [vmem:[#allocation8 + $0xd84] sm:$0xf]  ;;  %v10343_v46 = vor.u32 %v13584_v32, %v10340_v33  ;;  %6796 = vmatpush.bf16.msrb.mxu3 %v10087_v45 }
 0x264   :  { %v10596_v35 = vld [vmem:[#allocation8 + $0xda0] sm:$0xf0] }
 0x265   :  { %v13712_v38 = vld [vmem:[#allocation8 + $0xf84] sm:$0xf]  ;;  %v10599_v56 = vor.u32 %v13648_v34, %v10596_v35  ;;  %6809 = vmatpush.bf16.msra.mxu2 %v10343_v46 }
 0x266   :  { %v10852_v39 = vld [vmem:[#allocation8 + $0xfa0] sm:$0xf0] }
 0x267   :  { %v13512_v50 = vld [vmem:[#allocation8 + $0x944] sm:$0xf]  ;;  %v10855_v59 = vor.u32 %v13712_v38, %v10852_v39  ;;  %6822 = vmatpush.bf16.msra.mxu0 %v10599_v56 }
 0x268   :  { %v10052_v53 = vld [vmem:[#allocation8 + $0x960] sm:$0xf0] }
 0x269   :  { %v13576_v60 = vld [vmem:[#allocation8 + $0xb44] sm:$0xf]  ;;  %v10055_v2 = vor.u32 %v13512_v50, %v10052_v53  ;;  %6835 = vmatpush.bf16.msra.mxu1 %v10855_v59 }
 0x26a   :  { %v10308_v61 = vld [vmem:[#allocation8 + $0xb60] sm:$0xf0] }
 0x26b   :  { %v13640_v62 = vld [vmem:[#allocation8 + $0xd44] sm:$0xf]  ;;  %v10311_v3 = vor.u32 %v13576_v60, %v10308_v61  ;;  %6797 = vmatpush.bf16.msrb.mxu3 %v10055_v2 }
 0x26c   :  { %v10564_v63 = vld [vmem:[#allocation8 + $0xd60] sm:$0xf0] }
 0x26d   :  { %v13704_v0 = vld [vmem:[#allocation8 + $0xf44] sm:$0xf]  ;;  %v10567_v6 = vor.u32 %v13640_v62, %v10564_v63  ;;  %6810 = vmatpush.bf16.msra.mxu2 %v10311_v3 }
 0x26e   :  { %v10820_v1 = vld [vmem:[#allocation8 + $0xf60] sm:$0xf0] }
 0x26f   :  { %v13504_v4 = vld [vmem:[#allocation8 + $0x904] sm:$0xf]  ;;  %v10823_v7 = vor.u32 %v13704_v0, %v10820_v1  ;;  %6823 = vmatpush.bf16.msra.mxu0 %v10567_v6 }
 0x270   :  { %v10020_v5 = vld [vmem:[#allocation8 + $0x920] sm:$0xf0] }
 0x271   :  { %v13568_v8 = vld [vmem:[#allocation8 + $0xb04] sm:$0xf]  ;;  %v10023_v14 = vor.u32 %v13504_v4, %v10020_v5  ;;  %6836 = vmatpush.bf16.msra.mxu1 %v10823_v7 }
 0x272   :  { %v10276_v9 = vld [vmem:[#allocation8 + $0xb20] sm:$0xf0] }
 0x273   :  { %v13632_v10 = vld [vmem:[#allocation8 + $0xd04] sm:$0xf]  ;;  %v10279_v15 = vor.u32 %v13568_v8, %v10276_v9  ;;  %6798 = vmatpush.bf16.msrb.mxu3 %v10023_v14 }
 0x274   :  { %v10532_v11 = vld [vmem:[#allocation8 + $0xd20] sm:$0xf0] }
 0x275   :  { %v13696_v12 = vld [vmem:[#allocation8 + $0xf04] sm:$0xf]  ;;  %v10535_v18 = vor.u32 %v13632_v10, %v10532_v11  ;;  %6811 = vmatpush.bf16.msra.mxu2 %v10279_v15 }
 0x276   :  { %v10788_v13 = vld [vmem:[#allocation8 + $0xf20] sm:$0xf0] }
 0x277   :  { %v13496_v16 = vld [vmem:[#allocation8 + $0x8c4] sm:$0xf]  ;;  %v10791_v19 = vor.u32 %v13696_v12, %v10788_v13  ;;  %6824 = vmatpush.bf16.msra.mxu0 %v10535_v18 }
 0x278   :  { %v9988_v17 = vld [vmem:[#allocation8 + $0x8e0] sm:$0xf0] }
 0x279   :  { %v13560_v20 = vld [vmem:[#allocation8 + $0xac4] sm:$0xf]  ;;  %v9991_v26 = vor.u32 %v13496_v16, %v9988_v17  ;;  %6837 = vmatpush.bf16.msra.mxu1 %v10791_v19 }
 0x27a   :  { %v10244_v21 = vld [vmem:[#allocation8 + $0xae0] sm:$0xf0] }
 0x27b   :  { %v13624_v22 = vld [vmem:[#allocation8 + $0xcc4] sm:$0xf]  ;;  %v10247_v27 = vor.u32 %v13560_v20, %v10244_v21  ;;  %6799 = vmatpush.bf16.msrb.mxu3 %v9991_v26 }
 0x27c   :  { %v10500_v23 = vld [vmem:[#allocation8 + $0xce0] sm:$0xf0] }
 0x27d   :  { %v13688_v24 = vld [vmem:[#allocation8 + $0xec4] sm:$0xf]  ;;  %v10503_v30 = vor.u32 %v13624_v22, %v10500_v23  ;;  %6812 = vmatpush.bf16.msra.mxu2 %v10247_v27 }
 0x27e   :  { %v10756_v25 = vld [vmem:[#allocation8 + $0xee0] sm:$0xf0] }
 0x27f   :  { %v13488_v28 = vld [vmem:[#allocation8 + $0x884] sm:$0xf]  ;;  %v10759_v31 = vor.u32 %v13688_v24, %v10756_v25  ;;  %6825 = vmatpush.bf16.msra.mxu0 %v10503_v30 }
 0x280   :  { %v9956_v29 = vld [vmem:[#allocation8 + $0x8a0] sm:$0xf0] }
 0x281   :  { %v13552_v32 = vld [vmem:[#allocation8 + $0xa84] sm:$0xf]  ;;  %v9959_v45 = vor.u32 %v13488_v28, %v9956_v29  ;;  %6838 = vmatpush.bf16.msra.mxu1 %v10759_v31 }
 0x282   :  { %v10212_v33 = vld [vmem:[#allocation8 + $0xaa0] sm:$0xf0] }
 0x283   :  { %v13616_v34 = vld [vmem:[#allocation8 + $0xc84] sm:$0xf]  ;;  %v10215_v46 = vor.u32 %v13552_v32, %v10212_v33  ;;  %6800 = vmatpush.bf16.msrb.mxu3 %v9959_v45 }
 0x284   :  { %v10468_v35 = vld [vmem:[#allocation8 + $0xca0] sm:$0xf0] }
 0x285   :  { %v13680_v38 = vld [vmem:[#allocation8 + $0xe84] sm:$0xf]  ;;  %v10471_v56 = vor.u32 %v13616_v34, %v10468_v35  ;;  %6813 = vmatpush.bf16.msra.mxu2 %v10215_v46 }
 0x286   :  { %v10724_v39 = vld [vmem:[#allocation8 + $0xea0] sm:$0xf0] }
 0x287   :  { %v13480_v50 = vld [vmem:[#allocation8 + $0x844] sm:$0xf]  ;;  %v10727_v59 = vor.u32 %v13680_v38, %v10724_v39  ;;  %6826 = vmatpush.bf16.msra.mxu0 %v10471_v56 }
 0x288   :  { %v9924_v53 = vld [vmem:[#allocation8 + $0x860] sm:$0xf0] }
 0x289   :  { %v13544_v60 = vld [vmem:[#allocation8 + $0xa44] sm:$0xf]  ;;  %v9927_v3 = vor.u32 %v13480_v50, %v9924_v53  ;;  %6839 = vmatpush.bf16.msra.mxu1 %v10727_v59 }
 0x28a   :  { %v10180_v61 = vld [vmem:[#allocation8 + $0xa60] sm:$0xf0] }
 0x28b   :  { %v13608_v62 = vld [vmem:[#allocation8 + $0xc44] sm:$0xf]  ;;  %v10183_v4 = vor.u32 %v13544_v60, %v10180_v61  ;;  %6801 = vmatpush.bf16.msrb.mxu3 %v9927_v3 }
 0x28c   :  { %v10436_v63 = vld [vmem:[#allocation8 + $0xc60] sm:$0xf0] }
 0x28d   :  { %v13672_v0 = vld [vmem:[#allocation8 + $0xe44] sm:$0xf]  ;;  %v10439_v8 = vor.u32 %v13608_v62, %v10436_v63  ;;  %6814 = vmatpush.bf16.msra.mxu2 %v10183_v4 }
 0x28e   :  { %v10692_v1 = vld [vmem:[#allocation8 + $0xe60] sm:$0xf0] }
 0x28f   :  { %v13472_v2 = vld [vmem:[#allocation8 + $0x804] sm:$0xf]  ;;  %v10695_v9 = vor.u32 %v13672_v0, %v10692_v1  ;;  %6827 = vmatpush.bf16.msra.mxu0 %v10439_v8 }
 0x290   :  { %v9892_v5 = vld [vmem:[#allocation8 + $0x820] sm:$0xf0] }
 0x291   :  { %v13536_v6 = vld [vmem:[#allocation8 + $0xa04] sm:$0xf]  ;;  %v9895_v19 = vor.u32 %v13472_v2, %v9892_v5  ;;  %6840 = vmatpush.bf16.msra.mxu1 %v10695_v9  ;;  %v6570_v5 = vpop.f32.mrf.mxu0 }
 0x292   :  { %v10148_v7 = vld [vmem:[#allocation8 + $0xa20] sm:$0xf0] }
 0x293   :  { %v13600_v10 = vld [vmem:[#allocation8 + $0xc04] sm:$0xf]  ;;  %v10151_v20 = vor.u32 %v13536_v6, %v10148_v7  ;;  %6802 = vmatpush.bf16.msrb.mxu3 %v9895_v19  ;;  %v6583_v6 = vpop.f32.mrf.mxu1 }
 0x294   :  { %v10404_v11 = vld [vmem:[#allocation8 + $0xc20] sm:$0xf0] }
 0x295   :  { %v13664_v12 = vld [vmem:[#allocation8 + $0xe04] sm:$0xf]  ;;  %v10407_v24 = vor.u32 %v13600_v10, %v10404_v11  ;;  %6815 = vmatpush.bf16.msra.mxu2 %v10151_v20 }
 0x296   :  { %v10660_v13 = vld [vmem:[#allocation8 + $0xe20] sm:$0xf0]  ;;  %6803 = vmatmul.bf16.vlgmr.msrb.gmra.mxu3 %v14643_v36 }
 0x297   :  { %v13784_v14 = vld [vmem:[#allocation8 + $0x11c4] sm:$0xf]  ;;  %v10663_v25 = vor.u32 %v13664_v12, %v10660_v13  ;;  %6828 = vmatpush.bf16.msra.mxu0 %v10407_v24  ;;  %v6544_v24 = vpop.f32.mrf.mxu3 }
 0x298   :  { %v11140_v15 = vld [vmem:[#allocation8 + $0x11e0] sm:$0xf0]  ;;  %6816 = vmatmul.bf16.vlgmr.msra.gmra.mxu2 %v14647_v37 }
 0x299   :  { %v13848_v16 = vld [vmem:[#allocation8 + $0x13c4] sm:$0xf]  ;;  %v11143_v26 = vor.u32 %v13784_v14, %v11140_v15  ;;  %6841 = vmatpush.bf16.msra.mxu1 %v10663_v25  ;;  %v6557_v25 = vpop.f32.mrf.mxu2 }
 0x29a   :  { %v11396_v17 = vld [vmem:[#allocation8 + $0x13e0] sm:$0xf0]  ;;  %6829 = vmatmul.bf16.vlgmr.msra.gmra.mxu0 %v14651_v41 }
 0x29b   :  { %v13912_v18 = vld [vmem:[#allocation8 + $0x15c4] sm:$0xf]  ;;  %v11399_v27 = vor.u32 %v13848_v16, %v11396_v17  ;;  %6847 = vmatpush.bf16.msra.mxu3 %v11143_v26 }
 0x29c   :  { %v11652_v21 = vld [vmem:[#allocation8 + $0x15e0] sm:$0xf0]  ;;  %6842 = vmatmul.bf16.vlgmr.msra.gmra.mxu1 %v14655_v42 }
 0x29d   :  { %v13976_v22 = vld [vmem:[#allocation8 + $0x17c4] sm:$0xf]  ;;  %v11655_v30 = vor.u32 %v13912_v18, %v11652_v21  ;;  %6860 = vmatpush.bf16.msrb.mxu2 %v11399_v27 }
 0x29e   :  { %v11908_v23 = vld [vmem:[#allocation8 + $0x17e0] sm:$0xf0] }
 0x29f   :  { %v13776_v28 = vld [vmem:[#allocation8 + $0x1184] sm:$0xf]  ;;  %v11911_v31 = vor.u32 %v13976_v22, %v11908_v23  ;;  %6873 = vmatpush.bf16.msrb.mxu0 %v11655_v30 }
 0x2a0   :  { %v11108_v29 = vld [vmem:[#allocation8 + $0x11a0] sm:$0xf0] }
 0x2a1   :  { %v13840_v32 = vld [vmem:[#allocation8 + $0x1384] sm:$0xf]  ;;  %v11111_v45 = vor.u32 %v13776_v28, %v11108_v29  ;;  %6886 = vmatpush.bf16.msrb.mxu1 %v11911_v31 }
 0x2a2   :  { %v11364_v33 = vld [vmem:[#allocation8 + $0x13a0] sm:$0xf0] }
 0x2a3   :  { %v13904_v34 = vld [vmem:[#allocation8 + $0x1584] sm:$0xf]  ;;  %v11367_v46 = vor.u32 %v13840_v32, %v11364_v33  ;;  %6848 = vmatpush.bf16.msra.mxu3 %v11111_v45 }
 0x2a4   :  { %v11620_v35 = vld [vmem:[#allocation8 + $0x15a0] sm:$0xf0] }
 0x2a5   :  { %v13968_v38 = vld [vmem:[#allocation8 + $0x1784] sm:$0xf]  ;;  %v11623_v56 = vor.u32 %v13904_v34, %v11620_v35  ;;  %6861 = vmatpush.bf16.msrb.mxu2 %v11367_v46 }
 0x2a6   :  { %v11876_v39 = vld [vmem:[#allocation8 + $0x17a0] sm:$0xf0] }
 0x2a7   :  { %v13768_v50 = vld [vmem:[#allocation8 + $0x1144] sm:$0xf]  ;;  %v11879_v59 = vor.u32 %v13968_v38, %v11876_v39  ;;  %6874 = vmatpush.bf16.msrb.mxu0 %v11623_v56  ;;  %v6572_v38 = vpop.f32.mrf.mxu0  ;;  %v6585_v39 = vpop.f32.mrf.mxu1 }
 0x2a8   :  { %v11076_v53 = vld [vmem:[#allocation8 + $0x1160] sm:$0xf0] }
 0x2a9   :  { %v13832_v60 = vld [vmem:[#allocation8 + $0x1344] sm:$0xf]  ;;  %v11079_v3 = vor.u32 %v13768_v50, %v11076_v53  ;;  %6887 = vmatpush.bf16.msrb.mxu1 %v11879_v59 }
 0x2aa   :  { %v11332_v61 = vld [vmem:[#allocation8 + $0x1360] sm:$0xf0] }
 0x2ab   :  { %v13896_v62 = vld [vmem:[#allocation8 + $0x1544] sm:$0xf]  ;;  %v11335_v4 = vor.u32 %v13832_v60, %v11332_v61  ;;  %6849 = vmatpush.bf16.msra.mxu3 %v11079_v3 }
 0x2ac   :  { %v11588_v63 = vld [vmem:[#allocation8 + $0x1560] sm:$0xf0] }
 0x2ad   :  { %v13960_v0 = vld [vmem:[#allocation8 + $0x1744] sm:$0xf]  ;;  %v11591_v10 = vor.u32 %v13896_v62, %v11588_v63  ;;  %6862 = vmatpush.bf16.msrb.mxu2 %v11335_v4 }
 0x2ae   :  { %v11844_v1 = vld [vmem:[#allocation8 + $0x1760] sm:$0xf0] }
 0x2af   :  { %v14693_v2 = vld [vmem:[#allocation10] sm:$0xff]  ;;  %v11847_v11 = vor.u32 %v13960_v0, %v11844_v1  ;;  %6875 = vmatpush.bf16.msrb.mxu0 %v11591_v10 }
 0x2b0   :  { %v13760_v7 = vld [vmem:[#allocation8 + $0x1104] sm:$0xf]  ;;  %v1399_v17 = vperm.slane %v14693_v2, 0 }
 0x2b1   :  { %v11044_v8 = vld [vmem:[#allocation8 + $0x1120] sm:$0xf0]  ;;  %6888 = vmatpush.bf16.msrb.mxu1 %v11847_v11  ;;  %v6546_v11 = vpop.f32.mrf.mxu3 }
 0x2b2   :  { %v13824_v9 = vld [vmem:[#allocation8 + $0x1304] sm:$0xf]  ;;  %v11047_v18 = vor.u32 %v13760_v7, %v11044_v8  ;;  %v6545_v29 = vadd.f32 %v6544_v24, %v1399_v17 }
 0x2b3   :  { %v11300_v12 = vld [vmem:[#allocation8 + $0x1320] sm:$0xf0] }
 0x2b4   :  { %v13888_v13 = vld [vmem:[#allocation8 + $0x1504] sm:$0xf]  ;;  %v11303_v19 = vor.u32 %v13824_v9, %v11300_v12  ;;  %6850 = vmatpush.bf16.msra.mxu3 %v11047_v18  ;;  %v6558_v33 = vadd.f32 %v6557_v25, %v6545_v29  ;;  %v6559_v12 = vpop.f32.mrf.mxu2 }
 0x2b5   :  { %v11556_v14 = vld [vmem:[#allocation8 + $0x1520] sm:$0xf0] }
 0x2b6   :  { %v13952_v15 = vld [vmem:[#allocation8 + $0x1704] sm:$0xf]  ;;  %v11559_v22 = vor.u32 %v13888_v13, %v11556_v14  ;;  %6863 = vmatpush.bf16.msrb.mxu2 %v11303_v19  ;;  %v6571_v61 = vadd.f32 %v6570_v5, %v6558_v33 }
 0x2b7   :  { %v11812_v16 = vld [vmem:[#allocation8 + $0x1720] sm:$0xf0] }
 0x2b8   :  { %v13752_v20 = vld [vmem:[#allocation8 + $0x10c4] sm:$0xf]  ;;  %v11815_v23 = vor.u32 %v13952_v15, %v11812_v16  ;;  %6876 = vmatpush.bf16.msrb.mxu0 %v11559_v22  ;;  %v6584_v8 = vadd.f32 %v6583_v6, %v6571_v61  ;;  %v14696_v22 = vpop.f32.mrf.mxu1 }
 0x2b9   :  { %v11012_v21 = vld [vmem:[#allocation8 + $0x10e0] sm:$0xf0] }
 0x2ba   :  { %v13816_v26 = vld [vmem:[#allocation8 + $0x12c4] sm:$0xf]  ;;  %v11015_v34 = vor.u32 %v13752_v20, %v11012_v21  ;;  %6889 = vmatpush.bf16.msrb.mxu1 %v11815_v23  ;;  %v6622_v21 = vpop.f32.mrf.mxu0 }
 0x2bb   :  { %v11268_v27 = vld [vmem:[#allocation8 + $0x12e0] sm:$0xf0] }
 0x2bc   :  { %v13880_v28 = vld [vmem:[#allocation8 + $0x14c4] sm:$0xf]  ;;  %v11271_v35 = vor.u32 %v13816_v26, %v11268_v27  ;;  %6851 = vmatpush.bf16.msra.mxu3 %v11015_v34 }
 0x2bd   :  { %v11524_v30 = vld [vmem:[#allocation8 + $0x14e0] sm:$0xf0] }
 0x2be   :  { %v13944_v31 = vld [vmem:[#allocation8 + $0x16c4] sm:$0xf]  ;;  %v11527_v50 = vor.u32 %v13880_v28, %v11524_v30  ;;  %6864 = vmatpush.bf16.msrb.mxu2 %v11271_v35 }
 0x2bf   :  { %v11780_v32 = vld [vmem:[#allocation8 + $0x16e0] sm:$0xf0] }
 0x2c0   :  { %v13744_v45 = vld [vmem:[#allocation8 + $0x1084] sm:$0xf]  ;;  %v11783_v53 = vor.u32 %v13944_v31, %v11780_v32  ;;  %6877 = vmatpush.bf16.msrb.mxu0 %v11527_v50 }
 0x2c1   :  { %v10980_v46 = vld [vmem:[#allocation8 + $0x10a0] sm:$0xf0] }
 0x2c2   :  { %v13808_v56 = vld [vmem:[#allocation8 + $0x1284] sm:$0xf]  ;;  %v10983_v1 = vor.u32 %v13744_v45, %v10980_v46  ;;  %6890 = vmatpush.bf16.msrb.mxu1 %v11783_v53  ;;  %v6624_v12 = vpop.f32.mrf.mxu0 }
 0x2c3   :  { %v11236_v59 = vld [vmem:[#allocation8 + $0x12a0] sm:$0xf0] }
 0x2c4   :  { %v13872_v60 = vld [vmem:[#allocation8 + $0x1484] sm:$0xf]  ;;  %v11239_v3 = vor.u32 %v13808_v56, %v11236_v59  ;;  %6852 = vmatpush.bf16.msra.mxu3 %v10983_v1  ;;  %v6596_v59 = vpop.f32.mrf.mxu3 }
 0x2c5   :  { %v11492_v62 = vld [vmem:[#allocation8 + $0x14a0] sm:$0xf0] }
 0x2c6   :  { %v13936_v63 = vld [vmem:[#allocation8 + $0x1684] sm:$0xf]  ;;  %v11495_v9 = vor.u32 %v13872_v60, %v11492_v62  ;;  %6865 = vmatpush.bf16.msrb.mxu2 %v11239_v3  ;;  %v6609_v60 = vpop.f32.mrf.mxu2 }
 0x2c7   :  { %v11748_v0 = vld [vmem:[#allocation8 + $0x16a0] sm:$0xf0] }
 0x2c8   :  { %v13736_v4 = vld [vmem:[#allocation8 + $0x1044] sm:$0xf]  ;;  %v11751_v10 = vor.u32 %v13936_v63, %v11748_v0  ;;  %6878 = vmatpush.bf16.msrb.mxu0 %v11495_v9  ;;  %v6597_v63 = vadd.f32 %v6596_v59, %v6584_v8 }
 0x2c9   :  { %v10948_v7 = vld [vmem:[#allocation8 + $0x1060] sm:$0xf0] }
 0x2ca   :  { %v13800_v13 = vld [vmem:[#allocation8 + $0x1244] sm:$0xf]  ;;  %v10951_v19 = vor.u32 %v13736_v4, %v10948_v7  ;;  %6891 = vmatpush.bf16.msrb.mxu1 %v11751_v10  ;;  %v6610_v11 = vadd.f32 %v6609_v60, %v6597_v63 }
 0x2cb   :  { %v11204_v14 = vld [vmem:[#allocation8 + $0x1260] sm:$0xf0] }
 0x2cc   :  { %v13864_v15 = vld [vmem:[#allocation8 + $0x1444] sm:$0xf]  ;;  %v11207_v20 = vor.u32 %v13800_v13, %v11204_v14  ;;  %6853 = vmatpush.bf16.msra.mxu3 %v10951_v19  ;;  %v6637_v13 = vpop.f32.mrf.mxu1  ;;  %v6623_v8 = vadd.f32 %v6622_v21, %v6610_v11 }
 0x2cd   :  { %v11460_v5 = vld [vmem:[#allocation8 + $0x1460] sm:$0xf0] }
 0x2ce   :  { %v13928_v16 = vld [vmem:[#allocation8 + $0x1644] sm:$0xf]  ;;  %v11463_v25 = vor.u32 %v13864_v15, %v11460_v5  ;;  %6866 = vmatpush.bf16.msrb.mxu2 %v11207_v20  ;;  %v6636_v21 = vadd.f32 %v14696_v22, %v6623_v8 }
 0x2cf   :  { %v11716_v17 = vld [vmem:[#allocation8 + $0x1660] sm:$0xf0] }
 0x2d0   :  { %v13728_v18 = vld [vmem:[#allocation8 + $0x1004] sm:$0xf]  ;;  %v11719_v26 = vor.u32 %v13928_v16, %v11716_v17  ;;  %6879 = vmatpush.bf16.msrb.mxu0 %v11463_v25 }
 0x2d1   :  { %v10916_v6 = vld [vmem:[#allocation8 + $0x1020] sm:$0xf0] }
 0x2d2   :  { %v13792_v23 = vld [vmem:[#allocation8 + $0x1204] sm:$0xf]  ;;  %v10919_v38 = vor.u32 %v13728_v18, %v10916_v6  ;;  %6892 = vmatpush.bf16.msrb.mxu1 %v11719_v26 }
 0x2d3   :  { %v11172_v24 = vld [vmem:[#allocation8 + $0x1220] sm:$0xf0] }
 0x2d4   :  { %v13856_v27 = vld [vmem:[#allocation8 + $0x1404] sm:$0xf]  ;;  %v11175_v39 = vor.u32 %v13792_v23, %v11172_v24  ;;  %6854 = vmatpush.bf16.msra.mxu3 %v10919_v38  ;;  %v6687_v59 = vpop.f32.mrf.mxu1 }
 0x2d5   :  { %v11428_v28 = vld [vmem:[#allocation8 + $0x1420] sm:$0xf0] }
 0x2d6   :  { %v13920_v29 = vld [vmem:[#allocation8 + $0x1604] sm:$0xf]  ;;  %v11431_v53 = vor.u32 %v13856_v27, %v11428_v28  ;;  %6867 = vmatpush.bf16.msrb.mxu2 %v11175_v39 }
 0x2d7   :  { %v11684_v30 = vld [vmem:[#allocation8 + $0x1620] sm:$0xf0]  ;;  %6855 = vmatmul.bf16.vlgmr.msra.gmra.mxu3 %v14661_v51 }
 0x2d8   :  { %v14040_v31 = vld [vmem:[#allocation8 + $0x19c4] sm:$0xf]  ;;  %v11687_v56 = vor.u32 %v13920_v29, %v11684_v30  ;;  %6880 = vmatpush.bf16.msrb.mxu0 %v11431_v53  ;;  %v6598_v29 = vpop.f32.mrf.mxu3  ;;  %v6611_v30 = vpop.f32.mrf.mxu2 }
 0x2d9   :  { %v12164_v32 = vld [vmem:[#allocation8 + $0x19e0] sm:$0xf0]  ;;  %6868 = vmatmul.bf16.vlgmr.msrb.gmra.mxu2 %v14663_v52 }
 0x2da   :  { %v14104_v33 = vld [vmem:[#allocation8 + $0x1bc4] sm:$0xf]  ;;  %v12167_v61 = vor.u32 %v14040_v31, %v12164_v32  ;;  %6893 = vmatpush.bf16.msrb.mxu1 %v11687_v56  ;;  %v6674_v56 = vpop.f32.mrf.mxu0 }
 0x2db   :  { %v12420_v34 = vld [vmem:[#allocation8 + $0x1be0] sm:$0xf0]  ;;  %6881 = vmatmul.bf16.vlgmr.msrb.gmra.mxu0 %v14665_v57 }
 0x2dc   :  { %v14168_v35 = vld [vmem:[#allocation8 + $0x1dc4] sm:$0xf]  ;;  %v12423_v62 = vor.u32 %v14104_v33, %v12420_v34  ;;  %6899 = vmatpush.bf16.msrb.mxu3 %v12167_v61 }
 0x2dd   :  { %v12676_v45 = vld [vmem:[#allocation8 + $0x1de0] sm:$0xf0]  ;;  %6894 = vmatmul.bf16.vlgmr.msrb.gmra.mxu1 %v14667_v58 }
 0x2de   :  { %v14232_v46 = vld [vmem:[#allocation8 + $0x1fc4] sm:$0xf]  ;;  %v12679_v3 = vor.u32 %v14168_v35, %v12676_v45  ;;  %6912 = vmatpush.bf16.msra.mxu2 %v12423_v62 }
 0x2df   :  { %v12932_v50 = vld [vmem:[#allocation8 + $0x1fe0] sm:$0xf0] }
 0x2e0   :  { %v14032_v0 = vld [vmem:[#allocation8 + $0x1984] sm:$0xf]  ;;  %v12935_v4 = vor.u32 %v14232_v46, %v12932_v50  ;;  %6925 = vmatpush.bf16.msra.mxu0 %v12679_v3 }
 0x2e1   :  { %v12132_v1 = vld [vmem:[#allocation8 + $0x19a0] sm:$0xf0] }
 0x2e2   :  { %v14096_v7 = vld [vmem:[#allocation8 + $0x1b84] sm:$0xf]  ;;  %v12135_v16 = vor.u32 %v14032_v0, %v12132_v1  ;;  %6938 = vmatpush.bf16.msra.mxu1 %v12935_v4 }
 0x2e3   :  { %v12388_v9 = vld [vmem:[#allocation8 + $0x1ba0] sm:$0xf0] }
 0x2e4   :  { %v14160_v10 = vld [vmem:[#allocation8 + $0x1d84] sm:$0xf]  ;;  %v12391_v17 = vor.u32 %v14096_v7, %v12388_v9  ;;  %6900 = vmatpush.bf16.msrb.mxu3 %v12135_v16  ;;  %v6648_v16 = vpop.f32.mrf.mxu3 }
 0x2e5   :  { %v12644_v14 = vld [vmem:[#allocation8 + $0x1da0] sm:$0xf0] }
 0x2e6   :  { %v14224_v15 = vld [vmem:[#allocation8 + $0x1f84] sm:$0xf]  ;;  %v12647_v20 = vor.u32 %v14160_v10, %v12644_v14  ;;  %6913 = vmatpush.bf16.msra.mxu2 %v12391_v17  ;;  %v6661_v17 = vpop.f32.mrf.mxu2 }
 0x2e7   :  { %v12900_v5 = vld [vmem:[#allocation8 + $0x1fa0] sm:$0xf0] }
 0x2e8   :  { %v14024_v18 = vld [vmem:[#allocation8 + $0x1944] sm:$0xf]  ;;  %v12903_v6 = vor.u32 %v14224_v15, %v12900_v5  ;;  %6926 = vmatpush.bf16.msra.mxu0 %v12647_v20 }
 0x2e9   :  { %v12100_v19 = vld [vmem:[#allocation8 + $0x1960] sm:$0xf0] }
 0x2ea   :  { %v14088_v23 = vld [vmem:[#allocation8 + $0x1b44] sm:$0xf]  ;;  %v12103_v31 = vor.u32 %v14024_v18, %v12100_v19  ;;  %6939 = vmatpush.bf16.msra.mxu1 %v12903_v6  ;;  %v6649_v6 = vadd.f32 %v6648_v16, %v6636_v21  ;;  %v13405_v16 = vld [vmem:[#allocation8 + $0x5e4] sm:$0xf0] }
 0x2eb   :  { %v12356_v24 = vld [vmem:[#allocation8 + $0x1b60] sm:$0xf0] }
 0x2ec   :  { %v14152_v25 = vld [vmem:[#allocation8 + $0x1d44] sm:$0xf]  ;;  %v12359_v32 = vor.u32 %v14088_v23, %v12356_v24  ;;  %6901 = vmatpush.bf16.msrb.mxu3 %v12103_v31 }
 0x2ed   :  { %v12612_v26 = vld [vmem:[#allocation8 + $0x1d60] sm:$0xf0] }
 0x2ee   :  { %v14216_v27 = vld [vmem:[#allocation8 + $0x1f44] sm:$0xf]  ;;  %v12615_v35 = vor.u32 %v14152_v25, %v12612_v26  ;;  %6914 = vmatpush.bf16.msra.mxu2 %v12359_v32  ;;  %v6662_v26 = vadd.f32 %v6661_v17, %v6649_v6  ;;  %v9866_v17 = vld [vmem:[#allocation8 + $0x7c8] sm:$0xf] }
 0x2ef   :  { %v12868_v28 = vld [vmem:[#allocation8 + $0x1f60] sm:$0xf0] }
 0x2f0   :  { %v14016_v33 = vld [vmem:[#allocation8 + $0x1904] sm:$0xf]  ;;  %v12871_v38 = vor.u32 %v14216_v27, %v12868_v28  ;;  %6927 = vmatpush.bf16.msra.mxu0 %v12615_v35  ;;  %v6676_v27 = vpop.f32.mrf.mxu0  ;;  %v6689_v28 = vpop.f32.mrf.mxu1  ;;  %v6675_v21 = vadd.f32 %v6674_v56, %v6662_v26 }
 0x2f1   :  { %v12068_v34 = vld [vmem:[#allocation8 + $0x1920] sm:$0xf0]  ;;  %v9322_v28 = vld [vmem:[#allocation8 + $0x388] sm:$0xf] }
 0x2f2   :  { %v14080_v39 = vld [vmem:[#allocation8 + $0x1b04] sm:$0xf]  ;;  %v12071_v60 = vor.u32 %v14016_v33, %v12068_v34  ;;  %6940 = vmatpush.bf16.msra.mxu1 %v12871_v38 }
 0x2f3   :  { %v12324_v45 = vld [vmem:[#allocation8 + $0x1b20] sm:$0xf0] }
 0x2f4   :  { %v14144_v46 = vld [vmem:[#allocation8 + $0x1d04] sm:$0xf]  ;;  %v12327_v61 = vor.u32 %v14080_v39, %v12324_v45  ;;  %6902 = vmatpush.bf16.msrb.mxu3 %v12071_v60 }
 0x2f5   :  { %v12580_v22 = vld [vmem:[#allocation8 + $0x1d20] sm:$0xf0] }
 0x2f6   :  { %v14208_v50 = vld [vmem:[#allocation8 + $0x1f04] sm:$0xf]  ;;  %v12583_v0 = vor.u32 %v14144_v46, %v12580_v22  ;;  %6915 = vmatpush.bf16.msra.mxu2 %v12327_v61 }
 0x2f7   :  { %v12836_v53 = vld [vmem:[#allocation8 + $0x1f20] sm:$0xf0] }
 0x2f8   :  { %v14008_v62 = vld [vmem:[#allocation8 + $0x18c4] sm:$0xf]  ;;  %v12839_v1 = vor.u32 %v14208_v50, %v12836_v53  ;;  %6928 = vmatpush.bf16.msra.mxu0 %v12583_v0  ;;  %v14703_v0 = vadd.f32 %v6687_v59, %v6675_v21 }
 0x2f9   :  { %v12036_v63 = vld [vmem:[#allocation8 + $0x18e0] sm:$0xf0] }
 0x2fa   :  { %v14072_v3 = vld [vmem:[#allocation8 + $0x1ac4] sm:$0xf]  ;;  %v12039_v12 = vor.u32 %v14008_v62, %v12036_v63  ;;  %6941 = vmatpush.bf16.msra.mxu1 %v12839_v1 }
 0x2fb   :  { %v12292_v4 = vld [vmem:[#allocation8 + $0x1ae0] sm:$0xf0] }
 0x2fc   :  { %v14136_v7 = vld [vmem:[#allocation8 + $0x1cc4] sm:$0xf]  ;;  %v12295_v13 = vor.u32 %v14072_v3, %v12292_v4  ;;  %6903 = vmatpush.bf16.msrb.mxu3 %v12039_v12  ;;  %v6650_v4 = vpop.f32.mrf.mxu3  ;;  %v9098_v12 = vld [vmem:[#allocation8 + $0x1c8] sm:$0xf] }
 0x2fd   :  { %v12548_v9 = vld [vmem:[#allocation8 + $0x1ce0] sm:$0xf0] }
 0x2fe   :  { %v14200_v10 = vld [vmem:[#allocation8 + $0x1ec4] sm:$0xf]  ;;  %v12551_v5 = vor.u32 %v14136_v7, %v12548_v9  ;;  %6916 = vmatpush.bf16.msra.mxu2 %v12295_v13  ;;  %v6663_v7 = vpop.f32.mrf.mxu2  ;;  %v13277_v13 = vld [vmem:[#allocation8 + $0x1e4] sm:$0xf0] }
 0x2ff   :  { %v12804_v11 = vld [vmem:[#allocation8 + $0x1ee0] sm:$0xf0]  ;;  %v9099_v6 = vor.u32 %v13277_v13, %v9098_v12  ;;  %v9770_v12 = vld [vmem:[#allocation8 + $0x708] sm:$0xf] }
 0x300   :  { %v14000_v14 = vld [vmem:[#allocation8 + $0x1884] sm:$0xf]  ;;  %v12807_v8 = vor.u32 %v14200_v10, %v12804_v11  ;;  %6929 = vmatpush.bf16.msra.mxu0 %v12551_v5  ;;  %v9610_v5 = vld [vmem:[#allocation8 + $0x5c8] sm:$0xf] }
 0x301   :  { %v12004_v15 = vld [vmem:[#allocation8 + $0x18a0] sm:$0xf0]  ;;  %v9611_v26 = vor.u32 %v13405_v16, %v9610_v5  ;;  %v13445_v13 = vld [vmem:[#allocation8 + $0x724] sm:$0xf0] }
 0x302   :  { %v14064_v18 = vld [vmem:[#allocation8 + $0x1a84] sm:$0xf]  ;;  %v12007_v29 = vor.u32 %v14000_v14, %v12004_v15  ;;  %6942 = vmatpush.bf16.msra.mxu1 %v12807_v8  ;;  %v9354_v14 = vld [vmem:[#allocation8 + $0x3c8] sm:$0xf] }
 0x303   :  { %v12260_v19 = vld [vmem:[#allocation8 + $0x1aa0] sm:$0xf0]  ;;  %v13341_v15 = vld [vmem:[#allocation8 + $0x3e4] sm:$0xf0] }
 0x304   :  { %v14128_v20 = vld [vmem:[#allocation8 + $0x1c84] sm:$0xf]  ;;  %v12263_v30 = vor.u32 %v14064_v18, %v12260_v19  ;;  %6904 = vmatpush.bf16.msrb.mxu3 %v12007_v29  ;;  %v13469_v18 = vld [vmem:[#allocation8 + $0x7e4] sm:$0xf0] }
 0x305   :  { %v12516_v23 = vld [vmem:[#allocation8 + $0x1ca0] sm:$0xf0]  ;;  %v9867_v27 = vor.u32 %v13469_v18, %v9866_v17  ;;  %v13333_v29 = vld [vmem:[#allocation8 + $0x3a4] sm:$0xf0]  ;;  %v9771_v18 = vor.u32 %v13445_v13, %v9770_v12 }
 0x306   :  { %v14192_v24 = vld [vmem:[#allocation8 + $0x1e84] sm:$0xf]  ;;  %v12519_v33 = vor.u32 %v14128_v20, %v12516_v23  ;;  %6917 = vmatpush.bf16.msra.mxu2 %v12263_v30  ;;  %v9355_v23 = vor.u32 %v13341_v15, %v9354_v14  ;;  %v9578_v30 = vld [vmem:[#allocation8 + $0x588] sm:$0xf]  ;;  %v6726_v14 = vpop.f32.mrf.mxu0  ;;  %v6739_v15 = vpop.f32.mrf.mxu1 }
 0x307   :  { %v12772_v25 = vld [vmem:[#allocation8 + $0x1ea0] sm:$0xf0]  ;;  %v13245_v16 = vld [vmem:[#allocation8 + $0xe4] sm:$0xf0] }
 0x308   :  { %v13992_v31 = vld [vmem:[#allocation8 + $0x1844] sm:$0xf]  ;;  %v12775_v34 = vor.u32 %v14192_v24, %v12772_v25  ;;  %6930 = vmatpush.bf16.msra.mxu0 %v12519_v33  ;;  %v9066_v24 = vld [vmem:[#allocation8 + $0x188] sm:$0xf] }
 0x309   :  { %v11972_v32 = vld [vmem:[#allocation8 + $0x1860] sm:$0xf0]  ;;  %v13269_v25 = vld [vmem:[#allocation8 + $0x1a4] sm:$0xf0] }
 0x30a   :  { %v14056_v35 = vld [vmem:[#allocation8 + $0x1a44] sm:$0xf]  ;;  %v11975_v53 = vor.u32 %v13992_v31, %v11972_v32  ;;  %6943 = vmatpush.bf16.msra.mxu1 %v12775_v34  ;;  %v13397_v31 = vld [vmem:[#allocation8 + $0x5a4] sm:$0xf0]  ;;  %v9067_v34 = vor.u32 %v13269_v25, %v9066_v24 }
 0x30b   :  { %v12228_v38 = vld [vmem:[#allocation8 + $0x1a60] sm:$0xf0]  ;;  %v9834_v32 = vld [vmem:[#allocation8 + $0x788] sm:$0xf]  ;;  %v9579_v21 = vor.u32 %v13397_v31, %v9578_v30 }
 0x30c   :  { %v14120_v39 = vld [vmem:[#allocation8 + $0x1c44] sm:$0xf]  ;;  %v12231_v60 = vor.u32 %v14056_v35, %v12228_v38  ;;  %6905 = vmatpush.bf16.msrb.mxu3 %v11975_v53  ;;  %v13461_v33 = vld [vmem:[#allocation8 + $0x7a4] sm:$0xf0]  ;;  %v9323_v35 = vor.u32 %v13333_v29, %v9322_v28 }
 0x30d   :  { %v12484_v45 = vld [vmem:[#allocation8 + $0x1c60] sm:$0xf0]  ;;  %v9034_v38 = vld [vmem:[#allocation8 + $0x148] sm:$0xf] }
 0x30e   :  { %v14184_v46 = vld [vmem:[#allocation8 + $0x1e44] sm:$0xf]  ;;  %v12487_v1 = vor.u32 %v14120_v39, %v12484_v45  ;;  %6918 = vmatpush.bf16.msra.mxu2 %v12231_v60  ;;  %v13261_v39 = vld [vmem:[#allocation8 + $0x164] sm:$0xf0]  ;;  %v9835_v45 = vor.u32 %v13461_v33, %v9834_v32  ;;  %v6700_v32 = vpop.f32.mrf.mxu3  ;;  %v6713_v33 = vpop.f32.mrf.mxu2 }
 0x30f   :  { %v12740_v22 = vld [vmem:[#allocation8 + $0x1e60] sm:$0xf0]  ;;  %v13389_v53 = vld [vmem:[#allocation8 + $0x564] sm:$0xf0] }
 0x310   :  { %v13984_v50 = vld [vmem:[#allocation8 + $0x1804] sm:$0xf]  ;;  %v12743_v3 = vor.u32 %v14184_v46, %v12740_v22  ;;  %6931 = vmatpush.bf16.msra.mxu0 %v12487_v1  ;;  %v9290_v46 = vld [vmem:[#allocation8 + $0x348] sm:$0xf] }
 0x311   :  { %v11940_v61 = vld [vmem:[#allocation8 + $0x1820] sm:$0xf0]  ;;  %v13325_v22 = vld [vmem:[#allocation8 + $0x364] sm:$0xf0] }
 0x312   :  { %v14048_v62 = vld [vmem:[#allocation8 + $0x1a04] sm:$0xf]  ;;  %v11943_v8 = vor.u32 %v13984_v50, %v11940_v61  ;;  %6944 = vmatpush.bf16.msra.mxu1 %v12743_v3  ;;  %v9546_v50 = vld [vmem:[#allocation8 + $0x548] sm:$0xf] }
 0x313   :  { %v12196_v63 = vld [vmem:[#allocation8 + $0x1a20] sm:$0xf0]  ;;  %v9802_v60 = vld [vmem:[#allocation8 + $0x748] sm:$0xf]  ;;  %v9547_v4 = vor.u32 %v13389_v53, %v9546_v50  ;;  %v6728_v50 = vpop.f32.mrf.mxu0  ;;  %v6741_v53 = vpop.f32.mrf.mxu1 }
 0x314   :  { %v14112_v56 = vld [vmem:[#allocation8 + $0x1c04] sm:$0xf]  ;;  %v12199_v59 = vor.u32 %v14048_v62, %v12196_v63  ;;  %6906 = vmatpush.bf16.msrb.mxu3 %v11943_v8  ;;  %v13453_v61 = vld [vmem:[#allocation8 + $0x764] sm:$0xf0]  ;;  %v9035_v62 = vor.u32 %v13261_v39, %v9034_v38  ;;  %v9291_v63 = vor.u32 %v13325_v22, %v9290_v46  ;;  %v6701_v39 = vadd.f32 %v6700_v32, %v14703_v0 }
 0x315   :  { %v12452_v9 = vld [vmem:[#allocation8 + $0x1c20] sm:$0xf0]  ;;  %v9002_v1 = vld [vmem:[#allocation8 + $0x108] sm:$0xf]  ;;  %v9803_v7 = vor.u32 %v13453_v61, %v9802_v60 }
 0x316   :  { %v14176_v10 = vld [vmem:[#allocation8 + $0x1e04] sm:$0xf]  ;;  %v12455_v19 = vor.u32 %v14112_v56, %v12452_v9  ;;  %6919 = vmatpush.bf16.msra.mxu2 %v12199_v59  ;;  %v13253_v3 = vld [vmem:[#allocation8 + $0x124] sm:$0xf0]  ;;  %v6714_v22 = vadd.f32 %v6713_v33, %v6701_v39 }
 0x317   :  { %v12708_v11 = vld [vmem:[#allocation8 + $0x1e20] sm:$0xf0]  ;;  %6907 = vmatmul.bf16.vlgmr.msrb.gmra.mxu3 %v14673_v40  ;;  %v9258_v56 = vld [vmem:[#allocation8 + $0x308] sm:$0xf]  ;;  %v9003_v5 = vor.u32 %v13253_v3, %v9002_v1 }
 0x318   :  { %v12711_v20 = vor.u32 %v14176_v10, %v12708_v11  ;;  %6932 = vmatpush.bf16.msra.mxu0 %v12455_v19  ;;  %6951 = vmatpush.bf16.msra.mxu3 %v9099_v6  ;;  %v13317_v9 = vld [vmem:[#allocation8 + $0x324] sm:$0xf0]  ;;  %v6727_v0 = vadd.f32 %v6726_v14, %v6714_v22 }
 0x319   :  { %6920 = vmatmul.bf16.vlgmr.msra.gmra.mxu2 %v14675_v43  ;;  %v9514_v10 = vld [vmem:[#allocation8 + $0x508] sm:$0xf]  ;;  %v9259_v8 = vor.u32 %v13317_v9, %v9258_v56 }
 0x31a   :  { %6945 = vmatpush.bf16.msra.mxu1 %v12711_v20  ;;  %6964 = vmatpush.bf16.msrb.mxu2 %v9355_v23  ;;  %v13381_v11 = vld [vmem:[#allocation8 + $0x524] sm:$0xf0]  ;;  %v14710_v13 = vadd.f32 %v6739_v15, %v6727_v0 }
 0x31b   :  { %6933 = vmatmul.bf16.vlgmr.msra.gmra.mxu0 %v14677_v44  ;;  %v8970_v59 = vld [vmem:[#allocation8 + $0xc8] sm:$0xf]  ;;  %v9515_v17 = vor.u32 %v13381_v11, %v9514_v10 }
 0x31c   :  { %6977 = vmatpush.bf16.msrb.mxu0 %v9611_v26  ;;  %6952 = vmatpush.bf16.msra.mxu3 %v9067_v34  ;;  %v9226_v19 = vld [vmem:[#allocation8 + $0x2c8] sm:$0xf]  ;;  %v8971_v26 = vor.u32 %v13245_v16, %v8970_v59 }
 0x31d   :  { %6946 = vmatmul.bf16.vlgmr.msra.gmra.mxu1 %v14679_v55  ;;  %v13309_v20 = vld [vmem:[#allocation8 + $0x2e4] sm:$0xf0] }
 0x31e   :  { %6990 = vmatpush.bf16.msrb.mxu1 %v9867_v27  ;;  %6965 = vmatpush.bf16.msrb.mxu2 %v9323_v35  ;;  %v9482_v6 = vld [vmem:[#allocation8 + $0x4c8] sm:$0xf]  ;;  %v9227_v27 = vor.u32 %v13309_v20, %v9226_v19  ;;  %v6702_v20 = vpop.f32.mrf.mxu3 }
 0x31f   :  { %v13373_v23 = vld [vmem:[#allocation8 + $0x4e4] sm:$0xf0] }
 0x320   :  { %6978 = vmatpush.bf16.msrb.mxu0 %v9579_v21  ;;  %6953 = vmatpush.bf16.msra.mxu3 %v9035_v62  ;;  %v9738_v24 = vld [vmem:[#allocation8 + $0x6c8] sm:$0xf]  ;;  %v9483_v30 = vor.u32 %v13373_v23, %v9482_v6  ;;  %v6715_v6 = vpop.f32.mrf.mxu2 }
 0x321   :  { %v13437_v25 = vld [vmem:[#allocation8 + $0x6e4] sm:$0xf0] }
 0x322   :  { %6991 = vmatpush.bf16.msrb.mxu1 %v9835_v45  ;;  %6966 = vmatpush.bf16.msrb.mxu2 %v9291_v63  ;;  %v8938_v28 = vld [vmem:[#allocation8 + $0x88] sm:$0xf]  ;;  %v9739_v31 = vor.u32 %v13437_v25, %v9738_v24 }
 0x323   :  { %v13237_v29 = vld [vmem:[#allocation8 + $0xa4] sm:$0xf0] }
 0x324   :  { %6979 = vmatpush.bf16.msrb.mxu0 %v9547_v4  ;;  %6954 = vmatpush.bf16.msra.mxu3 %v9003_v5  ;;  %v9194_v34 = vld [vmem:[#allocation8 + $0x288] sm:$0xf]  ;;  %v8939_v60 = vor.u32 %v13237_v29, %v8938_v28 }
 0x325   :  { %v13301_v35 = vld [vmem:[#allocation8 + $0x2a4] sm:$0xf0] }
 0x326   :  { %6992 = vmatpush.bf16.msrb.mxu1 %v9803_v7  ;;  %6967 = vmatpush.bf16.msrb.mxu2 %v9259_v8  ;;  %v9450_v38 = vld [vmem:[#allocation8 + $0x488] sm:$0xf]  ;;  %v9195_v61 = vor.u32 %v13301_v35, %v9194_v34 }
 0x327   :  { %v13365_v21 = vld [vmem:[#allocation8 + $0x4a4] sm:$0xf0] }
 0x328   :  { %6980 = vmatpush.bf16.msrb.mxu0 %v9515_v17  ;;  %v9706_v45 = vld [vmem:[#allocation8 + $0x688] sm:$0xf]  ;;  %6955 = vmatpush.bf16.msra.mxu3 %v8971_v26  ;;  %v9451_v1 = vor.u32 %v13365_v21, %v9450_v38 }
 0x329   :  { %v13429_v46 = vld [vmem:[#allocation8 + $0x6a4] sm:$0xf0] }
 0x32a   :  { %6993 = vmatpush.bf16.msrb.mxu1 %v9771_v18  ;;  %6968 = vmatpush.bf16.msrb.mxu2 %v9227_v27  ;;  %v8906_v62 = vld [vmem:[#allocation8 + $0x48] sm:$0xf]  ;;  %v9707_v3 = vor.u32 %v13429_v46, %v9706_v45 }
 0x32b   :  { %v13229_v63 = vld [vmem:[#allocation8 + $0x64] sm:$0xf0] }
 0x32c   :  { %6981 = vmatpush.bf16.msrb.mxu0 %v9483_v30  ;;  %v9162_v4 = vld [vmem:[#allocation8 + $0x248] sm:$0xf]  ;;  %6956 = vmatpush.bf16.msra.mxu3 %v8939_v60  ;;  %v8907_v5 = vor.u32 %v13229_v63, %v8906_v62 }
 0x32d   :  { %v13293_v7 = vld [vmem:[#allocation8 + $0x264] sm:$0xf0] }
 0x32e   :  { %6994 = vmatpush.bf16.msrb.mxu1 %v9739_v31  ;;  %v9418_v56 = vld [vmem:[#allocation8 + $0x448] sm:$0xf]  ;;  %6969 = vmatpush.bf16.msrb.mxu2 %v9195_v61  ;;  %v9163_v8 = vor.u32 %v13293_v7, %v9162_v4 }
 0x32f   :  { %v13357_v9 = vld [vmem:[#allocation8 + $0x464] sm:$0xf0] }
 0x330   :  { %v9674_v10 = vld [vmem:[#allocation8 + $0x648] sm:$0xf]  ;;  %6982 = vmatpush.bf16.msrb.mxu0 %v9451_v1  ;;  %v9419_v18 = vor.u32 %v13357_v9, %v9418_v56  ;;  %6957 = vmatpush.bf16.msra.mxu3 %v8907_v5 }
 0x331   :  { %v13421_v11 = vld [vmem:[#allocation8 + $0x664] sm:$0xf0] }
 0x332   :  { %v8874_v12 = vld [vmem:[#allocation8 + $0x8] sm:$0xf]  ;;  %6995 = vmatpush.bf16.msrb.mxu1 %v9707_v3  ;;  %v9675_v19 = vor.u32 %v13421_v11, %v9674_v10  ;;  %6970 = vmatpush.bf16.msrb.mxu2 %v9163_v8 }
 0x333   :  { %v13221_v59 = vld [vmem:[#allocation8 + $0x24] sm:$0xf0] }
 0x334   :  { %v9130_v16 = vld [vmem:[#allocation8 + $0x208] sm:$0xf]  ;;  %v8875_v30 = vor.u32 %v13221_v59, %v8874_v12  ;;  %6983 = vmatpush.bf16.msrb.mxu0 %v9419_v18 }
 0x335   :  { %v13285_v17 = vld [vmem:[#allocation8 + $0x224] sm:$0xf0] }
 0x336   :  { %v9386_v14 = vld [vmem:[#allocation8 + $0x408] sm:$0xf]  ;;  %v9131_v31 = vor.u32 %v13285_v17, %v9130_v16  ;;  %6996 = vmatpush.bf16.msrb.mxu1 %v9675_v19  ;;  %6958 = vmatpush.bf16.msra.mxu3 %v8875_v30 }
 0x337   :  { %v13349_v23 = vld [vmem:[#allocation8 + $0x424] sm:$0xf0] }
 0x338   :  { %v9642_v24 = vld [vmem:[#allocation8 + $0x608] sm:$0xf]  ;;  %v9387_v35 = vor.u32 %v13349_v23, %v9386_v14  ;;  %6971 = vmatpush.bf16.msrb.mxu2 %v9131_v31 }
 0x339   :  { %v13413_v25 = vld [vmem:[#allocation8 + $0x624] sm:$0xf0]  ;;  %6959 = vmatmul.bf16.vlgmr.msra.gmra.mxu3 %v14621_v47 }
 0x33a   :  { %v10122_v26 = vld [vmem:[#allocation8 + $0x9c8] sm:$0xf]  ;;  %v9643_v38 = vor.u32 %v13413_v25, %v9642_v24  ;;  %6984 = vmatpush.bf16.msrb.mxu0 %v9387_v35 }
 0x33b   :  { %v13533_v15 = vld [vmem:[#allocation8 + $0x9e4] sm:$0xf0]  ;;  %6972 = vmatmul.bf16.vlgmr.msrb.gmra.mxu2 %v14623_v48 }
 0x33c   :  { %v10378_v27 = vld [vmem:[#allocation8 + $0xbc8] sm:$0xf]  ;;  %v10123_v39 = vor.u32 %v13533_v15, %v10122_v26  ;;  %6997 = vmatpush.bf16.msrb.mxu1 %v9643_v38 }
 0x33d   :  { %v13597_v28 = vld [vmem:[#allocation8 + $0xbe4] sm:$0xf0]  ;;  %6985 = vmatmul.bf16.vlgmr.msrb.gmra.mxu0 %v14625_v49 }
 0x33e   :  { %v10634_v29 = vld [vmem:[#allocation8 + $0xdc8] sm:$0xf]  ;;  %v10379_v21 = vor.u32 %v13597_v28, %v10378_v27  ;;  %7003 = vmatpush.bf16.msrb.mxu3 %v10123_v39  ;;  %v6778_v27 = vpop.f32.mrf.mxu0  ;;  %v14716_v28 = vpop.f32.mrf.mxu1 }
 0x33f   :  { %v13661_v32 = vld [vmem:[#allocation8 + $0xde4] sm:$0xf0]  ;;  %6998 = vmatmul.bf16.vlgmr.msrb.gmra.mxu1 %v14631_v54 }
 0x340   :  { %v10890_v33 = vld [vmem:[#allocation8 + $0xfc8] sm:$0xf]  ;;  %v10635_v22 = vor.u32 %v13661_v32, %v10634_v29  ;;  %7016 = vmatpush.bf16.msra.mxu2 %v10379_v21 }
 0x341   :  { %v13725_v34 = vld [vmem:[#allocation8 + $0xfe4] sm:$0xf0] }
 0x342   :  { %v10090_v45 = vld [vmem:[#allocation8 + $0x988] sm:$0xf]  ;;  %v10891_v50 = vor.u32 %v13725_v34, %v10890_v33  ;;  %7029 = vmatpush.bf16.msra.mxu0 %v10635_v22  ;;  %v1400_v22 = vperm.slane %v14693_v2, 1 }
 0x343   :  { %v13525_v46 = vld [vmem:[#allocation8 + $0x9a4] sm:$0xf0] }
 0x344   :  { %v10346_v53 = vld [vmem:[#allocation8 + $0xb88] sm:$0xf]  ;;  %v10091_v3 = vor.u32 %v13525_v46, %v10090_v45  ;;  %7042 = vmatpush.bf16.msra.mxu1 %v10891_v50 }
 0x345   :  { %v13589_v60 = vld [vmem:[#allocation8 + $0xba4] sm:$0xf0] }
 0x346   :  { %v10602_v61 = vld [vmem:[#allocation8 + $0xd88] sm:$0xf]  ;;  %v10347_v4 = vor.u32 %v13589_v60, %v10346_v53  ;;  %7004 = vmatpush.bf16.msrb.mxu3 %v10091_v3  ;;  %v6765_v3 = vpop.f32.mrf.mxu2 }
 0x347   :  { %v13653_v62 = vld [vmem:[#allocation8 + $0xda4] sm:$0xf0] }
 0x348   :  { %v10858_v63 = vld [vmem:[#allocation8 + $0xf88] sm:$0xf]  ;;  %v10603_v0 = vor.u32 %v13653_v62, %v10602_v61  ;;  %7017 = vmatpush.bf16.msra.mxu2 %v10347_v4 }
 0x349   :  { %v13717_v1 = vld [vmem:[#allocation8 + $0xfa4] sm:$0xf0] }
 0x34a   :  { %v10058_v7 = vld [vmem:[#allocation8 + $0x948] sm:$0xf]  ;;  %v10859_v9 = vor.u32 %v13717_v1, %v10858_v63  ;;  %7030 = vmatpush.bf16.msra.mxu0 %v10603_v0  ;;  %v6752_v1 = vpop.f32.mrf.mxu3 }
 0x34b   :  { %v13517_v56 = vld [vmem:[#allocation8 + $0x964] sm:$0xf0]  ;;  %v6753_v0 = vadd.f32 %v6752_v1, %v1400_v22 }
 0x34c   :  { %v10314_v10 = vld [vmem:[#allocation8 + $0xb48] sm:$0xf]  ;;  %v10059_v16 = vor.u32 %v13517_v56, %v10058_v7  ;;  %7043 = vmatpush.bf16.msra.mxu1 %v10859_v9 }
 0x34d   :  { %v13581_v11 = vld [vmem:[#allocation8 + $0xb64] sm:$0xf0]  ;;  %v6766_v2 = vadd.f32 %v6765_v3, %v6753_v0 }
 0x34e   :  { %v10570_v12 = vld [vmem:[#allocation8 + $0xd48] sm:$0xf]  ;;  %v10315_v17 = vor.u32 %v13581_v11, %v10314_v10  ;;  %7005 = vmatpush.bf16.msrb.mxu3 %v10059_v16 }
 0x34f   :  { %v13645_v5 = vld [vmem:[#allocation8 + $0xd64] sm:$0xf0] }
 0x350   :  { %v10826_v8 = vld [vmem:[#allocation8 + $0xf48] sm:$0xf]  ;;  %v10571_v20 = vor.u32 %v13645_v5, %v10570_v12  ;;  %7018 = vmatpush.bf16.msra.mxu2 %v10315_v17  ;;  %v6780_v12 = vpop.f32.mrf.mxu0  ;;  %v6793_v5 = vpop.f32.mrf.mxu1 }
 0x351   :  { %v13709_v59 = vld [vmem:[#allocation8 + $0xf64] sm:$0xf0] }
 0x352   :  { %v10026_v18 = vld [vmem:[#allocation8 + $0x908] sm:$0xf]  ;;  %v10827_v6 = vor.u32 %v13709_v59, %v10826_v8  ;;  %7031 = vmatpush.bf16.msra.mxu0 %v10571_v20 }
 0x353   :  { %v13509_v19 = vld [vmem:[#allocation8 + $0x924] sm:$0xf0] }
 0x354   :  { %v10282_v14 = vld [vmem:[#allocation8 + $0xb08] sm:$0xf]  ;;  %v10027_v29 = vor.u32 %v13509_v19, %v10026_v18  ;;  %7044 = vmatpush.bf16.msra.mxu1 %v10827_v6 }
 0x355   :  { %v13573_v23 = vld [vmem:[#allocation8 + $0xb24] sm:$0xf0] }
 0x356   :  { %v10538_v24 = vld [vmem:[#allocation8 + $0xd08] sm:$0xf]  ;;  %v10283_v30 = vor.u32 %v13573_v23, %v10282_v14  ;;  %7006 = vmatpush.bf16.msrb.mxu3 %v10027_v29  ;;  %v6779_v23 = vadd.f32 %v6778_v27, %v6766_v2  ;;  %v6767_v27 = vpop.f32.mrf.mxu2 }
 0x357   :  { %v13637_v25 = vld [vmem:[#allocation8 + $0xd24] sm:$0xf0] }
 0x358   :  { %v10794_v26 = vld [vmem:[#allocation8 + $0xf08] sm:$0xf]  ;;  %v10539_v34 = vor.u32 %v13637_v25, %v10538_v24  ;;  %7019 = vmatpush.bf16.msra.mxu2 %v10283_v30 }
 0x359   :  { %v13701_v15 = vld [vmem:[#allocation8 + $0xf24] sm:$0xf0] }
 0x35a   :  { %v9994_v31 = vld [vmem:[#allocation8 + $0x8c8] sm:$0xf]  ;;  %v10795_v35 = vor.u32 %v13701_v15, %v10794_v26  ;;  %7032 = vmatpush.bf16.msra.mxu0 %v10539_v34  ;;  %v14720_v34 = vadd.f32 %v14716_v28, %v6779_v23 }
 0x35b   :  { %v13501_v32 = vld [vmem:[#allocation8 + $0x8e4] sm:$0xf0] }
 0x35c   :  { %v10250_v33 = vld [vmem:[#allocation8 + $0xac8] sm:$0xf]  ;;  %v9995_v50 = vor.u32 %v13501_v32, %v9994_v31  ;;  %7045 = vmatpush.bf16.msra.mxu1 %v10795_v35 }
 0x35d   :  { %v13565_v38 = vld [vmem:[#allocation8 + $0xae4] sm:$0xf0] }
 0x35e   :  { %v10506_v39 = vld [vmem:[#allocation8 + $0xcc8] sm:$0xf]  ;;  %v10251_v53 = vor.u32 %v13565_v38, %v10250_v33  ;;  %7007 = vmatpush.bf16.msrb.mxu3 %v9995_v50 }
 0x35f   :  { %v13629_v21 = vld [vmem:[#allocation8 + $0xce4] sm:$0xf0] }
 0x360   :  { %v10762_v45 = vld [vmem:[#allocation8 + $0xec8] sm:$0xf]  ;;  %v10507_v62 = vor.u32 %v13629_v21, %v10506_v39  ;;  %7020 = vmatpush.bf16.msra.mxu2 %v10251_v53  ;;  %v6754_v39 = vpop.f32.mrf.mxu3 }
 0x361   :  { %v13693_v46 = vld [vmem:[#allocation8 + $0xee4] sm:$0xf0] }
 0x362   :  { %v9962_v60 = vld [vmem:[#allocation8 + $0x888] sm:$0xf]  ;;  %v10763_v63 = vor.u32 %v13693_v46, %v10762_v45  ;;  %7033 = vmatpush.bf16.msra.mxu0 %v10507_v62 }
 0x363   :  { %v13493_v61 = vld [vmem:[#allocation8 + $0x8a4] sm:$0xf0] }
 0x364   :  { %v10218_v4 = vld [vmem:[#allocation8 + $0xa88] sm:$0xf]  ;;  %v9963_v8 = vor.u32 %v13493_v61, %v9962_v60  ;;  %7046 = vmatpush.bf16.msra.mxu1 %v10763_v63 }
 0x365   :  { %v13557_v7 = vld [vmem:[#allocation8 + $0xaa4] sm:$0xf0] }
 0x366   :  { %v10474_v56 = vld [vmem:[#allocation8 + $0xc88] sm:$0xf]  ;;  %v10219_v59 = vor.u32 %v13557_v7, %v10218_v4  ;;  %7008 = vmatpush.bf16.msrb.mxu3 %v9963_v8 }
 0x367   :  { %v13621_v9 = vld [vmem:[#allocation8 + $0xca4] sm:$0xf0] }
 0x368   :  { %v10730_v10 = vld [vmem:[#allocation8 + $0xe88] sm:$0xf]  ;;  %v10475_v18 = vor.u32 %v13621_v9, %v10474_v56  ;;  %7021 = vmatpush.bf16.msra.mxu2 %v10219_v59 }
 0x369   :  { %v13685_v11 = vld [vmem:[#allocation8 + $0xea4] sm:$0xf0] }
 0x36a   :  { %v9930_v16 = vld [vmem:[#allocation8 + $0x848] sm:$0xf]  ;;  %v10731_v19 = vor.u32 %v13685_v11, %v10730_v10  ;;  %7034 = vmatpush.bf16.msra.mxu0 %v10475_v18 }
 0x36b   :  { %v13485_v17 = vld [vmem:[#allocation8 + $0x864] sm:$0xf0] }
 0x36c   :  { %v10186_v20 = vld [vmem:[#allocation8 + $0xa48] sm:$0xf]  ;;  %v9931_v29 = vor.u32 %v13485_v17, %v9930_v16  ;;  %7047 = vmatpush.bf16.msra.mxu1 %v10731_v19 }
 0x36d   :  { %v13549_v6 = vld [vmem:[#allocation8 + $0xa64] sm:$0xf0] }
 0x36e   :  { %v10442_v14 = vld [vmem:[#allocation8 + $0xc48] sm:$0xf]  ;;  %v10187_v30 = vor.u32 %v13549_v6, %v10186_v20  ;;  %7009 = vmatpush.bf16.msrb.mxu3 %v9931_v29 }
 0x36f   :  { %v13613_v24 = vld [vmem:[#allocation8 + $0xc64] sm:$0xf0] }
 0x370   :  { %v10698_v25 = vld [vmem:[#allocation8 + $0xe48] sm:$0xf]  ;;  %v10443_v35 = vor.u32 %v13613_v24, %v10442_v14  ;;  %7022 = vmatpush.bf16.msra.mxu2 %v10187_v30 }
 0x371   :  { %v13677_v26 = vld [vmem:[#allocation8 + $0xe64] sm:$0xf0] }
 0x372   :  { %v9898_v15 = vld [vmem:[#allocation8 + $0x808] sm:$0xf]  ;;  %v10699_v38 = vor.u32 %v13677_v26, %v10698_v25  ;;  %7035 = vmatpush.bf16.msra.mxu0 %v10443_v35 }
 0x373   :  { %v13477_v31 = vld [vmem:[#allocation8 + $0x824] sm:$0xf0] }
 0x374   :  { %v10154_v32 = vld [vmem:[#allocation8 + $0xa08] sm:$0xf]  ;;  %v9899_v63 = vor.u32 %v13477_v31, %v9898_v15  ;;  %7048 = vmatpush.bf16.msra.mxu1 %v10699_v38 }
 0x375   :  { %v13541_v33 = vld [vmem:[#allocation8 + $0xa24] sm:$0xf0] }
 0x376   :  { %v10410_v21 = vld [vmem:[#allocation8 + $0xc08] sm:$0xf]  ;;  %v10155_v28 = vor.u32 %v13541_v33, %v10154_v32  ;;  %7010 = vmatpush.bf16.msrb.mxu3 %v9899_v63 }
 0x377   :  { %v13605_v45 = vld [vmem:[#allocation8 + $0xc24] sm:$0xf0] }
 0x378   :  { %v10666_v46 = vld [vmem:[#allocation8 + $0xe08] sm:$0xf]  ;;  %v10411_v7 = vor.u32 %v13605_v45, %v10410_v21  ;;  %7023 = vmatpush.bf16.msra.mxu2 %v10155_v28 }
 0x379   :  { %v13669_v22 = vld [vmem:[#allocation8 + $0xe24] sm:$0xf0]  ;;  %7011 = vmatmul.bf16.vlgmr.msrb.gmra.mxu3 %v14643_v36 }
 0x37a   :  { %v11146_v50 = vld [vmem:[#allocation8 + $0x11c8] sm:$0xf]  ;;  %v10667_v56 = vor.u32 %v13669_v22, %v10666_v46  ;;  %7036 = vmatpush.bf16.msra.mxu0 %v10411_v7 }
 0x37b   :  { %v13789_v53 = vld [vmem:[#allocation8 + $0x11e4] sm:$0xf0]  ;;  %7024 = vmatmul.bf16.vlgmr.msra.gmra.mxu2 %v14647_v37 }
 0x37c   :  { %v11402_v60 = vld [vmem:[#allocation8 + $0x13c8] sm:$0xf]  ;;  %v11147_v0 = vor.u32 %v13789_v53, %v11146_v50  ;;  %7049 = vmatpush.bf16.msra.mxu1 %v10667_v56 }
 0x37d   :  { %v13853_v61 = vld [vmem:[#allocation8 + $0x13e4] sm:$0xf0]  ;;  %7037 = vmatmul.bf16.vlgmr.msra.gmra.mxu0 %v14651_v41 }
 0x37e   :  { %v11658_v62 = vld [vmem:[#allocation8 + $0x15c8] sm:$0xf]  ;;  %v11403_v9 = vor.u32 %v13853_v61, %v11402_v60  ;;  %7055 = vmatpush.bf16.msra.mxu3 %v11147_v0  ;;  %v6830_v60 = vpop.f32.mrf.mxu0  ;;  %v6843_v61 = vpop.f32.mrf.mxu1 }
 0x37f   :  { %v13917_v1 = vld [vmem:[#allocation8 + $0x15e4] sm:$0xf0]  ;;  %7050 = vmatmul.bf16.vlgmr.msra.gmra.mxu1 %v14655_v42 }
 0x380   :  { %v11914_v3 = vld [vmem:[#allocation8 + $0x17c8] sm:$0xf]  ;;  %v11659_v2 = vor.u32 %v13917_v1, %v11658_v62  ;;  %7068 = vmatpush.bf16.msrb.mxu2 %v11403_v9 }
 0x381   :  { %v13981_v4 = vld [vmem:[#allocation8 + $0x17e4] sm:$0xf0] }
 0x382   :  { %v11114_v10 = vld [vmem:[#allocation8 + $0x1188] sm:$0xf]  ;;  %v11915_v12 = vor.u32 %v13981_v4, %v11914_v3  ;;  %7081 = vmatpush.bf16.msrb.mxu0 %v11659_v2 }
 0x383   :  { %v13781_v11 = vld [vmem:[#allocation8 + $0x11a4] sm:$0xf0] }
 0x384   :  { %v11370_v5 = vld [vmem:[#allocation8 + $0x1388] sm:$0xf]  ;;  %v11115_v19 = vor.u32 %v13781_v11, %v11114_v10  ;;  %7094 = vmatpush.bf16.msrb.mxu1 %v11915_v12 }
 0x385   :  { %v13845_v8 = vld [vmem:[#allocation8 + $0x13a4] sm:$0xf0] }
 0x386   :  { %v11626_v59 = vld [vmem:[#allocation8 + $0x1588] sm:$0xf]  ;;  %v11371_v20 = vor.u32 %v13845_v8, %v11370_v5  ;;  %7056 = vmatpush.bf16.msra.mxu3 %v11115_v19 }
 0x387   :  { %v13909_v16 = vld [vmem:[#allocation8 + $0x15a4] sm:$0xf0] }
 0x388   :  { %v11882_v17 = vld [vmem:[#allocation8 + $0x1788] sm:$0xf]  ;;  %v11627_v23 = vor.u32 %v13909_v16, %v11626_v59  ;;  %7069 = vmatpush.bf16.msrb.mxu2 %v11371_v20 }
 0x389   :  { %v13973_v18 = vld [vmem:[#allocation8 + $0x17a4] sm:$0xf0] }
 0x38a   :  { %v11082_v6 = vld [vmem:[#allocation8 + $0x1148] sm:$0xf]  ;;  %v11883_v24 = vor.u32 %v13973_v18, %v11882_v17  ;;  %7082 = vmatpush.bf16.msrb.mxu0 %v11627_v23  ;;  %v6804_v17 = vpop.f32.mrf.mxu3  ;;  %v6817_v18 = vpop.f32.mrf.mxu2 }
 0x38b   :  { %v13773_v14 = vld [vmem:[#allocation8 + $0x1164] sm:$0xf0] }
 0x38c   :  { %v11338_v25 = vld [vmem:[#allocation8 + $0x1348] sm:$0xf]  ;;  %v11083_v32 = vor.u32 %v13773_v14, %v11082_v6  ;;  %7095 = vmatpush.bf16.msrb.mxu1 %v11883_v24  ;;  %v6805_v14 = vadd.f32 %v6804_v17, %v14720_v34 }
 0x38d   :  { %v13837_v26 = vld [vmem:[#allocation8 + $0x1364] sm:$0xf0] }
 0x38e   :  { %v11594_v15 = vld [vmem:[#allocation8 + $0x1548] sm:$0xf]  ;;  %v11339_v33 = vor.u32 %v13837_v26, %v11338_v25  ;;  %7057 = vmatpush.bf16.msra.mxu3 %v11083_v32  ;;  %v6818_v26 = vadd.f32 %v6817_v18, %v6805_v14 }
 0x38f   :  { %v13901_v29 = vld [vmem:[#allocation8 + $0x1564] sm:$0xf0] }
 0x390   :  { %v11850_v30 = vld [vmem:[#allocation8 + $0x1748] sm:$0xf]  ;;  %v11595_v39 = vor.u32 %v13901_v29, %v11594_v15  ;;  %7070 = vmatpush.bf16.msrb.mxu2 %v11339_v33  ;;  %v6832_v15 = vpop.f32.mrf.mxu0  ;;  %v6845_v29 = vpop.f32.mrf.mxu1  ;;  %v6831_v34 = vadd.f32 %v6830_v60, %v6818_v26 }
 0x391   :  { %v13965_v31 = vld [vmem:[#allocation8 + $0x1764] sm:$0xf0] }
 0x392   :  { %v11050_v35 = vld [vmem:[#allocation8 + $0x1108] sm:$0xf]  ;;  %v11851_v27 = vor.u32 %v13965_v31, %v11850_v30  ;;  %7083 = vmatpush.bf16.msrb.mxu0 %v11595_v39 }
 0x393   :  { %v13765_v38 = vld [vmem:[#allocation8 + $0x1124] sm:$0xf0] }
 0x394   :  { %v11306_v21 = vld [vmem:[#allocation8 + $0x1308] sm:$0xf]  ;;  %v11051_v62 = vor.u32 %v13765_v38, %v11050_v35  ;;  %7096 = vmatpush.bf16.msrb.mxu1 %v11851_v27 }
 0x395   :  { %v13829_v45 = vld [vmem:[#allocation8 + $0x1324] sm:$0xf0] }
 0x396   :  { %v11562_v46 = vld [vmem:[#allocation8 + $0x1508] sm:$0xf]  ;;  %v11307_v63 = vor.u32 %v13829_v45, %v11306_v21  ;;  %7058 = vmatpush.bf16.msra.mxu3 %v11051_v62 }
 0x397   :  { %v13893_v22 = vld [vmem:[#allocation8 + $0x1524] sm:$0xf0] }
 0x398   :  { %v11818_v50 = vld [vmem:[#allocation8 + $0x1708] sm:$0xf]  ;;  %v11563_v3 = vor.u32 %v13893_v22, %v11562_v46  ;;  %7071 = vmatpush.bf16.msrb.mxu2 %v11307_v63 }
 0x399   :  { %v13957_v53 = vld [vmem:[#allocation8 + $0x1724] sm:$0xf0] }
 0x39a   :  { %v11018_v28 = vld [vmem:[#allocation8 + $0x10c8] sm:$0xf]  ;;  %v11819_v4 = vor.u32 %v13957_v53, %v11818_v50  ;;  %7084 = vmatpush.bf16.msrb.mxu0 %v11563_v3  ;;  %v14727_v3 = vadd.f32 %v6843_v61, %v6831_v34 }
 0x39b   :  { %v13757_v1 = vld [vmem:[#allocation8 + $0x10e4] sm:$0xf0] }
 0x39c   :  { %v11274_v7 = vld [vmem:[#allocation8 + $0x12c8] sm:$0xf]  ;;  %v11019_v2 = vor.u32 %v13757_v1, %v11018_v28  ;;  %7097 = vmatpush.bf16.msrb.mxu1 %v11819_v4 }
 0x39d   :  { %v13821_v56 = vld [vmem:[#allocation8 + $0x12e4] sm:$0xf0] }
 0x39e   :  { %v11530_v0 = vld [vmem:[#allocation8 + $0x14c8] sm:$0xf]  ;;  %v11275_v12 = vor.u32 %v13821_v56, %v11274_v7  ;;  %7059 = vmatpush.bf16.msra.mxu3 %v11019_v2  ;;  %v6806_v56 = vpop.f32.mrf.mxu3 }
 0x39f   :  { %v13885_v9 = vld [vmem:[#allocation8 + $0x14e4] sm:$0xf0] }
 0x3a0   :  { %v11786_v10 = vld [vmem:[#allocation8 + $0x16c8] sm:$0xf]  ;;  %v11531_v59 = vor.u32 %v13885_v9, %v11530_v0  ;;  %7072 = vmatpush.bf16.msrb.mxu2 %v11275_v12  ;;  %v6819_v0 = vpop.f32.mrf.mxu2 }
 0x3a1   :  { %v13949_v11 = vld [vmem:[#allocation8 + $0x16e4] sm:$0xf0] }
 0x3a2   :  { %v10986_v5 = vld [vmem:[#allocation8 + $0x1088] sm:$0xf]  ;;  %v11787_v16 = vor.u32 %v13949_v11, %v11786_v10  ;;  %7085 = vmatpush.bf16.msrb.mxu0 %v11531_v59 }
 0x3a3   :  { %v13749_v8 = vld [vmem:[#allocation8 + $0x10a4] sm:$0xf0] }
 0x3a4   :  { %v11242_v19 = vld [vmem:[#allocation8 + $0x1288] sm:$0xf]  ;;  %v10987_v30 = vor.u32 %v13749_v8, %v10986_v5  ;;  %7098 = vmatpush.bf16.msrb.mxu1 %v11787_v16 }
 0x3a5   :  { %v13813_v20 = vld [vmem:[#allocation8 + $0x12a4] sm:$0xf0] }
 0x3a6   :  { %v11498_v6 = vld [vmem:[#allocation8 + $0x1488] sm:$0xf]  ;;  %v11243_v31 = vor.u32 %v13813_v20, %v11242_v19  ;;  %7060 = vmatpush.bf16.msra.mxu3 %v10987_v30 }
 0x3a7   :  { %v13877_v23 = vld [vmem:[#allocation8 + $0x14a4] sm:$0xf0] }
 0x3a8   :  { %v11754_v24 = vld [vmem:[#allocation8 + $0x1688] sm:$0xf]  ;;  %v11499_v35 = vor.u32 %v13877_v23, %v11498_v6  ;;  %7073 = vmatpush.bf16.msrb.mxu2 %v11243_v31 }
 0x3a9   :  { %v13941_v25 = vld [vmem:[#allocation8 + $0x16a4] sm:$0xf0] }
 0x3aa   :  { %v10954_v32 = vld [vmem:[#allocation8 + $0x1048] sm:$0xf]  ;;  %v11755_v38 = vor.u32 %v13941_v25, %v11754_v24  ;;  %7086 = vmatpush.bf16.msrb.mxu0 %v11499_v35 }
 0x3ab   :  { %v13741_v33 = vld [vmem:[#allocation8 + $0x1064] sm:$0xf0] }
 0x3ac   :  { %v11210_v39 = vld [vmem:[#allocation8 + $0x1248] sm:$0xf]  ;;  %v10955_v53 = vor.u32 %v13741_v33, %v10954_v32  ;;  %7099 = vmatpush.bf16.msrb.mxu1 %v11755_v38 }
 0x3ad   :  { %v13805_v27 = vld [vmem:[#allocation8 + $0x1264] sm:$0xf0] }
 0x3ae   :  { %v11466_v21 = vld [vmem:[#allocation8 + $0x1448] sm:$0xf]  ;;  %v11211_v62 = vor.u32 %v13805_v27, %v11210_v39  ;;  %7061 = vmatpush.bf16.msra.mxu3 %v10955_v53 }
 0x3af   :  { %v13869_v45 = vld [vmem:[#allocation8 + $0x1464] sm:$0xf0] }
 0x3b0   :  { %v11722_v46 = vld [vmem:[#allocation8 + $0x1648] sm:$0xf]  ;;  %v11467_v4 = vor.u32 %v13869_v45, %v11466_v21  ;;  %7074 = vmatpush.bf16.msrb.mxu2 %v11211_v62 }
 0x3b1   :  { %v13933_v22 = vld [vmem:[#allocation8 + $0x1664] sm:$0xf0] }
 0x3b2   :  { %v10922_v50 = vld [vmem:[#allocation8 + $0x1008] sm:$0xf]  ;;  %v11723_v7 = vor.u32 %v13933_v22, %v11722_v46  ;;  %7087 = vmatpush.bf16.msrb.mxu0 %v11467_v4 }
 0x3b3   :  { %v13733_v63 = vld [vmem:[#allocation8 + $0x1024] sm:$0xf0] }
 0x3b4   :  { %v11178_v28 = vld [vmem:[#allocation8 + $0x1208] sm:$0xf]  ;;  %v10923_v16 = vor.u32 %v13733_v63, %v10922_v50  ;;  %7100 = vmatpush.bf16.msrb.mxu1 %v11723_v7 }
 0x3b5   :  { %v13797_v1 = vld [vmem:[#allocation8 + $0x1224] sm:$0xf0] }
 0x3b6   :  { %v11434_v60 = vld [vmem:[#allocation8 + $0x1408] sm:$0xf]  ;;  %v11179_v61 = vor.u32 %v13797_v1, %v11178_v28  ;;  %7062 = vmatpush.bf16.msra.mxu3 %v10923_v16 }
 0x3b7   :  { %v13861_v9 = vld [vmem:[#allocation8 + $0x1424] sm:$0xf0] }
 0x3b8   :  { %v11690_v10 = vld [vmem:[#allocation8 + $0x1608] sm:$0xf]  ;;  %v11435_v20 = vor.u32 %v13861_v9, %v11434_v60  ;;  %7075 = vmatpush.bf16.msrb.mxu2 %v11179_v61 }
 0x3b9   :  { %v13925_v11 = vld [vmem:[#allocation8 + $0x1624] sm:$0xf0]  ;;  %7063 = vmatmul.bf16.vlgmr.msra.gmra.mxu3 %v14661_v51 }
 0x3ba   :  { %v12170_v2 = vld [vmem:[#allocation8 + $0x19c8] sm:$0xf]  ;;  %v11691_v6 = vor.u32 %v13925_v11, %v11690_v10  ;;  %7088 = vmatpush.bf16.msrb.mxu0 %v11435_v20 }
 0x3bb   :  { %v14045_v12 = vld [vmem:[#allocation8 + $0x19e4] sm:$0xf0]  ;;  %7076 = vmatmul.bf16.vlgmr.msrb.gmra.mxu2 %v14663_v52 }
 0x3bc   :  { %v12426_v5 = vld [vmem:[#allocation8 + $0x1bc8] sm:$0xf]  ;;  %v12171_v14 = vor.u32 %v14045_v12, %v12170_v2  ;;  %7101 = vmatpush.bf16.msrb.mxu1 %v11691_v6 }
 0x3bd   :  { %v14109_v8 = vld [vmem:[#allocation8 + $0x1be4] sm:$0xf0]  ;;  %7089 = vmatmul.bf16.vlgmr.msrb.gmra.mxu0 %v14665_v57 }
 0x3be   :  { %v12682_v59 = vld [vmem:[#allocation8 + $0x1dc8] sm:$0xf]  ;;  %v12427_v23 = vor.u32 %v14109_v8, %v12426_v5  ;;  %7107 = vmatpush.bf16.msrb.mxu3 %v12171_v14  ;;  %v6882_v5 = vpop.f32.mrf.mxu0  ;;  %v6895_v8 = vpop.f32.mrf.mxu1 }
 0x3bf   :  { %v14173_v17 = vld [vmem:[#allocation8 + $0x1de4] sm:$0xf0]  ;;  %7102 = vmatmul.bf16.vlgmr.msrb.gmra.mxu1 %v14667_v58 }
 0x3c0   :  { %v12938_v18 = vld [vmem:[#allocation8 + $0x1fc8] sm:$0xf]  ;;  %v12683_v26 = vor.u32 %v14173_v17, %v12682_v59  ;;  %7120 = vmatpush.bf16.msra.mxu2 %v12427_v23 }
 0x3c1   :  { %v14237_v19 = vld [vmem:[#allocation8 + $0x1fe4] sm:$0xf0] }
 0x3c2   :  { %v12138_v24 = vld [vmem:[#allocation8 + $0x1988] sm:$0xf]  ;;  %v12939_v15 = vor.u32 %v14237_v19, %v12938_v18  ;;  %7133 = vmatpush.bf16.msra.mxu0 %v12683_v26 }
 0x3c3   :  { %v14037_v25 = vld [vmem:[#allocation8 + $0x19a4] sm:$0xf0] }
 0x3c4   :  { %v12394_v29 = vld [vmem:[#allocation8 + $0x1b88] sm:$0xf]  ;;  %v12139_v38 = vor.u32 %v14037_v25, %v12138_v24  ;;  %7146 = vmatpush.bf16.msra.mxu1 %v12939_v15 }
 0x3c5   :  { %v14101_v30 = vld [vmem:[#allocation8 + $0x1ba4] sm:$0xf0] }
 0x3c6   :  { %v12650_v31 = vld [vmem:[#allocation8 + $0x1d88] sm:$0xf]  ;;  %v12395_v39 = vor.u32 %v14101_v30, %v12394_v29  ;;  %7108 = vmatpush.bf16.msrb.mxu3 %v12139_v38 }
 0x3c7   :  { %v14165_v32 = vld [vmem:[#allocation8 + $0x1da4] sm:$0xf0] }
 0x3c8   :  { %v12906_v33 = vld [vmem:[#allocation8 + $0x1f88] sm:$0xf]  ;;  %v12651_v34 = vor.u32 %v14165_v32, %v12650_v31  ;;  %7121 = vmatpush.bf16.msra.mxu2 %v12395_v39 }
 0x3c9   :  { %v14229_v35 = vld [vmem:[#allocation8 + $0x1fa4] sm:$0xf0] }
 0x3ca   :  { %v12106_v27 = vld [vmem:[#allocation8 + $0x1948] sm:$0xf]  ;;  %v12907_v45 = vor.u32 %v14229_v35, %v12906_v33  ;;  %7134 = vmatpush.bf16.msra.mxu0 %v12651_v34  ;;  %v6856_v33 = vpop.f32.mrf.mxu3  ;;  %v6869_v35 = vpop.f32.mrf.mxu2 }
 0x3cb   :  { %v14029_v21 = vld [vmem:[#allocation8 + $0x1964] sm:$0xf0] }
 0x3cc   :  { %v12362_v46 = vld [vmem:[#allocation8 + $0x1b48] sm:$0xf]  ;;  %v12107_v28 = vor.u32 %v14029_v21, %v12106_v27  ;;  %7147 = vmatpush.bf16.msra.mxu1 %v12907_v45  ;;  %v6857_v21 = vadd.f32 %v6856_v33, %v14727_v3  ;;  %v9612_v33 = vld [vmem:[#allocation8 + $0x5e8] sm:$0xf0] }
 0x3cd   :  { %v14093_v22 = vld [vmem:[#allocation8 + $0x1b64] sm:$0xf0] }
 0x3ce   :  { %v12618_v50 = vld [vmem:[#allocation8 + $0x1d48] sm:$0xf]  ;;  %v12363_v1 = vor.u32 %v14093_v22, %v12362_v46  ;;  %7109 = vmatpush.bf16.msrb.mxu3 %v12107_v28  ;;  %v6870_v22 = vadd.f32 %v6869_v35, %v6857_v21  ;;  %v13465_v35 = vld [vmem:[#allocation8 + $0x7cc] sm:$0xf] }
 0x3cf   :  { %v14157_v53 = vld [vmem:[#allocation8 + $0x1d64] sm:$0xf0] }
 0x3d0   :  { %v12874_v62 = vld [vmem:[#allocation8 + $0x1f48] sm:$0xf]  ;;  %v12619_v56 = vor.u32 %v14157_v53, %v12618_v50  ;;  %7122 = vmatpush.bf16.msra.mxu2 %v12363_v1  ;;  %v6884_v50 = vpop.f32.mrf.mxu0  ;;  %v6897_v53 = vpop.f32.mrf.mxu1  ;;  %v6883_v3 = vadd.f32 %v6882_v5, %v6870_v22 }
 0x3d1   :  { %v14221_v63 = vld [vmem:[#allocation8 + $0x1f64] sm:$0xf0]  ;;  %v13329_v53 = vld [vmem:[#allocation8 + $0x38c] sm:$0xf] }
 0x3d2   :  { %v12074_v4 = vld [vmem:[#allocation8 + $0x1908] sm:$0xf]  ;;  %v12875_v0 = vor.u32 %v14221_v63, %v12874_v62  ;;  %7135 = vmatpush.bf16.msra.mxu0 %v12619_v56 }
 0x3d3   :  { %v14021_v7 = vld [vmem:[#allocation8 + $0x1924] sm:$0xf0] }
 0x3d4   :  { %v12330_v60 = vld [vmem:[#allocation8 + $0x1b08] sm:$0xf]  ;;  %v12075_v59 = vor.u32 %v14021_v7, %v12074_v4  ;;  %7148 = vmatpush.bf16.msra.mxu1 %v12875_v0 }
 0x3d5   :  { %v14085_v9 = vld [vmem:[#allocation8 + $0x1b24] sm:$0xf0] }
 0x3d6   :  { %v12586_v10 = vld [vmem:[#allocation8 + $0x1d08] sm:$0xf]  ;;  %v12331_v16 = vor.u32 %v14085_v9, %v12330_v60  ;;  %7110 = vmatpush.bf16.msrb.mxu3 %v12075_v59 }
 0x3d7   :  { %v14149_v11 = vld [vmem:[#allocation8 + $0x1d24] sm:$0xf0] }
 0x3d8   :  { %v12842_v2 = vld [vmem:[#allocation8 + $0x1f08] sm:$0xf]  ;;  %v12587_v18 = vor.u32 %v14149_v11, %v12586_v10  ;;  %7123 = vmatpush.bf16.msra.mxu2 %v12331_v16 }
 0x3d9   :  { %v14213_v12 = vld [vmem:[#allocation8 + $0x1f24] sm:$0xf0] }
 0x3da   :  { %v12042_v61 = vld [vmem:[#allocation8 + $0x18c8] sm:$0xf]  ;;  %v12843_v19 = vor.u32 %v14213_v12, %v12842_v2  ;;  %7136 = vmatpush.bf16.msra.mxu0 %v12587_v18  ;;  %v14734_v18 = vadd.f32 %v6895_v8, %v6883_v3 }
 0x3db   :  { %v14013_v17 = vld [vmem:[#allocation8 + $0x18e4] sm:$0xf0] }
 0x3dc   :  { %v12298_v20 = vld [vmem:[#allocation8 + $0x1ac8] sm:$0xf]  ;;  %v12043_v26 = vor.u32 %v14013_v17, %v12042_v61  ;;  %7149 = vmatpush.bf16.msra.mxu1 %v12843_v19 }
 0x3dd   :  { %v14077_v6 = vld [vmem:[#allocation8 + $0x1ae4] sm:$0xf0] }
 0x3de   :  { %v12554_v14 = vld [vmem:[#allocation8 + $0x1cc8] sm:$0xf]  ;;  %v12299_v15 = vor.u32 %v14077_v6, %v12298_v20  ;;  %7111 = vmatpush.bf16.msrb.mxu3 %v12043_v26  ;;  %v6858_v6 = vpop.f32.mrf.mxu3  ;;  %v13273_v26 = vld [vmem:[#allocation8 + $0x1cc] sm:$0xf] }
 0x3df   :  { %v14141_v23 = vld [vmem:[#allocation8 + $0x1ce4] sm:$0xf0] }
 0x3e0   :  { %v12810_v24 = vld [vmem:[#allocation8 + $0x1ec8] sm:$0xf]  ;;  %v12555_v31 = vor.u32 %v14141_v23, %v12554_v14  ;;  %7124 = vmatpush.bf16.msra.mxu2 %v12299_v15  ;;  %v6871_v14 = vpop.f32.mrf.mxu2  ;;  %v9100_v15 = vld [vmem:[#allocation8 + $0x1e8] sm:$0xf0] }
 0x3e1   :  { %v14205_v25 = vld [vmem:[#allocation8 + $0x1ee4] sm:$0xf0]  ;;  %v9103_v21 = vor.u32 %v13273_v26, %v9100_v15  ;;  %v13441_v26 = vld [vmem:[#allocation8 + $0x70c] sm:$0xf] }
 0x3e2   :  { %v12010_v29 = vld [vmem:[#allocation8 + $0x1888] sm:$0xf]  ;;  %v12811_v32 = vor.u32 %v14205_v25, %v12810_v24  ;;  %7137 = vmatpush.bf16.msra.mxu0 %v12555_v31  ;;  %v13401_v31 = vld [vmem:[#allocation8 + $0x5cc] sm:$0xf] }
 0x3e3   :  { %v14005_v30 = vld [vmem:[#allocation8 + $0x18a4] sm:$0xf0]  ;;  %v9615_v22 = vor.u32 %v13401_v31, %v9612_v33  ;;  %v9772_v15 = vld [vmem:[#allocation8 + $0x728] sm:$0xf0] }
 0x3e4   :  { %v12266_v38 = vld [vmem:[#allocation8 + $0x1a88] sm:$0xf]  ;;  %v12011_v62 = vor.u32 %v14005_v30, %v12010_v29  ;;  %7150 = vmatpush.bf16.msra.mxu1 %v12811_v32  ;;  %v13337_v29 = vld [vmem:[#allocation8 + $0x3cc] sm:$0xf] }
 0x3e5   :  { %v14069_v39 = vld [vmem:[#allocation8 + $0x1aa4] sm:$0xf0]  ;;  %v9356_v30 = vld [vmem:[#allocation8 + $0x3e8] sm:$0xf0] }
 0x3e6   :  { %v12522_v27 = vld [vmem:[#allocation8 + $0x1c88] sm:$0xf]  ;;  %v12267_v63 = vor.u32 %v14069_v39, %v12266_v38  ;;  %7112 = vmatpush.bf16.msrb.mxu3 %v12011_v62  ;;  %v9868_v38 = vld [vmem:[#allocation8 + $0x7e8] sm:$0xf0] }
 0x3e7   :  { %v14133_v34 = vld [vmem:[#allocation8 + $0x1ca4] sm:$0xf0]  ;;  %v9871_v50 = vor.u32 %v13465_v35, %v9868_v38  ;;  %v9324_v62 = vld [vmem:[#allocation8 + $0x3a8] sm:$0xf0]  ;;  %v9775_v38 = vor.u32 %v13441_v26, %v9772_v15 }
 0x3e8   :  { %v12778_v45 = vld [vmem:[#allocation8 + $0x1e88] sm:$0xf]  ;;  %v12523_v4 = vor.u32 %v14133_v34, %v12522_v27  ;;  %7125 = vmatpush.bf16.msra.mxu2 %v12267_v63  ;;  %v9359_v34 = vor.u32 %v13337_v29, %v9356_v30  ;;  %v13393_v63 = vld [vmem:[#allocation8 + $0x58c] sm:$0xf]  ;;  %v6934_v29 = vpop.f32.mrf.mxu0  ;;  %v6947_v30 = vpop.f32.mrf.mxu1 }
 0x3e9   :  { %v14197_v46 = vld [vmem:[#allocation8 + $0x1ea4] sm:$0xf0]  ;;  %v8972_v33 = vld [vmem:[#allocation8 + $0xe8] sm:$0xf0] }
 0x3ea   :  { %v11978_v28 = vld [vmem:[#allocation8 + $0x1848] sm:$0xf]  ;;  %v12779_v7 = vor.u32 %v14197_v46, %v12778_v45  ;;  %7138 = vmatpush.bf16.msra.mxu0 %v12523_v4  ;;  %v13265_v45 = vld [vmem:[#allocation8 + $0x18c] sm:$0xf] }
 0x3eb   :  { %v13997_v1 = vld [vmem:[#allocation8 + $0x1864] sm:$0xf0]  ;;  %v9068_v46 = vld [vmem:[#allocation8 + $0x1a8] sm:$0xf0] }
 0x3ec   :  { %v12234_v56 = vld [vmem:[#allocation8 + $0x1a48] sm:$0xf]  ;;  %v11979_v12 = vor.u32 %v13997_v1, %v11978_v28  ;;  %7151 = vmatpush.bf16.msra.mxu1 %v12779_v7  ;;  %v9580_v28 = vld [vmem:[#allocation8 + $0x5a8] sm:$0xf0]  ;;  %v9071_v7 = vor.u32 %v13265_v45, %v9068_v46 }
 0x3ed   :  { %v14061_v0 = vld [vmem:[#allocation8 + $0x1a64] sm:$0xf0]  ;;  %v13457_v1 = vld [vmem:[#allocation8 + $0x78c] sm:$0xf]  ;;  %v9583_v3 = vor.u32 %v13393_v63, %v9580_v28 }
 0x3ee   :  { %v12490_v60 = vld [vmem:[#allocation8 + $0x1c48] sm:$0xf]  ;;  %v12235_v59 = vor.u32 %v14061_v0, %v12234_v56  ;;  %7113 = vmatpush.bf16.msrb.mxu3 %v11979_v12  ;;  %v9836_v4 = vld [vmem:[#allocation8 + $0x7a8] sm:$0xf0]  ;;  %v9327_v56 = vor.u32 %v13329_v53, %v9324_v62 }
 0x3ef   :  { %v14125_v9 = vld [vmem:[#allocation8 + $0x1c64] sm:$0xf0]  ;;  %v13257_v0 = vld [vmem:[#allocation8 + $0x14c] sm:$0xf] }
 0x3f0   :  { %v12746_v10 = vld [vmem:[#allocation8 + $0x1e48] sm:$0xf]  ;;  %v12491_v19 = vor.u32 %v14125_v9, %v12490_v60  ;;  %7126 = vmatpush.bf16.msra.mxu2 %v12235_v59  ;;  %v9036_v60 = vld [vmem:[#allocation8 + $0x168] sm:$0xf0]  ;;  %v9839_v9 = vor.u32 %v13457_v1, %v9836_v4  ;;  %v6908_v1 = vpop.f32.mrf.mxu3  ;;  %v6921_v4 = vpop.f32.mrf.mxu2 }
 0x3f1   :  { %v14189_v11 = vld [vmem:[#allocation8 + $0x1e64] sm:$0xf0]  ;;  %v9548_v12 = vld [vmem:[#allocation8 + $0x568] sm:$0xf0] }
 0x3f2   :  { %v11946_v2 = vld [vmem:[#allocation8 + $0x1808] sm:$0xf]  ;;  %v12747_v20 = vor.u32 %v14189_v11, %v12746_v10  ;;  %7139 = vmatpush.bf16.msra.mxu0 %v12491_v19  ;;  %v13321_v10 = vld [vmem:[#allocation8 + $0x34c] sm:$0xf] }
 0x3f3   :  { %v13989_v16 = vld [vmem:[#allocation8 + $0x1824] sm:$0xf0]  ;;  %v9292_v11 = vld [vmem:[#allocation8 + $0x368] sm:$0xf0] }
 0x3f4   :  { %v12202_v61 = vld [vmem:[#allocation8 + $0x1a08] sm:$0xf]  ;;  %v11947_v32 = vor.u32 %v13989_v16, %v11946_v2  ;;  %7152 = vmatpush.bf16.msra.mxu1 %v12747_v20  ;;  %v13385_v2 = vld [vmem:[#allocation8 + $0x54c] sm:$0xf] }
 0x3f5   :  { %v14053_v17 = vld [vmem:[#allocation8 + $0x1a24] sm:$0xf0]  ;;  %v13449_v59 = vld [vmem:[#allocation8 + $0x74c] sm:$0xf]  ;;  %v9551_v6 = vor.u32 %v13385_v2, %v9548_v12  ;;  %v6936_v2 = vpop.f32.mrf.mxu0  ;;  %v6949_v12 = vpop.f32.mrf.mxu1 }
 0x3f6   :  { %v12458_v5 = vld [vmem:[#allocation8 + $0x1c08] sm:$0xf]  ;;  %v12203_v8 = vor.u32 %v14053_v17, %v12202_v61  ;;  %7114 = vmatpush.bf16.msrb.mxu3 %v11947_v32  ;;  %v9804_v16 = vld [vmem:[#allocation8 + $0x768] sm:$0xf0]  ;;  %v9039_v61 = vor.u32 %v13257_v0, %v9036_v60  ;;  %v9295_v17 = vor.u32 %v13321_v10, %v9292_v11  ;;  %v6909_v60 = vadd.f32 %v6908_v1, %v14734_v18 }
 0x3f7   :  { %v14117_v23 = vld [vmem:[#allocation8 + $0x1c24] sm:$0xf0]  ;;  %v13249_v19 = vld [vmem:[#allocation8 + $0x10c] sm:$0xf]  ;;  %v9807_v14 = vor.u32 %v13449_v59, %v9804_v16 }
 0x3f8   :  { %v12714_v24 = vld [vmem:[#allocation8 + $0x1e08] sm:$0xf]  ;;  %v12459_v39 = vor.u32 %v14117_v23, %v12458_v5  ;;  %7127 = vmatpush.bf16.msra.mxu2 %v12203_v8  ;;  %v9004_v20 = vld [vmem:[#allocation8 + $0x128] sm:$0xf0]  ;;  %v6922_v11 = vadd.f32 %v6921_v4, %v6909_v60 }
 0x3f9   :  { %v14181_v25 = vld [vmem:[#allocation8 + $0x1e24] sm:$0xf0]  ;;  %7115 = vmatmul.bf16.vlgmr.msrb.gmra.mxu3 %v14673_v40  ;;  %v13313_v5 = vld [vmem:[#allocation8 + $0x30c] sm:$0xf]  ;;  %v9007_v31 = vor.u32 %v13249_v19, %v9004_v20 }
 0x3fa   :  { %v12715_v27 = vor.u32 %v14181_v25, %v12714_v24  ;;  %7140 = vmatpush.bf16.msra.mxu0 %v12459_v39  ;;  %7159 = vmatpush.bf16.msra.mxu3 %v9103_v21  ;;  %v9260_v23 = vld [vmem:[#allocation8 + $0x328] sm:$0xf0]  ;;  %v6935_v18 = vadd.f32 %v6934_v29, %v6922_v11 }
 0x3fb   :  { %7128 = vmatmul.bf16.vlgmr.msra.gmra.mxu2 %v14675_v43  ;;  %v13377_v24 = vld [vmem:[#allocation8 + $0x50c] sm:$0xf]  ;;  %v9263_v32 = vor.u32 %v13313_v5, %v9260_v23 }
 0x3fc   :  { %7153 = vmatpush.bf16.msra.mxu1 %v12715_v27  ;;  %7172 = vmatpush.bf16.msrb.mxu2 %v9359_v34  ;;  %v9516_v25 = vld [vmem:[#allocation8 + $0x528] sm:$0xf0]  ;;  %v14741_v15 = vadd.f32 %v6947_v30, %v6935_v18 }
 0x3fd   :  { %7141 = vmatmul.bf16.vlgmr.msra.gmra.mxu0 %v14677_v44  ;;  %v13241_v8 = vld [vmem:[#allocation8 + $0xcc] sm:$0xf]  ;;  %v9519_v35 = vor.u32 %v13377_v24, %v9516_v25 }
 0x3fe   :  { %7185 = vmatpush.bf16.msrb.mxu0 %v9615_v22  ;;  %7160 = vmatpush.bf16.msra.mxu3 %v9071_v7  ;;  %v13305_v39 = vld [vmem:[#allocation8 + $0x2cc] sm:$0xf]  ;;  %v8975_v22 = vor.u32 %v13241_v8, %v8972_v33 }
 0x3ff   :  { %7154 = vmatmul.bf16.vlgmr.msra.gmra.mxu1 %v14679_v55  ;;  %v9228_v27 = vld [vmem:[#allocation8 + $0x2e8] sm:$0xf0] }
 0x400   :  { %7198 = vmatpush.bf16.msrb.mxu1 %v9871_v50  ;;  %7173 = vmatpush.bf16.msrb.mxu2 %v9327_v56  ;;  %v13369_v21 = vld [vmem:[#allocation8 + $0x4cc] sm:$0xf]  ;;  %v9231_v50 = vor.u32 %v13305_v39, %v9228_v27  ;;  %v6910_v27 = vpop.f32.mrf.mxu3 }
 0x401   :  { %v9484_v34 = vld [vmem:[#allocation8 + $0x4e8] sm:$0xf0] }
 0x402   :  { %7186 = vmatpush.bf16.msrb.mxu0 %v9583_v3  ;;  %7161 = vmatpush.bf16.msra.mxu3 %v9039_v61  ;;  %v13433_v45 = vld [vmem:[#allocation8 + $0x6cc] sm:$0xf]  ;;  %v9487_v63 = vor.u32 %v13369_v21, %v9484_v34  ;;  %v6923_v21 = vpop.f32.mrf.mxu2 }
 0x403   :  { %v9740_v46 = vld [vmem:[#allocation8 + $0x6e8] sm:$0xf0] }
 0x404   :  { %7199 = vmatpush.bf16.msrb.mxu1 %v9839_v9  ;;  %7174 = vmatpush.bf16.msrb.mxu2 %v9295_v17  ;;  %v13233_v53 = vld [vmem:[#allocation8 + $0x8c] sm:$0xf]  ;;  %v9743_v28 = vor.u32 %v13433_v45, %v9740_v46 }
 0x405   :  { %v8940_v62 = vld [vmem:[#allocation8 + $0xa8] sm:$0xf0] }
 0x406   :  { %7187 = vmatpush.bf16.msrb.mxu0 %v9551_v6  ;;  %7162 = vmatpush.bf16.msra.mxu3 %v9007_v31  ;;  %v13297_v7 = vld [vmem:[#allocation8 + $0x28c] sm:$0xf]  ;;  %v8943_v59 = vor.u32 %v13233_v53, %v8940_v62 }
 0x407   :  { %v9196_v56 = vld [vmem:[#allocation8 + $0x2a8] sm:$0xf0] }
 0x408   :  { %7200 = vmatpush.bf16.msrb.mxu1 %v9807_v14  ;;  %7175 = vmatpush.bf16.msrb.mxu2 %v9263_v32  ;;  %v13361_v0 = vld [vmem:[#allocation8 + $0x48c] sm:$0xf]  ;;  %v9199_v16 = vor.u32 %v13297_v7, %v9196_v56 }
 0x409   :  { %v9452_v3 = vld [vmem:[#allocation8 + $0x4a8] sm:$0xf0] }
 0x40a   :  { %7188 = vmatpush.bf16.msrb.mxu0 %v9519_v35  ;;  %v13425_v9 = vld [vmem:[#allocation8 + $0x68c] sm:$0xf]  ;;  %7163 = vmatpush.bf16.msra.mxu3 %v8975_v22  ;;  %v9455_v19 = vor.u32 %v13361_v0, %v9452_v3 }
 0x40b   :  { %v9708_v10 = vld [vmem:[#allocation8 + $0x6a8] sm:$0xf0] }
 0x40c   :  { %7201 = vmatpush.bf16.msrb.mxu1 %v9775_v38  ;;  %7176 = vmatpush.bf16.msrb.mxu2 %v9231_v50  ;;  %v13225_v61 = vld [vmem:[#allocation8 + $0x4c] sm:$0xf]  ;;  %v9711_v20 = vor.u32 %v13425_v9, %v9708_v10 }
 0x40d   :  { %v8908_v17 = vld [vmem:[#allocation8 + $0x68] sm:$0xf0] }
 0x40e   :  { %7189 = vmatpush.bf16.msrb.mxu0 %v9487_v63  ;;  %v13289_v6 = vld [vmem:[#allocation8 + $0x24c] sm:$0xf]  ;;  %7164 = vmatpush.bf16.msra.mxu3 %v8943_v59  ;;  %v8911_v31 = vor.u32 %v13225_v61, %v8908_v17 }
 0x40f   :  { %v9164_v14 = vld [vmem:[#allocation8 + $0x268] sm:$0xf0] }
 0x410   :  { %7202 = vmatpush.bf16.msrb.mxu1 %v9743_v28  ;;  %v13353_v5 = vld [vmem:[#allocation8 + $0x44c] sm:$0xf]  ;;  %7177 = vmatpush.bf16.msrb.mxu2 %v9199_v16  ;;  %v9167_v32 = vor.u32 %v13289_v6, %v9164_v14 }
 0x411   :  { %v9420_v23 = vld [vmem:[#allocation8 + $0x468] sm:$0xf0] }
 0x412   :  { %v13417_v24 = vld [vmem:[#allocation8 + $0x64c] sm:$0xf]  ;;  %7190 = vmatpush.bf16.msrb.mxu0 %v9455_v19  ;;  %v9423_v38 = vor.u32 %v13353_v5, %v9420_v23  ;;  %7165 = vmatpush.bf16.msra.mxu3 %v8911_v31 }
 0x413   :  { %v9676_v25 = vld [vmem:[#allocation8 + $0x668] sm:$0xf0] }
 0x414   :  { %v13217_v26 = vld [vmem:[#allocation8 + $0xc] sm:$0xf]  ;;  %7203 = vmatpush.bf16.msrb.mxu1 %v9711_v20  ;;  %v9679_v39 = vor.u32 %v13417_v24, %v9676_v25  ;;  %7178 = vmatpush.bf16.msrb.mxu2 %v9167_v32 }
 0x415   :  { %v8876_v8 = vld [vmem:[#allocation8 + $0x28] sm:$0xf0] }
 0x416   :  { %v13281_v33 = vld [vmem:[#allocation8 + $0x20c] sm:$0xf]  ;;  %v8879_v63 = vor.u32 %v13217_v26, %v8876_v8  ;;  %7191 = vmatpush.bf16.msrb.mxu0 %v9423_v38 }
 0x417   :  { %v9132_v35 = vld [vmem:[#allocation8 + $0x228] sm:$0xf0] }
 0x418   :  { %v13345_v29 = vld [vmem:[#allocation8 + $0x40c] sm:$0xf]  ;;  %v9135_v28 = vor.u32 %v13281_v33, %v9132_v35  ;;  %7204 = vmatpush.bf16.msrb.mxu1 %v9679_v39  ;;  %7166 = vmatpush.bf16.msra.mxu3 %v8879_v63 }
 0x419   :  { %v9388_v34 = vld [vmem:[#allocation8 + $0x428] sm:$0xf0] }
 0x41a   :  { %v13409_v45 = vld [vmem:[#allocation8 + $0x60c] sm:$0xf]  ;;  %v9391_v56 = vor.u32 %v13345_v29, %v9388_v34  ;;  %7179 = vmatpush.bf16.msrb.mxu2 %v9135_v28 }
 0x41b   :  { %v9644_v46 = vld [vmem:[#allocation8 + $0x628] sm:$0xf0]  ;;  %7167 = vmatmul.bf16.vlgmr.msra.gmra.mxu3 %v14621_v47 }
 0x41c   :  { %v13529_v22 = vld [vmem:[#allocation8 + $0x9cc] sm:$0xf]  ;;  %v9647_v0 = vor.u32 %v13409_v45, %v9644_v46  ;;  %7192 = vmatpush.bf16.msrb.mxu0 %v9391_v56 }
 0x41d   :  { %v10124_v30 = vld [vmem:[#allocation8 + $0x9e8] sm:$0xf0]  ;;  %7180 = vmatmul.bf16.vlgmr.msrb.gmra.mxu2 %v14623_v48 }
 0x41e   :  { %v13593_v50 = vld [vmem:[#allocation8 + $0xbcc] sm:$0xf]  ;;  %v10127_v60 = vor.u32 %v13529_v22, %v10124_v30  ;;  %7205 = vmatpush.bf16.msrb.mxu1 %v9647_v0 }
 0x41f   :  { %v10380_v53 = vld [vmem:[#allocation8 + $0xbe8] sm:$0xf0]  ;;  %7193 = vmatmul.bf16.vlgmr.msrb.gmra.mxu0 %v14625_v49 }
 0x420   :  { %v13657_v62 = vld [vmem:[#allocation8 + $0xdcc] sm:$0xf]  ;;  %v10383_v3 = vor.u32 %v13593_v50, %v10380_v53  ;;  %7211 = vmatpush.bf16.msrb.mxu3 %v10127_v60  ;;  %v6986_v50 = vpop.f32.mrf.mxu0  ;;  %v14747_v53 = vpop.f32.mrf.mxu1 }
 0x421   :  { %v10636_v1 = vld [vmem:[#allocation8 + $0xde8] sm:$0xf0]  ;;  %7206 = vmatmul.bf16.vlgmr.msrb.gmra.mxu1 %v14631_v54 }
 0x422   :  { %v13721_v4 = vld [vmem:[#allocation8 + $0xfcc] sm:$0xf]  ;;  %v10639_v11 = vor.u32 %v13657_v62, %v10636_v1  ;;  %7224 = vmatpush.bf16.msra.mxu2 %v10383_v3 }
 0x423   :  { %v10892_v7 = vld [vmem:[#allocation8 + $0xfe8] sm:$0xf0] }
 0x424   :  { %v13521_v9 = vld [vmem:[#allocation8 + $0x98c] sm:$0xf]  ;;  %v10895_v2 = vor.u32 %v13721_v4, %v10892_v7  ;;  %7237 = vmatpush.bf16.msra.mxu0 %v10639_v11  ;;  %v14321_v11 = vld [vmem:[#allocation10] sm:$0xff] }
 0x425   :  { %v10092_v10 = vld [vmem:[#allocation8 + $0x9a8] sm:$0xf0] }
 0x426   :  { %v13585_v12 = vld [vmem:[#allocation8 + $0xb8c] sm:$0xf]  ;;  %v10095_v20 = vor.u32 %v13521_v9, %v10092_v10  ;;  %7250 = vmatpush.bf16.msra.mxu1 %v10895_v2  ;;  %v1401_v2 = vperm.slane %v14321_v11, 2 }
 0x427   :  { %v10348_v59 = vld [vmem:[#allocation8 + $0xba8] sm:$0xf0] }
 0x428   :  { %v13649_v16 = vld [vmem:[#allocation8 + $0xd8c] sm:$0xf]  ;;  %v10351_v6 = vor.u32 %v13585_v12, %v10348_v59  ;;  %7212 = vmatpush.bf16.msrb.mxu3 %v10095_v20  ;;  %v6960_v20 = vpop.f32.mrf.mxu3 }
 0x429   :  { %v10604_v61 = vld [vmem:[#allocation8 + $0xda8] sm:$0xf0] }
 0x42a   :  { %v13713_v17 = vld [vmem:[#allocation8 + $0xf8c] sm:$0xf]  ;;  %v10607_v18 = vor.u32 %v13649_v16, %v10604_v61  ;;  %7225 = vmatpush.bf16.msra.mxu2 %v10351_v6  ;;  %v6973_v6 = vpop.f32.mrf.mxu2 }
 0x42b   :  { %v10860_v19 = vld [vmem:[#allocation8 + $0xfa8] sm:$0xf0] }
 0x42c   :  { %v13513_v14 = vld [vmem:[#allocation8 + $0x94c] sm:$0xf]  ;;  %v10863_v23 = vor.u32 %v13713_v17, %v10860_v19  ;;  %7238 = vmatpush.bf16.msra.mxu0 %v10607_v18 }
 0x42d   :  { %v10060_v5 = vld [vmem:[#allocation8 + $0x968] sm:$0xf0] }
 0x42e   :  { %v13577_v24 = vld [vmem:[#allocation8 + $0xb4c] sm:$0xf]  ;;  %v10063_v33 = vor.u32 %v13513_v14, %v10060_v5  ;;  %7251 = vmatpush.bf16.msra.mxu1 %v10863_v23  ;;  %v6961_v23 = vadd.f32 %v6960_v20, %v1401_v2 }
 0x42f   :  { %v10316_v25 = vld [vmem:[#allocation8 + $0xb68] sm:$0xf0] }
 0x430   :  { %v13641_v26 = vld [vmem:[#allocation8 + $0xd4c] sm:$0xf]  ;;  %v10319_v35 = vor.u32 %v13577_v24, %v10316_v25  ;;  %7213 = vmatpush.bf16.msrb.mxu3 %v10063_v33 }
 0x431   :  { %v10572_v31 = vld [vmem:[#allocation8 + $0xd68] sm:$0xf0] }
 0x432   :  { %v13705_v32 = vld [vmem:[#allocation8 + $0xf4c] sm:$0xf]  ;;  %v10575_v27 = vor.u32 %v13641_v26, %v10572_v31  ;;  %7226 = vmatpush.bf16.msra.mxu2 %v10319_v35  ;;  %v6974_v31 = vadd.f32 %v6973_v6, %v6961_v23 }
 0x433   :  { %v10828_v8 = vld [vmem:[#allocation8 + $0xf68] sm:$0xf0] }
 0x434   :  { %v13505_v38 = vld [vmem:[#allocation8 + $0x90c] sm:$0xf]  ;;  %v10831_v21 = vor.u32 %v13705_v32, %v10828_v8  ;;  %7239 = vmatpush.bf16.msra.mxu0 %v10575_v27  ;;  %v6988_v32 = vpop.f32.mrf.mxu0  ;;  %v7001_v8 = vpop.f32.mrf.mxu1 }
 0x435   :  { %v10028_v39 = vld [vmem:[#allocation8 + $0x928] sm:$0xf0] }
 0x436   :  { %v13569_v29 = vld [vmem:[#allocation8 + $0xb0c] sm:$0xf]  ;;  %v10031_v62 = vor.u32 %v13505_v38, %v10028_v39  ;;  %7252 = vmatpush.bf16.msra.mxu1 %v10831_v21 }
 0x437   :  { %v10284_v34 = vld [vmem:[#allocation8 + $0xb28] sm:$0xf0] }
 0x438   :  { %v13633_v45 = vld [vmem:[#allocation8 + $0xd0c] sm:$0xf]  ;;  %v10287_v63 = vor.u32 %v13569_v29, %v10284_v34  ;;  %7214 = vmatpush.bf16.msrb.mxu3 %v10031_v62 }
 0x439   :  { %v10540_v46 = vld [vmem:[#allocation8 + $0xd28] sm:$0xf0] }
 0x43a   :  { %v13697_v22 = vld [vmem:[#allocation8 + $0xf0c] sm:$0xf]  ;;  %v10543_v7 = vor.u32 %v13633_v45, %v10540_v46  ;;  %7227 = vmatpush.bf16.msra.mxu2 %v10287_v63  ;;  %v6987_v46 = vadd.f32 %v6986_v50, %v6974_v31  ;;  %v6975_v50 = vpop.f32.mrf.mxu2 }
 0x43b   :  { %v10796_v30 = vld [vmem:[#allocation8 + $0xf28] sm:$0xf0] }
 0x43c   :  { %v13497_v28 = vld [vmem:[#allocation8 + $0x8cc] sm:$0xf]  ;;  %v10799_v56 = vor.u32 %v13697_v22, %v10796_v30  ;;  %7240 = vmatpush.bf16.msra.mxu0 %v10543_v7 }
 0x43d   :  { %v9996_v1 = vld [vmem:[#allocation8 + $0x8e8] sm:$0xf0] }
 0x43e   :  { %v13561_v4 = vld [vmem:[#allocation8 + $0xacc] sm:$0xf]  ;;  %v9999_v12 = vor.u32 %v13497_v28, %v9996_v1  ;;  %7253 = vmatpush.bf16.msra.mxu1 %v10799_v56 }
 0x43f   :  { %v10252_v0 = vld [vmem:[#allocation8 + $0xae8] sm:$0xf0] }
 0x440   :  { %v13625_v60 = vld [vmem:[#allocation8 + $0xccc] sm:$0xf]  ;;  %v10255_v59 = vor.u32 %v13561_v4, %v10252_v0  ;;  %7215 = vmatpush.bf16.msrb.mxu3 %v9999_v12  ;;  %v14750_v0 = vadd.f32 %v14747_v53, %v6987_v46 }
 0x441   :  { %v10508_v3 = vld [vmem:[#allocation8 + $0xce8] sm:$0xf0] }
 0x442   :  { %v13689_v9 = vld [vmem:[#allocation8 + $0xecc] sm:$0xf]  ;;  %v10511_v17 = vor.u32 %v13625_v60, %v10508_v3  ;;  %7228 = vmatpush.bf16.msra.mxu2 %v10255_v59 }
 0x443   :  { %v10764_v10 = vld [vmem:[#allocation8 + $0xee8] sm:$0xf0] }
 0x444   :  { %v13489_v16 = vld [vmem:[#allocation8 + $0x88c] sm:$0xf]  ;;  %v10767_v19 = vor.u32 %v13689_v9, %v10764_v10  ;;  %7241 = vmatpush.bf16.msra.mxu0 %v10511_v17  ;;  %v6962_v9 = vpop.f32.mrf.mxu3 }
 0x445   :  { %v9964_v61 = vld [vmem:[#allocation8 + $0x8a8] sm:$0xf0] }
 0x446   :  { %v13553_v14 = vld [vmem:[#allocation8 + $0xa8c] sm:$0xf]  ;;  %v9967_v33 = vor.u32 %v13489_v16, %v9964_v61  ;;  %7254 = vmatpush.bf16.msra.mxu1 %v10767_v19 }
 0x447   :  { %v10220_v5 = vld [vmem:[#allocation8 + $0xaa8] sm:$0xf0] }
 0x448   :  { %v13617_v18 = vld [vmem:[#allocation8 + $0xc8c] sm:$0xf]  ;;  %v10223_v35 = vor.u32 %v13553_v14, %v10220_v5  ;;  %7216 = vmatpush.bf16.msrb.mxu3 %v9967_v33 }
 0x449   :  { %v10476_v24 = vld [vmem:[#allocation8 + $0xca8] sm:$0xf0] }
 0x44a   :  { %v13681_v25 = vld [vmem:[#allocation8 + $0xe8c] sm:$0xf]  ;;  %v10479_v27 = vor.u32 %v13617_v18, %v10476_v24  ;;  %7229 = vmatpush.bf16.msra.mxu2 %v10223_v35 }
 0x44b   :  { %v10732_v26 = vld [vmem:[#allocation8 + $0xea8] sm:$0xf0] }
 0x44c   :  { %v13481_v38 = vld [vmem:[#allocation8 + $0x84c] sm:$0xf]  ;;  %v10735_v21 = vor.u32 %v13681_v25, %v10732_v26  ;;  %7242 = vmatpush.bf16.msra.mxu0 %v10479_v27 }
 0x44d   :  { %v9932_v39 = vld [vmem:[#allocation8 + $0x868] sm:$0xf0] }
 0x44e   :  { %v13545_v29 = vld [vmem:[#allocation8 + $0xa4c] sm:$0xf]  ;;  %v9935_v28 = vor.u32 %v13481_v38, %v9932_v39  ;;  %7255 = vmatpush.bf16.msra.mxu1 %v10735_v21 }
 0x44f   :  { %v10188_v34 = vld [vmem:[#allocation8 + $0xa68] sm:$0xf0] }
 0x450   :  { %v13609_v45 = vld [vmem:[#allocation8 + $0xc4c] sm:$0xf]  ;;  %v10191_v1 = vor.u32 %v13545_v29, %v10188_v34  ;;  %7217 = vmatpush.bf16.msrb.mxu3 %v9935_v28 }
 0x451   :  { %v10444_v22 = vld [vmem:[#allocation8 + $0xc68] sm:$0xf0] }
 0x452   :  { %v13673_v30 = vld [vmem:[#allocation8 + $0xe4c] sm:$0xf]  ;;  %v10447_v60 = vor.u32 %v13609_v45, %v10444_v22  ;;  %7230 = vmatpush.bf16.msra.mxu2 %v10191_v1 }
 0x453   :  { %v10700_v62 = vld [vmem:[#allocation8 + $0xe68] sm:$0xf0] }
 0x454   :  { %v13473_v63 = vld [vmem:[#allocation8 + $0x80c] sm:$0xf]  ;;  %v10703_v3 = vor.u32 %v13673_v30, %v10700_v62  ;;  %7243 = vmatpush.bf16.msra.mxu0 %v10447_v60 }
 0x455   :  { %v9900_v4 = vld [vmem:[#allocation8 + $0x828] sm:$0xf0] }
 0x456   :  { %v13537_v7 = vld [vmem:[#allocation8 + $0xa0c] sm:$0xf]  ;;  %v9903_v20 = vor.u32 %v13473_v63, %v9900_v4  ;;  %7256 = vmatpush.bf16.msra.mxu1 %v10703_v3 }
 0x457   :  { %v10156_v56 = vld [vmem:[#allocation8 + $0xa28] sm:$0xf0] }
 0x458   :  { %v13601_v10 = vld [vmem:[#allocation8 + $0xc0c] sm:$0xf]  ;;  %v10159_v53 = vor.u32 %v13537_v7, %v10156_v56  ;;  %7218 = vmatpush.bf16.msrb.mxu3 %v9903_v20 }
 0x459   :  { %v10412_v11 = vld [vmem:[#allocation8 + $0xc28] sm:$0xf0] }
 0x45a   :  { %v13665_v2 = vld [vmem:[#allocation8 + $0xe0c] sm:$0xf]  ;;  %v10415_v18 = vor.u32 %v13601_v10, %v10412_v11  ;;  %7231 = vmatpush.bf16.msra.mxu2 %v10159_v53 }
 0x45b   :  { %v10668_v12 = vld [vmem:[#allocation8 + $0xe28] sm:$0xf0]  ;;  %7219 = vmatmul.bf16.vlgmr.msrb.gmra.mxu3 %v14643_v36 }
 0x45c   :  { %v13785_v59 = vld [vmem:[#allocation8 + $0x11cc] sm:$0xf]  ;;  %v10671_v23 = vor.u32 %v13665_v2, %v10668_v12  ;;  %7244 = vmatpush.bf16.msra.mxu0 %v10415_v18 }
 0x45d   :  { %v11148_v16 = vld [vmem:[#allocation8 + $0x11e8] sm:$0xf0]  ;;  %7232 = vmatmul.bf16.vlgmr.msra.gmra.mxu2 %v14647_v37 }
 0x45e   :  { %v13849_v61 = vld [vmem:[#allocation8 + $0x13cc] sm:$0xf]  ;;  %v11151_v24 = vor.u32 %v13785_v59, %v11148_v16  ;;  %7257 = vmatpush.bf16.msra.mxu1 %v10671_v23 }
 0x45f   :  { %v11404_v17 = vld [vmem:[#allocation8 + $0x13e8] sm:$0xf0]  ;;  %7245 = vmatmul.bf16.vlgmr.msra.gmra.mxu0 %v14651_v41 }
 0x460   :  { %v13913_v19 = vld [vmem:[#allocation8 + $0x15cc] sm:$0xf]  ;;  %v11407_v25 = vor.u32 %v13849_v61, %v11404_v17  ;;  %7263 = vmatpush.bf16.msra.mxu3 %v11151_v24  ;;  %v7038_v17 = vpop.f32.mrf.mxu0 }
 0x461   :  { %v11660_v6 = vld [vmem:[#allocation8 + $0x15e8] sm:$0xf0]  ;;  %7258 = vmatmul.bf16.vlgmr.msra.gmra.mxu1 %v14655_v42 }
 0x462   :  { %v13977_v14 = vld [vmem:[#allocation8 + $0x17cc] sm:$0xf]  ;;  %v11663_v32 = vor.u32 %v13913_v19, %v11660_v6  ;;  %7276 = vmatpush.bf16.msrb.mxu2 %v11407_v25  ;;  %v7051_v19 = vpop.f32.mrf.mxu1 }
 0x463   :  { %v11916_v5 = vld [vmem:[#allocation8 + $0x17e8] sm:$0xf0] }
 0x464   :  { %v13777_v26 = vld [vmem:[#allocation8 + $0x118c] sm:$0xf]  ;;  %v11919_v8 = vor.u32 %v13977_v14, %v11916_v5  ;;  %7289 = vmatpush.bf16.msrb.mxu0 %v11663_v32 }
 0x465   :  { %v11116_v31 = vld [vmem:[#allocation8 + $0x11a8] sm:$0xf0] }
 0x466   :  { %v13841_v33 = vld [vmem:[#allocation8 + $0x138c] sm:$0xf]  ;;  %v11119_v29 = vor.u32 %v13777_v26, %v11116_v31  ;;  %7302 = vmatpush.bf16.msrb.mxu1 %v11919_v8 }
 0x467   :  { %v11372_v35 = vld [vmem:[#allocation8 + $0x13a8] sm:$0xf0] }
 0x468   :  { %v13905_v38 = vld [vmem:[#allocation8 + $0x158c] sm:$0xf]  ;;  %v11375_v34 = vor.u32 %v13841_v33, %v11372_v35  ;;  %7264 = vmatpush.bf16.msra.mxu3 %v11119_v29  ;;  %v7025_v29 = vpop.f32.mrf.mxu2 }
 0x469   :  { %v11628_v39 = vld [vmem:[#allocation8 + $0x15a8] sm:$0xf0] }
 0x46a   :  { %v13969_v27 = vld [vmem:[#allocation8 + $0x178c] sm:$0xf]  ;;  %v11631_v22 = vor.u32 %v13905_v38, %v11628_v39  ;;  %7277 = vmatpush.bf16.msrb.mxu2 %v11375_v34 }
 0x46b   :  { %v11884_v21 = vld [vmem:[#allocation8 + $0x17a8] sm:$0xf0] }
 0x46c   :  { %v13769_v45 = vld [vmem:[#allocation8 + $0x114c] sm:$0xf]  ;;  %v11887_v30 = vor.u32 %v13969_v27, %v11884_v21  ;;  %7290 = vmatpush.bf16.msrb.mxu0 %v11631_v22  ;;  %v7012_v21 = vpop.f32.mrf.mxu3 }
 0x46d   :  { %v11084_v46 = vld [vmem:[#allocation8 + $0x1168] sm:$0xf0]  ;;  %v7013_v22 = vadd.f32 %v7012_v21, %v14750_v0 }
 0x46e   :  { %v13833_v62 = vld [vmem:[#allocation8 + $0x134c] sm:$0xf]  ;;  %v11087_v56 = vor.u32 %v13769_v45, %v11084_v46  ;;  %7303 = vmatpush.bf16.msrb.mxu1 %v11887_v30 }
 0x46f   :  { %v11340_v63 = vld [vmem:[#allocation8 + $0x1368] sm:$0xf0] }
 0x470   :  { %v13897_v28 = vld [vmem:[#allocation8 + $0x154c] sm:$0xf]  ;;  %v11343_v60 = vor.u32 %v13833_v62, %v11340_v63  ;;  %7265 = vmatpush.bf16.msra.mxu3 %v11087_v56 }
 0x471   :  { %v11596_v1 = vld [vmem:[#allocation8 + $0x1568] sm:$0xf0] }
 0x472   :  { %v13961_v4 = vld [vmem:[#allocation8 + $0x174c] sm:$0xf]  ;;  %v11599_v50 = vor.u32 %v13897_v28, %v11596_v1  ;;  %7278 = vmatpush.bf16.msrb.mxu2 %v11343_v60  ;;  %v7026_v28 = vadd.f32 %v7025_v29, %v7013_v22  ;;  %v7040_v1 = vpop.f32.mrf.mxu0 }
 0x473   :  { %v11852_v7 = vld [vmem:[#allocation8 + $0x1768] sm:$0xf0] }
 0x474   :  { %v13761_v3 = vld [vmem:[#allocation8 + $0x110c] sm:$0xf]  ;;  %v11855_v10 = vor.u32 %v13961_v4, %v11852_v7  ;;  %7291 = vmatpush.bf16.msrb.mxu0 %v11599_v50  ;;  %v7053_v4 = vpop.f32.mrf.mxu1  ;;  %v7039_v0 = vadd.f32 %v7038_v17, %v7026_v28 }
 0x475   :  { %v11052_v9 = vld [vmem:[#allocation8 + $0x1128] sm:$0xf0] }
 0x476   :  { %v13825_v11 = vld [vmem:[#allocation8 + $0x130c] sm:$0xf]  ;;  %v11055_v20 = vor.u32 %v13761_v3, %v11052_v9  ;;  %7304 = vmatpush.bf16.msrb.mxu1 %v11855_v10 }
 0x477   :  { %v11308_v2 = vld [vmem:[#allocation8 + $0x1328] sm:$0xf0] }
 0x478   :  { %v13889_v12 = vld [vmem:[#allocation8 + $0x150c] sm:$0xf]  ;;  %v11311_v53 = vor.u32 %v13825_v11, %v11308_v2  ;;  %7266 = vmatpush.bf16.msra.mxu3 %v11055_v20 }
 0x479   :  { %v11564_v59 = vld [vmem:[#allocation8 + $0x1528] sm:$0xf0] }
 0x47a   :  { %v13953_v16 = vld [vmem:[#allocation8 + $0x170c] sm:$0xf]  ;;  %v11567_v5 = vor.u32 %v13889_v12, %v11564_v59  ;;  %7279 = vmatpush.bf16.msrb.mxu2 %v11311_v53 }
 0x47b   :  { %v11820_v61 = vld [vmem:[#allocation8 + $0x1728] sm:$0xf0] }
 0x47c   :  { %v13753_v6 = vld [vmem:[#allocation8 + $0x10cc] sm:$0xf]  ;;  %v11823_v18 = vor.u32 %v13953_v16, %v11820_v61  ;;  %7292 = vmatpush.bf16.msrb.mxu0 %v11567_v5 }
 0x47d   :  { %v11020_v14 = vld [vmem:[#allocation8 + $0x10e8] sm:$0xf0] }
 0x47e   :  { %v13817_v23 = vld [vmem:[#allocation8 + $0x12cc] sm:$0xf]  ;;  %v11023_v8 = vor.u32 %v13753_v6, %v11020_v14  ;;  %7305 = vmatpush.bf16.msrb.mxu1 %v11823_v18  ;;  %v14757_v18 = vadd.f32 %v7051_v19, %v7039_v0 }
 0x47f   :  { %v11276_v24 = vld [vmem:[#allocation8 + $0x12e8] sm:$0xf0] }
 0x480   :  { %v13881_v25 = vld [vmem:[#allocation8 + $0x14cc] sm:$0xf]  ;;  %v11279_v33 = vor.u32 %v13817_v23, %v11276_v24  ;;  %7267 = vmatpush.bf16.msra.mxu3 %v11023_v8 }
 0x481   :  { %v11532_v26 = vld [vmem:[#allocation8 + $0x14e8] sm:$0xf0] }
 0x482   :  { %v13945_v31 = vld [vmem:[#allocation8 + $0x16cc] sm:$0xf]  ;;  %v11535_v39 = vor.u32 %v13881_v25, %v11532_v26  ;;  %7280 = vmatpush.bf16.msrb.mxu2 %v11279_v33  ;;  %v7014_v25 = vpop.f32.mrf.mxu3  ;;  %v7027_v26 = vpop.f32.mrf.mxu2 }
 0x483   :  { %v11788_v32 = vld [vmem:[#allocation8 + $0x16e8] sm:$0xf0] }
 0x484   :  { %v13745_v35 = vld [vmem:[#allocation8 + $0x108c] sm:$0xf]  ;;  %v11791_v27 = vor.u32 %v13945_v31, %v11788_v32  ;;  %7293 = vmatpush.bf16.msrb.mxu0 %v11535_v39 }
 0x485   :  { %v10988_v38 = vld [vmem:[#allocation8 + $0x10a8] sm:$0xf0] }
 0x486   :  { %v13809_v34 = vld [vmem:[#allocation8 + $0x128c] sm:$0xf]  ;;  %v10991_v7 = vor.u32 %v13745_v35, %v10988_v38  ;;  %7306 = vmatpush.bf16.msrb.mxu1 %v11791_v27 }
 0x487   :  { %v11244_v45 = vld [vmem:[#allocation8 + $0x12a8] sm:$0xf0] }
 0x488   :  { %v13873_v46 = vld [vmem:[#allocation8 + $0x148c] sm:$0xf]  ;;  %v11247_v56 = vor.u32 %v13809_v34, %v11244_v45  ;;  %7268 = vmatpush.bf16.msra.mxu3 %v10991_v7 }
 0x489   :  { %v11500_v30 = vld [vmem:[#allocation8 + $0x14a8] sm:$0xf0] }
 0x48a   :  { %v13937_v62 = vld [vmem:[#allocation8 + $0x168c] sm:$0xf]  ;;  %v11503_v9 = vor.u32 %v13873_v46, %v11500_v30  ;;  %7281 = vmatpush.bf16.msrb.mxu2 %v11247_v56 }
 0x48b   :  { %v11756_v63 = vld [vmem:[#allocation8 + $0x16a8] sm:$0xf0] }
 0x48c   :  { %v13737_v60 = vld [vmem:[#allocation8 + $0x104c] sm:$0xf]  ;;  %v11759_v50 = vor.u32 %v13937_v62, %v11756_v63  ;;  %7294 = vmatpush.bf16.msrb.mxu0 %v11503_v9 }
 0x48d   :  { %v10956_v3 = vld [vmem:[#allocation8 + $0x1068] sm:$0xf0] }
 0x48e   :  { %v13801_v10 = vld [vmem:[#allocation8 + $0x124c] sm:$0xf]  ;;  %v10959_v20 = vor.u32 %v13737_v60, %v10956_v3  ;;  %7307 = vmatpush.bf16.msrb.mxu1 %v11759_v50 }
 0x48f   :  { %v11212_v11 = vld [vmem:[#allocation8 + $0x1268] sm:$0xf0] }
 0x490   :  { %v13865_v2 = vld [vmem:[#allocation8 + $0x144c] sm:$0xf]  ;;  %v11215_v53 = vor.u32 %v13801_v10, %v11212_v11  ;;  %7269 = vmatpush.bf16.msra.mxu3 %v10959_v20 }
 0x491   :  { %v11468_v12 = vld [vmem:[#allocation8 + $0x1468] sm:$0xf0] }
 0x492   :  { %v13929_v59 = vld [vmem:[#allocation8 + $0x164c] sm:$0xf]  ;;  %v11471_v23 = vor.u32 %v13865_v2, %v11468_v12  ;;  %7282 = vmatpush.bf16.msrb.mxu2 %v11215_v53 }
 0x493   :  { %v11724_v16 = vld [vmem:[#allocation8 + $0x1668] sm:$0xf0] }
 0x494   :  { %v13729_v61 = vld [vmem:[#allocation8 + $0x100c] sm:$0xf]  ;;  %v11727_v24 = vor.u32 %v13929_v59, %v11724_v16  ;;  %7295 = vmatpush.bf16.msrb.mxu0 %v11471_v23 }
 0x495   :  { %v10924_v6 = vld [vmem:[#allocation8 + $0x1028] sm:$0xf0] }
 0x496   :  { %v13793_v14 = vld [vmem:[#allocation8 + $0x120c] sm:$0xf]  ;;  %v10927_v21 = vor.u32 %v13729_v61, %v10924_v6  ;;  %7308 = vmatpush.bf16.msrb.mxu1 %v11727_v24 }
 0x497   :  { %v11180_v5 = vld [vmem:[#allocation8 + $0x1228] sm:$0xf0] }
 0x498   :  { %v13857_v17 = vld [vmem:[#allocation8 + $0x140c] sm:$0xf]  ;;  %v11183_v19 = vor.u32 %v13793_v14, %v11180_v5  ;;  %7270 = vmatpush.bf16.msra.mxu3 %v10927_v21 }
 0x499   :  { %v11436_v31 = vld [vmem:[#allocation8 + $0x1428] sm:$0xf0] }
 0x49a   :  { %v13921_v32 = vld [vmem:[#allocation8 + $0x160c] sm:$0xf]  ;;  %v11439_v46 = vor.u32 %v13857_v17, %v11436_v31  ;;  %7283 = vmatpush.bf16.msrb.mxu2 %v11183_v19 }
 0x49b   :  { %v11692_v8 = vld [vmem:[#allocation8 + $0x1628] sm:$0xf0]  ;;  %7271 = vmatmul.bf16.vlgmr.msra.gmra.mxu3 %v14661_v51 }
 0x49c   :  { %v14041_v33 = vld [vmem:[#allocation8 + $0x19cc] sm:$0xf]  ;;  %v11695_v22 = vor.u32 %v13921_v32, %v11692_v8  ;;  %7296 = vmatpush.bf16.msrb.mxu0 %v11439_v46 }
 0x49d   :  { %v12172_v35 = vld [vmem:[#allocation8 + $0x19e8] sm:$0xf0]  ;;  %7284 = vmatmul.bf16.vlgmr.msrb.gmra.mxu2 %v14663_v52 }
 0x49e   :  { %v14105_v38 = vld [vmem:[#allocation8 + $0x1bcc] sm:$0xf]  ;;  %v12175_v30 = vor.u32 %v14041_v33, %v12172_v35  ;;  %7309 = vmatpush.bf16.msrb.mxu1 %v11695_v22 }
 0x49f   :  { %v12428_v39 = vld [vmem:[#allocation8 + $0x1be8] sm:$0xf0]  ;;  %7297 = vmatmul.bf16.vlgmr.msrb.gmra.mxu0 %v14665_v57 }
 0x4a0   :  { %v14169_v27 = vld [vmem:[#allocation8 + $0x1dcc] sm:$0xf]  ;;  %v12431_v62 = vor.u32 %v14105_v38, %v12428_v39  ;;  %7315 = vmatpush.bf16.msrb.mxu3 %v12175_v30  ;;  %v7090_v39 = vpop.f32.mrf.mxu0 }
 0x4a1   :  { %v12684_v29 = vld [vmem:[#allocation8 + $0x1de8] sm:$0xf0]  ;;  %7310 = vmatmul.bf16.vlgmr.msrb.gmra.mxu1 %v14667_v58 }
 0x4a2   :  { %v14233_v34 = vld [vmem:[#allocation8 + $0x1fcc] sm:$0xf]  ;;  %v12687_v1 = vor.u32 %v14169_v27, %v12684_v29  ;;  %7328 = vmatpush.bf16.msra.mxu2 %v12431_v62  ;;  %v7103_v27 = vpop.f32.mrf.mxu1 }
 0x4a3   :  { %v12940_v45 = vld [vmem:[#allocation8 + $0x1fe8] sm:$0xf0] }
 0x4a4   :  { %v14033_v63 = vld [vmem:[#allocation8 + $0x198c] sm:$0xf]  ;;  %v12943_v4 = vor.u32 %v14233_v34, %v12940_v45  ;;  %7341 = vmatpush.bf16.msra.mxu0 %v12687_v1 }
 0x4a5   :  { %v12140_v28 = vld [vmem:[#allocation8 + $0x19a8] sm:$0xf0] }
 0x4a6   :  { %v14097_v7 = vld [vmem:[#allocation8 + $0x1b8c] sm:$0xf]  ;;  %v12143_v10 = vor.u32 %v14033_v63, %v12140_v28  ;;  %7354 = vmatpush.bf16.msra.mxu1 %v12943_v4 }
 0x4a7   :  { %v12396_v56 = vld [vmem:[#allocation8 + $0x1ba8] sm:$0xf0] }
 0x4a8   :  { %v14161_v60 = vld [vmem:[#allocation8 + $0x1d8c] sm:$0xf]  ;;  %v12399_v11 = vor.u32 %v14097_v7, %v12396_v56  ;;  %7316 = vmatpush.bf16.msrb.mxu3 %v12143_v10  ;;  %v7077_v10 = vpop.f32.mrf.mxu2 }
 0x4a9   :  { %v12652_v3 = vld [vmem:[#allocation8 + $0x1da8] sm:$0xf0] }
 0x4aa   :  { %v14225_v9 = vld [vmem:[#allocation8 + $0x1f8c] sm:$0xf]  ;;  %v12655_v12 = vor.u32 %v14161_v60, %v12652_v3  ;;  %7329 = vmatpush.bf16.msra.mxu2 %v12399_v11 }
 0x4ab   :  { %v12908_v50 = vld [vmem:[#allocation8 + $0x1fa8] sm:$0xf0] }
 0x4ac   :  { %v14025_v2 = vld [vmem:[#allocation8 + $0x194c] sm:$0xf]  ;;  %v12911_v59 = vor.u32 %v14225_v9, %v12908_v50  ;;  %7342 = vmatpush.bf16.msra.mxu0 %v12655_v12  ;;  %v7064_v50 = vpop.f32.mrf.mxu3 }
 0x4ad   :  { %v12108_v0 = vld [vmem:[#allocation8 + $0x1968] sm:$0xf0]  ;;  %v7065_v12 = vadd.f32 %v7064_v50, %v14757_v18 }
 0x4ae   :  { %v14089_v16 = vld [vmem:[#allocation8 + $0x1b4c] sm:$0xf]  ;;  %v12111_v5 = vor.u32 %v14025_v2, %v12108_v0  ;;  %7355 = vmatpush.bf16.msra.mxu1 %v12911_v59 }
 0x4af   :  { %v12364_v61 = vld [vmem:[#allocation8 + $0x1b68] sm:$0xf0] }
 0x4b0   :  { %v14153_v20 = vld [vmem:[#allocation8 + $0x1d4c] sm:$0xf]  ;;  %v12367_v23 = vor.u32 %v14089_v16, %v12364_v61  ;;  %7317 = vmatpush.bf16.msrb.mxu3 %v12111_v5 }
 0x4b1   :  { %v12620_v53 = vld [vmem:[#allocation8 + $0x1d68] sm:$0xf0] }
 0x4b2   :  { %v14217_v6 = vld [vmem:[#allocation8 + $0x1f4c] sm:$0xf]  ;;  %v12623_v26 = vor.u32 %v14153_v20, %v12620_v53  ;;  %7330 = vmatpush.bf16.msra.mxu2 %v12367_v23  ;;  %v7078_v20 = vadd.f32 %v7077_v10, %v7065_v12  ;;  %v7092_v53 = vpop.f32.mrf.mxu0  ;;  %v13406_v10 = vld [vmem:[#allocation8 + $0x5ec] sm:$0xf0] }
 0x4b3   :  { %v12876_v14 = vld [vmem:[#allocation8 + $0x1f68] sm:$0xf0] }
 0x4b4   :  { %v14017_v24 = vld [vmem:[#allocation8 + $0x190c] sm:$0xf]  ;;  %v12879_v17 = vor.u32 %v14217_v6, %v12876_v14  ;;  %7343 = vmatpush.bf16.msra.mxu0 %v12623_v26  ;;  %v7105_v6 = vpop.f32.mrf.mxu1  ;;  %v7091_v18 = vadd.f32 %v7090_v39, %v7078_v20  ;;  %v13270_v20 = vld [vmem:[#allocation8 + $0x1ac] sm:$0xf0] }
 0x4b5   :  { %v12076_v25 = vld [vmem:[#allocation8 + $0x1928] sm:$0xf0] }
 0x4b6   :  { %v14081_v31 = vld [vmem:[#allocation8 + $0x1b0c] sm:$0xf]  ;;  %v12079_v21 = vor.u32 %v14017_v24, %v12076_v25  ;;  %7356 = vmatpush.bf16.msra.mxu1 %v12879_v17 }
 0x4b7   :  { %v12332_v32 = vld [vmem:[#allocation8 + $0x1b28] sm:$0xf0] }
 0x4b8   :  { %v14145_v8 = vld [vmem:[#allocation8 + $0x1d0c] sm:$0xf]  ;;  %v12335_v19 = vor.u32 %v14081_v31, %v12332_v32  ;;  %7318 = vmatpush.bf16.msrb.mxu3 %v12079_v21 }
 0x4b9   :  { %v12588_v33 = vld [vmem:[#allocation8 + $0x1d28] sm:$0xf0] }
 0x4ba   :  { %v14209_v35 = vld [vmem:[#allocation8 + $0x1f0c] sm:$0xf]  ;;  %v12591_v45 = vor.u32 %v14145_v8, %v12588_v33  ;;  %7331 = vmatpush.bf16.msra.mxu2 %v12335_v19 }
 0x4bb   :  { %v12844_v38 = vld [vmem:[#allocation8 + $0x1f28] sm:$0xf0] }
 0x4bc   :  { %v14009_v29 = vld [vmem:[#allocation8 + $0x18cc] sm:$0xf]  ;;  %v12847_v46 = vor.u32 %v14209_v35, %v12844_v38  ;;  %7344 = vmatpush.bf16.msra.mxu0 %v12591_v45 }
 0x4bd   :  { %v12044_v34 = vld [vmem:[#allocation8 + $0x18e8] sm:$0xf0] }
 0x4be   :  { %v14073_v22 = vld [vmem:[#allocation8 + $0x1acc] sm:$0xf]  ;;  %v12047_v4 = vor.u32 %v14009_v29, %v12044_v34  ;;  %7357 = vmatpush.bf16.msra.mxu1 %v12847_v46  ;;  %v14764_v46 = vadd.f32 %v7103_v27, %v7091_v18  ;;  %v13262_v18 = vld [vmem:[#allocation8 + $0x16c] sm:$0xf0] }
 0x4bf   :  { %v12300_v30 = vld [vmem:[#allocation8 + $0x1ae8] sm:$0xf0] }
 0x4c0   :  { %v14137_v62 = vld [vmem:[#allocation8 + $0x1ccc] sm:$0xf]  ;;  %v12303_v7 = vor.u32 %v14073_v22, %v12300_v30  ;;  %7319 = vmatpush.bf16.msrb.mxu3 %v12047_v4 }
 0x4c1   :  { %v12556_v63 = vld [vmem:[#allocation8 + $0x1ce8] sm:$0xf0] }
 0x4c2   :  { %v14201_v28 = vld [vmem:[#allocation8 + $0x1ecc] sm:$0xf]  ;;  %v12559_v3 = vor.u32 %v14137_v62, %v12556_v63  ;;  %7332 = vmatpush.bf16.msra.mxu2 %v12303_v7  ;;  %v7066_v62 = vpop.f32.mrf.mxu3  ;;  %v7079_v63 = vpop.f32.mrf.mxu2  ;;  %v9106_v7 = vld [vmem:[#allocation8 + $0x1d0] sm:$0xf] }
 0x4c3   :  { %v12812_v1 = vld [vmem:[#allocation8 + $0x1ee8] sm:$0xf0]  ;;  %v13254_v62 = vld [vmem:[#allocation8 + $0x12c] sm:$0xf0] }
 0x4c4   :  { %v14001_v56 = vld [vmem:[#allocation8 + $0x188c] sm:$0xf]  ;;  %v12815_v9 = vor.u32 %v14201_v28, %v12812_v1  ;;  %7345 = vmatpush.bf16.msra.mxu0 %v12559_v3  ;;  %v13342_v3 = vld [vmem:[#allocation8 + $0x3ec] sm:$0xf0] }
 0x4c5   :  { %v12012_v60 = vld [vmem:[#allocation8 + $0x18a8] sm:$0xf0] }
 0x4c6   :  { %v14065_v11 = vld [vmem:[#allocation8 + $0x1a8c] sm:$0xf]  ;;  %v12015_v14 = vor.u32 %v14001_v56, %v12012_v60  ;;  %7358 = vmatpush.bf16.msra.mxu1 %v12815_v9  ;;  %v13278_v56 = vld [vmem:[#allocation8 + $0x1ec] sm:$0xf0] }
 0x4c7   :  { %v12268_v2 = vld [vmem:[#allocation8 + $0x1aa8] sm:$0xf0]  ;;  %v9362_v60 = vld [vmem:[#allocation8 + $0x3d0] sm:$0xf] }
 0x4c8   :  { %v14129_v0 = vld [vmem:[#allocation8 + $0x1c8c] sm:$0xf]  ;;  %v12271_v5 = vor.u32 %v14065_v11, %v12268_v2  ;;  %7320 = vmatpush.bf16.msrb.mxu3 %v12015_v14  ;;  %v9618_v9 = vld [vmem:[#allocation8 + $0x5d0] sm:$0xf] }
 0x4c9   :  { %v12524_v59 = vld [vmem:[#allocation8 + $0x1ca8] sm:$0xf0]  ;;  %v9874_v11 = vld [vmem:[#allocation8 + $0x7d0] sm:$0xf]  ;;  %v9619_v53 = vor.u32 %v13406_v10, %v9618_v9  ;;  %v7155_v9 = vpop.f32.mrf.mxu1 }
 0x4ca   :  { %v14193_v16 = vld [vmem:[#allocation8 + $0x1e8c] sm:$0xf]  ;;  %v12527_v25 = vor.u32 %v14129_v0, %v12524_v59  ;;  %7333 = vmatpush.bf16.msra.mxu2 %v12271_v5  ;;  %v13470_v2 = vld [vmem:[#allocation8 + $0x7ec] sm:$0xf0]  ;;  %v9107_v59 = vor.u32 %v13278_v56, %v9106_v7 }
 0x4cb   :  { %v12780_v61 = vld [vmem:[#allocation8 + $0x1ea8] sm:$0xf0]  ;;  %v9875_v6 = vor.u32 %v13470_v2, %v9874_v11  ;;  %v9330_v14 = vld [vmem:[#allocation8 + $0x390] sm:$0xf] }
 0x4cc   :  { %v13993_v23 = vld [vmem:[#allocation8 + $0x184c] sm:$0xf]  ;;  %v12783_v26 = vor.u32 %v14193_v16, %v12780_v61  ;;  %7346 = vmatpush.bf16.msra.mxu0 %v12527_v25  ;;  %v9363_v16 = vor.u32 %v13342_v3, %v9362_v60  ;;  %v9074_v61 = vld [vmem:[#allocation8 + $0x190] sm:$0xf]  ;;  %v7142_v3 = vpop.f32.mrf.mxu0 }
 0x4cd   :  { %v11980_v24 = vld [vmem:[#allocation8 + $0x1868] sm:$0xf0]  ;;  %v13334_v5 = vld [vmem:[#allocation8 + $0x3ac] sm:$0xf0] }
 0x4ce   :  { %v14057_v17 = vld [vmem:[#allocation8 + $0x1a4c] sm:$0xf]  ;;  %v11983_v21 = vor.u32 %v13993_v23, %v11980_v24  ;;  %7359 = vmatpush.bf16.msra.mxu1 %v12783_v26  ;;  %v9586_v23 = vld [vmem:[#allocation8 + $0x590] sm:$0xf] }
 0x4cf   :  { %v12236_v31 = vld [vmem:[#allocation8 + $0x1a68] sm:$0xf0]  ;;  %v13398_v24 = vld [vmem:[#allocation8 + $0x5ac] sm:$0xf0] }
 0x4d0   :  { %v14121_v32 = vld [vmem:[#allocation8 + $0x1c4c] sm:$0xf]  ;;  %v12239_v19 = vor.u32 %v14057_v17, %v12236_v31  ;;  %7321 = vmatpush.bf16.msrb.mxu3 %v11983_v21  ;;  %v9842_v25 = vld [vmem:[#allocation8 + $0x790] sm:$0xf]  ;;  %v9075_v17 = vor.u32 %v13270_v20, %v9074_v61  ;;  %v9331_v31 = vor.u32 %v13334_v5, %v9330_v14 }
 0x4d1   :  { %v12492_v8 = vld [vmem:[#allocation8 + $0x1c68] sm:$0xf0]  ;;  %v13462_v26 = vld [vmem:[#allocation8 + $0x7ac] sm:$0xf0] }
 0x4d2   :  { %v14185_v33 = vld [vmem:[#allocation8 + $0x1e4c] sm:$0xf]  ;;  %v12495_v22 = vor.u32 %v14121_v32, %v12492_v8  ;;  %7334 = vmatpush.bf16.msra.mxu2 %v12239_v19  ;;  %v9042_v32 = vld [vmem:[#allocation8 + $0x150] sm:$0xf]  ;;  %v9587_v8 = vor.u32 %v13398_v24, %v9586_v23 }
 0x4d3   :  { %v12748_v35 = vld [vmem:[#allocation8 + $0x1e68] sm:$0xf0]  ;;  %v9554_v21 = vld [vmem:[#allocation8 + $0x550] sm:$0xf] }
 0x4d4   :  { %v13985_v38 = vld [vmem:[#allocation8 + $0x180c] sm:$0xf]  ;;  %v12751_v30 = vor.u32 %v14185_v33, %v12748_v35  ;;  %7347 = vmatpush.bf16.msra.mxu0 %v12495_v22  ;;  %v9843_v33 = vor.u32 %v13462_v26, %v9842_v25  ;;  %v9298_v35 = vld [vmem:[#allocation8 + $0x350] sm:$0xf]  ;;  %v7116_v26 = vpop.f32.mrf.mxu3 }
 0x4d5   :  { %v11948_v29 = vld [vmem:[#allocation8 + $0x1828] sm:$0xf0]  ;;  %v13390_v19 = vld [vmem:[#allocation8 + $0x56c] sm:$0xf0] }
 0x4d6   :  { %v14049_v34 = vld [vmem:[#allocation8 + $0x1a0c] sm:$0xf]  ;;  %v11951_v50 = vor.u32 %v13985_v38, %v11948_v29  ;;  %7360 = vmatpush.bf16.msra.mxu1 %v12751_v30  ;;  %v13326_v38 = vld [vmem:[#allocation8 + $0x36c] sm:$0xf0]  ;;  %v9555_v63 = vor.u32 %v13390_v19, %v9554_v21  ;;  %v7144_v19 = vpop.f32.mrf.mxu0 }
 0x4d7   :  { %v12204_v45 = vld [vmem:[#allocation8 + $0x1a28] sm:$0xf0]  ;;  %v9810_v29 = vld [vmem:[#allocation8 + $0x750] sm:$0xf]  ;;  %v9299_v22 = vor.u32 %v13326_v38, %v9298_v35 }
 0x4d8   :  { %v14113_v39 = vld [vmem:[#allocation8 + $0x1c0c] sm:$0xf]  ;;  %v12207_v27 = vor.u32 %v14049_v34, %v12204_v45  ;;  %7322 = vmatpush.bf16.msrb.mxu3 %v11951_v50  ;;  %v13454_v34 = vld [vmem:[#allocation8 + $0x76c] sm:$0xf0]  ;;  %v9043_v45 = vor.u32 %v13262_v18, %v9042_v32 }
 0x4d9   :  { %v12460_v28 = vld [vmem:[#allocation8 + $0x1c28] sm:$0xf0]  ;;  %v9010_v30 = vld [vmem:[#allocation8 + $0x110] sm:$0xf] }
 0x4da   :  { %v14177_v1 = vld [vmem:[#allocation8 + $0x1e0c] sm:$0xf]  ;;  %v12463_v0 = vor.u32 %v14113_v39, %v12460_v28  ;;  %7335 = vmatpush.bf16.msra.mxu2 %v12207_v27  ;;  %v9811_v39 = vor.u32 %v13454_v34, %v9810_v29  ;;  %v9266_v28 = vld [vmem:[#allocation8 + $0x310] sm:$0xf]  ;;  %v9011_v50 = vor.u32 %v13254_v62, %v9010_v30  ;;  %v7157_v29 = vpop.f32.mrf.mxu1 }
 0x4db   :  { %v12716_v4 = vld [vmem:[#allocation8 + $0x1e28] sm:$0xf0]  ;;  %7323 = vmatmul.bf16.vlgmr.msrb.gmra.mxu3 %v14673_v40  ;;  %v13382_v7 = vld [vmem:[#allocation8 + $0x52c] sm:$0xf0] }
 0x4dc   :  { %v12719_v12 = vor.u32 %v14177_v1, %v12716_v4  ;;  %7348 = vmatpush.bf16.msra.mxu0 %v12463_v0  ;;  %7367 = vmatpush.bf16.msra.mxu3 %v9107_v59  ;;  %v13318_v1 = vld [vmem:[#allocation8 + $0x32c] sm:$0xf0] }
 0x4dd   :  { %7336 = vmatmul.bf16.vlgmr.msra.gmra.mxu2 %v14675_v43  ;;  %v9522_v4 = vld [vmem:[#allocation8 + $0x510] sm:$0xf]  ;;  %v9267_v27 = vor.u32 %v13318_v1, %v9266_v28 }
 0x4de   :  { %7361 = vmatpush.bf16.msra.mxu1 %v12719_v12  ;;  %7380 = vmatpush.bf16.msrb.mxu2 %v9363_v16  ;;  %v9778_v56 = vld [vmem:[#allocation8 + $0x710] sm:$0xf]  ;;  %v9523_v2 = vor.u32 %v13382_v7, %v9522_v4 }
 0x4df   :  { %7349 = vmatmul.bf16.vlgmr.msra.gmra.mxu0 %v14677_v44  ;;  %v13446_v60 = vld [vmem:[#allocation8 + $0x72c] sm:$0xf0] }
 0x4e0   :  { %7393 = vmatpush.bf16.msrb.mxu0 %v9619_v53  ;;  %7368 = vmatpush.bf16.msra.mxu3 %v9075_v17  ;;  %v8978_v10 = vld [vmem:[#allocation8 + $0xd0] sm:$0xf]  ;;  %v9779_v0 = vor.u32 %v13446_v60, %v9778_v56  ;;  %v7129_v17 = vpop.f32.mrf.mxu2 }
 0x4e1   :  { %7362 = vmatmul.bf16.vlgmr.msra.gmra.mxu1 %v14679_v55  ;;  %v13246_v11 = vld [vmem:[#allocation8 + $0xec] sm:$0xf0] }
 0x4e2   :  { %7406 = vmatpush.bf16.msrb.mxu1 %v9875_v6  ;;  %7381 = vmatpush.bf16.msrb.mxu2 %v9331_v31  ;;  %v9234_v12 = vld [vmem:[#allocation8 + $0x2d0] sm:$0xf]  ;;  %v8979_v6 = vor.u32 %v13246_v11, %v8978_v10 }
 0x4e3   :  { %v13310_v59 = vld [vmem:[#allocation8 + $0x2ec] sm:$0xf0] }
 0x4e4   :  { %7394 = vmatpush.bf16.msrb.mxu0 %v9587_v8  ;;  %7369 = vmatpush.bf16.msra.mxu3 %v9043_v45  ;;  %v9490_v16 = vld [vmem:[#allocation8 + $0x4d0] sm:$0xf]  ;;  %v9235_v14 = vor.u32 %v13310_v59, %v9234_v12  ;;  %v7117_v8 = vadd.f32 %v7116_v26, %v14764_v46 }
 0x4e5   :  { %v13374_v61 = vld [vmem:[#allocation8 + $0x4ec] sm:$0xf0] }
 0x4e6   :  { %7407 = vmatpush.bf16.msrb.mxu1 %v9843_v33  ;;  %7382 = vmatpush.bf16.msrb.mxu2 %v9299_v22  ;;  %v9746_v20 = vld [vmem:[#allocation8 + $0x6d0] sm:$0xf]  ;;  %v9491_v24 = vor.u32 %v13374_v61, %v9490_v16  ;;  %v7130_v21 = vadd.f32 %v7129_v17, %v7117_v8  ;;  %v7118_v16 = vpop.f32.mrf.mxu3 }
 0x4e7   :  { %v13438_v53 = vld [vmem:[#allocation8 + $0x6ec] sm:$0xf0] }
 0x4e8   :  { %7395 = vmatpush.bf16.msrb.mxu0 %v9555_v63  ;;  %7370 = vmatpush.bf16.msra.mxu3 %v9011_v50  ;;  %v8946_v5 = vld [vmem:[#allocation8 + $0x90] sm:$0xf]  ;;  %v9747_v25 = vor.u32 %v13438_v53, %v9746_v20  ;;  %v7143_v46 = vadd.f32 %v7142_v3, %v7130_v21  ;;  %v7131_v61 = vpop.f32.mrf.mxu2 }
 0x4e9   :  { %v13238_v23 = vld [vmem:[#allocation8 + $0xac] sm:$0xf0] }
 0x4ea   :  { %7408 = vmatpush.bf16.msrb.mxu1 %v9811_v39  ;;  %7383 = vmatpush.bf16.msrb.mxu2 %v9267_v27  ;;  %v9202_v31 = vld [vmem:[#allocation8 + $0x290] sm:$0xf]  ;;  %v8947_v34 = vor.u32 %v13238_v23, %v8946_v5  ;;  %v14771_v50 = vadd.f32 %v7155_v9, %v7143_v46 }
 0x4eb   :  { %v13302_v32 = vld [vmem:[#allocation8 + $0x2ac] sm:$0xf0] }
 0x4ec   :  { %7396 = vmatpush.bf16.msrb.mxu0 %v9523_v2  ;;  %v9458_v18 = vld [vmem:[#allocation8 + $0x490] sm:$0xf]  ;;  %7371 = vmatpush.bf16.msra.mxu3 %v8979_v6  ;;  %v9203_v45 = vor.u32 %v13302_v32, %v9202_v31 }
 0x4ed   :  { %v13366_v33 = vld [vmem:[#allocation8 + $0x4ac] sm:$0xf0] }
 0x4ee   :  { %7409 = vmatpush.bf16.msrb.mxu1 %v9779_v0  ;;  %v9714_v35 = vld [vmem:[#allocation8 + $0x690] sm:$0xf]  ;;  %7384 = vmatpush.bf16.msrb.mxu2 %v9235_v14  ;;  %v9459_v62 = vor.u32 %v13366_v33, %v9458_v18 }
 0x4ef   :  { %v13430_v38 = vld [vmem:[#allocation8 + $0x6ac] sm:$0xf0] }
 0x4f0   :  { %v8914_v22 = vld [vmem:[#allocation8 + $0x50] sm:$0xf]  ;;  %7397 = vmatpush.bf16.msrb.mxu0 %v9491_v24  ;;  %v9715_v63 = vor.u32 %v13430_v38, %v9714_v35  ;;  %7372 = vmatpush.bf16.msra.mxu3 %v8947_v34 }
 0x4f1   :  { %v13230_v30 = vld [vmem:[#allocation8 + $0x6c] sm:$0xf0] }
 0x4f2   :  { %7410 = vmatpush.bf16.msrb.mxu1 %v9747_v25  ;;  %v9170_v39 = vld [vmem:[#allocation8 + $0x250] sm:$0xf]  ;;  %7385 = vmatpush.bf16.msrb.mxu2 %v9203_v45  ;;  %v8915_v27 = vor.u32 %v13230_v30, %v8914_v22 }
 0x4f3   :  { %v13294_v28 = vld [vmem:[#allocation8 + $0x26c] sm:$0xf0] }
 0x4f4   :  { %v9426_v1 = vld [vmem:[#allocation8 + $0x450] sm:$0xf]  ;;  %v9171_v10 = vor.u32 %v13294_v28, %v9170_v39  ;;  %7398 = vmatpush.bf16.msrb.mxu0 %v9459_v62  ;;  %7373 = vmatpush.bf16.msra.mxu3 %v8915_v27 }
 0x4f5   :  { %v13358_v4 = vld [vmem:[#allocation8 + $0x46c] sm:$0xf0] }
 0x4f6   :  { %v9682_v7 = vld [vmem:[#allocation8 + $0x650] sm:$0xf]  ;;  %7411 = vmatpush.bf16.msrb.mxu1 %v9715_v63  ;;  %v9427_v12 = vor.u32 %v13358_v4, %v9426_v1  ;;  %7386 = vmatpush.bf16.msrb.mxu2 %v9171_v10 }
 0x4f7   :  { %v13422_v56 = vld [vmem:[#allocation8 + $0x66c] sm:$0xf0] }
 0x4f8   :  { %v8882_v60 = vld [vmem:[#allocation8 + $0x10] sm:$0xf]  ;;  %v9683_v59 = vor.u32 %v13422_v56, %v9682_v7  ;;  %7399 = vmatpush.bf16.msrb.mxu0 %v9427_v12 }
 0x4f9   :  { %v13222_v11 = vld [vmem:[#allocation8 + $0x2c] sm:$0xf0] }
 0x4fa   :  { %v9138_v2 = vld [vmem:[#allocation8 + $0x210] sm:$0xf]  ;;  %v8883_v25 = vor.u32 %v13222_v11, %v8882_v60  ;;  %7412 = vmatpush.bf16.msrb.mxu1 %v9683_v59 }
 0x4fb   :  { %v13286_v0 = vld [vmem:[#allocation8 + $0x22c] sm:$0xf0] }
 0x4fc   :  { %v9394_v3 = vld [vmem:[#allocation8 + $0x410] sm:$0xf]  ;;  %v9139_v26 = vor.u32 %v13286_v0, %v9138_v2  ;;  %7374 = vmatpush.bf16.msra.mxu3 %v8883_v25 }
 0x4fd   :  { %v13350_v20 = vld [vmem:[#allocation8 + $0x42c] sm:$0xf0] }
 0x4fe   :  { %v9650_v53 = vld [vmem:[#allocation8 + $0x610] sm:$0xf]  ;;  %v9395_v18 = vor.u32 %v13350_v20, %v9394_v3  ;;  %7387 = vmatpush.bf16.msrb.mxu2 %v9139_v26 }
 0x4ff   :  { %v13414_v6 = vld [vmem:[#allocation8 + $0x62c] sm:$0xf0]  ;;  %7375 = vmatmul.bf16.vlgmr.msra.gmra.mxu3 %v14621_v47 }
 0x500   :  { %v10130_v14 = vld [vmem:[#allocation8 + $0x9d0] sm:$0xf]  ;;  %v9651_v8 = vor.u32 %v13414_v6, %v9650_v53  ;;  %7400 = vmatpush.bf16.msrb.mxu0 %v9395_v18 }
 0x501   :  { %v13534_v9 = vld [vmem:[#allocation8 + $0x9ec] sm:$0xf0]  ;;  %7388 = vmatmul.bf16.vlgmr.msrb.gmra.mxu2 %v14623_v48 }
 0x502   :  { %v10386_v5 = vld [vmem:[#allocation8 + $0xbd0] sm:$0xf]  ;;  %v10131_v33 = vor.u32 %v13534_v9, %v10130_v14  ;;  %7413 = vmatpush.bf16.msrb.mxu1 %v9651_v8 }
 0x503   :  { %v13598_v23 = vld [vmem:[#allocation8 + $0xbec] sm:$0xf0]  ;;  %7401 = vmatmul.bf16.vlgmr.msrb.gmra.mxu0 %v14625_v49 }
 0x504   :  { %v10642_v24 = vld [vmem:[#allocation8 + $0xdd0] sm:$0xf]  ;;  %v10387_v35 = vor.u32 %v13598_v23, %v10386_v5  ;;  %7419 = vmatpush.bf16.msrb.mxu3 %v10131_v33  ;;  %v7194_v23 = vpop.f32.mrf.mxu0 }
 0x505   :  { %v13662_v17 = vld [vmem:[#allocation8 + $0xdec] sm:$0xf0]  ;;  %7414 = vmatmul.bf16.vlgmr.msrb.gmra.mxu1 %v14631_v54 }
 0x506   :  { %v10898_v31 = vld [vmem:[#allocation8 + $0xfd0] sm:$0xf]  ;;  %v10643_v19 = vor.u32 %v13662_v17, %v10642_v24  ;;  %7432 = vmatpush.bf16.msra.mxu2 %v10387_v35  ;;  %v14777_v24 = vpop.f32.mrf.mxu1 }
 0x507   :  { %v13726_v32 = vld [vmem:[#allocation8 + $0xfec] sm:$0xf0] }
 0x508   :  { %v10098_v38 = vld [vmem:[#allocation8 + $0x990] sm:$0xf]  ;;  %v10899_v29 = vor.u32 %v13726_v32, %v10898_v31  ;;  %7445 = vmatpush.bf16.msra.mxu0 %v10643_v19 }
 0x509   :  { %v13526_v21 = vld [vmem:[#allocation8 + $0x9ac] sm:$0xf0] }
 0x50a   :  { %v10354_v34 = vld [vmem:[#allocation8 + $0xb90] sm:$0xf]  ;;  %v10099_v39 = vor.u32 %v13526_v21, %v10098_v38  ;;  %7458 = vmatpush.bf16.msra.mxu1 %v10899_v29  ;;  %v14322_v29 = vld [vmem:[#allocation10] sm:$0xff] }
 0x50b   :  { %v13590_v45 = vld [vmem:[#allocation8 + $0xbac] sm:$0xf0] }
 0x50c   :  { %v10610_v22 = vld [vmem:[#allocation8 + $0xd90] sm:$0xf]  ;;  %v10355_v28 = vor.u32 %v13590_v45, %v10354_v34  ;;  %7420 = vmatpush.bf16.msrb.mxu3 %v10099_v39  ;;  %v1402_v34 = vperm.slane %v14322_v29, 3 }
 0x50d   :  { %v13654_v30 = vld [vmem:[#allocation8 + $0xdac] sm:$0xf0] }
 0x50e   :  { %v10866_v62 = vld [vmem:[#allocation8 + $0xf90] sm:$0xf]  ;;  %v10611_v4 = vor.u32 %v13654_v30, %v10610_v22  ;;  %7433 = vmatpush.bf16.msra.mxu2 %v10355_v28  ;;  %v7168_v28 = vpop.f32.mrf.mxu3 }
 0x50f   :  { %v13718_v63 = vld [vmem:[#allocation8 + $0xfac] sm:$0xf0] }
 0x510   :  { %v10066_v1 = vld [vmem:[#allocation8 + $0x950] sm:$0xf]  ;;  %v10867_v7 = vor.u32 %v13718_v63, %v10866_v62  ;;  %7446 = vmatpush.bf16.msra.mxu0 %v10611_v4 }
 0x511   :  { %v13518_v46 = vld [vmem:[#allocation8 + $0x96c] sm:$0xf0] }
 0x512   :  { %v10322_v56 = vld [vmem:[#allocation8 + $0xb50] sm:$0xf]  ;;  %v10067_v0 = vor.u32 %v13518_v46, %v10066_v1  ;;  %7459 = vmatpush.bf16.msra.mxu1 %v10867_v7  ;;  %v7181_v1 = vpop.f32.mrf.mxu2 }
 0x513   :  { %v13582_v60 = vld [vmem:[#allocation8 + $0xb6c] sm:$0xf0] }
 0x514   :  { %v10578_v27 = vld [vmem:[#allocation8 + $0xd50] sm:$0xf]  ;;  %v10323_v12 = vor.u32 %v13582_v60, %v10322_v56  ;;  %7421 = vmatpush.bf16.msrb.mxu3 %v10067_v0  ;;  %v7169_v56 = vadd.f32 %v7168_v28, %v1402_v34  ;;  %v7209_v0 = vpop.f32.mrf.mxu1 }
 0x515   :  { %v13646_v10 = vld [vmem:[#allocation8 + $0xd6c] sm:$0xf0] }
 0x516   :  { %v10834_v11 = vld [vmem:[#allocation8 + $0xf50] sm:$0xf]  ;;  %v10579_v61 = vor.u32 %v13646_v10, %v10578_v27  ;;  %7434 = vmatpush.bf16.msra.mxu2 %v10323_v12 }
 0x517   :  { %v13710_v2 = vld [vmem:[#allocation8 + $0xf6c] sm:$0xf0] }
 0x518   :  { %v10034_v59 = vld [vmem:[#allocation8 + $0x910] sm:$0xf]  ;;  %v10835_v3 = vor.u32 %v13710_v2, %v10834_v11  ;;  %7447 = vmatpush.bf16.msra.mxu0 %v10579_v61  ;;  %v7182_v11 = vadd.f32 %v7181_v1, %v7169_v56  ;;  %v7196_v2 = vpop.f32.mrf.mxu0 }
 0x519   :  { %v13510_v16 = vld [vmem:[#allocation8 + $0x92c] sm:$0xf0] }
 0x51a   :  { %v10290_v20 = vld [vmem:[#allocation8 + $0xb10] sm:$0xf]  ;;  %v10035_v25 = vor.u32 %v13510_v16, %v10034_v59  ;;  %7460 = vmatpush.bf16.msra.mxu1 %v10835_v3 }
 0x51b   :  { %v13574_v53 = vld [vmem:[#allocation8 + $0xb2c] sm:$0xf0] }
 0x51c   :  { %v10546_v6 = vld [vmem:[#allocation8 + $0xd10] sm:$0xf]  ;;  %v10291_v26 = vor.u32 %v13574_v53, %v10290_v20  ;;  %7422 = vmatpush.bf16.msrb.mxu3 %v10035_v25 }
 0x51d   :  { %v13638_v14 = vld [vmem:[#allocation8 + $0xd2c] sm:$0xf0] }
 0x51e   :  { %v10802_v9 = vld [vmem:[#allocation8 + $0xf10] sm:$0xf]  ;;  %v10547_v18 = vor.u32 %v13638_v14, %v10546_v6  ;;  %7435 = vmatpush.bf16.msra.mxu2 %v10291_v26 }
 0x51f   :  { %v13702_v5 = vld [vmem:[#allocation8 + $0xf2c] sm:$0xf0] }
 0x520   :  { %v10002_v17 = vld [vmem:[#allocation8 + $0x8d0] sm:$0xf]  ;;  %v10803_v8 = vor.u32 %v13702_v5, %v10802_v9  ;;  %7448 = vmatpush.bf16.msra.mxu0 %v10547_v18  ;;  %v7195_v9 = vadd.f32 %v7194_v23, %v7182_v11  ;;  %v7183_v23 = vpop.f32.mrf.mxu2 }
 0x521   :  { %v13502_v31 = vld [vmem:[#allocation8 + $0x8ec] sm:$0xf0] }
 0x522   :  { %v10258_v32 = vld [vmem:[#allocation8 + $0xad0] sm:$0xf]  ;;  %v10003_v45 = vor.u32 %v13502_v31, %v10002_v17  ;;  %7461 = vmatpush.bf16.msra.mxu1 %v10803_v8 }
 0x523   :  { %v13566_v33 = vld [vmem:[#allocation8 + $0xaec] sm:$0xf0] }
 0x524   :  { %v10514_v35 = vld [vmem:[#allocation8 + $0xcd0] sm:$0xf]  ;;  %v10259_v22 = vor.u32 %v13566_v33, %v10258_v32  ;;  %7423 = vmatpush.bf16.msrb.mxu3 %v10003_v45 }
 0x525   :  { %v13630_v38 = vld [vmem:[#allocation8 + $0xcec] sm:$0xf0] }
 0x526   :  { %v10770_v21 = vld [vmem:[#allocation8 + $0xed0] sm:$0xf]  ;;  %v10515_v63 = vor.u32 %v13630_v38, %v10514_v35  ;;  %7436 = vmatpush.bf16.msra.mxu2 %v10259_v22  ;;  %v14780_v35 = vadd.f32 %v14777_v24, %v7195_v9 }
 0x527   :  { %v13694_v19 = vld [vmem:[#allocation8 + $0xeec] sm:$0xf0] }
 0x528   :  { %v9970_v30 = vld [vmem:[#allocation8 + $0x890] sm:$0xf]  ;;  %v10771_v39 = vor.u32 %v13694_v19, %v10770_v21  ;;  %7449 = vmatpush.bf16.msra.mxu0 %v10515_v63  ;;  %v7170_v19 = vpop.f32.mrf.mxu3 }
 0x529   :  { %v13494_v62 = vld [vmem:[#allocation8 + $0x8ac] sm:$0xf0] }
 0x52a   :  { %v10226_v46 = vld [vmem:[#allocation8 + $0xa90] sm:$0xf]  ;;  %v9971_v12 = vor.u32 %v13494_v62, %v9970_v30  ;;  %7462 = vmatpush.bf16.msra.mxu1 %v10771_v39 }
 0x52b   :  { %v13558_v4 = vld [vmem:[#allocation8 + $0xaac] sm:$0xf0] }
 0x52c   :  { %v10482_v7 = vld [vmem:[#allocation8 + $0xc90] sm:$0xf]  ;;  %v10227_v59 = vor.u32 %v13558_v4, %v10226_v46  ;;  %7424 = vmatpush.bf16.msrb.mxu3 %v9971_v12 }
 0x52d   :  { %v13622_v60 = vld [vmem:[#allocation8 + $0xcac] sm:$0xf0] }
 0x52e   :  { %v10738_v27 = vld [vmem:[#allocation8 + $0xe90] sm:$0xf]  ;;  %v10483_v3 = vor.u32 %v13622_v60, %v10482_v7  ;;  %7437 = vmatpush.bf16.msra.mxu2 %v10227_v59 }
 0x52f   :  { %v13686_v10 = vld [vmem:[#allocation8 + $0xeac] sm:$0xf0] }
 0x530   :  { %v9938_v16 = vld [vmem:[#allocation8 + $0x850] sm:$0xf]  ;;  %v10739_v20 = vor.u32 %v13686_v10, %v10738_v27  ;;  %7450 = vmatpush.bf16.msra.mxu0 %v10483_v3 }
 0x531   :  { %v13486_v61 = vld [vmem:[#allocation8 + $0x86c] sm:$0xf0] }
 0x532   :  { %v10194_v53 = vld [vmem:[#allocation8 + $0xa50] sm:$0xf]  ;;  %v9939_v31 = vor.u32 %v13486_v61, %v9938_v16  ;;  %7463 = vmatpush.bf16.msra.mxu1 %v10739_v20 }
 0x533   :  { %v13550_v6 = vld [vmem:[#allocation8 + $0xa6c] sm:$0xf0] }
 0x534   :  { %v10450_v14 = vld [vmem:[#allocation8 + $0xc50] sm:$0xf]  ;;  %v10195_v32 = vor.u32 %v13550_v6, %v10194_v53  ;;  %7425 = vmatpush.bf16.msrb.mxu3 %v9939_v31 }
 0x535   :  { %v13614_v5 = vld [vmem:[#allocation8 + $0xc6c] sm:$0xf0] }
 0x536   :  { %v10706_v25 = vld [vmem:[#allocation8 + $0xe50] sm:$0xf]  ;;  %v10451_v38 = vor.u32 %v13614_v5, %v10450_v14  ;;  %7438 = vmatpush.bf16.msra.mxu2 %v10195_v32 }
 0x537   :  { %v13678_v26 = vld [vmem:[#allocation8 + $0xe6c] sm:$0xf0] }
 0x538   :  { %v9906_v17 = vld [vmem:[#allocation8 + $0x810] sm:$0xf]  ;;  %v10707_v21 = vor.u32 %v13678_v26, %v10706_v25  ;;  %7451 = vmatpush.bf16.msra.mxu0 %v10451_v38 }
 0x539   :  { %v13478_v18 = vld [vmem:[#allocation8 + $0x82c] sm:$0xf0] }
 0x53a   :  { %v10162_v8 = vld [vmem:[#allocation8 + $0xa10] sm:$0xf]  ;;  %v9907_v1 = vor.u32 %v13478_v18, %v9906_v17  ;;  %7464 = vmatpush.bf16.msra.mxu1 %v10707_v21 }
 0x53b   :  { %v13542_v33 = vld [vmem:[#allocation8 + $0xa2c] sm:$0xf0] }
 0x53c   :  { %v10418_v29 = vld [vmem:[#allocation8 + $0xc10] sm:$0xf]  ;;  %v10163_v24 = vor.u32 %v13542_v33, %v10162_v8  ;;  %7426 = vmatpush.bf16.msrb.mxu3 %v9907_v1  ;;  %v7259_v1 = vpop.f32.mrf.mxu1 }
 0x53d   :  { %v13606_v34 = vld [vmem:[#allocation8 + $0xc2c] sm:$0xf0] }
 0x53e   :  { %v10674_v45 = vld [vmem:[#allocation8 + $0xe10] sm:$0xf]  ;;  %v10419_v56 = vor.u32 %v13606_v34, %v10418_v29  ;;  %7439 = vmatpush.bf16.msra.mxu2 %v10163_v24 }
 0x53f   :  { %v13670_v22 = vld [vmem:[#allocation8 + $0xe2c] sm:$0xf0]  ;;  %7427 = vmatmul.bf16.vlgmr.msrb.gmra.mxu3 %v14643_v36 }
 0x540   :  { %v11154_v30 = vld [vmem:[#allocation8 + $0x11d0] sm:$0xf]  ;;  %v10675_v60 = vor.u32 %v13670_v22, %v10674_v45  ;;  %7452 = vmatpush.bf16.msra.mxu0 %v10419_v56 }
 0x541   :  { %v13790_v62 = vld [vmem:[#allocation8 + $0x11ec] sm:$0xf0]  ;;  %7440 = vmatmul.bf16.vlgmr.msra.gmra.mxu2 %v14647_v37 }
 0x542   :  { %v11410_v63 = vld [vmem:[#allocation8 + $0x13d0] sm:$0xf]  ;;  %v11155_v27 = vor.u32 %v13790_v62, %v11154_v30  ;;  %7465 = vmatpush.bf16.msra.mxu1 %v10675_v60 }
 0x543   :  { %v13854_v39 = vld [vmem:[#allocation8 + $0x13ec] sm:$0xf0]  ;;  %7453 = vmatmul.bf16.vlgmr.msra.gmra.mxu0 %v14651_v41 }
 0x544   :  { %v11666_v28 = vld [vmem:[#allocation8 + $0x15d0] sm:$0xf]  ;;  %v11411_v10 = vor.u32 %v13854_v39, %v11410_v63  ;;  %7471 = vmatpush.bf16.msra.mxu3 %v11155_v27 }
 0x545   :  { %v13918_v46 = vld [vmem:[#allocation8 + $0x15ec] sm:$0xf0]  ;;  %7466 = vmatmul.bf16.vlgmr.msra.gmra.mxu1 %v14655_v42 }
 0x546   :  { %v11922_v4 = vld [vmem:[#allocation8 + $0x17d0] sm:$0xf]  ;;  %v11667_v0 = vor.u32 %v13918_v46, %v11666_v28  ;;  %7484 = vmatpush.bf16.msrb.mxu2 %v11411_v10  ;;  %v7246_v28 = vpop.f32.mrf.mxu0 }
 0x547   :  { %v13982_v7 = vld [vmem:[#allocation8 + $0x17ec] sm:$0xf0] }
 0x548   :  { %v11122_v11 = vld [vmem:[#allocation8 + $0x1190] sm:$0xf]  ;;  %v11923_v12 = vor.u32 %v13982_v7, %v11922_v4  ;;  %7497 = vmatpush.bf16.msrb.mxu0 %v11667_v0 }
 0x549   :  { %v13782_v2 = vld [vmem:[#allocation8 + $0x11ac] sm:$0xf0] }
 0x54a   :  { %v11378_v59 = vld [vmem:[#allocation8 + $0x1390] sm:$0xf]  ;;  %v11123_v6 = vor.u32 %v13782_v2, %v11122_v11  ;;  %7510 = vmatpush.bf16.msrb.mxu1 %v11923_v12 }
 0x54b   :  { %v13846_v16 = vld [vmem:[#allocation8 + $0x13ac] sm:$0xf0] }
 0x54c   :  { %v11634_v61 = vld [vmem:[#allocation8 + $0x1590] sm:$0xf]  ;;  %v11379_v14 = vor.u32 %v13846_v16, %v11378_v59  ;;  %7472 = vmatpush.bf16.msra.mxu3 %v11123_v6  ;;  %v7220_v6 = vpop.f32.mrf.mxu3 }
 0x54d   :  { %v13910_v3 = vld [vmem:[#allocation8 + $0x15ac] sm:$0xf0] }
 0x54e   :  { %v11890_v20 = vld [vmem:[#allocation8 + $0x1790] sm:$0xf]  ;;  %v11635_v25 = vor.u32 %v13910_v3, %v11634_v61  ;;  %7485 = vmatpush.bf16.msrb.mxu2 %v11379_v14  ;;  %v7233_v14 = vpop.f32.mrf.mxu2 }
 0x54f   :  { %v13974_v53 = vld [vmem:[#allocation8 + $0x17ac] sm:$0xf0] }
 0x550   :  { %v11090_v9 = vld [vmem:[#allocation8 + $0x1150] sm:$0xf]  ;;  %v11891_v26 = vor.u32 %v13974_v53, %v11890_v20  ;;  %7498 = vmatpush.bf16.msrb.mxu0 %v11635_v25 }
 0x551   :  { %v13774_v5 = vld [vmem:[#allocation8 + $0x116c] sm:$0xf0] }
 0x552   :  { %v11346_v17 = vld [vmem:[#allocation8 + $0x1350] sm:$0xf]  ;;  %v11091_v38 = vor.u32 %v13774_v5, %v11090_v9  ;;  %7511 = vmatpush.bf16.msrb.mxu1 %v11891_v26  ;;  %v7221_v26 = vadd.f32 %v7220_v6, %v14780_v35 }
 0x553   :  { %v13838_v31 = vld [vmem:[#allocation8 + $0x136c] sm:$0xf0] }
 0x554   :  { %v11602_v32 = vld [vmem:[#allocation8 + $0x1550] sm:$0xf]  ;;  %v11347_v21 = vor.u32 %v13838_v31, %v11346_v17  ;;  %7473 = vmatpush.bf16.msra.mxu3 %v11091_v38 }
 0x555   :  { %v13902_v18 = vld [vmem:[#allocation8 + $0x156c] sm:$0xf0] }
 0x556   :  { %v11858_v8 = vld [vmem:[#allocation8 + $0x1750] sm:$0xf]  ;;  %v11603_v29 = vor.u32 %v13902_v18, %v11602_v32  ;;  %7486 = vmatpush.bf16.msrb.mxu2 %v11347_v21  ;;  %v7234_v18 = vadd.f32 %v7233_v14, %v7221_v26 }
 0x557   :  { %v13966_v33 = vld [vmem:[#allocation8 + $0x176c] sm:$0xf0] }
 0x558   :  { %v11058_v19 = vld [vmem:[#allocation8 + $0x1110] sm:$0xf]  ;;  %v11859_v34 = vor.u32 %v13966_v33, %v11858_v8  ;;  %7499 = vmatpush.bf16.msrb.mxu0 %v11603_v29  ;;  %v7248_v8 = vpop.f32.mrf.mxu0  ;;  %v7261_v33 = vpop.f32.mrf.mxu1  ;;  %v7247_v35 = vadd.f32 %v7246_v28, %v7234_v18 }
 0x559   :  { %v13766_v23 = vld [vmem:[#allocation8 + $0x112c] sm:$0xf0] }
 0x55a   :  { %v11314_v45 = vld [vmem:[#allocation8 + $0x1310] sm:$0xf]  ;;  %v11059_v24 = vor.u32 %v13766_v23, %v11058_v19  ;;  %7512 = vmatpush.bf16.msrb.mxu1 %v11859_v34 }
 0x55b   :  { %v13830_v22 = vld [vmem:[#allocation8 + $0x132c] sm:$0xf0] }
 0x55c   :  { %v11570_v30 = vld [vmem:[#allocation8 + $0x1510] sm:$0xf]  ;;  %v11315_v46 = vor.u32 %v13830_v22, %v11314_v45  ;;  %7474 = vmatpush.bf16.msra.mxu3 %v11059_v24 }
 0x55d   :  { %v13894_v62 = vld [vmem:[#allocation8 + $0x152c] sm:$0xf0] }
 0x55e   :  { %v11826_v63 = vld [vmem:[#allocation8 + $0x1710] sm:$0xf]  ;;  %v11571_v56 = vor.u32 %v13894_v62, %v11570_v30  ;;  %7487 = vmatpush.bf16.msrb.mxu2 %v11315_v46 }
 0x55f   :  { %v13958_v39 = vld [vmem:[#allocation8 + $0x172c] sm:$0xf0] }
 0x560   :  { %v11026_v4 = vld [vmem:[#allocation8 + $0x10d0] sm:$0xf]  ;;  %v11827_v60 = vor.u32 %v13958_v39, %v11826_v63  ;;  %7500 = vmatpush.bf16.msrb.mxu0 %v11571_v56 }
 0x561   :  { %v13758_v7 = vld [vmem:[#allocation8 + $0x10ec] sm:$0xf0] }
 0x562   :  { %v11282_v27 = vld [vmem:[#allocation8 + $0x12d0] sm:$0xf]  ;;  %v11027_v59 = vor.u32 %v13758_v7, %v11026_v4  ;;  %7513 = vmatpush.bf16.msrb.mxu1 %v11827_v60 }
 0x563   :  { %v13822_v10 = vld [vmem:[#allocation8 + $0x12ec] sm:$0xf0] }
 0x564   :  { %v11538_v11 = vld [vmem:[#allocation8 + $0x14d0] sm:$0xf]  ;;  %v11283_v16 = vor.u32 %v13822_v10, %v11282_v27  ;;  %7475 = vmatpush.bf16.msra.mxu3 %v11027_v59  ;;  %v14787_v27 = vadd.f32 %v7259_v1, %v7247_v35 }
 0x565   :  { %v13886_v2 = vld [vmem:[#allocation8 + $0x14ec] sm:$0xf0] }
 0x566   :  { %v11794_v0 = vld [vmem:[#allocation8 + $0x16d0] sm:$0xf]  ;;  %v11539_v20 = vor.u32 %v13886_v2, %v11538_v11  ;;  %7488 = vmatpush.bf16.msrb.mxu2 %v11283_v16  ;;  %v7222_v2 = vpop.f32.mrf.mxu3 }
 0x567   :  { %v13950_v12 = vld [vmem:[#allocation8 + $0x16ec] sm:$0xf0] }
 0x568   :  { %v10994_v61 = vld [vmem:[#allocation8 + $0x1090] sm:$0xf]  ;;  %v11795_v53 = vor.u32 %v13950_v12, %v11794_v0  ;;  %7501 = vmatpush.bf16.msrb.mxu0 %v11539_v20  ;;  %v7235_v0 = vpop.f32.mrf.mxu2 }
 0x569   :  { %v13750_v3 = vld [vmem:[#allocation8 + $0x10ac] sm:$0xf0] }
 0x56a   :  { %v11250_v9 = vld [vmem:[#allocation8 + $0x1290] sm:$0xf]  ;;  %v10995_v38 = vor.u32 %v13750_v3, %v10994_v61  ;;  %7514 = vmatpush.bf16.msrb.mxu1 %v11795_v53 }
 0x56b   :  { %v13814_v5 = vld [vmem:[#allocation8 + $0x12ac] sm:$0xf0] }
 0x56c   :  { %v11506_v25 = vld [vmem:[#allocation8 + $0x1490] sm:$0xf]  ;;  %v11251_v21 = vor.u32 %v13814_v5, %v11250_v9  ;;  %7476 = vmatpush.bf16.msra.mxu3 %v10995_v38 }
 0x56d   :  { %v13878_v17 = vld [vmem:[#allocation8 + $0x14ac] sm:$0xf0] }
 0x56e   :  { %v11762_v31 = vld [vmem:[#allocation8 + $0x1690] sm:$0xf]  ;;  %v11507_v29 = vor.u32 %v13878_v17, %v11506_v25  ;;  %7489 = vmatpush.bf16.msrb.mxu2 %v11251_v21 }
 0x56f   :  { %v13942_v32 = vld [vmem:[#allocation8 + $0x16ac] sm:$0xf0] }
 0x570   :  { %v10962_v19 = vld [vmem:[#allocation8 + $0x1050] sm:$0xf]  ;;  %v11763_v34 = vor.u32 %v13942_v32, %v11762_v31  ;;  %7502 = vmatpush.bf16.msrb.mxu0 %v11507_v29 }
 0x571   :  { %v13742_v23 = vld [vmem:[#allocation8 + $0x106c] sm:$0xf0] }
 0x572   :  { %v11218_v45 = vld [vmem:[#allocation8 + $0x1250] sm:$0xf]  ;;  %v10963_v46 = vor.u32 %v13742_v23, %v10962_v19  ;;  %7515 = vmatpush.bf16.msrb.mxu1 %v11763_v34 }
 0x573   :  { %v13806_v22 = vld [vmem:[#allocation8 + $0x126c] sm:$0xf0] }
 0x574   :  { %v11474_v30 = vld [vmem:[#allocation8 + $0x1450] sm:$0xf]  ;;  %v11219_v4 = vor.u32 %v13806_v22, %v11218_v45  ;;  %7477 = vmatpush.bf16.msra.mxu3 %v10963_v46 }
 0x575   :  { %v13870_v62 = vld [vmem:[#allocation8 + $0x146c] sm:$0xf0] }
 0x576   :  { %v11730_v63 = vld [vmem:[#allocation8 + $0x1650] sm:$0xf]  ;;  %v11475_v10 = vor.u32 %v13870_v62, %v11474_v30  ;;  %7490 = vmatpush.bf16.msrb.mxu2 %v11219_v4 }
 0x577   :  { %v13934_v39 = vld [vmem:[#allocation8 + $0x166c] sm:$0xf0] }
 0x578   :  { %v10930_v24 = vld [vmem:[#allocation8 + $0x1010] sm:$0xf]  ;;  %v11731_v11 = vor.u32 %v13934_v39, %v11730_v63  ;;  %7503 = vmatpush.bf16.msrb.mxu0 %v11475_v10 }
 0x579   :  { %v13734_v7 = vld [vmem:[#allocation8 + $0x102c] sm:$0xf0] }
 0x57a   :  { %v11186_v56 = vld [vmem:[#allocation8 + $0x1210] sm:$0xf]  ;;  %v10931_v14 = vor.u32 %v13734_v7, %v10930_v24  ;;  %7516 = vmatpush.bf16.msrb.mxu1 %v11731_v11 }
 0x57b   :  { %v13798_v60 = vld [vmem:[#allocation8 + $0x122c] sm:$0xf0] }
 0x57c   :  { %v11442_v28 = vld [vmem:[#allocation8 + $0x1410] sm:$0xf]  ;;  %v11187_v1 = vor.u32 %v13798_v60, %v11186_v56  ;;  %7478 = vmatpush.bf16.msra.mxu3 %v10931_v14  ;;  %v7311_v14 = vpop.f32.mrf.mxu1 }
 0x57d   :  { %v13862_v12 = vld [vmem:[#allocation8 + $0x142c] sm:$0xf0] }
 0x57e   :  { %v11698_v59 = vld [vmem:[#allocation8 + $0x1610] sm:$0xf]  ;;  %v11443_v26 = vor.u32 %v13862_v12, %v11442_v28  ;;  %7491 = vmatpush.bf16.msrb.mxu2 %v11187_v1 }
 0x57f   :  { %v13926_v16 = vld [vmem:[#allocation8 + $0x162c] sm:$0xf0]  ;;  %7479 = vmatmul.bf16.vlgmr.msra.gmra.mxu3 %v14661_v51 }
 0x580   :  { %v12178_v61 = vld [vmem:[#allocation8 + $0x19d0] sm:$0xf]  ;;  %v11699_v17 = vor.u32 %v13926_v16, %v11698_v59  ;;  %7504 = vmatpush.bf16.msrb.mxu0 %v11443_v26 }
 0x581   :  { %v14046_v3 = vld [vmem:[#allocation8 + $0x19ec] sm:$0xf0]  ;;  %7492 = vmatmul.bf16.vlgmr.msrb.gmra.mxu2 %v14663_v52 }
 0x582   :  { %v12434_v20 = vld [vmem:[#allocation8 + $0x1bd0] sm:$0xf]  ;;  %v12179_v31 = vor.u32 %v14046_v3, %v12178_v61  ;;  %7517 = vmatpush.bf16.msrb.mxu1 %v11699_v17 }
 0x583   :  { %v14110_v53 = vld [vmem:[#allocation8 + $0x1bec] sm:$0xf0]  ;;  %7505 = vmatmul.bf16.vlgmr.msrb.gmra.mxu0 %v14665_v57 }
 0x584   :  { %v12690_v6 = vld [vmem:[#allocation8 + $0x1dd0] sm:$0xf]  ;;  %v12435_v32 = vor.u32 %v14110_v53, %v12434_v20  ;;  %7523 = vmatpush.bf16.msrb.mxu3 %v12179_v31 }
 0x585   :  { %v14174_v9 = vld [vmem:[#allocation8 + $0x1dec] sm:$0xf0]  ;;  %7518 = vmatmul.bf16.vlgmr.msrb.gmra.mxu1 %v14667_v58 }
 0x586   :  { %v12946_v5 = vld [vmem:[#allocation8 + $0x1fd0] sm:$0xf]  ;;  %v12691_v33 = vor.u32 %v14174_v9, %v12690_v6  ;;  %7536 = vmatpush.bf16.msra.mxu2 %v12435_v32  ;;  %v7298_v6 = vpop.f32.mrf.mxu0 }
 0x587   :  { %v14238_v25 = vld [vmem:[#allocation8 + $0x1fec] sm:$0xf0] }
 0x588   :  { %v12146_v18 = vld [vmem:[#allocation8 + $0x1990] sm:$0xf]  ;;  %v12947_v38 = vor.u32 %v14238_v25, %v12946_v5  ;;  %7549 = vmatpush.bf16.msra.mxu0 %v12691_v33 }
 0x589   :  { %v14038_v8 = vld [vmem:[#allocation8 + $0x19ac] sm:$0xf0] }
 0x58a   :  { %v12402_v21 = vld [vmem:[#allocation8 + $0x1b90] sm:$0xf]  ;;  %v12147_v22 = vor.u32 %v14038_v8, %v12146_v18  ;;  %7562 = vmatpush.bf16.msra.mxu1 %v12947_v38 }
 0x58b   :  { %v14102_v19 = vld [vmem:[#allocation8 + $0x1bac] sm:$0xf0] }
 0x58c   :  { %v12658_v23 = vld [vmem:[#allocation8 + $0x1d90] sm:$0xf]  ;;  %v12403_v30 = vor.u32 %v14102_v19, %v12402_v21  ;;  %7524 = vmatpush.bf16.msrb.mxu3 %v12147_v22  ;;  %v7272_v22 = vpop.f32.mrf.mxu3 }
 0x58d   :  { %v14166_v29 = vld [vmem:[#allocation8 + $0x1dac] sm:$0xf0] }
 0x58e   :  { %v12914_v34 = vld [vmem:[#allocation8 + $0x1f90] sm:$0xf]  ;;  %v12659_v63 = vor.u32 %v14166_v29, %v12658_v23  ;;  %7537 = vmatpush.bf16.msra.mxu2 %v12403_v30  ;;  %v7285_v30 = vpop.f32.mrf.mxu2 }
 0x58f   :  { %v14230_v45 = vld [vmem:[#allocation8 + $0x1fac] sm:$0xf0] }
 0x590   :  { %v12114_v35 = vld [vmem:[#allocation8 + $0x1950] sm:$0xf]  ;;  %v12915_v39 = vor.u32 %v14230_v45, %v12914_v34  ;;  %7550 = vmatpush.bf16.msra.mxu0 %v12659_v63 }
 0x591   :  { %v14030_v62 = vld [vmem:[#allocation8 + $0x196c] sm:$0xf0] }
 0x592   :  { %v12370_v24 = vld [vmem:[#allocation8 + $0x1b50] sm:$0xf]  ;;  %v12115_v10 = vor.u32 %v14030_v62, %v12114_v35  ;;  %7563 = vmatpush.bf16.msra.mxu1 %v12915_v39  ;;  %v7273_v39 = vadd.f32 %v7272_v22, %v14787_v27  ;;  %v13402_v22 = vld [vmem:[#allocation8 + $0x5d4] sm:$0xf] }
 0x593   :  { %v14094_v46 = vld [vmem:[#allocation8 + $0x1b6c] sm:$0xf0] }
 0x594   :  { %v12626_v4 = vld [vmem:[#allocation8 + $0x1d50] sm:$0xf]  ;;  %v12371_v11 = vor.u32 %v14094_v46, %v12370_v24  ;;  %7525 = vmatpush.bf16.msrb.mxu3 %v12115_v10 }
 0x595   :  { %v14158_v7 = vld [vmem:[#allocation8 + $0x1d6c] sm:$0xf0] }
 0x596   :  { %v12882_v56 = vld [vmem:[#allocation8 + $0x1f50] sm:$0xf]  ;;  %v12627_v28 = vor.u32 %v14158_v7, %v12626_v4  ;;  %7538 = vmatpush.bf16.msra.mxu2 %v12371_v11  ;;  %v7286_v7 = vadd.f32 %v7285_v30, %v7273_v39 }
 0x597   :  { %v14222_v60 = vld [vmem:[#allocation8 + $0x1f6c] sm:$0xf0] }
 0x598   :  { %v12082_v2 = vld [vmem:[#allocation8 + $0x1910] sm:$0xf]  ;;  %v12883_v12 = vor.u32 %v14222_v60, %v12882_v56  ;;  %7551 = vmatpush.bf16.msra.mxu0 %v12627_v28  ;;  %v7300_v56 = vpop.f32.mrf.mxu0  ;;  %v7313_v60 = vpop.f32.mrf.mxu1  ;;  %v7299_v27 = vadd.f32 %v7298_v6, %v7286_v7  ;;  %v13266_v7 = vld [vmem:[#allocation8 + $0x194] sm:$0xf] }
 0x599   :  { %v14022_v0 = vld [vmem:[#allocation8 + $0x192c] sm:$0xf0]  ;;  %v9076_v56 = vld [vmem:[#allocation8 + $0x1b0] sm:$0xf0] }
 0x59a   :  { %v12338_v59 = vld [vmem:[#allocation8 + $0x1b10] sm:$0xf]  ;;  %v12083_v1 = vor.u32 %v14022_v0, %v12082_v2  ;;  %7564 = vmatpush.bf16.msra.mxu1 %v12883_v12 }
 0x59b   :  { %v14086_v16 = vld [vmem:[#allocation8 + $0x1b2c] sm:$0xf0] }
 0x59c   :  { %v12594_v61 = vld [vmem:[#allocation8 + $0x1d10] sm:$0xf]  ;;  %v12339_v9 = vor.u32 %v14086_v16, %v12338_v59  ;;  %7526 = vmatpush.bf16.msrb.mxu3 %v12083_v1 }
 0x59d   :  { %v14150_v3 = vld [vmem:[#allocation8 + $0x1d2c] sm:$0xf0] }
 0x59e   :  { %v12850_v20 = vld [vmem:[#allocation8 + $0x1f10] sm:$0xf]  ;;  %v12595_v26 = vor.u32 %v14150_v3, %v12594_v61  ;;  %7539 = vmatpush.bf16.msra.mxu2 %v12339_v9 }
 0x59f   :  { %v14214_v53 = vld [vmem:[#allocation8 + $0x1f2c] sm:$0xf0] }
 0x5a0   :  { %v12050_v5 = vld [vmem:[#allocation8 + $0x18d0] sm:$0xf]  ;;  %v12851_v17 = vor.u32 %v14214_v53, %v12850_v20  ;;  %7552 = vmatpush.bf16.msra.mxu0 %v12595_v26 }
 0x5a1   :  { %v14014_v25 = vld [vmem:[#allocation8 + $0x18ec] sm:$0xf0] }
 0x5a2   :  { %v12306_v31 = vld [vmem:[#allocation8 + $0x1ad0] sm:$0xf]  ;;  %v12051_v21 = vor.u32 %v14014_v25, %v12050_v5  ;;  %7565 = vmatpush.bf16.msra.mxu1 %v12851_v17 }
 0x5a3   :  { %v14078_v32 = vld [vmem:[#allocation8 + $0x1aec] sm:$0xf0] }
 0x5a4   :  { %v12562_v18 = vld [vmem:[#allocation8 + $0x1cd0] sm:$0xf]  ;;  %v12307_v19 = vor.u32 %v14078_v32, %v12306_v31  ;;  %7527 = vmatpush.bf16.msrb.mxu3 %v12051_v21  ;;  %v14794_v31 = vadd.f32 %v7311_v14, %v7299_v27  ;;  %v13258_v27 = vld [vmem:[#allocation8 + $0x154] sm:$0xf] }
 0x5a5   :  { %v14142_v8 = vld [vmem:[#allocation8 + $0x1cec] sm:$0xf0] }
 0x5a6   :  { %v12818_v33 = vld [vmem:[#allocation8 + $0x1ed0] sm:$0xf]  ;;  %v12563_v34 = vor.u32 %v14142_v8, %v12562_v18  ;;  %7540 = vmatpush.bf16.msra.mxu2 %v12307_v19  ;;  %v7274_v8 = vpop.f32.mrf.mxu3 }
 0x5a7   :  { %v14206_v38 = vld [vmem:[#allocation8 + $0x1eec] sm:$0xf0]  ;;  %v13250_v8 = vld [vmem:[#allocation8 + $0x114] sm:$0xf] }
 0x5a8   :  { %v12018_v23 = vld [vmem:[#allocation8 + $0x1890] sm:$0xf]  ;;  %v12819_v45 = vor.u32 %v14206_v38, %v12818_v33  ;;  %7553 = vmatpush.bf16.msra.mxu0 %v12563_v34  ;;  %v7287_v33 = vpop.f32.mrf.mxu2  ;;  %v13338_v34 = vld [vmem:[#allocation8 + $0x3d4] sm:$0xf] }
 0x5a9   :  { %v14006_v29 = vld [vmem:[#allocation8 + $0x18ac] sm:$0xf0]  ;;  %v9012_v33 = vld [vmem:[#allocation8 + $0x130] sm:$0xf0] }
 0x5aa   :  { %v12274_v35 = vld [vmem:[#allocation8 + $0x1a90] sm:$0xf]  ;;  %v12019_v10 = vor.u32 %v14006_v29, %v12018_v23  ;;  %7566 = vmatpush.bf16.msra.mxu1 %v12819_v45  ;;  %v13274_v23 = vld [vmem:[#allocation8 + $0x1d4] sm:$0xf] }
 0x5ab   :  { %v14070_v62 = vld [vmem:[#allocation8 + $0x1aac] sm:$0xf0]  ;;  %v9108_v29 = vld [vmem:[#allocation8 + $0x1f0] sm:$0xf0] }
 0x5ac   :  { %v12530_v63 = vld [vmem:[#allocation8 + $0x1c90] sm:$0xf]  ;;  %v12275_v11 = vor.u32 %v14070_v62, %v12274_v35  ;;  %7528 = vmatpush.bf16.msrb.mxu3 %v12019_v10  ;;  %v9364_v45 = vld [vmem:[#allocation8 + $0x3f0] sm:$0xf0] }
 0x5ad   :  { %v14134_v24 = vld [vmem:[#allocation8 + $0x1cac] sm:$0xf0]  ;;  %v9620_v35 = vld [vmem:[#allocation8 + $0x5f0] sm:$0xf0] }
 0x5ae   :  { %v12786_v46 = vld [vmem:[#allocation8 + $0x1e90] sm:$0xf]  ;;  %v12531_v28 = vor.u32 %v14134_v24, %v12530_v63  ;;  %7541 = vmatpush.bf16.msra.mxu2 %v12275_v11  ;;  %v13466_v62 = vld [vmem:[#allocation8 + $0x7d4] sm:$0xf]  ;;  %v9623_v60 = vor.u32 %v13402_v22, %v9620_v35  ;;  %v7350_v22 = vpop.f32.mrf.mxu0 }
 0x5af   :  { %v14198_v4 = vld [vmem:[#allocation8 + $0x1eac] sm:$0xf0]  ;;  %v9876_v63 = vld [vmem:[#allocation8 + $0x7f0] sm:$0xf0] }
 0x5b0   :  { %v11986_v2 = vld [vmem:[#allocation8 + $0x1850] sm:$0xf]  ;;  %v12787_v12 = vor.u32 %v14198_v4, %v12786_v46  ;;  %7554 = vmatpush.bf16.msra.mxu0 %v12531_v28  ;;  %v9111_v46 = vor.u32 %v13274_v23, %v9108_v29  ;;  %v9367_v4 = vor.u32 %v13338_v34, %v9364_v45  ;;  %v9879_v10 = vor.u32 %v13466_v62, %v9876_v63  ;;  %v13330_v11 = vld [vmem:[#allocation8 + $0x394] sm:$0xf] }
 0x5b1   :  { %v13998_v0 = vld [vmem:[#allocation8 + $0x186c] sm:$0xf0]  ;;  %v9588_v28 = vld [vmem:[#allocation8 + $0x5b0] sm:$0xf0] }
 0x5b2   :  { %v12242_v59 = vld [vmem:[#allocation8 + $0x1a50] sm:$0xf]  ;;  %v11987_v9 = vor.u32 %v13998_v0, %v11986_v2  ;;  %7567 = vmatpush.bf16.msra.mxu1 %v12787_v12  ;;  %v9332_v2 = vld [vmem:[#allocation8 + $0x3b0] sm:$0xf0] }
 0x5b3   :  { %v14062_v16 = vld [vmem:[#allocation8 + $0x1a6c] sm:$0xf0]  ;;  %v13394_v0 = vld [vmem:[#allocation8 + $0x594] sm:$0xf] }
 0x5b4   :  { %v12498_v61 = vld [vmem:[#allocation8 + $0x1c50] sm:$0xf]  ;;  %v12243_v5 = vor.u32 %v14062_v16, %v12242_v59  ;;  %7529 = vmatpush.bf16.msrb.mxu3 %v11987_v9  ;;  %v13458_v12 = vld [vmem:[#allocation8 + $0x794] sm:$0xf]  ;;  %v9079_v16 = vor.u32 %v13266_v7, %v9076_v56 }
 0x5b5   :  { %v14126_v3 = vld [vmem:[#allocation8 + $0x1c6c] sm:$0xf0]  ;;  %v9844_v59 = vld [vmem:[#allocation8 + $0x7b0] sm:$0xf0] }
 0x5b6   :  { %v12754_v20 = vld [vmem:[#allocation8 + $0x1e50] sm:$0xf]  ;;  %v12499_v32 = vor.u32 %v14126_v3, %v12498_v61  ;;  %7542 = vmatpush.bf16.msra.mxu2 %v12243_v5  ;;  %v9335_v61 = vor.u32 %v13330_v11, %v9332_v2  ;;  %v9044_v3 = vld [vmem:[#allocation8 + $0x170] sm:$0xf0] }
 0x5b7   :  { %v14190_v53 = vld [vmem:[#allocation8 + $0x1e6c] sm:$0xf0]  ;;  %v9300_v9 = vld [vmem:[#allocation8 + $0x370] sm:$0xf0] }
 0x5b8   :  { %v11954_v1 = vld [vmem:[#allocation8 + $0x1810] sm:$0xf]  ;;  %v12755_v18 = vor.u32 %v14190_v53, %v12754_v20  ;;  %7555 = vmatpush.bf16.msra.mxu0 %v12499_v32  ;;  %v9591_v20 = vor.u32 %v13394_v0, %v9588_v28  ;;  %v9847_v53 = vor.u32 %v13458_v12, %v9844_v59  ;;  %v13386_v5 = vld [vmem:[#allocation8 + $0x554] sm:$0xf]  ;;  %v9047_v32 = vor.u32 %v13258_v27, %v9044_v3 }
 0x5b9   :  { %v13990_v25 = vld [vmem:[#allocation8 + $0x182c] sm:$0xf0]  ;;  %v13378_v23 = vld [vmem:[#allocation8 + $0x514] sm:$0xf] }
 0x5ba   :  { %v12210_v26 = vld [vmem:[#allocation8 + $0x1a10] sm:$0xf]  ;;  %v11955_v30 = vor.u32 %v13990_v25, %v11954_v1  ;;  %7568 = vmatpush.bf16.msra.mxu1 %v12755_v18  ;;  %v13322_v1 = vld [vmem:[#allocation8 + $0x354] sm:$0xf] }
 0x5bb   :  { %v14054_v17 = vld [vmem:[#allocation8 + $0x1a2c] sm:$0xf0]  ;;  %v9556_v25 = vld [vmem:[#allocation8 + $0x570] sm:$0xf0]  ;;  %v9303_v18 = vor.u32 %v13322_v1, %v9300_v9 }
 0x5bc   :  { %v12466_v6 = vld [vmem:[#allocation8 + $0x1c10] sm:$0xf]  ;;  %v12211_v14 = vor.u32 %v14054_v17, %v12210_v26  ;;  %7530 = vmatpush.bf16.msrb.mxu3 %v11955_v30  ;;  %v13450_v26 = vld [vmem:[#allocation8 + $0x754] sm:$0xf]  ;;  %v7363_v30 = vpop.f32.mrf.mxu1 }
 0x5bd   :  { %v14118_v38 = vld [vmem:[#allocation8 + $0x1c2c] sm:$0xf0]  ;;  %v9812_v17 = vld [vmem:[#allocation8 + $0x770] sm:$0xf0] }
 0x5be   :  { %v12722_v21 = vld [vmem:[#allocation8 + $0x1e10] sm:$0xf]  ;;  %v12467_v39 = vor.u32 %v14118_v38, %v12466_v6  ;;  %7543 = vmatpush.bf16.msra.mxu2 %v12211_v14  ;;  %v9559_v6 = vor.u32 %v13386_v5, %v9556_v25  ;;  %v9815_v38 = vor.u32 %v13450_v26, %v9812_v17  ;;  %v9524_v29 = vld [vmem:[#allocation8 + $0x530] sm:$0xf0]  ;;  %v9015_v14 = vor.u32 %v13250_v8, %v9012_v33  ;;  %v7352_v26 = vpop.f32.mrf.mxu0 }
 0x5bf   :  { %v14182_v19 = vld [vmem:[#allocation8 + $0x1e2c] sm:$0xf0]  ;;  %7531 = vmatmul.bf16.vlgmr.msrb.gmra.mxu3 %v14673_v40  ;;  %v13442_v34 = vld [vmem:[#allocation8 + $0x714] sm:$0xf] }
 0x5c0   :  { %v12723_v24 = vor.u32 %v14182_v19, %v12722_v21  ;;  %7556 = vmatpush.bf16.msra.mxu0 %v12467_v39  ;;  %7575 = vmatpush.bf16.msra.mxu3 %v9111_v46  ;;  %v13314_v21 = vld [vmem:[#allocation8 + $0x314] sm:$0xf]  ;;  %v9527_v39 = vor.u32 %v13378_v23, %v9524_v29 }
 0x5c1   :  { %7544 = vmatmul.bf16.vlgmr.msra.gmra.mxu2 %v14675_v43  ;;  %v9268_v19 = vld [vmem:[#allocation8 + $0x330] sm:$0xf0] }
 0x5c2   :  { %7569 = vmatpush.bf16.msra.mxu1 %v12723_v24  ;;  %7588 = vmatpush.bf16.msrb.mxu2 %v9367_v4  ;;  %v9780_v45 = vld [vmem:[#allocation8 + $0x730] sm:$0xf0]  ;;  %v9271_v35 = vor.u32 %v13314_v21, %v9268_v19 }
 0x5c3   :  { %7557 = vmatmul.bf16.vlgmr.msra.gmra.mxu0 %v14677_v44  ;;  %v13242_v62 = vld [vmem:[#allocation8 + $0xd4] sm:$0xf]  ;;  %v9783_v24 = vor.u32 %v13442_v34, %v9780_v45 }
 0x5c4   :  { %7601 = vmatpush.bf16.msrb.mxu0 %v9623_v60  ;;  %7576 = vmatpush.bf16.msra.mxu3 %v9079_v16  ;;  %v8980_v63 = vld [vmem:[#allocation8 + $0xf0] sm:$0xf0]  ;;  %v7324_v16 = vpop.f32.mrf.mxu3  ;;  %v7365_v17 = vpop.f32.mrf.mxu1 }
 0x5c5   :  { %7570 = vmatmul.bf16.vlgmr.msra.gmra.mxu1 %v14679_v55  ;;  %v13306_v46 = vld [vmem:[#allocation8 + $0x2d4] sm:$0xf]  ;;  %v8983_v11 = vor.u32 %v13242_v62, %v8980_v63 }
 0x5c6   :  { %7614 = vmatpush.bf16.msrb.mxu1 %v9879_v10  ;;  %7589 = vmatpush.bf16.msrb.mxu2 %v9335_v61  ;;  %v9236_v4 = vld [vmem:[#allocation8 + $0x2f0] sm:$0xf0]  ;;  %v7337_v61 = vpop.f32.mrf.mxu2 }
 0x5c7   :  { %v13370_v7 = vld [vmem:[#allocation8 + $0x4d4] sm:$0xf]  ;;  %v9239_v2 = vor.u32 %v13306_v46, %v9236_v4 }
 0x5c8   :  { %7602 = vmatpush.bf16.msrb.mxu0 %v9591_v20  ;;  %7577 = vmatpush.bf16.msra.mxu3 %v9047_v32  ;;  %v9492_v56 = vld [vmem:[#allocation8 + $0x4f0] sm:$0xf0] }
 0x5c9   :  { %v13434_v60 = vld [vmem:[#allocation8 + $0x6d4] sm:$0xf]  ;;  %v9495_v12 = vor.u32 %v13370_v7, %v9492_v56 }
 0x5ca   :  { %7615 = vmatpush.bf16.msrb.mxu1 %v9847_v53  ;;  %7590 = vmatpush.bf16.msrb.mxu2 %v9303_v18  ;;  %v9748_v10 = vld [vmem:[#allocation8 + $0x6f0] sm:$0xf0]  ;;  %v7325_v53 = vadd.f32 %v7324_v16, %v14794_v31 }
 0x5cb   :  { %v13234_v0 = vld [vmem:[#allocation8 + $0x94] sm:$0xf]  ;;  %v9751_v59 = vor.u32 %v13434_v60, %v9748_v10 }
 0x5cc   :  { %7603 = vmatpush.bf16.msrb.mxu0 %v9559_v6  ;;  %7578 = vmatpush.bf16.msra.mxu3 %v9015_v14  ;;  %v8948_v28 = vld [vmem:[#allocation8 + $0xb0] sm:$0xf0]  ;;  %v7338_v25 = vadd.f32 %v7337_v61, %v7325_v53  ;;  %v7326_v56 = vpop.f32.mrf.mxu3 }
 0x5cd   :  { %v13298_v27 = vld [vmem:[#allocation8 + $0x294] sm:$0xf]  ;;  %v8951_v32 = vor.u32 %v13234_v0, %v8948_v28 }
 0x5ce   :  { %7616 = vmatpush.bf16.msrb.mxu1 %v9815_v38  ;;  %7591 = vmatpush.bf16.msrb.mxu2 %v9271_v35  ;;  %v9204_v3 = vld [vmem:[#allocation8 + $0x2b0] sm:$0xf0]  ;;  %v7351_v31 = vadd.f32 %v7350_v22, %v7338_v25  ;;  %v7339_v60 = vpop.f32.mrf.mxu2 }
 0x5cf   :  { %v13362_v20 = vld [vmem:[#allocation8 + $0x494] sm:$0xf]  ;;  %v9207_v18 = vor.u32 %v13298_v27, %v9204_v3 }
 0x5d0   :  { %7604 = vmatpush.bf16.msrb.mxu0 %v9527_v39  ;;  %v9460_v1 = vld [vmem:[#allocation8 + $0x4b0] sm:$0xf0]  ;;  %7579 = vmatpush.bf16.msra.mxu3 %v8983_v11  ;;  %v14801_v35 = vadd.f32 %v7363_v30, %v7351_v31 }
 0x5d1   :  { %v13426_v9 = vld [vmem:[#allocation8 + $0x694] sm:$0xf]  ;;  %v9463_v6 = vor.u32 %v13362_v20, %v9460_v1 }
 0x5d2   :  { %7617 = vmatpush.bf16.msrb.mxu1 %v9783_v24  ;;  %v9716_v5 = vld [vmem:[#allocation8 + $0x6b0] sm:$0xf0]  ;;  %7592 = vmatpush.bf16.msrb.mxu2 %v9239_v2 }
 0x5d3   :  { %v13226_v8 = vld [vmem:[#allocation8 + $0x54] sm:$0xf]  ;;  %v9719_v38 = vor.u32 %v13426_v9, %v9716_v5 }
 0x5d4   :  { %v8916_v33 = vld [vmem:[#allocation8 + $0x70] sm:$0xf0]  ;;  %7605 = vmatpush.bf16.msrb.mxu0 %v9495_v12  ;;  %7580 = vmatpush.bf16.msra.mxu3 %v8951_v32 }
 0x5d5   :  { %v13290_v21 = vld [vmem:[#allocation8 + $0x254] sm:$0xf]  ;;  %v8919_v62 = vor.u32 %v13226_v8, %v8916_v33 }
 0x5d6   :  { %7618 = vmatpush.bf16.msrb.mxu1 %v9751_v59  ;;  %v9172_v19 = vld [vmem:[#allocation8 + $0x270] sm:$0xf0]  ;;  %7593 = vmatpush.bf16.msrb.mxu2 %v9207_v18 }
 0x5d7   :  { %v13354_v23 = vld [vmem:[#allocation8 + $0x454] sm:$0xf]  ;;  %v9175_v63 = vor.u32 %v13290_v21, %v9172_v19 }
 0x5d8   :  { %v9428_v29 = vld [vmem:[#allocation8 + $0x470] sm:$0xf0]  ;;  %7606 = vmatpush.bf16.msrb.mxu0 %v9463_v6  ;;  %7581 = vmatpush.bf16.msra.mxu3 %v8919_v62 }
 0x5d9   :  { %v13418_v34 = vld [vmem:[#allocation8 + $0x654] sm:$0xf]  ;;  %v9431_v4 = vor.u32 %v13354_v23, %v9428_v29 }
 0x5da   :  { %v9684_v45 = vld [vmem:[#allocation8 + $0x670] sm:$0xf0]  ;;  %7619 = vmatpush.bf16.msrb.mxu1 %v9719_v38  ;;  %7594 = vmatpush.bf16.msrb.mxu2 %v9175_v63 }
 0x5db   :  { %v13218_v14 = vld [vmem:[#allocation8 + $0x14] sm:$0xf]  ;;  %v9687_v7 = vor.u32 %v13418_v34, %v9684_v45 }
 0x5dc   :  { %v8884_v39 = vld [vmem:[#allocation8 + $0x30] sm:$0xf0]  ;;  %7607 = vmatpush.bf16.msrb.mxu0 %v9431_v4 }
 0x5dd   :  { %v13282_v24 = vld [vmem:[#allocation8 + $0x214] sm:$0xf]  ;;  %v8887_v16 = vor.u32 %v13218_v14, %v8884_v39 }
 0x5de   :  { %v9140_v46 = vld [vmem:[#allocation8 + $0x230] sm:$0xf0]  ;;  %7620 = vmatpush.bf16.msrb.mxu1 %v9687_v7 }
 0x5df   :  { %v13346_v22 = vld [vmem:[#allocation8 + $0x414] sm:$0xf]  ;;  %v9143_v61 = vor.u32 %v13282_v24, %v9140_v46  ;;  %7582 = vmatpush.bf16.msra.mxu3 %v8887_v16  ;;  %v14807_v16 = vpop.f32.mrf.mxu1 }
 0x5e0   :  { %v9396_v10 = vld [vmem:[#allocation8 + $0x430] sm:$0xf0] }
 0x5e1   :  { %v13410_v11 = vld [vmem:[#allocation8 + $0x614] sm:$0xf]  ;;  %v9399_v53 = vor.u32 %v13346_v22, %v9396_v10  ;;  %7595 = vmatpush.bf16.msrb.mxu2 %v9143_v61 }
 0x5e2   :  { %v9652_v2 = vld [vmem:[#allocation8 + $0x630] sm:$0xf0]  ;;  %7583 = vmatmul.bf16.vlgmr.msra.gmra.mxu3 %v14621_v47 }
 0x5e3   :  { %v13530_v0 = vld [vmem:[#allocation8 + $0x9d4] sm:$0xf]  ;;  %v9655_v1 = vor.u32 %v13410_v11, %v9652_v2  ;;  %7608 = vmatpush.bf16.msrb.mxu0 %v9399_v53 }
 0x5e4   :  { %v10132_v30 = vld [vmem:[#allocation8 + $0x9f0] sm:$0xf0]  ;;  %7596 = vmatmul.bf16.vlgmr.msrb.gmra.mxu2 %v14623_v48 }
 0x5e5   :  { %v13594_v28 = vld [vmem:[#allocation8 + $0xbd4] sm:$0xf]  ;;  %v10135_v9 = vor.u32 %v13530_v0, %v10132_v30  ;;  %7621 = vmatpush.bf16.msrb.mxu1 %v9655_v1 }
 0x5e6   :  { %v10388_v12 = vld [vmem:[#allocation8 + $0xbf0] sm:$0xf0]  ;;  %7609 = vmatmul.bf16.vlgmr.msrb.gmra.mxu0 %v14625_v49 }
 0x5e7   :  { %v13658_v59 = vld [vmem:[#allocation8 + $0xdd4] sm:$0xf]  ;;  %v10391_v5 = vor.u32 %v13594_v28, %v10388_v12  ;;  %7627 = vmatpush.bf16.msrb.mxu3 %v10135_v9 }
 0x5e8   :  { %v10644_v27 = vld [vmem:[#allocation8 + $0xdf0] sm:$0xf0]  ;;  %7622 = vmatmul.bf16.vlgmr.msrb.gmra.mxu1 %v14631_v54 }
 0x5e9   :  { %v13722_v3 = vld [vmem:[#allocation8 + $0xfd4] sm:$0xf]  ;;  %v10647_v17 = vor.u32 %v13658_v59, %v10644_v27  ;;  %7640 = vmatpush.bf16.msra.mxu2 %v10391_v5  ;;  %v7402_v59 = vpop.f32.mrf.mxu0 }
 0x5ea   :  { %v10900_v20 = vld [vmem:[#allocation8 + $0xff0] sm:$0xf0] }
 0x5eb   :  { %v13522_v25 = vld [vmem:[#allocation8 + $0x994] sm:$0xf]  ;;  %v10903_v32 = vor.u32 %v13722_v3, %v10900_v20  ;;  %7653 = vmatpush.bf16.msra.mxu0 %v10647_v17 }
 0x5ec   :  { %v10100_v26 = vld [vmem:[#allocation8 + $0x9b0] sm:$0xf0] }
 0x5ed   :  { %v13586_v18 = vld [vmem:[#allocation8 + $0xb94] sm:$0xf]  ;;  %v10103_v19 = vor.u32 %v13522_v25, %v10100_v26  ;;  %7666 = vmatpush.bf16.msra.mxu1 %v10903_v32 }
 0x5ee   :  { %v10356_v8 = vld [vmem:[#allocation8 + $0xbb0] sm:$0xf0] }
 0x5ef   :  { %v13650_v33 = vld [vmem:[#allocation8 + $0xd94] sm:$0xf]  ;;  %v10359_v23 = vor.u32 %v13586_v18, %v10356_v8  ;;  %7628 = vmatpush.bf16.msrb.mxu3 %v10103_v19  ;;  %v14323_v18 = vld [vmem:[#allocation10] sm:$0xff] }
 0x5f0   :  { %v10612_v6 = vld [vmem:[#allocation8 + $0xdb0] sm:$0xf0]  ;;  %v1403_v8 = vperm.slane %v14323_v18, 4 }
 0x5f1   :  { %v13714_v38 = vld [vmem:[#allocation8 + $0xf94] sm:$0xf]  ;;  %v10615_v34 = vor.u32 %v13650_v33, %v10612_v6  ;;  %7641 = vmatpush.bf16.msra.mxu2 %v10359_v23 }
 0x5f2   :  { %v10868_v21 = vld [vmem:[#allocation8 + $0xfb0] sm:$0xf0] }
 0x5f3   :  { %v13514_v31 = vld [vmem:[#allocation8 + $0x954] sm:$0xf]  ;;  %v10871_v45 = vor.u32 %v13714_v38, %v10868_v21  ;;  %7654 = vmatpush.bf16.msra.mxu0 %v10615_v34 }
 0x5f4   :  { %v10068_v29 = vld [vmem:[#allocation8 + $0x970] sm:$0xf0] }
 0x5f5   :  { %v13578_v14 = vld [vmem:[#allocation8 + $0xb54] sm:$0xf]  ;;  %v10071_v4 = vor.u32 %v13514_v31, %v10068_v29  ;;  %7667 = vmatpush.bf16.msra.mxu1 %v10871_v45  ;;  %v7376_v31 = vpop.f32.mrf.mxu3  ;;  %v7389_v29 = vpop.f32.mrf.mxu2 }
 0x5f6   :  { %v10324_v62 = vld [vmem:[#allocation8 + $0xb70] sm:$0xf0] }
 0x5f7   :  { %v13642_v63 = vld [vmem:[#allocation8 + $0xd54] sm:$0xf]  ;;  %v10327_v7 = vor.u32 %v13578_v14, %v10324_v62  ;;  %7629 = vmatpush.bf16.msrb.mxu3 %v10071_v4  ;;  %v7377_v62 = vadd.f32 %v7376_v31, %v1403_v8  ;;  %v7404_v4 = vpop.f32.mrf.mxu0 }
 0x5f8   :  { %v10580_v39 = vld [vmem:[#allocation8 + $0xd70] sm:$0xf0] }
 0x5f9   :  { %v13706_v24 = vld [vmem:[#allocation8 + $0xf54] sm:$0xf]  ;;  %v10583_v22 = vor.u32 %v13642_v63, %v10580_v39  ;;  %7642 = vmatpush.bf16.msra.mxu2 %v10327_v7  ;;  %v7417_v7 = vpop.f32.mrf.mxu1 }
 0x5fa   :  { %v10836_v46 = vld [vmem:[#allocation8 + $0xf70] sm:$0xf0] }
 0x5fb   :  { %v13506_v56 = vld [vmem:[#allocation8 + $0x914] sm:$0xf]  ;;  %v10839_v10 = vor.u32 %v13706_v24, %v10836_v46  ;;  %7655 = vmatpush.bf16.msra.mxu0 %v10583_v22  ;;  %v7390_v46 = vadd.f32 %v7389_v29, %v7377_v62 }
 0x5fc   :  { %v10036_v60 = vld [vmem:[#allocation8 + $0x930] sm:$0xf0] }
 0x5fd   :  { %v13570_v11 = vld [vmem:[#allocation8 + $0xb14] sm:$0xf]  ;;  %v10039_v61 = vor.u32 %v13506_v56, %v10036_v60  ;;  %7668 = vmatpush.bf16.msra.mxu1 %v10839_v10  ;;  %v7378_v18 = vpop.f32.mrf.mxu3 }
 0x5fe   :  { %v10292_v2 = vld [vmem:[#allocation8 + $0xb30] sm:$0xf0] }
 0x5ff   :  { %v13634_v0 = vld [vmem:[#allocation8 + $0xd14] sm:$0xf]  ;;  %v10295_v27 = vor.u32 %v13570_v11, %v10292_v2  ;;  %7630 = vmatpush.bf16.msrb.mxu3 %v10039_v61 }
 0x600   :  { %v10548_v30 = vld [vmem:[#allocation8 + $0xd30] sm:$0xf0] }
 0x601   :  { %v13698_v28 = vld [vmem:[#allocation8 + $0xf14] sm:$0xf]  ;;  %v10551_v1 = vor.u32 %v13634_v0, %v10548_v30  ;;  %7643 = vmatpush.bf16.msra.mxu2 %v10295_v27 }
 0x602   :  { %v10804_v12 = vld [vmem:[#allocation8 + $0xf30] sm:$0xf0] }
 0x603   :  { %v13498_v3 = vld [vmem:[#allocation8 + $0x8d4] sm:$0xf]  ;;  %v10807_v9 = vor.u32 %v13698_v28, %v10804_v12  ;;  %7656 = vmatpush.bf16.msra.mxu0 %v10551_v1  ;;  %v7403_v12 = vadd.f32 %v7402_v59, %v7390_v46  ;;  %v7391_v59 = vpop.f32.mrf.mxu2 }
 0x604   :  { %v10004_v20 = vld [vmem:[#allocation8 + $0x8f0] sm:$0xf0] }
 0x605   :  { %v13562_v53 = vld [vmem:[#allocation8 + $0xad4] sm:$0xf]  ;;  %v10007_v33 = vor.u32 %v13498_v3, %v10004_v20  ;;  %7669 = vmatpush.bf16.msra.mxu1 %v10807_v9 }
 0x606   :  { %v10260_v5 = vld [vmem:[#allocation8 + $0xaf0] sm:$0xf0] }
 0x607   :  { %v13626_v25 = vld [vmem:[#allocation8 + $0xcd4] sm:$0xf]  ;;  %v10263_v6 = vor.u32 %v13562_v53, %v10260_v5  ;;  %7631 = vmatpush.bf16.msrb.mxu3 %v10007_v33 }
 0x608   :  { %v10516_v26 = vld [vmem:[#allocation8 + $0xcf0] sm:$0xf0] }
 0x609   :  { %v13690_v17 = vld [vmem:[#allocation8 + $0xed4] sm:$0xf]  ;;  %v10519_v19 = vor.u32 %v13626_v25, %v10516_v26  ;;  %7644 = vmatpush.bf16.msra.mxu2 %v10263_v6  ;;  %v14810_v26 = vadd.f32 %v14807_v16, %v7403_v12 }
 0x60a   :  { %v10772_v32 = vld [vmem:[#allocation8 + $0xef0] sm:$0xf0] }
 0x60b   :  { %v13490_v38 = vld [vmem:[#allocation8 + $0x894] sm:$0xf]  ;;  %v10775_v23 = vor.u32 %v13690_v17, %v10772_v32  ;;  %7657 = vmatpush.bf16.msra.mxu0 %v10519_v19 }
 0x60c   :  { %v9972_v21 = vld [vmem:[#allocation8 + $0x8b0] sm:$0xf0] }
 0x60d   :  { %v13554_v34 = vld [vmem:[#allocation8 + $0xa94] sm:$0xf]  ;;  %v9975_v56 = vor.u32 %v13490_v38, %v9972_v21  ;;  %7670 = vmatpush.bf16.msra.mxu1 %v10775_v23 }
 0x60e   :  { %v10228_v45 = vld [vmem:[#allocation8 + $0xab0] sm:$0xf0] }
 0x60f   :  { %v13618_v14 = vld [vmem:[#allocation8 + $0xc94] sm:$0xf]  ;;  %v10231_v60 = vor.u32 %v13554_v34, %v10228_v45  ;;  %7632 = vmatpush.bf16.msrb.mxu3 %v9975_v56 }
 0x610   :  { %v10484_v63 = vld [vmem:[#allocation8 + $0xcb0] sm:$0xf0] }
 0x611   :  { %v13682_v39 = vld [vmem:[#allocation8 + $0xe94] sm:$0xf]  ;;  %v10487_v11 = vor.u32 %v13618_v14, %v10484_v63  ;;  %7645 = vmatpush.bf16.msra.mxu2 %v10231_v60 }
 0x612   :  { %v10740_v24 = vld [vmem:[#allocation8 + $0xeb0] sm:$0xf0] }
 0x613   :  { %v13482_v22 = vld [vmem:[#allocation8 + $0x854] sm:$0xf]  ;;  %v10743_v2 = vor.u32 %v13682_v39, %v10740_v24  ;;  %7658 = vmatpush.bf16.msra.mxu0 %v10487_v11 }
 0x614   :  { %v9940_v10 = vld [vmem:[#allocation8 + $0x870] sm:$0xf0] }
 0x615   :  { %v13546_v0 = vld [vmem:[#allocation8 + $0xa54] sm:$0xf]  ;;  %v9943_v53 = vor.u32 %v13482_v22, %v9940_v10  ;;  %7671 = vmatpush.bf16.msra.mxu1 %v10743_v2 }
 0x616   :  { %v10196_v30 = vld [vmem:[#allocation8 + $0xa70] sm:$0xf0] }
 0x617   :  { %v13610_v28 = vld [vmem:[#allocation8 + $0xc54] sm:$0xf]  ;;  %v10199_v1 = vor.u32 %v13546_v0, %v10196_v30  ;;  %7633 = vmatpush.bf16.msrb.mxu3 %v9943_v53 }
 0x618   :  { %v10452_v61 = vld [vmem:[#allocation8 + $0xc70] sm:$0xf0] }
 0x619   :  { %v13674_v27 = vld [vmem:[#allocation8 + $0xe54] sm:$0xf]  ;;  %v10455_v17 = vor.u32 %v13610_v28, %v10452_v61  ;;  %7646 = vmatpush.bf16.msra.mxu2 %v10199_v1 }
 0x61a   :  { %v10708_v3 = vld [vmem:[#allocation8 + $0xe70] sm:$0xf0] }
 0x61b   :  { %v13474_v20 = vld [vmem:[#allocation8 + $0x814] sm:$0xf]  ;;  %v10711_v32 = vor.u32 %v13674_v27, %v10708_v3  ;;  %7659 = vmatpush.bf16.msra.mxu0 %v10455_v17 }
 0x61c   :  { %v9908_v9 = vld [vmem:[#allocation8 + $0x830] sm:$0xf0] }
 0x61d   :  { %v13538_v5 = vld [vmem:[#allocation8 + $0xa14] sm:$0xf]  ;;  %v9911_v34 = vor.u32 %v13474_v20, %v9908_v9  ;;  %7672 = vmatpush.bf16.msra.mxu1 %v10711_v32 }
 0x61e   :  { %v10164_v25 = vld [vmem:[#allocation8 + $0xa30] sm:$0xf0] }
 0x61f   :  { %v13602_v8 = vld [vmem:[#allocation8 + $0xc14] sm:$0xf]  ;;  %v10167_v16 = vor.u32 %v13538_v5, %v10164_v25  ;;  %7634 = vmatpush.bf16.msrb.mxu3 %v9911_v34  ;;  %v7454_v34 = vpop.f32.mrf.mxu0 }
 0x620   :  { %v10420_v33 = vld [vmem:[#allocation8 + $0xc30] sm:$0xf0] }
 0x621   :  { %v13666_v6 = vld [vmem:[#allocation8 + $0xe14] sm:$0xf]  ;;  %v10423_v63 = vor.u32 %v13602_v8, %v10420_v33  ;;  %7647 = vmatpush.bf16.msra.mxu2 %v10167_v16  ;;  %v7467_v16 = vpop.f32.mrf.mxu1 }
 0x622   :  { %v10676_v38 = vld [vmem:[#allocation8 + $0xe30] sm:$0xf0]  ;;  %7635 = vmatmul.bf16.vlgmr.msrb.gmra.mxu3 %v14643_v36 }
 0x623   :  { %v13786_v21 = vld [vmem:[#allocation8 + $0x11d4] sm:$0xf]  ;;  %v10679_v39 = vor.u32 %v13666_v6, %v10676_v38  ;;  %7660 = vmatpush.bf16.msra.mxu0 %v10423_v63 }
 0x624   :  { %v11156_v19 = vld [vmem:[#allocation8 + $0x11f0] sm:$0xf0]  ;;  %7648 = vmatmul.bf16.vlgmr.msra.gmra.mxu2 %v14647_v37 }
 0x625   :  { %v13850_v23 = vld [vmem:[#allocation8 + $0x13d4] sm:$0xf]  ;;  %v11159_v24 = vor.u32 %v13786_v21, %v11156_v19  ;;  %7673 = vmatpush.bf16.msra.mxu1 %v10679_v39 }
 0x626   :  { %v11412_v31 = vld [vmem:[#allocation8 + $0x13f0] sm:$0xf0]  ;;  %7661 = vmatmul.bf16.vlgmr.msra.gmra.mxu0 %v14651_v41 }
 0x627   :  { %v13914_v29 = vld [vmem:[#allocation8 + $0x15d4] sm:$0xf]  ;;  %v11415_v46 = vor.u32 %v13850_v23, %v11412_v31  ;;  %7679 = vmatpush.bf16.msra.mxu3 %v11159_v24 }
 0x628   :  { %v11668_v45 = vld [vmem:[#allocation8 + $0x15f0] sm:$0xf0]  ;;  %7674 = vmatmul.bf16.vlgmr.msra.gmra.mxu1 %v14655_v42 }
 0x629   :  { %v13978_v14 = vld [vmem:[#allocation8 + $0x17d4] sm:$0xf]  ;;  %v11671_v56 = vor.u32 %v13914_v29, %v11668_v45  ;;  %7692 = vmatpush.bf16.msrb.mxu2 %v11415_v46 }
 0x62a   :  { %v11924_v62 = vld [vmem:[#allocation8 + $0x17f0] sm:$0xf0] }
 0x62b   :  { %v13778_v4 = vld [vmem:[#allocation8 + $0x1194] sm:$0xf]  ;;  %v11927_v60 = vor.u32 %v13978_v14, %v11924_v62  ;;  %7705 = vmatpush.bf16.msrb.mxu0 %v11671_v56 }
 0x62c   :  { %v11124_v7 = vld [vmem:[#allocation8 + $0x11b0] sm:$0xf0] }
 0x62d   :  { %v13842_v22 = vld [vmem:[#allocation8 + $0x1394] sm:$0xf]  ;;  %v11127_v28 = vor.u32 %v13778_v4, %v11124_v7  ;;  %7718 = vmatpush.bf16.msrb.mxu1 %v11927_v60 }
 0x62e   :  { %v11380_v10 = vld [vmem:[#allocation8 + $0x13b0] sm:$0xf0] }
 0x62f   :  { %v13906_v11 = vld [vmem:[#allocation8 + $0x1594] sm:$0xf]  ;;  %v11383_v12 = vor.u32 %v13842_v22, %v11380_v10  ;;  %7680 = vmatpush.bf16.msra.mxu3 %v11127_v28 }
 0x630   :  { %v11636_v2 = vld [vmem:[#allocation8 + $0x15b0] sm:$0xf0] }
 0x631   :  { %v13970_v0 = vld [vmem:[#allocation8 + $0x1794] sm:$0xf]  ;;  %v11639_v3 = vor.u32 %v13906_v11, %v11636_v2  ;;  %7693 = vmatpush.bf16.msrb.mxu2 %v11383_v12  ;;  %v7428_v12 = vpop.f32.mrf.mxu3 }
 0x632   :  { %v11892_v30 = vld [vmem:[#allocation8 + $0x17b0] sm:$0xf0] }
 0x633   :  { %v13770_v61 = vld [vmem:[#allocation8 + $0x1154] sm:$0xf]  ;;  %v11895_v20 = vor.u32 %v13970_v0, %v11892_v30  ;;  %7706 = vmatpush.bf16.msrb.mxu0 %v11639_v3 }
 0x634   :  { %v11092_v27 = vld [vmem:[#allocation8 + $0x1170] sm:$0xf0] }
 0x635   :  { %v13834_v53 = vld [vmem:[#allocation8 + $0x1354] sm:$0xf]  ;;  %v11095_v32 = vor.u32 %v13770_v61, %v11092_v27  ;;  %7719 = vmatpush.bf16.msrb.mxu1 %v11895_v20  ;;  %v7441_v61 = vpop.f32.mrf.mxu2 }
 0x636   :  { %v11348_v1 = vld [vmem:[#allocation8 + $0x1370] sm:$0xf0] }
 0x637   :  { %v13898_v9 = vld [vmem:[#allocation8 + $0x1554] sm:$0xf]  ;;  %v11351_v18 = vor.u32 %v13834_v53, %v11348_v1  ;;  %7681 = vmatpush.bf16.msra.mxu3 %v11095_v32  ;;  %v7429_v53 = vadd.f32 %v7428_v12, %v14810_v26  ;;  %v7469_v32 = vpop.f32.mrf.mxu1 }
 0x638   :  { %v11604_v5 = vld [vmem:[#allocation8 + $0x1570] sm:$0xf0] }
 0x639   :  { %v13962_v25 = vld [vmem:[#allocation8 + $0x1754] sm:$0xf]  ;;  %v11607_v33 = vor.u32 %v13898_v9, %v11604_v5  ;;  %7694 = vmatpush.bf16.msrb.mxu2 %v11351_v18 }
 0x63a   :  { %v11860_v17 = vld [vmem:[#allocation8 + $0x1770] sm:$0xf0] }
 0x63b   :  { %v13762_v59 = vld [vmem:[#allocation8 + $0x1114] sm:$0xf]  ;;  %v11863_v6 = vor.u32 %v13962_v25, %v11860_v17  ;;  %7707 = vmatpush.bf16.msrb.mxu0 %v11607_v33  ;;  %v7442_v25 = vadd.f32 %v7441_v61, %v7429_v53  ;;  %v7456_v17 = vpop.f32.mrf.mxu0 }
 0x63c   :  { %v11060_v8 = vld [vmem:[#allocation8 + $0x1130] sm:$0xf0] }
 0x63d   :  { %v13826_v38 = vld [vmem:[#allocation8 + $0x1314] sm:$0xf]  ;;  %v11063_v45 = vor.u32 %v13762_v59, %v11060_v8  ;;  %7720 = vmatpush.bf16.msrb.mxu1 %v11863_v6  ;;  %v7455_v26 = vadd.f32 %v7454_v34, %v7442_v25 }
 0x63e   :  { %v11316_v21 = vld [vmem:[#allocation8 + $0x1330] sm:$0xf0] }
 0x63f   :  { %v13890_v19 = vld [vmem:[#allocation8 + $0x1514] sm:$0xf]  ;;  %v11319_v14 = vor.u32 %v13826_v38, %v11316_v21  ;;  %7682 = vmatpush.bf16.msra.mxu3 %v11063_v45 }
 0x640   :  { %v11572_v23 = vld [vmem:[#allocation8 + $0x1530] sm:$0xf0] }
 0x641   :  { %v13954_v31 = vld [vmem:[#allocation8 + $0x1714] sm:$0xf]  ;;  %v11575_v39 = vor.u32 %v13890_v19, %v11572_v23  ;;  %7695 = vmatpush.bf16.msrb.mxu2 %v11319_v14 }
 0x642   :  { %v11828_v29 = vld [vmem:[#allocation8 + $0x1730] sm:$0xf0] }
 0x643   :  { %v13754_v62 = vld [vmem:[#allocation8 + $0x10d4] sm:$0xf]  ;;  %v11831_v24 = vor.u32 %v13954_v31, %v11828_v29  ;;  %7708 = vmatpush.bf16.msrb.mxu0 %v11575_v39 }
 0x644   :  { %v11028_v63 = vld [vmem:[#allocation8 + $0x10f0] sm:$0xf0] }
 0x645   :  { %v13818_v46 = vld [vmem:[#allocation8 + $0x12d4] sm:$0xf]  ;;  %v11031_v10 = vor.u32 %v13754_v62, %v11028_v63  ;;  %7721 = vmatpush.bf16.msrb.mxu1 %v11831_v24 }
 0x646   :  { %v11284_v4 = vld [vmem:[#allocation8 + $0x12f0] sm:$0xf0] }
 0x647   :  { %v13882_v7 = vld [vmem:[#allocation8 + $0x14d4] sm:$0xf]  ;;  %v11287_v11 = vor.u32 %v13818_v46, %v11284_v4  ;;  %7683 = vmatpush.bf16.msra.mxu3 %v11031_v10  ;;  %v14817_v4 = vadd.f32 %v7467_v16, %v7455_v26 }
 0x648   :  { %v11540_v56 = vld [vmem:[#allocation8 + $0x14f0] sm:$0xf0] }
 0x649   :  { %v13946_v60 = vld [vmem:[#allocation8 + $0x16d4] sm:$0xf]  ;;  %v11543_v30 = vor.u32 %v13882_v7, %v11540_v56  ;;  %7696 = vmatpush.bf16.msrb.mxu2 %v11287_v11 }
 0x64a   :  { %v11796_v22 = vld [vmem:[#allocation8 + $0x16f0] sm:$0xf0] }
 0x64b   :  { %v13746_v2 = vld [vmem:[#allocation8 + $0x1094] sm:$0xf]  ;;  %v11799_v28 = vor.u32 %v13946_v60, %v11796_v22  ;;  %7709 = vmatpush.bf16.msrb.mxu0 %v11543_v30  ;;  %v7430_v60 = vpop.f32.mrf.mxu3  ;;  %v7443_v22 = vpop.f32.mrf.mxu2 }
 0x64c   :  { %v10996_v0 = vld [vmem:[#allocation8 + $0x10b0] sm:$0xf0] }
 0x64d   :  { %v13810_v27 = vld [vmem:[#allocation8 + $0x1294] sm:$0xf]  ;;  %v10999_v18 = vor.u32 %v13746_v2, %v10996_v0  ;;  %7722 = vmatpush.bf16.msrb.mxu1 %v11799_v28 }
 0x64e   :  { %v11252_v3 = vld [vmem:[#allocation8 + $0x12b0] sm:$0xf0] }
 0x64f   :  { %v13874_v20 = vld [vmem:[#allocation8 + $0x1494] sm:$0xf]  ;;  %v11255_v59 = vor.u32 %v13810_v27, %v11252_v3  ;;  %7684 = vmatpush.bf16.msra.mxu3 %v10999_v18 }
 0x650   :  { %v11508_v1 = vld [vmem:[#allocation8 + $0x14b0] sm:$0xf0] }
 0x651   :  { %v13938_v9 = vld [vmem:[#allocation8 + $0x1694] sm:$0xf]  ;;  %v11511_v6 = vor.u32 %v13874_v20, %v11508_v1  ;;  %7697 = vmatpush.bf16.msrb.mxu2 %v11255_v59 }
 0x652   :  { %v11764_v5 = vld [vmem:[#allocation8 + $0x16b0] sm:$0xf0] }
 0x653   :  { %v13738_v8 = vld [vmem:[#allocation8 + $0x1054] sm:$0xf]  ;;  %v11767_v38 = vor.u32 %v13938_v9, %v11764_v5  ;;  %7710 = vmatpush.bf16.msrb.mxu0 %v11511_v6 }
 0x654   :  { %v10964_v33 = vld [vmem:[#allocation8 + $0x1070] sm:$0xf0] }
 0x655   :  { %v13802_v21 = vld [vmem:[#allocation8 + $0x1254] sm:$0xf]  ;;  %v10967_v62 = vor.u32 %v13738_v8, %v10964_v33  ;;  %7723 = vmatpush.bf16.msrb.mxu1 %v11767_v38 }
 0x656   :  { %v11220_v19 = vld [vmem:[#allocation8 + $0x1270] sm:$0xf0] }
 0x657   :  { %v13866_v23 = vld [vmem:[#allocation8 + $0x1454] sm:$0xf]  ;;  %v11223_v63 = vor.u32 %v13802_v21, %v11220_v19  ;;  %7685 = vmatpush.bf16.msra.mxu3 %v10967_v62 }
 0x658   :  { %v11476_v31 = vld [vmem:[#allocation8 + $0x1470] sm:$0xf0] }
 0x659   :  { %v13930_v29 = vld [vmem:[#allocation8 + $0x1654] sm:$0xf]  ;;  %v11479_v7 = vor.u32 %v13866_v23, %v11476_v31  ;;  %7698 = vmatpush.bf16.msrb.mxu2 %v11223_v63 }
 0x65a   :  { %v11732_v45 = vld [vmem:[#allocation8 + $0x1670] sm:$0xf0] }
 0x65b   :  { %v13730_v14 = vld [vmem:[#allocation8 + $0x1014] sm:$0xf]  ;;  %v11735_v56 = vor.u32 %v13930_v29, %v11732_v45  ;;  %7711 = vmatpush.bf16.msrb.mxu0 %v11479_v7 }
 0x65c   :  { %v10932_v39 = vld [vmem:[#allocation8 + $0x1030] sm:$0xf0] }
 0x65d   :  { %v13794_v24 = vld [vmem:[#allocation8 + $0x1214] sm:$0xf]  ;;  %v10935_v27 = vor.u32 %v13730_v14, %v10932_v39  ;;  %7724 = vmatpush.bf16.msrb.mxu1 %v11735_v56 }
 0x65e   :  { %v11188_v46 = vld [vmem:[#allocation8 + $0x1230] sm:$0xf0] }
 0x65f   :  { %v13858_v34 = vld [vmem:[#allocation8 + $0x1414] sm:$0xf]  ;;  %v11191_v16 = vor.u32 %v13794_v24, %v11188_v46  ;;  %7686 = vmatpush.bf16.msra.mxu3 %v10935_v27  ;;  %v7506_v27 = vpop.f32.mrf.mxu0 }
 0x660   :  { %v11444_v10 = vld [vmem:[#allocation8 + $0x1430] sm:$0xf0] }
 0x661   :  { %v13922_v11 = vld [vmem:[#allocation8 + $0x1614] sm:$0xf]  ;;  %v11447_v1 = vor.u32 %v13858_v34, %v11444_v10  ;;  %7699 = vmatpush.bf16.msrb.mxu2 %v11191_v16  ;;  %v7519_v16 = vpop.f32.mrf.mxu1 }
 0x662   :  { %v11700_v2 = vld [vmem:[#allocation8 + $0x1630] sm:$0xf0]  ;;  %7687 = vmatmul.bf16.vlgmr.msra.gmra.mxu3 %v14661_v51 }
 0x663   :  { %v14042_v0 = vld [vmem:[#allocation8 + $0x19d4] sm:$0xf]  ;;  %v11703_v9 = vor.u32 %v13922_v11, %v11700_v2  ;;  %7712 = vmatpush.bf16.msrb.mxu0 %v11447_v1 }
 0x664   :  { %v12180_v30 = vld [vmem:[#allocation8 + $0x19f0] sm:$0xf0]  ;;  %7700 = vmatmul.bf16.vlgmr.msrb.gmra.mxu2 %v14663_v52 }
 0x665   :  { %v14106_v28 = vld [vmem:[#allocation8 + $0x1bd4] sm:$0xf]  ;;  %v12183_v5 = vor.u32 %v14042_v0, %v12180_v30  ;;  %7725 = vmatpush.bf16.msrb.mxu1 %v11703_v9 }
 0x666   :  { %v12436_v12 = vld [vmem:[#allocation8 + $0x1bf0] sm:$0xf0]  ;;  %7713 = vmatmul.bf16.vlgmr.msrb.gmra.mxu0 %v14665_v57 }
 0x667   :  { %v14170_v61 = vld [vmem:[#allocation8 + $0x1dd4] sm:$0xf]  ;;  %v12439_v25 = vor.u32 %v14106_v28, %v12436_v12  ;;  %7731 = vmatpush.bf16.msrb.mxu3 %v12183_v5 }
 0x668   :  { %v12692_v3 = vld [vmem:[#allocation8 + $0x1df0] sm:$0xf0]  ;;  %7726 = vmatmul.bf16.vlgmr.msrb.gmra.mxu1 %v14667_v58 }
 0x669   :  { %v14234_v20 = vld [vmem:[#allocation8 + $0x1fd4] sm:$0xf]  ;;  %v12695_v18 = vor.u32 %v14170_v61, %v12692_v3  ;;  %7744 = vmatpush.bf16.msra.mxu2 %v12439_v25 }
 0x66a   :  { %v12948_v53 = vld [vmem:[#allocation8 + $0x1ff0] sm:$0xf0] }
 0x66b   :  { %v14034_v17 = vld [vmem:[#allocation8 + $0x1994] sm:$0xf]  ;;  %v12951_v59 = vor.u32 %v14234_v20, %v12948_v53  ;;  %7757 = vmatpush.bf16.msra.mxu0 %v12695_v18 }
 0x66c   :  { %v12148_v32 = vld [vmem:[#allocation8 + $0x19b0] sm:$0xf0] }
 0x66d   :  { %v14098_v8 = vld [vmem:[#allocation8 + $0x1b94] sm:$0xf]  ;;  %v12151_v23 = vor.u32 %v14034_v17, %v12148_v32  ;;  %7770 = vmatpush.bf16.msra.mxu1 %v12951_v59 }
 0x66e   :  { %v12404_v33 = vld [vmem:[#allocation8 + $0x1bb0] sm:$0xf0] }
 0x66f   :  { %v14162_v6 = vld [vmem:[#allocation8 + $0x1d94] sm:$0xf]  ;;  %v12407_v26 = vor.u32 %v14098_v8, %v12404_v33  ;;  %7732 = vmatpush.bf16.msrb.mxu3 %v12151_v23 }
 0x670   :  { %v12660_v38 = vld [vmem:[#allocation8 + $0x1db0] sm:$0xf0] }
 0x671   :  { %v14226_v21 = vld [vmem:[#allocation8 + $0x1f94] sm:$0xf]  ;;  %v12663_v45 = vor.u32 %v14162_v6, %v12660_v38  ;;  %7745 = vmatpush.bf16.msra.mxu2 %v12407_v26  ;;  %v7480_v26 = vpop.f32.mrf.mxu3 }
 0x672   :  { %v12916_v19 = vld [vmem:[#allocation8 + $0x1fb0] sm:$0xf0] }
 0x673   :  { %v14026_v31 = vld [vmem:[#allocation8 + $0x1954] sm:$0xf]  ;;  %v12919_v14 = vor.u32 %v14226_v21, %v12916_v19  ;;  %7758 = vmatpush.bf16.msra.mxu0 %v12663_v45 }
 0x674   :  { %v12116_v29 = vld [vmem:[#allocation8 + $0x1970] sm:$0xf0] }
 0x675   :  { %v14090_v62 = vld [vmem:[#allocation8 + $0x1b54] sm:$0xf]  ;;  %v12119_v56 = vor.u32 %v14026_v31, %v12116_v29  ;;  %7771 = vmatpush.bf16.msra.mxu1 %v12919_v14  ;;  %v7493_v31 = vpop.f32.mrf.mxu2 }
 0x676   :  { %v12372_v63 = vld [vmem:[#allocation8 + $0x1b70] sm:$0xf0] }
 0x677   :  { %v14154_v39 = vld [vmem:[#allocation8 + $0x1d54] sm:$0xf]  ;;  %v12375_v60 = vor.u32 %v14090_v62, %v12372_v63  ;;  %7733 = vmatpush.bf16.msrb.mxu3 %v12119_v56  ;;  %v7481_v62 = vadd.f32 %v7480_v26, %v14817_v4  ;;  %v7521_v56 = vpop.f32.mrf.mxu1  ;;  %v13343_v26 = vld [vmem:[#allocation8 + $0x3f4] sm:$0xf0] }
 0x678   :  { %v12628_v24 = vld [vmem:[#allocation8 + $0x1d70] sm:$0xf0]  ;;  %v13271_v56 = vld [vmem:[#allocation8 + $0x1b4] sm:$0xf0] }
 0x679   :  { %v14218_v46 = vld [vmem:[#allocation8 + $0x1f54] sm:$0xf]  ;;  %v12631_v10 = vor.u32 %v14154_v39, %v12628_v24  ;;  %7746 = vmatpush.bf16.msra.mxu2 %v12375_v60 }
 0x67a   :  { %v12884_v7 = vld [vmem:[#allocation8 + $0x1f70] sm:$0xf0] }
 0x67b   :  { %v14018_v22 = vld [vmem:[#allocation8 + $0x1914] sm:$0xf]  ;;  %v12887_v11 = vor.u32 %v14218_v46, %v12884_v7  ;;  %7759 = vmatpush.bf16.msra.mxu0 %v12631_v10  ;;  %v7494_v46 = vadd.f32 %v7493_v31, %v7481_v62  ;;  %v7508_v7 = vpop.f32.mrf.mxu0  ;;  %v9626_v31 = vld [vmem:[#allocation8 + $0x5d8] sm:$0xf] }
 0x67c   :  { %v12084_v34 = vld [vmem:[#allocation8 + $0x1930] sm:$0xf0]  ;;  %v13471_v62 = vld [vmem:[#allocation8 + $0x7f4] sm:$0xf0] }
 0x67d   :  { %v14082_v2 = vld [vmem:[#allocation8 + $0x1b14] sm:$0xf]  ;;  %v12087_v3 = vor.u32 %v14018_v22, %v12084_v34  ;;  %7772 = vmatpush.bf16.msra.mxu1 %v12887_v11  ;;  %v7507_v4 = vadd.f32 %v7506_v27, %v7494_v46  ;;  %v9082_v7 = vld [vmem:[#allocation8 + $0x198] sm:$0xf] }
 0x67e   :  { %v12340_v0 = vld [vmem:[#allocation8 + $0x1b30] sm:$0xf0] }
 0x67f   :  { %v14146_v30 = vld [vmem:[#allocation8 + $0x1d14] sm:$0xf]  ;;  %v12343_v20 = vor.u32 %v14082_v2, %v12340_v0  ;;  %7734 = vmatpush.bf16.msrb.mxu3 %v12087_v3 }
 0x680   :  { %v12596_v28 = vld [vmem:[#allocation8 + $0x1d30] sm:$0xf0] }
 0x681   :  { %v14210_v12 = vld [vmem:[#allocation8 + $0x1f14] sm:$0xf]  ;;  %v12599_v9 = vor.u32 %v14146_v30, %v12596_v28  ;;  %7747 = vmatpush.bf16.msra.mxu2 %v12343_v20 }
 0x682   :  { %v12852_v61 = vld [vmem:[#allocation8 + $0x1f30] sm:$0xf0] }
 0x683   :  { %v14010_v53 = vld [vmem:[#allocation8 + $0x18d4] sm:$0xf]  ;;  %v12855_v5 = vor.u32 %v14210_v12, %v12852_v61  ;;  %7760 = vmatpush.bf16.msra.mxu0 %v12599_v9 }
 0x684   :  { %v12052_v1 = vld [vmem:[#allocation8 + $0x18f0] sm:$0xf0] }
 0x685   :  { %v14074_v25 = vld [vmem:[#allocation8 + $0x1ad4] sm:$0xf]  ;;  %v12055_v33 = vor.u32 %v14010_v53, %v12052_v1  ;;  %7773 = vmatpush.bf16.msra.mxu1 %v12855_v5 }
 0x686   :  { %v12308_v17 = vld [vmem:[#allocation8 + $0x1af0] sm:$0xf0] }
 0x687   :  { %v14138_v32 = vld [vmem:[#allocation8 + $0x1cd4] sm:$0xf]  ;;  %v12311_v6 = vor.u32 %v14074_v25, %v12308_v17  ;;  %7735 = vmatpush.bf16.msrb.mxu3 %v12055_v33  ;;  %v14824_v17 = vadd.f32 %v7519_v16, %v7507_v4 }
 0x688   :  { %v12564_v18 = vld [vmem:[#allocation8 + $0x1cf0] sm:$0xf0] }
 0x689   :  { %v14202_v59 = vld [vmem:[#allocation8 + $0x1ed4] sm:$0xf]  ;;  %v12567_v19 = vor.u32 %v14138_v32, %v12564_v18  ;;  %7748 = vmatpush.bf16.msra.mxu2 %v12311_v6 }
 0x68a   :  { %v12820_v8 = vld [vmem:[#allocation8 + $0x1ef0] sm:$0xf0] }
 0x68b   :  { %v14002_v38 = vld [vmem:[#allocation8 + $0x1894] sm:$0xf]  ;;  %v12823_v23 = vor.u32 %v14202_v59, %v12820_v8  ;;  %7761 = vmatpush.bf16.msra.mxu0 %v12567_v19  ;;  %v7482_v59 = vpop.f32.mrf.mxu3  ;;  %v7495_v8 = vpop.f32.mrf.mxu2  ;;  %v13279_v19 = vld [vmem:[#allocation8 + $0x1f4] sm:$0xf0] }
 0x68c   :  { %v12020_v21 = vld [vmem:[#allocation8 + $0x18b0] sm:$0xf0]  ;;  %v9018_v8 = vld [vmem:[#allocation8 + $0x118] sm:$0xf] }
 0x68d   :  { %v14066_v29 = vld [vmem:[#allocation8 + $0x1a94] sm:$0xf]  ;;  %v12023_v60 = vor.u32 %v14002_v38, %v12020_v21  ;;  %7774 = vmatpush.bf16.msra.mxu1 %v12823_v23  ;;  %v9114_v21 = vld [vmem:[#allocation8 + $0x1d8] sm:$0xf] }
 0x68e   :  { %v12276_v45 = vld [vmem:[#allocation8 + $0x1ab0] sm:$0xf0]  ;;  %v9370_v23 = vld [vmem:[#allocation8 + $0x3d8] sm:$0xf] }
 0x68f   :  { %v14130_v14 = vld [vmem:[#allocation8 + $0x1c94] sm:$0xf]  ;;  %v12279_v22 = vor.u32 %v14066_v29, %v12276_v45  ;;  %7736 = vmatpush.bf16.msrb.mxu3 %v12023_v60  ;;  %v13407_v45 = vld [vmem:[#allocation8 + $0x5f4] sm:$0xf0]  ;;  %v9371_v46 = vor.u32 %v13343_v26, %v9370_v23 }
 0x690   :  { %v12532_v63 = vld [vmem:[#allocation8 + $0x1cb0] sm:$0xf0]  ;;  %v9627_v60 = vor.u32 %v13407_v45, %v9626_v31  ;;  %v13383_v23 = vld [vmem:[#allocation8 + $0x534] sm:$0xf0] }
 0x691   :  { %v14194_v39 = vld [vmem:[#allocation8 + $0x1e94] sm:$0xf]  ;;  %v12535_v11 = vor.u32 %v14130_v14, %v12532_v63  ;;  %7749 = vmatpush.bf16.msra.mxu2 %v12279_v22  ;;  %v9882_v14 = vld [vmem:[#allocation8 + $0x7d8] sm:$0xf] }
 0x692   :  { %v12788_v24 = vld [vmem:[#allocation8 + $0x1eb0] sm:$0xf0]  ;;  %v9883_v22 = vor.u32 %v13471_v62, %v9882_v14  ;;  %v9786_v26 = vld [vmem:[#allocation8 + $0x718] sm:$0xf] }
 0x693   :  { %v13994_v34 = vld [vmem:[#allocation8 + $0x1854] sm:$0xf]  ;;  %v12791_v2 = vor.u32 %v14194_v39, %v12788_v24  ;;  %7762 = vmatpush.bf16.msra.mxu0 %v12535_v11  ;;  %v9115_v24 = vor.u32 %v13279_v19, %v9114_v21  ;;  %v9594_v11 = vld [vmem:[#allocation8 + $0x598] sm:$0xf] }
 0x694   :  { %v11988_v10 = vld [vmem:[#allocation8 + $0x1870] sm:$0xf0]  ;;  %v13319_v21 = vld [vmem:[#allocation8 + $0x334] sm:$0xf0] }
 0x695   :  { %v14058_v0 = vld [vmem:[#allocation8 + $0x1a54] sm:$0xf]  ;;  %v11991_v53 = vor.u32 %v13994_v34, %v11988_v10  ;;  %7775 = vmatpush.bf16.msra.mxu1 %v12791_v2  ;;  %v9338_v34 = vld [vmem:[#allocation8 + $0x398] sm:$0xf] }
 0x696   :  { %v12244_v30 = vld [vmem:[#allocation8 + $0x1a70] sm:$0xf0]  ;;  %v13335_v10 = vld [vmem:[#allocation8 + $0x3b4] sm:$0xf0] }
 0x697   :  { %v14122_v28 = vld [vmem:[#allocation8 + $0x1c54] sm:$0xf]  ;;  %v12247_v1 = vor.u32 %v14058_v0, %v12244_v30  ;;  %7737 = vmatpush.bf16.msrb.mxu3 %v11991_v53  ;;  %v13399_v2 = vld [vmem:[#allocation8 + $0x5b4] sm:$0xf0]  ;;  %v9339_v4 = vor.u32 %v13335_v10, %v9338_v34 }
 0x698   :  { %v12500_v12 = vld [vmem:[#allocation8 + $0x1c70] sm:$0xf0]  ;;  %v9850_v0 = vld [vmem:[#allocation8 + $0x798] sm:$0xf] }
 0x699   :  { %v14186_v61 = vld [vmem:[#allocation8 + $0x1e54] sm:$0xf]  ;;  %v12503_v32 = vor.u32 %v14122_v28, %v12500_v12  ;;  %7750 = vmatpush.bf16.msra.mxu2 %v12247_v1  ;;  %v13463_v30 = vld [vmem:[#allocation8 + $0x7b4] sm:$0xf0]  ;;  %v9083_v28 = vor.u32 %v13271_v56, %v9082_v7 }
 0x69a   :  { %v12756_v3 = vld [vmem:[#allocation8 + $0x1e70] sm:$0xf0]  ;;  %v9050_v12 = vld [vmem:[#allocation8 + $0x158] sm:$0xf] }
 0x69b   :  { %v13986_v20 = vld [vmem:[#allocation8 + $0x1814] sm:$0xf]  ;;  %v12759_v18 = vor.u32 %v14186_v61, %v12756_v3  ;;  %7763 = vmatpush.bf16.msra.mxu0 %v12503_v32  ;;  %v13263_v61 = vld [vmem:[#allocation8 + $0x174] sm:$0xf0]  ;;  %v9595_v3 = vor.u32 %v13399_v2, %v9594_v11 }
 0x69c   :  { %v11956_v9 = vld [vmem:[#allocation8 + $0x1830] sm:$0xf0]  ;;  %v9306_v53 = vld [vmem:[#allocation8 + $0x358] sm:$0xf] }
 0x69d   :  { %v14050_v5 = vld [vmem:[#allocation8 + $0x1a14] sm:$0xf]  ;;  %v11959_v29 = vor.u32 %v13986_v20, %v11956_v9  ;;  %7776 = vmatpush.bf16.msra.mxu1 %v12759_v18  ;;  %v9851_v20 = vor.u32 %v13463_v30, %v9850_v0  ;;  %v13327_v1 = vld [vmem:[#allocation8 + $0x374] sm:$0xf0]  ;;  %v9051_v18 = vor.u32 %v13263_v61, %v9050_v12  ;;  %v7545_v12 = vpop.f32.mrf.mxu2 }
 0x69e   :  { %v12212_v25 = vld [vmem:[#allocation8 + $0x1a30] sm:$0xf0]  ;;  %v9562_v9 = vld [vmem:[#allocation8 + $0x558] sm:$0xf]  ;;  %v9307_v59 = vor.u32 %v13327_v1, %v9306_v53 }
 0x69f   :  { %v14114_v27 = vld [vmem:[#allocation8 + $0x1c14] sm:$0xf]  ;;  %v12215_v16 = vor.u32 %v14050_v5, %v12212_v25  ;;  %7738 = vmatpush.bf16.msrb.mxu3 %v11959_v29  ;;  %v13391_v5 = vld [vmem:[#allocation8 + $0x574] sm:$0xf0]  ;;  %v7558_v29 = vpop.f32.mrf.mxu0 }
 0x6a0   :  { %v12468_v33 = vld [vmem:[#allocation8 + $0x1c30] sm:$0xf0]  ;;  %v9818_v25 = vld [vmem:[#allocation8 + $0x758] sm:$0xf] }
 0x6a1   :  { %v14178_v6 = vld [vmem:[#allocation8 + $0x1e14] sm:$0xf]  ;;  %v12471_v63 = vor.u32 %v14114_v27, %v12468_v33  ;;  %7751 = vmatpush.bf16.msra.mxu2 %v12215_v16  ;;  %v13455_v32 = vld [vmem:[#allocation8 + $0x774] sm:$0xf0]  ;;  %v9563_v33 = vor.u32 %v13391_v5, %v9562_v9  ;;  %v7571_v16 = vpop.f32.mrf.mxu1 }
 0x6a2   :  { %v12724_v38 = vld [vmem:[#allocation8 + $0x1e30] sm:$0xf0]  ;;  %7739 = vmatmul.bf16.vlgmr.msrb.gmra.mxu3 %v14673_v40  ;;  %v13255_v27 = vld [vmem:[#allocation8 + $0x134] sm:$0xf0] }
 0x6a3   :  { %v12727_v39 = vor.u32 %v14178_v6, %v12724_v38  ;;  %7764 = vmatpush.bf16.msra.mxu0 %v12471_v63  ;;  %7783 = vmatpush.bf16.msra.mxu3 %v9115_v24  ;;  %v9819_v6 = vor.u32 %v13455_v32, %v9818_v25  ;;  %v9274_v38 = vld [vmem:[#allocation8 + $0x318] sm:$0xf]  ;;  %v9019_v45 = vor.u32 %v13255_v27, %v9018_v8 }
 0x6a4   :  { %7752 = vmatmul.bf16.vlgmr.msra.gmra.mxu2 %v14675_v43  ;;  %v9530_v19 = vld [vmem:[#allocation8 + $0x518] sm:$0xf]  ;;  %v9275_v14 = vor.u32 %v13319_v21, %v9274_v38 }
 0x6a5   :  { %7777 = vmatpush.bf16.msra.mxu1 %v12727_v39  ;;  %7796 = vmatpush.bf16.msrb.mxu2 %v9371_v46  ;;  %v13447_v31 = vld [vmem:[#allocation8 + $0x734] sm:$0xf0]  ;;  %v9531_v39 = vor.u32 %v13383_v23, %v9530_v19 }
 0x6a6   :  { %7765 = vmatmul.bf16.vlgmr.msra.gmra.mxu0 %v14677_v44  ;;  %v8986_v62 = vld [vmem:[#allocation8 + $0xd8] sm:$0xf]  ;;  %v9787_v24 = vor.u32 %v13447_v31, %v9786_v26 }
 0x6a7   :  { %7809 = vmatpush.bf16.msrb.mxu0 %v9627_v60  ;;  %7784 = vmatpush.bf16.msra.mxu3 %v9083_v28  ;;  %v13247_v63 = vld [vmem:[#allocation8 + $0xf4] sm:$0xf0]  ;;  %v7560_v32 = vpop.f32.mrf.mxu0 }
 0x6a8   :  { %7778 = vmatmul.bf16.vlgmr.msra.gmra.mxu1 %v14679_v55  ;;  %v9242_v46 = vld [vmem:[#allocation8 + $0x2d8] sm:$0xf]  ;;  %v8987_v10 = vor.u32 %v13247_v63, %v8986_v62 }
 0x6a9   :  { %7822 = vmatpush.bf16.msrb.mxu1 %v9883_v22  ;;  %7797 = vmatpush.bf16.msrb.mxu2 %v9339_v4  ;;  %v13311_v7 = vld [vmem:[#allocation8 + $0x2f4] sm:$0xf0]  ;;  %v7532_v4 = vpop.f32.mrf.mxu3 }
 0x6aa   :  { %v9498_v56 = vld [vmem:[#allocation8 + $0x4d8] sm:$0xf]  ;;  %v9243_v11 = vor.u32 %v13311_v7, %v9242_v46  ;;  %v7533_v53 = vadd.f32 %v7532_v4, %v14824_v17 }
 0x6ab   :  { %7810 = vmatpush.bf16.msrb.mxu0 %v9595_v3  ;;  %7785 = vmatpush.bf16.msra.mxu3 %v9051_v18  ;;  %v13375_v60 = vld [vmem:[#allocation8 + $0x4f4] sm:$0xf0]  ;;  %v7573_v18 = vpop.f32.mrf.mxu1 }
 0x6ac   :  { %v9754_v22 = vld [vmem:[#allocation8 + $0x6d8] sm:$0xf]  ;;  %v9499_v30 = vor.u32 %v13375_v60, %v9498_v56  ;;  %v7546_v25 = vadd.f32 %v7545_v12, %v7533_v53 }
 0x6ad   :  { %7823 = vmatpush.bf16.msrb.mxu1 %v9851_v20  ;;  %7798 = vmatpush.bf16.msrb.mxu2 %v9307_v59  ;;  %v13439_v34 = vld [vmem:[#allocation8 + $0x6f4] sm:$0xf0] }
 0x6ae   :  { %v8954_v2 = vld [vmem:[#allocation8 + $0x98] sm:$0xf]  ;;  %v9755_v28 = vor.u32 %v13439_v34, %v9754_v22  ;;  %v7559_v17 = vadd.f32 %v7558_v29, %v7546_v25  ;;  %v7547_v34 = vpop.f32.mrf.mxu2 }
 0x6af   :  { %7811 = vmatpush.bf16.msrb.mxu0 %v9563_v33  ;;  %7786 = vmatpush.bf16.msra.mxu3 %v9019_v45  ;;  %v13239_v0 = vld [vmem:[#allocation8 + $0xb4] sm:$0xf0] }
 0x6b0   :  { %v9210_v61 = vld [vmem:[#allocation8 + $0x298] sm:$0xf]  ;;  %v8955_v59 = vor.u32 %v13239_v0, %v8954_v2  ;;  %v14831_v62 = vadd.f32 %v7571_v16, %v7559_v17 }
 0x6b1   :  { %7824 = vmatpush.bf16.msrb.mxu1 %v9819_v6  ;;  %7799 = vmatpush.bf16.msrb.mxu2 %v9275_v14  ;;  %v13303_v3 = vld [vmem:[#allocation8 + $0x2b4] sm:$0xf0]  ;;  %v7534_v22 = vpop.f32.mrf.mxu3 }
 0x6b2   :  { %v9466_v20 = vld [vmem:[#allocation8 + $0x498] sm:$0xf]  ;;  %v9211_v8 = vor.u32 %v13303_v3, %v9210_v61 }
 0x6b3   :  { %7812 = vmatpush.bf16.msrb.mxu0 %v9531_v39  ;;  %v13367_v1 = vld [vmem:[#allocation8 + $0x4b4] sm:$0xf0]  ;;  %7787 = vmatpush.bf16.msra.mxu3 %v8987_v10 }
 0x6b4   :  { %v9722_v9 = vld [vmem:[#allocation8 + $0x698] sm:$0xf]  ;;  %v9467_v6 = vor.u32 %v13367_v1, %v9466_v20 }
 0x6b5   :  { %7825 = vmatpush.bf16.msrb.mxu1 %v9787_v24  ;;  %v13431_v5 = vld [vmem:[#allocation8 + $0x6b4] sm:$0xf0]  ;;  %7800 = vmatpush.bf16.msrb.mxu2 %v9243_v11 }
 0x6b6   :  { %v8922_v27 = vld [vmem:[#allocation8 + $0x58] sm:$0xf]  ;;  %v9723_v38 = vor.u32 %v13431_v5, %v9722_v9 }
 0x6b7   :  { %v13231_v33 = vld [vmem:[#allocation8 + $0x74] sm:$0xf0]  ;;  %7813 = vmatpush.bf16.msrb.mxu0 %v9499_v30  ;;  %7788 = vmatpush.bf16.msra.mxu3 %v8955_v59 }
 0x6b8   :  { %v9178_v21 = vld [vmem:[#allocation8 + $0x258] sm:$0xf]  ;;  %v8923_v63 = vor.u32 %v13231_v33, %v8922_v27 }
 0x6b9   :  { %7826 = vmatpush.bf16.msrb.mxu1 %v9755_v28  ;;  %v13295_v19 = vld [vmem:[#allocation8 + $0x274] sm:$0xf0]  ;;  %7801 = vmatpush.bf16.msrb.mxu2 %v9211_v8 }
 0x6ba   :  { %v9434_v23 = vld [vmem:[#allocation8 + $0x458] sm:$0xf]  ;;  %v9179_v39 = vor.u32 %v13295_v19, %v9178_v21 }
 0x6bb   :  { %v13359_v26 = vld [vmem:[#allocation8 + $0x474] sm:$0xf0]  ;;  %7814 = vmatpush.bf16.msrb.mxu0 %v9467_v6  ;;  %7789 = vmatpush.bf16.msra.mxu3 %v8923_v63 }
 0x6bc   :  { %v9690_v31 = vld [vmem:[#allocation8 + $0x658] sm:$0xf]  ;;  %v9435_v56 = vor.u32 %v13359_v26, %v9434_v23 }
 0x6bd   :  { %v13423_v45 = vld [vmem:[#allocation8 + $0x674] sm:$0xf0]  ;;  %7827 = vmatpush.bf16.msrb.mxu1 %v9723_v38  ;;  %7802 = vmatpush.bf16.msrb.mxu2 %v9179_v39 }
 0x6be   :  { %v8890_v14 = vld [vmem:[#allocation8 + $0x18] sm:$0xf]  ;;  %v9691_v60 = vor.u32 %v13423_v45, %v9690_v31 }
 0x6bf   :  { %v13223_v24 = vld [vmem:[#allocation8 + $0x34] sm:$0xf0]  ;;  %7815 = vmatpush.bf16.msrb.mxu0 %v9435_v56 }
 0x6c0   :  { %v9146_v46 = vld [vmem:[#allocation8 + $0x218] sm:$0xf]  ;;  %v8891_v12 = vor.u32 %v13223_v24, %v8890_v14 }
 0x6c1   :  { %v13287_v7 = vld [vmem:[#allocation8 + $0x234] sm:$0xf0]  ;;  %7828 = vmatpush.bf16.msrb.mxu1 %v9691_v60 }
 0x6c2   :  { %v9402_v29 = vld [vmem:[#allocation8 + $0x418] sm:$0xf]  ;;  %v9147_v61 = vor.u32 %v13287_v7, %v9146_v46  ;;  %7790 = vmatpush.bf16.msra.mxu3 %v8891_v12  ;;  %v7610_v12 = vpop.f32.mrf.mxu0 }
 0x6c3   :  { %v13351_v10 = vld [vmem:[#allocation8 + $0x434] sm:$0xf0] }
 0x6c4   :  { %v9658_v11 = vld [vmem:[#allocation8 + $0x618] sm:$0xf]  ;;  %v9403_v1 = vor.u32 %v13351_v10, %v9402_v29  ;;  %7803 = vmatpush.bf16.msrb.mxu2 %v9147_v61  ;;  %v14837_v61 = vpop.f32.mrf.mxu1 }
 0x6c5   :  { %v13415_v2 = vld [vmem:[#allocation8 + $0x634] sm:$0xf0]  ;;  %7791 = vmatmul.bf16.vlgmr.msra.gmra.mxu3 %v14621_v47 }
 0x6c6   :  { %v10138_v0 = vld [vmem:[#allocation8 + $0x9d8] sm:$0xf]  ;;  %v9659_v9 = vor.u32 %v13415_v2, %v9658_v11  ;;  %7816 = vmatpush.bf16.msrb.mxu0 %v9403_v1 }
 0x6c7   :  { %v13535_v16 = vld [vmem:[#allocation8 + $0x9f4] sm:$0xf0]  ;;  %7804 = vmatmul.bf16.vlgmr.msrb.gmra.mxu2 %v14623_v48 }
 0x6c8   :  { %v10394_v30 = vld [vmem:[#allocation8 + $0xbd8] sm:$0xf]  ;;  %v10139_v5 = vor.u32 %v13535_v16, %v10138_v0  ;;  %7829 = vmatpush.bf16.msrb.mxu1 %v9659_v9 }
 0x6c9   :  { %v13599_v28 = vld [vmem:[#allocation8 + $0xbf4] sm:$0xf0]  ;;  %7817 = vmatmul.bf16.vlgmr.msrb.gmra.mxu0 %v14625_v49 }
 0x6ca   :  { %v10650_v4 = vld [vmem:[#allocation8 + $0xdd8] sm:$0xf]  ;;  %v10395_v25 = vor.u32 %v13599_v28, %v10394_v30  ;;  %7835 = vmatpush.bf16.msrb.mxu3 %v10139_v5 }
 0x6cb   :  { %v13663_v3 = vld [vmem:[#allocation8 + $0xdf4] sm:$0xf0]  ;;  %7830 = vmatmul.bf16.vlgmr.msrb.gmra.mxu1 %v14631_v54 }
 0x6cc   :  { %v10906_v20 = vld [vmem:[#allocation8 + $0xfd8] sm:$0xf]  ;;  %v10651_v59 = vor.u32 %v13663_v3, %v10650_v4  ;;  %7848 = vmatpush.bf16.msra.mxu2 %v10395_v25 }
 0x6cd   :  { %v13727_v53 = vld [vmem:[#allocation8 + $0xff4] sm:$0xf0] }
 0x6ce   :  { %v10106_v32 = vld [vmem:[#allocation8 + $0x998] sm:$0xf]  ;;  %v10907_v8 = vor.u32 %v13727_v53, %v10906_v20  ;;  %7861 = vmatpush.bf16.msra.mxu0 %v10651_v59 }
 0x6cf   :  { %v13527_v18 = vld [vmem:[#allocation8 + $0x9b4] sm:$0xf0] }
 0x6d0   :  { %v10362_v27 = vld [vmem:[#allocation8 + $0xb98] sm:$0xf]  ;;  %v10107_v23 = vor.u32 %v13527_v18, %v10106_v32  ;;  %7874 = vmatpush.bf16.msra.mxu1 %v10907_v8 }
 0x6d1   :  { %v13591_v33 = vld [vmem:[#allocation8 + $0xbb4] sm:$0xf0] }
 0x6d2   :  { %v10618_v6 = vld [vmem:[#allocation8 + $0xd98] sm:$0xf]  ;;  %v10363_v17 = vor.u32 %v13591_v33, %v10362_v27  ;;  %7836 = vmatpush.bf16.msrb.mxu3 %v10107_v23  ;;  %v14324_v33 = vld [vmem:[#allocation10] sm:$0xff] }
 0x6d3   :  { %v13655_v38 = vld [vmem:[#allocation8 + $0xdb4] sm:$0xf0] }
 0x6d4   :  { %v10874_v21 = vld [vmem:[#allocation8 + $0xf98] sm:$0xf]  ;;  %v10619_v45 = vor.u32 %v13655_v38, %v10618_v6  ;;  %7849 = vmatpush.bf16.msra.mxu2 %v10363_v17  ;;  %v1404_v6 = vperm.slane %v14324_v33, 5 }
 0x6d5   :  { %v13719_v19 = vld [vmem:[#allocation8 + $0xfb4] sm:$0xf0] }
 0x6d6   :  { %v10074_v26 = vld [vmem:[#allocation8 + $0x958] sm:$0xf]  ;;  %v10875_v14 = vor.u32 %v13719_v19, %v10874_v21  ;;  %7862 = vmatpush.bf16.msra.mxu0 %v10619_v45  ;;  %v7597_v45 = vpop.f32.mrf.mxu2 }
 0x6d7   :  { %v13519_v31 = vld [vmem:[#allocation8 + $0x974] sm:$0xf0] }
 0x6d8   :  { %v10330_v63 = vld [vmem:[#allocation8 + $0xb58] sm:$0xf]  ;;  %v10075_v60 = vor.u32 %v13519_v31, %v10074_v26  ;;  %7875 = vmatpush.bf16.msra.mxu1 %v10875_v14  ;;  %v7584_v31 = vpop.f32.mrf.mxu3 }
 0x6d9   :  { %v13583_v39 = vld [vmem:[#allocation8 + $0xb74] sm:$0xf0] }
 0x6da   :  { %v10586_v24 = vld [vmem:[#allocation8 + $0xd58] sm:$0xf]  ;;  %v10331_v22 = vor.u32 %v13583_v39, %v10330_v63  ;;  %7837 = vmatpush.bf16.msrb.mxu3 %v10075_v60 }
 0x6db   :  { %v13647_v46 = vld [vmem:[#allocation8 + $0xd74] sm:$0xf0] }
 0x6dc   :  { %v10842_v7 = vld [vmem:[#allocation8 + $0xf58] sm:$0xf]  ;;  %v10587_v10 = vor.u32 %v13647_v46, %v10586_v24  ;;  %7850 = vmatpush.bf16.msra.mxu2 %v10331_v22  ;;  %v7585_v24 = vadd.f32 %v7584_v31, %v1404_v6  ;;  %v7612_v22 = vpop.f32.mrf.mxu0 }
 0x6dd   :  { %v13711_v56 = vld [vmem:[#allocation8 + $0xf74] sm:$0xf0] }
 0x6de   :  { %v10042_v34 = vld [vmem:[#allocation8 + $0x918] sm:$0xf]  ;;  %v10843_v11 = vor.u32 %v13711_v56, %v10842_v7  ;;  %7863 = vmatpush.bf16.msra.mxu0 %v10587_v10  ;;  %v7598_v60 = vadd.f32 %v7597_v45, %v7585_v24 }
 0x6df   :  { %v13511_v29 = vld [vmem:[#allocation8 + $0x934] sm:$0xf0] }
 0x6e0   :  { %v10298_v2 = vld [vmem:[#allocation8 + $0xb18] sm:$0xf]  ;;  %v10043_v3 = vor.u32 %v13511_v29, %v10042_v34  ;;  %7876 = vmatpush.bf16.msra.mxu1 %v10843_v11  ;;  %v7625_v34 = vpop.f32.mrf.mxu1  ;;  %v7586_v6 = vpop.f32.mrf.mxu3 }
 0x6e1   :  { %v13575_v0 = vld [vmem:[#allocation8 + $0xb34] sm:$0xf0] }
 0x6e2   :  { %v10554_v16 = vld [vmem:[#allocation8 + $0xd18] sm:$0xf]  ;;  %v10299_v20 = vor.u32 %v13575_v0, %v10298_v2  ;;  %7838 = vmatpush.bf16.msrb.mxu3 %v10043_v3  ;;  %v7611_v3 = vadd.f32 %v7610_v12, %v7598_v60  ;;  %v7599_v12 = vpop.f32.mrf.mxu2 }
 0x6e3   :  { %v13639_v30 = vld [vmem:[#allocation8 + $0xd34] sm:$0xf0] }
 0x6e4   :  { %v10810_v28 = vld [vmem:[#allocation8 + $0xf18] sm:$0xf]  ;;  %v10555_v5 = vor.u32 %v13639_v30, %v10554_v16  ;;  %7851 = vmatpush.bf16.msra.mxu2 %v10299_v20 }
 0x6e5   :  { %v13703_v4 = vld [vmem:[#allocation8 + $0xf34] sm:$0xf0] }
 0x6e6   :  { %v10010_v53 = vld [vmem:[#allocation8 + $0x8d8] sm:$0xf]  ;;  %v10811_v25 = vor.u32 %v13703_v4, %v10810_v28  ;;  %7864 = vmatpush.bf16.msra.mxu0 %v10555_v5 }
 0x6e7   :  { %v13503_v1 = vld [vmem:[#allocation8 + $0x8f4] sm:$0xf0] }
 0x6e8   :  { %v10266_v9 = vld [vmem:[#allocation8 + $0xad8] sm:$0xf]  ;;  %v10011_v38 = vor.u32 %v13503_v1, %v10010_v53  ;;  %7877 = vmatpush.bf16.msra.mxu1 %v10811_v25 }
 0x6e9   :  { %v13567_v32 = vld [vmem:[#allocation8 + $0xaf4] sm:$0xf0] }
 0x6ea   :  { %v10522_v18 = vld [vmem:[#allocation8 + $0xcd8] sm:$0xf]  ;;  %v10267_v21 = vor.u32 %v13567_v32, %v10266_v9  ;;  %7839 = vmatpush.bf16.msrb.mxu3 %v10011_v38 }
 0x6eb   :  { %v13631_v59 = vld [vmem:[#allocation8 + $0xcf4] sm:$0xf0] }
 0x6ec   :  { %v10778_v8 = vld [vmem:[#allocation8 + $0xed8] sm:$0xf]  ;;  %v10523_v17 = vor.u32 %v13631_v59, %v10522_v18  ;;  %7852 = vmatpush.bf16.msra.mxu2 %v10267_v21 }
 0x6ed   :  { %v13695_v27 = vld [vmem:[#allocation8 + $0xef4] sm:$0xf0] }
 0x6ee   :  { %v9978_v19 = vld [vmem:[#allocation8 + $0x898] sm:$0xf]  ;;  %v10779_v26 = vor.u32 %v13695_v27, %v10778_v8  ;;  %7865 = vmatpush.bf16.msra.mxu0 %v10523_v17  ;;  %v14840_v8 = vadd.f32 %v14837_v61, %v7611_v3 }
 0x6ef   :  { %v13495_v23 = vld [vmem:[#allocation8 + $0x8b4] sm:$0xf0] }
 0x6f0   :  { %v10234_v14 = vld [vmem:[#allocation8 + $0xa98] sm:$0xf]  ;;  %v9979_v29 = vor.u32 %v13495_v23, %v9978_v19  ;;  %7878 = vmatpush.bf16.msra.mxu1 %v10779_v26 }
 0x6f1   :  { %v13559_v63 = vld [vmem:[#allocation8 + $0xab4] sm:$0xf0] }
 0x6f2   :  { %v10490_v39 = vld [vmem:[#allocation8 + $0xc98] sm:$0xf]  ;;  %v10235_v10 = vor.u32 %v13559_v63, %v10234_v14  ;;  %7840 = vmatpush.bf16.msrb.mxu3 %v9979_v29 }
 0x6f3   :  { %v13623_v46 = vld [vmem:[#allocation8 + $0xcb4] sm:$0xf0] }
 0x6f4   :  { %v10746_v7 = vld [vmem:[#allocation8 + $0xe98] sm:$0xf]  ;;  %v10491_v0 = vor.u32 %v13623_v46, %v10490_v39  ;;  %7853 = vmatpush.bf16.msra.mxu2 %v10235_v10 }
 0x6f5   :  { %v13687_v56 = vld [vmem:[#allocation8 + $0xeb4] sm:$0xf0] }
 0x6f6   :  { %v9946_v11 = vld [vmem:[#allocation8 + $0x858] sm:$0xf]  ;;  %v10747_v16 = vor.u32 %v13687_v56, %v10746_v7  ;;  %7866 = vmatpush.bf16.msra.mxu0 %v10491_v0 }
 0x6f7   :  { %v13487_v2 = vld [vmem:[#allocation8 + $0x874] sm:$0xf0] }
 0x6f8   :  { %v10202_v30 = vld [vmem:[#allocation8 + $0xa58] sm:$0xf]  ;;  %v9947_v5 = vor.u32 %v13487_v2, %v9946_v11  ;;  %7879 = vmatpush.bf16.msra.mxu1 %v10747_v16 }
 0x6f9   :  { %v13551_v28 = vld [vmem:[#allocation8 + $0xa74] sm:$0xf0] }
 0x6fa   :  { %v10458_v4 = vld [vmem:[#allocation8 + $0xc58] sm:$0xf]  ;;  %v10203_v25 = vor.u32 %v13551_v28, %v10202_v30  ;;  %7841 = vmatpush.bf16.msrb.mxu3 %v9947_v5 }
 0x6fb   :  { %v13615_v20 = vld [vmem:[#allocation8 + $0xc74] sm:$0xf0] }
 0x6fc   :  { %v10714_v53 = vld [vmem:[#allocation8 + $0xe58] sm:$0xf]  ;;  %v10459_v27 = vor.u32 %v13615_v20, %v10458_v4  ;;  %7854 = vmatpush.bf16.msra.mxu2 %v10203_v25 }
 0x6fd   :  { %v13679_v1 = vld [vmem:[#allocation8 + $0xe74] sm:$0xf0] }
 0x6fe   :  { %v9914_v9 = vld [vmem:[#allocation8 + $0x818] sm:$0xf]  ;;  %v10715_v33 = vor.u32 %v13679_v1, %v10714_v53  ;;  %7867 = vmatpush.bf16.msra.mxu0 %v10459_v27 }
 0x6ff   :  { %v13479_v32 = vld [vmem:[#allocation8 + $0x834] sm:$0xf0] }
 0x700   :  { %v10170_v18 = vld [vmem:[#allocation8 + $0xa18] sm:$0xf]  ;;  %v9915_v63 = vor.u32 %v13479_v32, %v9914_v9  ;;  %7880 = vmatpush.bf16.msra.mxu1 %v10715_v33 }
 0x701   :  { %v13543_v59 = vld [vmem:[#allocation8 + $0xa34] sm:$0xf0] }
 0x702   :  { %v10426_v38 = vld [vmem:[#allocation8 + $0xc18] sm:$0xf]  ;;  %v10171_v61 = vor.u32 %v13543_v59, %v10170_v18  ;;  %7842 = vmatpush.bf16.msrb.mxu3 %v9915_v63 }
 0x703   :  { %v13607_v21 = vld [vmem:[#allocation8 + $0xc34] sm:$0xf0] }
 0x704   :  { %v10682_v19 = vld [vmem:[#allocation8 + $0xe18] sm:$0xf]  ;;  %v10427_v7 = vor.u32 %v13607_v21, %v10426_v38  ;;  %7855 = vmatpush.bf16.msra.mxu2 %v10171_v61  ;;  %v7662_v61 = vpop.f32.mrf.mxu0 }
 0x705   :  { %v13671_v23 = vld [vmem:[#allocation8 + $0xe34] sm:$0xf0]  ;;  %7843 = vmatmul.bf16.vlgmr.msrb.gmra.mxu3 %v14643_v36 }
 0x706   :  { %v11162_v17 = vld [vmem:[#allocation8 + $0x11d8] sm:$0xf]  ;;  %v10683_v56 = vor.u32 %v13671_v23, %v10682_v19  ;;  %7868 = vmatpush.bf16.msra.mxu0 %v10427_v7 }
 0x707   :  { %v13791_v26 = vld [vmem:[#allocation8 + $0x11f4] sm:$0xf0]  ;;  %7856 = vmatmul.bf16.vlgmr.msra.gmra.mxu2 %v14647_v37 }
 0x708   :  { %v11418_v31 = vld [vmem:[#allocation8 + $0x13d8] sm:$0xf]  ;;  %v11163_v60 = vor.u32 %v13791_v26, %v11162_v17  ;;  %7881 = vmatpush.bf16.msra.mxu1 %v10683_v56 }
 0x709   :  { %v13855_v45 = vld [vmem:[#allocation8 + $0x13f4] sm:$0xf0]  ;;  %7869 = vmatmul.bf16.vlgmr.msra.gmra.mxu0 %v14651_v41 }
 0x70a   :  { %v11674_v14 = vld [vmem:[#allocation8 + $0x15d8] sm:$0xf]  ;;  %v11419_v22 = vor.u32 %v13855_v45, %v11418_v31  ;;  %7887 = vmatpush.bf16.msra.mxu3 %v11163_v60 }
 0x70b   :  { %v13919_v39 = vld [vmem:[#allocation8 + $0x15f4] sm:$0xf0]  ;;  %7882 = vmatmul.bf16.vlgmr.msra.gmra.mxu1 %v14655_v42 }
 0x70c   :  { %v11930_v24 = vld [vmem:[#allocation8 + $0x17d8] sm:$0xf]  ;;  %v11675_v10 = vor.u32 %v13919_v39, %v11674_v14  ;;  %7900 = vmatpush.bf16.msrb.mxu2 %v11419_v22  ;;  %v7675_v39 = vpop.f32.mrf.mxu1 }
 0x70d   :  { %v13983_v46 = vld [vmem:[#allocation8 + $0x17f4] sm:$0xf0] }
 0x70e   :  { %v11130_v34 = vld [vmem:[#allocation8 + $0x1198] sm:$0xf]  ;;  %v11931_v11 = vor.u32 %v13983_v46, %v11930_v24  ;;  %7913 = vmatpush.bf16.msrb.mxu0 %v11675_v10 }
 0x70f   :  { %v13783_v29 = vld [vmem:[#allocation8 + $0x11b4] sm:$0xf0] }
 0x710   :  { %v11386_v2 = vld [vmem:[#allocation8 + $0x1398] sm:$0xf]  ;;  %v11131_v3 = vor.u32 %v13783_v29, %v11130_v34  ;;  %7926 = vmatpush.bf16.msrb.mxu1 %v11931_v11 }
 0x711   :  { %v13847_v0 = vld [vmem:[#allocation8 + $0x13b4] sm:$0xf0] }
 0x712   :  { %v11642_v16 = vld [vmem:[#allocation8 + $0x1598] sm:$0xf]  ;;  %v11387_v20 = vor.u32 %v13847_v0, %v11386_v2  ;;  %7888 = vmatpush.bf16.msra.mxu3 %v11131_v3 }
 0x713   :  { %v13911_v30 = vld [vmem:[#allocation8 + $0x15b4] sm:$0xf0] }
 0x714   :  { %v11898_v28 = vld [vmem:[#allocation8 + $0x1798] sm:$0xf]  ;;  %v11643_v9 = vor.u32 %v13911_v30, %v11642_v16  ;;  %7901 = vmatpush.bf16.msrb.mxu2 %v11387_v20 }
 0x715   :  { %v13975_v4 = vld [vmem:[#allocation8 + $0x17b4] sm:$0xf0] }
 0x716   :  { %v11098_v53 = vld [vmem:[#allocation8 + $0x1158] sm:$0xf]  ;;  %v11899_v5 = vor.u32 %v13975_v4, %v11898_v28  ;;  %7914 = vmatpush.bf16.msrb.mxu0 %v11643_v9 }
 0x717   :  { %v13775_v1 = vld [vmem:[#allocation8 + $0x1174] sm:$0xf0] }
 0x718   :  { %v11354_v25 = vld [vmem:[#allocation8 + $0x1358] sm:$0xf]  ;;  %v11099_v6 = vor.u32 %v13775_v1, %v11098_v53  ;;  %7927 = vmatpush.bf16.msrb.mxu1 %v11899_v5  ;;  %v7636_v53 = vpop.f32.mrf.mxu3  ;;  %v7649_v1 = vpop.f32.mrf.mxu2 }
 0x719   :  { %v13839_v32 = vld [vmem:[#allocation8 + $0x1374] sm:$0xf0] }
 0x71a   :  { %v11610_v18 = vld [vmem:[#allocation8 + $0x1558] sm:$0xf]  ;;  %v11355_v12 = vor.u32 %v13839_v32, %v11354_v25  ;;  %7889 = vmatpush.bf16.msra.mxu3 %v11099_v6  ;;  %v7637_v32 = vadd.f32 %v7636_v53, %v14840_v8  ;;  %v7664_v6 = vpop.f32.mrf.mxu0 }
 0x71b   :  { %v13903_v59 = vld [vmem:[#allocation8 + $0x1574] sm:$0xf0] }
 0x71c   :  { %v11866_v27 = vld [vmem:[#allocation8 + $0x1758] sm:$0xf]  ;;  %v11611_v19 = vor.u32 %v13903_v59, %v11610_v18  ;;  %7902 = vmatpush.bf16.msrb.mxu2 %v11355_v12  ;;  %v7677_v12 = vpop.f32.mrf.mxu1 }
 0x71d   :  { %v13967_v33 = vld [vmem:[#allocation8 + $0x1774] sm:$0xf0] }
 0x71e   :  { %v11066_v38 = vld [vmem:[#allocation8 + $0x1118] sm:$0xf]  ;;  %v11867_v23 = vor.u32 %v13967_v33, %v11866_v27  ;;  %7915 = vmatpush.bf16.msrb.mxu0 %v11611_v19  ;;  %v7650_v33 = vadd.f32 %v7649_v1, %v7637_v32 }
 0x71f   :  { %v13767_v21 = vld [vmem:[#allocation8 + $0x1134] sm:$0xf0] }
 0x720   :  { %v11322_v17 = vld [vmem:[#allocation8 + $0x1318] sm:$0xf]  ;;  %v11067_v24 = vor.u32 %v13767_v21, %v11066_v38  ;;  %7928 = vmatpush.bf16.msrb.mxu1 %v11867_v23  ;;  %v7663_v8 = vadd.f32 %v7662_v61, %v7650_v33 }
 0x721   :  { %v13831_v26 = vld [vmem:[#allocation8 + $0x1334] sm:$0xf0] }
 0x722   :  { %v11578_v31 = vld [vmem:[#allocation8 + $0x1518] sm:$0xf]  ;;  %v11323_v46 = vor.u32 %v13831_v26, %v11322_v17  ;;  %7890 = vmatpush.bf16.msra.mxu3 %v11067_v24 }
 0x723   :  { %v13895_v45 = vld [vmem:[#allocation8 + $0x1534] sm:$0xf0] }
 0x724   :  { %v11834_v14 = vld [vmem:[#allocation8 + $0x1718] sm:$0xf]  ;;  %v11579_v60 = vor.u32 %v13895_v45, %v11578_v31  ;;  %7903 = vmatpush.bf16.msrb.mxu2 %v11323_v46 }
 0x725   :  { %v13959_v63 = vld [vmem:[#allocation8 + $0x1734] sm:$0xf0] }
 0x726   :  { %v11034_v7 = vld [vmem:[#allocation8 + $0x10d8] sm:$0xf]  ;;  %v11835_v22 = vor.u32 %v13959_v63, %v11834_v14  ;;  %7916 = vmatpush.bf16.msrb.mxu0 %v11579_v60 }
 0x727   :  { %v13759_v56 = vld [vmem:[#allocation8 + $0x10f4] sm:$0xf0] }
 0x728   :  { %v11290_v34 = vld [vmem:[#allocation8 + $0x12d8] sm:$0xf]  ;;  %v11035_v16 = vor.u32 %v13759_v56, %v11034_v7  ;;  %7929 = vmatpush.bf16.msrb.mxu1 %v11835_v22 }
 0x729   :  { %v13823_v29 = vld [vmem:[#allocation8 + $0x12f4] sm:$0xf0] }
 0x72a   :  { %v11546_v10 = vld [vmem:[#allocation8 + $0x14d8] sm:$0xf]  ;;  %v11291_v30 = vor.u32 %v13823_v29, %v11290_v34  ;;  %7891 = vmatpush.bf16.msra.mxu3 %v11035_v16  ;;  %v7651_v16 = vpop.f32.mrf.mxu2 }
 0x72b   :  { %v13887_v11 = vld [vmem:[#allocation8 + $0x14f4] sm:$0xf0] }
 0x72c   :  { %v11802_v2 = vld [vmem:[#allocation8 + $0x16d8] sm:$0xf]  ;;  %v11547_v3 = vor.u32 %v13887_v11, %v11546_v10  ;;  %7904 = vmatpush.bf16.msrb.mxu2 %v11291_v30  ;;  %v14847_v10 = vadd.f32 %v7675_v39, %v7663_v8 }
 0x72d   :  { %v13951_v0 = vld [vmem:[#allocation8 + $0x16f4] sm:$0xf0] }
 0x72e   :  { %v11002_v28 = vld [vmem:[#allocation8 + $0x1098] sm:$0xf]  ;;  %v11803_v20 = vor.u32 %v13951_v0, %v11802_v2  ;;  %7917 = vmatpush.bf16.msrb.mxu0 %v11547_v3  ;;  %v7638_v0 = vpop.f32.mrf.mxu3 }
 0x72f   :  { %v13751_v4 = vld [vmem:[#allocation8 + $0x10b4] sm:$0xf0] }
 0x730   :  { %v11258_v9 = vld [vmem:[#allocation8 + $0x1298] sm:$0xf]  ;;  %v11003_v38 = vor.u32 %v13751_v4, %v11002_v28  ;;  %7930 = vmatpush.bf16.msrb.mxu1 %v11803_v20 }
 0x731   :  { %v13815_v5 = vld [vmem:[#allocation8 + $0x12b4] sm:$0xf0] }
 0x732   :  { %v11514_v25 = vld [vmem:[#allocation8 + $0x1498] sm:$0xf]  ;;  %v11259_v21 = vor.u32 %v13815_v5, %v11258_v9  ;;  %7892 = vmatpush.bf16.msra.mxu3 %v11003_v38 }
 0x733   :  { %v13879_v18 = vld [vmem:[#allocation8 + $0x14b4] sm:$0xf0] }
 0x734   :  { %v11770_v59 = vld [vmem:[#allocation8 + $0x1698] sm:$0xf]  ;;  %v11515_v17 = vor.u32 %v13879_v18, %v11514_v25  ;;  %7905 = vmatpush.bf16.msrb.mxu2 %v11259_v21 }
 0x735   :  { %v13943_v27 = vld [vmem:[#allocation8 + $0x16b4] sm:$0xf0] }
 0x736   :  { %v10970_v19 = vld [vmem:[#allocation8 + $0x1058] sm:$0xf]  ;;  %v11771_v26 = vor.u32 %v13943_v27, %v11770_v59  ;;  %7918 = vmatpush.bf16.msrb.mxu0 %v11515_v17 }
 0x737   :  { %v13743_v23 = vld [vmem:[#allocation8 + $0x1074] sm:$0xf0] }
 0x738   :  { %v11226_v31 = vld [vmem:[#allocation8 + $0x1258] sm:$0xf]  ;;  %v10971_v56 = vor.u32 %v13743_v23, %v10970_v19  ;;  %7931 = vmatpush.bf16.msrb.mxu1 %v11771_v26 }
 0x739   :  { %v13807_v45 = vld [vmem:[#allocation8 + $0x1274] sm:$0xf0] }
 0x73a   :  { %v11482_v14 = vld [vmem:[#allocation8 + $0x1458] sm:$0xf]  ;;  %v11227_v60 = vor.u32 %v13807_v45, %v11226_v31  ;;  %7893 = vmatpush.bf16.msra.mxu3 %v10971_v56 }
 0x73b   :  { %v13871_v63 = vld [vmem:[#allocation8 + $0x1474] sm:$0xf0] }
 0x73c   :  { %v11738_v24 = vld [vmem:[#allocation8 + $0x1658] sm:$0xf]  ;;  %v11483_v11 = vor.u32 %v13871_v63, %v11482_v14  ;;  %7906 = vmatpush.bf16.msrb.mxu2 %v11227_v60 }
 0x73d   :  { %v13935_v46 = vld [vmem:[#allocation8 + $0x1674] sm:$0xf0] }
 0x73e   :  { %v10938_v7 = vld [vmem:[#allocation8 + $0x1018] sm:$0xf]  ;;  %v11739_v2 = vor.u32 %v13935_v46, %v11738_v24  ;;  %7919 = vmatpush.bf16.msrb.mxu0 %v11483_v11 }
 0x73f   :  { %v13735_v22 = vld [vmem:[#allocation8 + $0x1034] sm:$0xf0] }
 0x740   :  { %v11194_v34 = vld [vmem:[#allocation8 + $0x1218] sm:$0xf]  ;;  %v10939_v5 = vor.u32 %v13735_v22, %v10938_v7  ;;  %7932 = vmatpush.bf16.msrb.mxu1 %v11739_v2 }
 0x741   :  { %v13799_v29 = vld [vmem:[#allocation8 + $0x1234] sm:$0xf0] }
 0x742   :  { %v11450_v61 = vld [vmem:[#allocation8 + $0x1418] sm:$0xf]  ;;  %v11195_v39 = vor.u32 %v13799_v29, %v11194_v34  ;;  %7894 = vmatpush.bf16.msra.mxu3 %v10939_v5 }
 0x743   :  { %v13863_v30 = vld [vmem:[#allocation8 + $0x1434] sm:$0xf0] }
 0x744   :  { %v11706_v28 = vld [vmem:[#allocation8 + $0x1618] sm:$0xf]  ;;  %v11451_v59 = vor.u32 %v13863_v30, %v11450_v61  ;;  %7907 = vmatpush.bf16.msrb.mxu2 %v11195_v39  ;;  %v7714_v39 = vpop.f32.mrf.mxu0 }
 0x745   :  { %v13927_v4 = vld [vmem:[#allocation8 + $0x1634] sm:$0xf0]  ;;  %7895 = vmatmul.bf16.vlgmr.msra.gmra.mxu3 %v14661_v51 }
 0x746   :  { %v12186_v3 = vld [vmem:[#allocation8 + $0x19d8] sm:$0xf]  ;;  %v11707_v27 = vor.u32 %v13927_v4, %v11706_v28  ;;  %7920 = vmatpush.bf16.msrb.mxu0 %v11451_v59 }
 0x747   :  { %v14047_v20 = vld [vmem:[#allocation8 + $0x19f4] sm:$0xf0]  ;;  %7908 = vmatmul.bf16.vlgmr.msrb.gmra.mxu2 %v14663_v52 }
 0x748   :  { %v12442_v53 = vld [vmem:[#allocation8 + $0x1bd8] sm:$0xf]  ;;  %v12187_v33 = vor.u32 %v14047_v20, %v12186_v3  ;;  %7933 = vmatpush.bf16.msrb.mxu1 %v11707_v27 }
 0x749   :  { %v14111_v1 = vld [vmem:[#allocation8 + $0x1bf4] sm:$0xf0]  ;;  %7921 = vmatmul.bf16.vlgmr.msrb.gmra.mxu0 %v14665_v57 }
 0x74a   :  { %v12698_v9 = vld [vmem:[#allocation8 + $0x1dd8] sm:$0xf]  ;;  %v12443_v6 = vor.u32 %v14111_v1, %v12442_v53  ;;  %7939 = vmatpush.bf16.msrb.mxu3 %v12187_v33 }
 0x74b   :  { %v14175_v25 = vld [vmem:[#allocation8 + $0x1df4] sm:$0xf0]  ;;  %7934 = vmatmul.bf16.vlgmr.msrb.gmra.mxu1 %v14667_v58 }
 0x74c   :  { %v12954_v32 = vld [vmem:[#allocation8 + $0x1fd8] sm:$0xf]  ;;  %v12699_v21 = vor.u32 %v14175_v25, %v12698_v9  ;;  %7952 = vmatpush.bf16.msra.mxu2 %v12443_v6  ;;  %v7727_v25 = vpop.f32.mrf.mxu1 }
 0x74d   :  { %v14239_v18 = vld [vmem:[#allocation8 + $0x1ff4] sm:$0xf0] }
 0x74e   :  { %v12154_v12 = vld [vmem:[#allocation8 + $0x1998] sm:$0xf]  ;;  %v12955_v19 = vor.u32 %v14239_v18, %v12954_v32  ;;  %7965 = vmatpush.bf16.msra.mxu0 %v12699_v21 }
 0x74f   :  { %v14039_v38 = vld [vmem:[#allocation8 + $0x19b4] sm:$0xf0] }
 0x750   :  { %v12410_v23 = vld [vmem:[#allocation8 + $0x1b98] sm:$0xf]  ;;  %v12155_v8 = vor.u32 %v14039_v38, %v12154_v12  ;;  %7978 = vmatpush.bf16.msra.mxu1 %v12955_v19 }
 0x751   :  { %v14103_v17 = vld [vmem:[#allocation8 + $0x1bb4] sm:$0xf0] }
 0x752   :  { %v12666_v26 = vld [vmem:[#allocation8 + $0x1d98] sm:$0xf]  ;;  %v12411_v63 = vor.u32 %v14103_v17, %v12410_v23  ;;  %7940 = vmatpush.bf16.msrb.mxu3 %v12155_v8 }
 0x753   :  { %v14167_v31 = vld [vmem:[#allocation8 + $0x1db4] sm:$0xf0] }
 0x754   :  { %v12922_v45 = vld [vmem:[#allocation8 + $0x1f98] sm:$0xf]  ;;  %v12667_v7 = vor.u32 %v14167_v31, %v12666_v26  ;;  %7953 = vmatpush.bf16.msra.mxu2 %v12411_v63 }
 0x755   :  { %v14231_v14 = vld [vmem:[#allocation8 + $0x1fb4] sm:$0xf0] }
 0x756   :  { %v12122_v24 = vld [vmem:[#allocation8 + $0x1958] sm:$0xf]  ;;  %v12923_v56 = vor.u32 %v14231_v14, %v12922_v45  ;;  %7966 = vmatpush.bf16.msra.mxu0 %v12667_v7 }
 0x757   :  { %v14031_v46 = vld [vmem:[#allocation8 + $0x1974] sm:$0xf0] }
 0x758   :  { %v12378_v60 = vld [vmem:[#allocation8 + $0x1b58] sm:$0xf]  ;;  %v12123_v0 = vor.u32 %v14031_v46, %v12122_v24  ;;  %7979 = vmatpush.bf16.msra.mxu1 %v12923_v56  ;;  %v7688_v24 = vpop.f32.mrf.mxu3  ;;  %v7701_v46 = vpop.f32.mrf.mxu2 }
 0x759   :  { %v14095_v22 = vld [vmem:[#allocation8 + $0x1b74] sm:$0xf0] }
 0x75a   :  { %v12634_v34 = vld [vmem:[#allocation8 + $0x1d58] sm:$0xf]  ;;  %v12379_v16 = vor.u32 %v14095_v22, %v12378_v60  ;;  %7941 = vmatpush.bf16.msrb.mxu3 %v12123_v0  ;;  %v7689_v22 = vadd.f32 %v7688_v24, %v14847_v10  ;;  %v7716_v0 = vpop.f32.mrf.mxu0  ;;  %v13339_v24 = vld [vmem:[#allocation8 + $0x3dc] sm:$0xf] }
 0x75b   :  { %v14159_v29 = vld [vmem:[#allocation8 + $0x1d74] sm:$0xf0] }
 0x75c   :  { %v12890_v11 = vld [vmem:[#allocation8 + $0x1f58] sm:$0xf]  ;;  %v12635_v28 = vor.u32 %v14159_v29, %v12634_v34  ;;  %7954 = vmatpush.bf16.msra.mxu2 %v12379_v16  ;;  %v7729_v16 = vpop.f32.mrf.mxu1 }
 0x75d   :  { %v14223_v2 = vld [vmem:[#allocation8 + $0x1f74] sm:$0xf0]  ;;  %v13267_v16 = vld [vmem:[#allocation8 + $0x19c] sm:$0xf] }
 0x75e   :  { %v12090_v61 = vld [vmem:[#allocation8 + $0x1918] sm:$0xf]  ;;  %v12891_v4 = vor.u32 %v14223_v2, %v12890_v11  ;;  %7967 = vmatpush.bf16.msra.mxu0 %v12635_v28  ;;  %v7702_v2 = vadd.f32 %v7701_v46, %v7689_v22  ;;  %v9372_v46 = vld [vmem:[#allocation8 + $0x3f8] sm:$0xf0] }
 0x75f   :  { %v14023_v30 = vld [vmem:[#allocation8 + $0x1934] sm:$0xf0]  ;;  %v13467_v22 = vld [vmem:[#allocation8 + $0x7dc] sm:$0xf]  ;;  %v9375_v0 = vor.u32 %v13339_v24, %v9372_v46 }
 0x760   :  { %v12346_v3 = vld [vmem:[#allocation8 + $0x1b18] sm:$0xf]  ;;  %v12091_v32 = vor.u32 %v14023_v30, %v12090_v61  ;;  %7980 = vmatpush.bf16.msra.mxu1 %v12891_v4  ;;  %v7715_v10 = vadd.f32 %v7714_v39, %v7702_v2  ;;  %v13379_v24 = vld [vmem:[#allocation8 + $0x51c] sm:$0xf] }
 0x761   :  { %v14087_v20 = vld [vmem:[#allocation8 + $0x1b34] sm:$0xf0]  ;;  %v9532_v46 = vld [vmem:[#allocation8 + $0x538] sm:$0xf0] }
 0x762   :  { %v12602_v53 = vld [vmem:[#allocation8 + $0x1d18] sm:$0xf]  ;;  %v12347_v18 = vor.u32 %v14087_v20, %v12346_v3  ;;  %7942 = vmatpush.bf16.msrb.mxu3 %v12091_v32 }
 0x763   :  { %v14151_v1 = vld [vmem:[#allocation8 + $0x1d34] sm:$0xf0] }
 0x764   :  { %v12858_v9 = vld [vmem:[#allocation8 + $0x1f18] sm:$0xf]  ;;  %v12603_v33 = vor.u32 %v14151_v1, %v12602_v53  ;;  %7955 = vmatpush.bf16.msra.mxu2 %v12347_v18 }
 0x765   :  { %v14215_v5 = vld [vmem:[#allocation8 + $0x1f34] sm:$0xf0] }
 0x766   :  { %v12058_v59 = vld [vmem:[#allocation8 + $0x18d8] sm:$0xf]  ;;  %v12859_v6 = vor.u32 %v14215_v5, %v12858_v9  ;;  %7968 = vmatpush.bf16.msra.mxu0 %v12603_v33 }
 0x767   :  { %v14015_v27 = vld [vmem:[#allocation8 + $0x18f4] sm:$0xf0] }
 0x768   :  { %v12314_v12 = vld [vmem:[#allocation8 + $0x1ad8] sm:$0xf]  ;;  %v12059_v26 = vor.u32 %v14015_v27, %v12058_v59  ;;  %7981 = vmatpush.bf16.msra.mxu1 %v12859_v6 }
 0x769   :  { %v14079_v38 = vld [vmem:[#allocation8 + $0x1af4] sm:$0xf0] }
 0x76a   :  { %v12570_v21 = vld [vmem:[#allocation8 + $0x1cd8] sm:$0xf]  ;;  %v12315_v31 = vor.u32 %v14079_v38, %v12314_v12  ;;  %7943 = vmatpush.bf16.msrb.mxu3 %v12059_v26  ;;  %v7703_v26 = vpop.f32.mrf.mxu2 }
 0x76b   :  { %v14143_v19 = vld [vmem:[#allocation8 + $0x1cf4] sm:$0xf0] }
 0x76c   :  { %v12826_v23 = vld [vmem:[#allocation8 + $0x1ed8] sm:$0xf]  ;;  %v12571_v8 = vor.u32 %v14143_v19, %v12570_v21  ;;  %7956 = vmatpush.bf16.msra.mxu2 %v12315_v31  ;;  %v14854_v21 = vadd.f32 %v7727_v25, %v7715_v10 }
 0x76d   :  { %v14207_v17 = vld [vmem:[#allocation8 + $0x1ef4] sm:$0xf0] }
 0x76e   :  { %v12026_v45 = vld [vmem:[#allocation8 + $0x1898] sm:$0xf]  ;;  %v12827_v63 = vor.u32 %v14207_v17, %v12826_v23  ;;  %7969 = vmatpush.bf16.msra.mxu0 %v12571_v8  ;;  %v7690_v17 = vpop.f32.mrf.mxu3  ;;  %v13275_v8 = vld [vmem:[#allocation8 + $0x1dc] sm:$0xf] }
 0x76f   :  { %v14007_v14 = vld [vmem:[#allocation8 + $0x18b4] sm:$0xf0] }
 0x770   :  { %v12282_v7 = vld [vmem:[#allocation8 + $0x1a98] sm:$0xf]  ;;  %v12027_v61 = vor.u32 %v14007_v14, %v12026_v45  ;;  %7982 = vmatpush.bf16.msra.mxu1 %v12827_v63  ;;  %v9116_v63 = vld [vmem:[#allocation8 + $0x1f8] sm:$0xf0] }
 0x771   :  { %v14071_v56 = vld [vmem:[#allocation8 + $0x1ab4] sm:$0xf0]  ;;  %v9119_v2 = vor.u32 %v13275_v8, %v9116_v63  ;;  %v13315_v8 = vld [vmem:[#allocation8 + $0x31c] sm:$0xf] }
 0x772   :  { %v12538_v60 = vld [vmem:[#allocation8 + $0x1c98] sm:$0xf]  ;;  %v12283_v30 = vor.u32 %v14071_v56, %v12282_v7  ;;  %7944 = vmatpush.bf16.msrb.mxu3 %v12027_v61  ;;  %v13403_v7 = vld [vmem:[#allocation8 + $0x5dc] sm:$0xf] }
 0x773   :  { %v14135_v34 = vld [vmem:[#allocation8 + $0x1cb4] sm:$0xf0]  ;;  %v9084_v61 = vld [vmem:[#allocation8 + $0x1b8] sm:$0xf0] }
 0x774   :  { %v12794_v29 = vld [vmem:[#allocation8 + $0x1e98] sm:$0xf]  ;;  %v12539_v3 = vor.u32 %v14135_v34, %v12538_v60  ;;  %7957 = vmatpush.bf16.msra.mxu2 %v12283_v30  ;;  %v9628_v60 = vld [vmem:[#allocation8 + $0x5f8] sm:$0xf0]  ;;  %v9087_v10 = vor.u32 %v13267_v16, %v9084_v61 }
 0x775   :  { %v14199_v11 = vld [vmem:[#allocation8 + $0x1eb4] sm:$0xf0]  ;;  %v9884_v34 = vld [vmem:[#allocation8 + $0x7f8] sm:$0xf0]  ;;  %v9631_v30 = vor.u32 %v13403_v7, %v9628_v60  ;;  %v7779_v60 = vpop.f32.mrf.mxu1 }
 0x776   :  { %v11994_v28 = vld [vmem:[#allocation8 + $0x1858] sm:$0xf]  ;;  %v12795_v20 = vor.u32 %v14199_v11, %v12794_v29  ;;  %7970 = vmatpush.bf16.msra.mxu0 %v12539_v3  ;;  %v9340_v3 = vld [vmem:[#allocation8 + $0x3b8] sm:$0xf0] }
 0x777   :  { %v13999_v4 = vld [vmem:[#allocation8 + $0x1874] sm:$0xf0]  ;;  %v9276_v63 = vld [vmem:[#allocation8 + $0x338] sm:$0xf0] }
 0x778   :  { %v12250_v53 = vld [vmem:[#allocation8 + $0x1a58] sm:$0xf]  ;;  %v11995_v27 = vor.u32 %v13999_v4, %v11994_v28  ;;  %7983 = vmatpush.bf16.msra.mxu1 %v12795_v20  ;;  %v9887_v28 = vor.u32 %v13467_v22, %v9884_v34  ;;  %v13331_v4 = vld [vmem:[#allocation8 + $0x39c] sm:$0xf]  ;;  %v9279_v34 = vor.u32 %v13315_v8, %v9276_v63 }
 0x779   :  { %v14063_v1 = vld [vmem:[#allocation8 + $0x1a74] sm:$0xf0]  ;;  %v13395_v20 = vld [vmem:[#allocation8 + $0x59c] sm:$0xf] }
 0x77a   :  { %v12506_v9 = vld [vmem:[#allocation8 + $0x1c58] sm:$0xf]  ;;  %v12251_v33 = vor.u32 %v14063_v1, %v12250_v53  ;;  %7945 = vmatpush.bf16.msrb.mxu3 %v11995_v27  ;;  %v9596_v53 = vld [vmem:[#allocation8 + $0x5b8] sm:$0xf0] }
 0x77b   :  { %v14127_v5 = vld [vmem:[#allocation8 + $0x1c74] sm:$0xf0]  ;;  %v13459_v1 = vld [vmem:[#allocation8 + $0x79c] sm:$0xf] }
 0x77c   :  { %v12762_v32 = vld [vmem:[#allocation8 + $0x1e58] sm:$0xf]  ;;  %v12507_v19 = vor.u32 %v14127_v5, %v12506_v9  ;;  %7958 = vmatpush.bf16.msra.mxu2 %v12251_v33  ;;  %v9852_v9 = vld [vmem:[#allocation8 + $0x7b8] sm:$0xf0]  ;;  %v9343_v5 = vor.u32 %v13331_v4, %v9340_v3 }
 0x77d   :  { %v14191_v18 = vld [vmem:[#allocation8 + $0x1e74] sm:$0xf0]  ;;  %v9855_v27 = vor.u32 %v13459_v1, %v9852_v9  ;;  %v13323_v33 = vld [vmem:[#allocation8 + $0x35c] sm:$0xf] }
 0x77e   :  { %v11962_v59 = vld [vmem:[#allocation8 + $0x1818] sm:$0xf]  ;;  %v12763_v23 = vor.u32 %v14191_v18, %v12762_v32  ;;  %7971 = vmatpush.bf16.msra.mxu0 %v12507_v19  ;;  %v13259_v32 = vld [vmem:[#allocation8 + $0x15c] sm:$0xf] }
 0x77f   :  { %v13991_v6 = vld [vmem:[#allocation8 + $0x1834] sm:$0xf0]  ;;  %v9052_v18 = vld [vmem:[#allocation8 + $0x178] sm:$0xf0] }
 0x780   :  { %v12218_v12 = vld [vmem:[#allocation8 + $0x1a18] sm:$0xf]  ;;  %v11963_v56 = vor.u32 %v13991_v6, %v11962_v59  ;;  %7984 = vmatpush.bf16.msra.mxu1 %v12763_v23  ;;  %v9599_v59 = vor.u32 %v13395_v20, %v9596_v53  ;;  %v9308_v6 = vld [vmem:[#allocation8 + $0x378] sm:$0xf0]  ;;  %v9055_v17 = vor.u32 %v13259_v32, %v9052_v18  ;;  %v7740_v32 = vpop.f32.mrf.mxu3  ;;  %v7753_v18 = vpop.f32.mrf.mxu2 }
 0x781   :  { %v14055_v38 = vld [vmem:[#allocation8 + $0x1a34] sm:$0xf0]  ;;  %v13451_v19 = vld [vmem:[#allocation8 + $0x75c] sm:$0xf]  ;;  %v9311_v26 = vor.u32 %v13323_v33, %v9308_v6  ;;  %v7741_v6 = vadd.f32 %v7740_v32, %v14854_v21 }
 0x782   :  { %v12474_v39 = vld [vmem:[#allocation8 + $0x1c18] sm:$0xf]  ;;  %v12219_v25 = vor.u32 %v14055_v38, %v12218_v12  ;;  %7946 = vmatpush.bf16.msrb.mxu3 %v11963_v56  ;;  %v13387_v12 = vld [vmem:[#allocation8 + $0x55c] sm:$0xf] }
 0x783   :  { %v14119_v31 = vld [vmem:[#allocation8 + $0x1c34] sm:$0xf0]  ;;  %v9564_v38 = vld [vmem:[#allocation8 + $0x578] sm:$0xf0] }
 0x784   :  { %v12730_v45 = vld [vmem:[#allocation8 + $0x1e18] sm:$0xf]  ;;  %v12475_v29 = vor.u32 %v14119_v31, %v12474_v39  ;;  %7959 = vmatpush.bf16.msra.mxu2 %v12219_v25  ;;  %v9820_v23 = vld [vmem:[#allocation8 + $0x778] sm:$0xf0]  ;;  %v7766_v25 = vpop.f32.mrf.mxu0 }
 0x785   :  { %v14183_v14 = vld [vmem:[#allocation8 + $0x1e34] sm:$0xf0]  ;;  %7947 = vmatmul.bf16.vlgmr.msrb.gmra.mxu3 %v14673_v40  ;;  %v13251_v39 = vld [vmem:[#allocation8 + $0x11c] sm:$0xf] }
 0x786   :  { %v12731_v11 = vor.u32 %v14183_v14, %v12730_v45  ;;  %7972 = vmatpush.bf16.msra.mxu0 %v12475_v29  ;;  %7991 = vmatpush.bf16.msra.mxu3 %v9119_v2  ;;  %v9020_v31 = vld [vmem:[#allocation8 + $0x138] sm:$0xf0]  ;;  %v9567_v45 = vor.u32 %v13387_v12, %v9564_v38  ;;  %v9823_v14 = vor.u32 %v13451_v19, %v9820_v23 }
 0x787   :  { %7960 = vmatmul.bf16.vlgmr.msra.gmra.mxu2 %v14675_v43  ;;  %v13443_v7 = vld [vmem:[#allocation8 + $0x71c] sm:$0xf]  ;;  %v9023_v22 = vor.u32 %v13251_v39, %v9020_v31  ;;  %v9535_v2 = vor.u32 %v13379_v24, %v9532_v46  ;;  %v7754_v23 = vadd.f32 %v7753_v18, %v7741_v6 }
 0x788   :  { %7985 = vmatpush.bf16.msra.mxu1 %v12731_v11  ;;  %8004 = vmatpush.bf16.msrb.mxu2 %v9375_v0  ;;  %v9788_v56 = vld [vmem:[#allocation8 + $0x738] sm:$0xf0] }
 0x789   :  { %7973 = vmatmul.bf16.vlgmr.msra.gmra.mxu0 %v14677_v44  ;;  %v13243_v29 = vld [vmem:[#allocation8 + $0xdc] sm:$0xf]  ;;  %v9791_v0 = vor.u32 %v13443_v7, %v9788_v56  ;;  %v7767_v21 = vadd.f32 %v7766_v25, %v7754_v23 }
 0x78a   :  { %8017 = vmatpush.bf16.msrb.mxu0 %v9631_v30  ;;  %7992 = vmatpush.bf16.msra.mxu3 %v9087_v10  ;;  %v8988_v11 = vld [vmem:[#allocation8 + $0xf8] sm:$0xf0] }
 0x78b   :  { %7986 = vmatmul.bf16.vlgmr.msra.gmra.mxu1 %v14679_v55  ;;  %v13307_v16 = vld [vmem:[#allocation8 + $0x2dc] sm:$0xf]  ;;  %v8991_v20 = vor.u32 %v13243_v29, %v8988_v11  ;;  %v14861_v11 = vadd.f32 %v7779_v60, %v7767_v21 }
 0x78c   :  { %8030 = vmatpush.bf16.msrb.mxu1 %v9887_v28  ;;  %8005 = vmatpush.bf16.msrb.mxu2 %v9343_v5  ;;  %v9244_v61 = vld [vmem:[#allocation8 + $0x2f8] sm:$0xf0] }
 0x78d   :  { %v13371_v30 = vld [vmem:[#allocation8 + $0x4dc] sm:$0xf]  ;;  %v9247_v53 = vor.u32 %v13307_v16, %v9244_v61 }
 0x78e   :  { %8018 = vmatpush.bf16.msrb.mxu0 %v9599_v59  ;;  %7993 = vmatpush.bf16.msra.mxu3 %v9055_v17  ;;  %v9500_v28 = vld [vmem:[#allocation8 + $0x4f8] sm:$0xf0]  ;;  %v7768_v17 = vpop.f32.mrf.mxu0 }
 0x78f   :  { %v13435_v4 = vld [vmem:[#allocation8 + $0x6dc] sm:$0xf]  ;;  %v9503_v10 = vor.u32 %v13371_v30, %v9500_v28 }
 0x790   :  { %8031 = vmatpush.bf16.msrb.mxu1 %v9855_v27  ;;  %8006 = vmatpush.bf16.msrb.mxu2 %v9311_v26  ;;  %v9756_v3 = vld [vmem:[#allocation8 + $0x6f8] sm:$0xf0]  ;;  %v7781_v26 = vpop.f32.mrf.mxu1 }
 0x791   :  { %v13235_v1 = vld [vmem:[#allocation8 + $0x9c] sm:$0xf]  ;;  %v9759_v5 = vor.u32 %v13435_v4, %v9756_v3  ;;  %v7742_v3 = vpop.f32.mrf.mxu3 }
 0x792   :  { %8019 = vmatpush.bf16.msrb.mxu0 %v9567_v45  ;;  %7994 = vmatpush.bf16.msra.mxu3 %v9023_v22  ;;  %v8956_v9 = vld [vmem:[#allocation8 + $0xb8] sm:$0xf0] }
 0x793   :  { %v13299_v59 = vld [vmem:[#allocation8 + $0x29c] sm:$0xf]  ;;  %v8959_v39 = vor.u32 %v13235_v1, %v8956_v9 }
 0x794   :  { %8032 = vmatpush.bf16.msrb.mxu1 %v9823_v14  ;;  %8007 = vmatpush.bf16.msrb.mxu2 %v9279_v34  ;;  %v9212_v27 = vld [vmem:[#allocation8 + $0x2b8] sm:$0xf0] }
 0x795   :  { %v13363_v33 = vld [vmem:[#allocation8 + $0x49c] sm:$0xf]  ;;  %v9215_v31 = vor.u32 %v13299_v59, %v9212_v27 }
 0x796   :  { %8020 = vmatpush.bf16.msrb.mxu0 %v9535_v2  ;;  %v9468_v12 = vld [vmem:[#allocation8 + $0x4b8] sm:$0xf0]  ;;  %7995 = vmatpush.bf16.msra.mxu3 %v8991_v20  ;;  %v7755_v20 = vpop.f32.mrf.mxu2 }
 0x797   :  { %v13427_v38 = vld [vmem:[#allocation8 + $0x69c] sm:$0xf]  ;;  %v9471_v8 = vor.u32 %v13363_v33, %v9468_v12 }
 0x798   :  { %8033 = vmatpush.bf16.msrb.mxu1 %v9791_v0  ;;  %v9724_v19 = vld [vmem:[#allocation8 + $0x6b8] sm:$0xf0]  ;;  %8008 = vmatpush.bf16.msrb.mxu2 %v9247_v53 }
 0x799   :  { %v13227_v45 = vld [vmem:[#allocation8 + $0x5c] sm:$0xf]  ;;  %v9727_v63 = vor.u32 %v13427_v38, %v9724_v19 }
 0x79a   :  { %v8924_v14 = vld [vmem:[#allocation8 + $0x78] sm:$0xf0]  ;;  %8021 = vmatpush.bf16.msrb.mxu0 %v9503_v10  ;;  %7996 = vmatpush.bf16.msra.mxu3 %v8959_v39 }
 0x79b   :  { %v13291_v24 = vld [vmem:[#allocation8 + $0x25c] sm:$0xf]  ;;  %v8927_v2 = vor.u32 %v13227_v45, %v8924_v14 }
 0x79c   :  { %8034 = vmatpush.bf16.msrb.mxu1 %v9759_v5  ;;  %v9180_v46 = vld [vmem:[#allocation8 + $0x278] sm:$0xf0]  ;;  %8009 = vmatpush.bf16.msrb.mxu2 %v9215_v31 }
 0x79d   :  { %v13355_v7 = vld [vmem:[#allocation8 + $0x45c] sm:$0xf]  ;;  %v9183_v0 = vor.u32 %v13291_v24, %v9180_v46 }
 0x79e   :  { %v9436_v56 = vld [vmem:[#allocation8 + $0x478] sm:$0xf0]  ;;  %8022 = vmatpush.bf16.msrb.mxu0 %v9471_v8  ;;  %7997 = vmatpush.bf16.msra.mxu3 %v8927_v2 }
 0x79f   :  { %v13419_v22 = vld [vmem:[#allocation8 + $0x65c] sm:$0xf]  ;;  %v9439_v28 = vor.u32 %v13355_v7, %v9436_v56 }
 0x7a0   :  { %v9692_v34 = vld [vmem:[#allocation8 + $0x678] sm:$0xf0]  ;;  %8035 = vmatpush.bf16.msrb.mxu1 %v9727_v63  ;;  %8010 = vmatpush.bf16.msrb.mxu2 %v9183_v0 }
 0x7a1   :  { %v13219_v29 = vld [vmem:[#allocation8 + $0x1c] sm:$0xf]  ;;  %v9695_v4 = vor.u32 %v13419_v22, %v9692_v34 }
 0x7a2   :  { %v8892_v16 = vld [vmem:[#allocation8 + $0x38] sm:$0xf0]  ;;  %8023 = vmatpush.bf16.msrb.mxu0 %v9439_v28 }
 0x7a3   :  { %v13283_v61 = vld [vmem:[#allocation8 + $0x21c] sm:$0xf]  ;;  %v8895_v59 = vor.u32 %v13219_v29, %v8892_v16 }
 0x7a4   :  { %v9148_v30 = vld [vmem:[#allocation8 + $0x238] sm:$0xf0]  ;;  %8036 = vmatpush.bf16.msrb.mxu1 %v9695_v4 }
 0x7a5   :  { %v13347_v25 = vld [vmem:[#allocation8 + $0x41c] sm:$0xf]  ;;  %v9151_v27 = vor.u32 %v13283_v61, %v9148_v30  ;;  %7998 = vmatpush.bf16.msra.mxu3 %v8895_v59 }
 0x7a6   :  { %v9404_v53 = vld [vmem:[#allocation8 + $0x438] sm:$0xf0] }
 0x7a7   :  { %v13411_v1 = vld [vmem:[#allocation8 + $0x61c] sm:$0xf]  ;;  %v9407_v38 = vor.u32 %v13347_v25, %v9404_v53  ;;  %8011 = vmatpush.bf16.msrb.mxu2 %v9151_v27 }
 0x7a8   :  { %v9660_v9 = vld [vmem:[#allocation8 + $0x638] sm:$0xf0]  ;;  %7999 = vmatmul.bf16.vlgmr.msra.gmra.mxu3 %v14621_v47 }
 0x7a9   :  { %v13531_v10 = vld [vmem:[#allocation8 + $0x9dc] sm:$0xf]  ;;  %v9663_v19 = vor.u32 %v13411_v1, %v9660_v9  ;;  %8024 = vmatpush.bf16.msrb.mxu0 %v9407_v38 }
 0x7aa   :  { %v10140_v60 = vld [vmem:[#allocation8 + $0x9f8] sm:$0xf0]  ;;  %8012 = vmatmul.bf16.vlgmr.msrb.gmra.mxu2 %v14623_v48 }
 0x7ab   :  { %v13595_v5 = vld [vmem:[#allocation8 + $0xbdc] sm:$0xf]  ;;  %v10143_v23 = vor.u32 %v13531_v10, %v10140_v60  ;;  %8037 = vmatpush.bf16.msrb.mxu1 %v9663_v19 }
 0x7ac   :  { %v10396_v32 = vld [vmem:[#allocation8 + $0xbf8] sm:$0xf0]  ;;  %8025 = vmatmul.bf16.vlgmr.msrb.gmra.mxu0 %v14625_v49  ;;  %v7818_v49 = vpop.f32.mrf.mxu0 }
 0x7ad   :  { %v13659_v18 = vld [vmem:[#allocation8 + $0xddc] sm:$0xf]  ;;  %v10399_v17 = vor.u32 %v13595_v5, %v10396_v32  ;;  %8043 = vmatpush.bf16.msrb.mxu3 %v10143_v23 }
 0x7ae   :  { %v10652_v33 = vld [vmem:[#allocation8 + $0xdf8] sm:$0xf0]  ;;  %8038 = vmatmul.bf16.vlgmr.msrb.gmra.mxu1 %v14631_v54  ;;  %v14867_v54 = vpop.f32.mrf.mxu1 }
 0x7af   :  { %v13723_v6 = vld [vmem:[#allocation8 + $0xfdc] sm:$0xf]  ;;  %v10655_v31 = vor.u32 %v13659_v18, %v10652_v33  ;;  %8056 = vmatpush.bf16.msra.mxu2 %v10399_v17 }
 0x7b0   :  { %v10908_v12 = vld [vmem:[#allocation8 + $0xff8] sm:$0xf0] }
 0x7b1   :  { %v13523_v26 = vld [vmem:[#allocation8 + $0x99c] sm:$0xf]  ;;  %v10911_v45 = vor.u32 %v13723_v6, %v10908_v12  ;;  %8069 = vmatpush.bf16.msra.mxu0 %v10655_v31  ;;  %v14869_v31 = vld [vmem:[#allocation10] sm:$0xff] }
 0x7b2   :  { %v10108_v39 = vld [vmem:[#allocation8 + $0x9b8] sm:$0xf0] }
 0x7b3   :  { %v13587_v14 = vld [vmem:[#allocation8 + $0xb9c] sm:$0xf]  ;;  %v10111_v21 = vor.u32 %v13523_v26, %v10108_v39  ;;  %8082 = vmatpush.bf16.msra.mxu1 %v10911_v45  ;;  %v1405_v45 = vperm.slane %v14869_v31, 6 }
 0x7b4   :  { %v10364_v8 = vld [vmem:[#allocation8 + $0xbb8] sm:$0xf0] }
 0x7b5   :  { %v13651_v63 = vld [vmem:[#allocation8 + $0xd9c] sm:$0xf]  ;;  %v10367_v56 = vor.u32 %v13587_v14, %v10364_v8  ;;  %8044 = vmatpush.bf16.msrb.mxu3 %v10111_v21  ;;  %v7792_v21 = vpop.f32.mrf.mxu3 }
 0x7b6   :  { %v10620_v24 = vld [vmem:[#allocation8 + $0xdb8] sm:$0xf0] }
 0x7b7   :  { %v13715_v46 = vld [vmem:[#allocation8 + $0xf9c] sm:$0xf]  ;;  %v10623_v29 = vor.u32 %v13651_v63, %v10620_v24  ;;  %8057 = vmatpush.bf16.msra.mxu2 %v10367_v56  ;;  %v7805_v56 = vpop.f32.mrf.mxu2 }
 0x7b8   :  { %v10876_v7 = vld [vmem:[#allocation8 + $0xfb8] sm:$0xf0] }
 0x7b9   :  { %v13515_v22 = vld [vmem:[#allocation8 + $0x95c] sm:$0xf]  ;;  %v10879_v2 = vor.u32 %v13715_v46, %v10876_v7  ;;  %8070 = vmatpush.bf16.msra.mxu0 %v10623_v29 }
 0x7ba   :  { %v10076_v34 = vld [vmem:[#allocation8 + $0x978] sm:$0xf0] }
 0x7bb   :  { %v13579_v0 = vld [vmem:[#allocation8 + $0xb5c] sm:$0xf]  ;;  %v10079_v3 = vor.u32 %v13515_v22, %v10076_v34  ;;  %8083 = vmatpush.bf16.msra.mxu1 %v10879_v2  ;;  %v7793_v2 = vadd.f32 %v7792_v21, %v1405_v45 }
 0x7bc   :  { %v10332_v16 = vld [vmem:[#allocation8 + $0xb78] sm:$0xf0] }
 0x7bd   :  { %v13643_v61 = vld [vmem:[#allocation8 + $0xd5c] sm:$0xf]  ;;  %v10335_v20 = vor.u32 %v13579_v0, %v10332_v16  ;;  %8045 = vmatpush.bf16.msrb.mxu3 %v10079_v3 }
 0x7be   :  { %v10588_v30 = vld [vmem:[#allocation8 + $0xd78] sm:$0xf0] }
 0x7bf   :  { %v13707_v28 = vld [vmem:[#allocation8 + $0xf5c] sm:$0xf]  ;;  %v10591_v1 = vor.u32 %v13643_v61, %v10588_v30  ;;  %8058 = vmatpush.bf16.msra.mxu2 %v10335_v20  ;;  %v7806_v30 = vadd.f32 %v7805_v56, %v7793_v2 }
 0x7c0   :  { %v10844_v4 = vld [vmem:[#allocation8 + $0xf78] sm:$0xf0] }
 0x7c1   :  { %v13507_v25 = vld [vmem:[#allocation8 + $0x91c] sm:$0xf]  ;;  %v10847_v9 = vor.u32 %v13707_v28, %v10844_v4  ;;  %8071 = vmatpush.bf16.msra.mxu0 %v10591_v1  ;;  %v7820_v28 = vpop.f32.mrf.mxu0  ;;  %v7833_v4 = vpop.f32.mrf.mxu1 }
 0x7c2   :  { %v10044_v53 = vld [vmem:[#allocation8 + $0x938] sm:$0xf0] }
 0x7c3   :  { %v13571_v47 = vld [vmem:[#allocation8 + $0xb1c] sm:$0xf]  ;;  %v10047_v18 = vor.u32 %v13507_v25, %v10044_v53  ;;  %8084 = vmatpush.bf16.msra.mxu1 %v10847_v9 }
 0x7c4   :  { %v10300_v10 = vld [vmem:[#allocation8 + $0xb38] sm:$0xf0] }
 0x7c5   :  { %v13635_v48 = vld [vmem:[#allocation8 + $0xd1c] sm:$0xf]  ;;  %v10303_v59 = vor.u32 %v13571_v47, %v10300_v10  ;;  %8046 = vmatpush.bf16.msrb.mxu3 %v10047_v18 }
 0x7c6   :  { %v10556_v60 = vld [vmem:[#allocation8 + $0xd38] sm:$0xf0] }
 0x7c7   :  { %v13699_v5 = vld [vmem:[#allocation8 + $0xf1c] sm:$0xf]  ;;  %v10559_v12 = vor.u32 %v13635_v48, %v10556_v60  ;;  %8059 = vmatpush.bf16.msra.mxu2 %v10303_v59  ;;  %v7819_v60 = vadd.f32 %v7818_v49, %v7806_v30  ;;  %v7807_v49 = vpop.f32.mrf.mxu2 }
 0x7c8   :  { %v10812_v32 = vld [vmem:[#allocation8 + $0xf38] sm:$0xf0] }
 0x7c9   :  { %v13499_v27 = vld [vmem:[#allocation8 + $0x8dc] sm:$0xf]  ;;  %v10815_v38 = vor.u32 %v13699_v5, %v10812_v32  ;;  %8072 = vmatpush.bf16.msra.mxu0 %v10559_v12 }
 0x7ca   :  { %v10012_v33 = vld [vmem:[#allocation8 + $0x8f8] sm:$0xf0] }
 0x7cb   :  { %v13563_v6 = vld [vmem:[#allocation8 + $0xadc] sm:$0xf]  ;;  %v10015_v14 = vor.u32 %v13499_v27, %v10012_v33  ;;  %8085 = vmatpush.bf16.msra.mxu1 %v10815_v38 }
 0x7cc   :  { %v10268_v19 = vld [vmem:[#allocation8 + $0xaf8] sm:$0xf0] }
 0x7cd   :  { %v13627_v23 = vld [vmem:[#allocation8 + $0xcdc] sm:$0xf]  ;;  %v10271_v8 = vor.u32 %v13563_v6, %v10268_v19  ;;  %8047 = vmatpush.bf16.msrb.mxu3 %v10015_v14  ;;  %v14873_v19 = vadd.f32 %v14867_v54, %v7819_v60 }
 0x7ce   :  { %v10524_v17 = vld [vmem:[#allocation8 + $0xcf8] sm:$0xf0] }
 0x7cf   :  { %v13691_v26 = vld [vmem:[#allocation8 + $0xedc] sm:$0xf]  ;;  %v10527_v46 = vor.u32 %v13627_v23, %v10524_v17  ;;  %8060 = vmatpush.bf16.msra.mxu2 %v10271_v8 }
 0x7d0   :  { %v10780_v39 = vld [vmem:[#allocation8 + $0xef8] sm:$0xf0] }
 0x7d1   :  { %v13491_v63 = vld [vmem:[#allocation8 + $0x89c] sm:$0xf]  ;;  %v10783_v7 = vor.u32 %v13691_v26, %v10780_v39  ;;  %8073 = vmatpush.bf16.msra.mxu0 %v10527_v46  ;;  %v7794_v26 = vpop.f32.mrf.mxu3 }
 0x7d2   :  { %v9980_v24 = vld [vmem:[#allocation8 + $0x8b8] sm:$0xf0] }
 0x7d3   :  { %v13555_v22 = vld [vmem:[#allocation8 + $0xa9c] sm:$0xf]  ;;  %v9983_v3 = vor.u32 %v13491_v63, %v9980_v24  ;;  %8086 = vmatpush.bf16.msra.mxu1 %v10783_v7 }
 0x7d4   :  { %v10236_v34 = vld [vmem:[#allocation8 + $0xab8] sm:$0xf0] }
 0x7d5   :  { %v13619_v29 = vld [vmem:[#allocation8 + $0xc9c] sm:$0xf]  ;;  %v10239_v20 = vor.u32 %v13555_v22, %v10236_v34  ;;  %8048 = vmatpush.bf16.msrb.mxu3 %v9983_v3 }
 0x7d6   :  { %v10492_v0 = vld [vmem:[#allocation8 + $0xcb8] sm:$0xf0] }
 0x7d7   :  { %v13683_v16 = vld [vmem:[#allocation8 + $0xe9c] sm:$0xf]  ;;  %v10495_v1 = vor.u32 %v13619_v29, %v10492_v0  ;;  %8061 = vmatpush.bf16.msra.mxu2 %v10239_v20 }
 0x7d8   :  { %v10748_v61 = vld [vmem:[#allocation8 + $0xeb8] sm:$0xf0] }
 0x7d9   :  { %v13483_v25 = vld [vmem:[#allocation8 + $0x85c] sm:$0xf]  ;;  %v10751_v9 = vor.u32 %v13683_v16, %v10748_v61  ;;  %8074 = vmatpush.bf16.msra.mxu0 %v10495_v1 }
 0x7da   :  { %v9948_v53 = vld [vmem:[#allocation8 + $0x878] sm:$0xf0] }
 0x7db   :  { %v13547_v47 = vld [vmem:[#allocation8 + $0xa5c] sm:$0xf]  ;;  %v9951_v27 = vor.u32 %v13483_v25, %v9948_v53  ;;  %8087 = vmatpush.bf16.msra.mxu1 %v10751_v9 }
 0x7dc   :  { %v10204_v10 = vld [vmem:[#allocation8 + $0xa78] sm:$0xf0] }
 0x7dd   :  { %v13611_v48 = vld [vmem:[#allocation8 + $0xc5c] sm:$0xf]  ;;  %v10207_v33 = vor.u32 %v13547_v47, %v10204_v10  ;;  %8049 = vmatpush.bf16.msrb.mxu3 %v9951_v27 }
 0x7de   :  { %v10460_v5 = vld [vmem:[#allocation8 + $0xc78] sm:$0xf0] }
 0x7df   :  { %v13675_v32 = vld [vmem:[#allocation8 + $0xe5c] sm:$0xf]  ;;  %v10463_v23 = vor.u32 %v13611_v48, %v10460_v5  ;;  %8062 = vmatpush.bf16.msra.mxu2 %v10207_v33 }
 0x7e0   :  { %v10716_v18 = vld [vmem:[#allocation8 + $0xe78] sm:$0xf0] }
 0x7e1   :  { %v13475_v59 = vld [vmem:[#allocation8 + $0x81c] sm:$0xf]  ;;  %v10719_v17 = vor.u32 %v13675_v32, %v10716_v18  ;;  %8075 = vmatpush.bf16.msra.mxu0 %v10463_v23 }
 0x7e2   :  { %v9916_v6 = vld [vmem:[#allocation8 + $0x838] sm:$0xf0] }
 0x7e3   :  { %v13539_v12 = vld [vmem:[#allocation8 + $0xa1c] sm:$0xf]  ;;  %v9919_v56 = vor.u32 %v13475_v59, %v9916_v6  ;;  %8088 = vmatpush.bf16.msra.mxu1 %v10719_v17 }
 0x7e4   :  { %v10172_v38 = vld [vmem:[#allocation8 + $0xa38] sm:$0xf0] }
 0x7e5   :  { %v13603_v39 = vld [vmem:[#allocation8 + $0xc1c] sm:$0xf]  ;;  %v10175_v54 = vor.u32 %v13539_v12, %v10172_v38  ;;  %8050 = vmatpush.bf16.msrb.mxu3 %v9919_v56 }
 0x7e6   :  { %v10428_v45 = vld [vmem:[#allocation8 + $0xc38] sm:$0xf0] }
 0x7e7   :  { %v13667_v14 = vld [vmem:[#allocation8 + $0xe1c] sm:$0xf]  ;;  %v10431_v2 = vor.u32 %v13603_v39, %v10428_v45  ;;  %8063 = vmatpush.bf16.msra.mxu2 %v10175_v54 }
 0x7e8   :  { %v10684_v8 = vld [vmem:[#allocation8 + $0xe38] sm:$0xf0]  ;;  %8051 = vmatmul.bf16.vlgmr.msrb.gmra.mxu3 %v14643_v36 }
 0x7e9   :  { %v13787_v63 = vld [vmem:[#allocation8 + $0x11dc] sm:$0xf]  ;;  %v10687_v0 = vor.u32 %v13667_v14, %v10684_v8  ;;  %8076 = vmatpush.bf16.msra.mxu0 %v10431_v2 }
 0x7ea   :  { %v11164_v24 = vld [vmem:[#allocation8 + $0x11f8] sm:$0xf0]  ;;  %8064 = vmatmul.bf16.vlgmr.msra.gmra.mxu2 %v14647_v37 }
 0x7eb   :  { %v13851_v46 = vld [vmem:[#allocation8 + $0x13dc] sm:$0xf]  ;;  %v11167_v16 = vor.u32 %v13787_v63, %v11164_v24  ;;  %8089 = vmatpush.bf16.msra.mxu1 %v10687_v0 }
 0x7ec   :  { %v11420_v7 = vld [vmem:[#allocation8 + $0x13f8] sm:$0xf0]  ;;  %8077 = vmatmul.bf16.vlgmr.msra.gmra.mxu0 %v14651_v41  ;;  %v7870_v41 = vpop.f32.mrf.mxu0 }
 0x7ed   :  { %v13915_v21 = vld [vmem:[#allocation8 + $0x15dc] sm:$0xf]  ;;  %v11423_v61 = vor.u32 %v13851_v46, %v11420_v7  ;;  %8095 = vmatpush.bf16.msra.mxu3 %v11167_v16 }
 0x7ee   :  { %v11676_v22 = vld [vmem:[#allocation8 + $0x15f8] sm:$0xf0]  ;;  %8090 = vmatmul.bf16.vlgmr.msra.gmra.mxu1 %v14655_v42  ;;  %v7883_v42 = vpop.f32.mrf.mxu1 }
 0x7ef   :  { %v13979_v34 = vld [vmem:[#allocation8 + $0x17dc] sm:$0xf]  ;;  %v11679_v4 = vor.u32 %v13915_v21, %v11676_v22  ;;  %8108 = vmatpush.bf16.msrb.mxu2 %v11423_v61 }
 0x7f0   :  { %v11932_v29 = vld [vmem:[#allocation8 + $0x17f8] sm:$0xf0] }
 0x7f1   :  { %v13779_v30 = vld [vmem:[#allocation8 + $0x119c] sm:$0xf]  ;;  %v11935_v3 = vor.u32 %v13979_v34, %v11932_v29  ;;  %8121 = vmatpush.bf16.msrb.mxu0 %v11679_v4 }
 0x7f2   :  { %v11132_v28 = vld [vmem:[#allocation8 + $0x11b8] sm:$0xf0] }
 0x7f3   :  { %v13843_v20 = vld [vmem:[#allocation8 + $0x139c] sm:$0xf]  ;;  %v11135_v10 = vor.u32 %v13779_v30, %v11132_v28  ;;  %8134 = vmatpush.bf16.msrb.mxu1 %v11935_v3 }
 0x7f4   :  { %v11388_v25 = vld [vmem:[#allocation8 + $0x13b8] sm:$0xf0] }
 0x7f5   :  { %v13907_v53 = vld [vmem:[#allocation8 + $0x159c] sm:$0xf]  ;;  %v11391_v48 = vor.u32 %v13843_v20, %v11388_v25  ;;  %8096 = vmatpush.bf16.msra.mxu3 %v11135_v10 }
 0x7f6   :  { %v11644_v1 = vld [vmem:[#allocation8 + $0x15b8] sm:$0xf0] }
 0x7f7   :  { %v13971_v9 = vld [vmem:[#allocation8 + $0x179c] sm:$0xf]  ;;  %v11647_v32 = vor.u32 %v13907_v53, %v11644_v1  ;;  %8109 = vmatpush.bf16.msrb.mxu2 %v11391_v48  ;;  %v7844_v53 = vpop.f32.mrf.mxu3  ;;  %v7857_v1 = vpop.f32.mrf.mxu2 }
 0x7f8   :  { %v11900_v47 = vld [vmem:[#allocation8 + $0x17b8] sm:$0xf0]  ;;  %v7845_v48 = vadd.f32 %v7844_v53, %v14873_v19 }
 0x7f9   :  { %v13771_v60 = vld [vmem:[#allocation8 + $0x115c] sm:$0xf]  ;;  %v11903_v18 = vor.u32 %v13971_v9, %v11900_v47  ;;  %8122 = vmatpush.bf16.msrb.mxu0 %v11647_v32 }
 0x7fa   :  { %v11100_v5 = vld [vmem:[#allocation8 + $0x1178] sm:$0xf0] }
 0x7fb   :  { %v13835_v59 = vld [vmem:[#allocation8 + $0x135c] sm:$0xf]  ;;  %v11103_v23 = vor.u32 %v13771_v60, %v11100_v5  ;;  %8135 = vmatpush.bf16.msrb.mxu1 %v11903_v18  ;;  %v7858_v18 = vadd.f32 %v7857_v1, %v7845_v48 }
 0x7fc   :  { %v11356_v27 = vld [vmem:[#allocation8 + $0x1378] sm:$0xf0] }
 0x7fd   :  { %v13899_v33 = vld [vmem:[#allocation8 + $0x155c] sm:$0xf]  ;;  %v11359_v17 = vor.u32 %v13835_v59, %v11356_v27  ;;  %8097 = vmatpush.bf16.msra.mxu3 %v11103_v23  ;;  %v7872_v59 = vpop.f32.mrf.mxu0  ;;  %v7885_v27 = vpop.f32.mrf.mxu1  ;;  %v7871_v19 = vadd.f32 %v7870_v41, %v7858_v18 }
 0x7fe   :  { %v11612_v6 = vld [vmem:[#allocation8 + $0x1578] sm:$0xf0] }
 0x7ff   :  { %v13963_v12 = vld [vmem:[#allocation8 + $0x175c] sm:$0xf]  ;;  %v11615_v39 = vor.u32 %v13899_v33, %v11612_v6  ;;  %8110 = vmatpush.bf16.msrb.mxu2 %v11359_v17 }
 0x800   :  { %v11868_v38 = vld [vmem:[#allocation8 + $0x1778] sm:$0xf0] }
 0x801   :  { %v13763_v26 = vld [vmem:[#allocation8 + $0x111c] sm:$0xf]  ;;  %v11871_v45 = vor.u32 %v13963_v12, %v11868_v38  ;;  %8123 = vmatpush.bf16.msrb.mxu0 %v11615_v39 }
 0x802   :  { %v11068_v49 = vld [vmem:[#allocation8 + $0x1138] sm:$0xf0] }
 0x803   :  { %v13827_v36 = vld [vmem:[#allocation8 + $0x131c] sm:$0xf]  ;;  %v11071_v46 = vor.u32 %v13763_v26, %v11068_v49  ;;  %8136 = vmatpush.bf16.msrb.mxu1 %v11871_v45 }
 0x804   :  { %v11324_v14 = vld [vmem:[#allocation8 + $0x1338] sm:$0xf0] }
 0x805   :  { %v13891_v37 = vld [vmem:[#allocation8 + $0x151c] sm:$0xf]  ;;  %v11327_v7 = vor.u32 %v13827_v36, %v11324_v14  ;;  %8098 = vmatpush.bf16.msra.mxu3 %v11071_v46 }
 0x806   :  { %v11580_v8 = vld [vmem:[#allocation8 + $0x1538] sm:$0xf0] }
 0x807   :  { %v13955_v63 = vld [vmem:[#allocation8 + $0x171c] sm:$0xf]  ;;  %v11583_v54 = vor.u32 %v13891_v37, %v11580_v8  ;;  %8111 = vmatpush.bf16.msrb.mxu2 %v11327_v7 }
 0x808   :  { %v11836_v24 = vld [vmem:[#allocation8 + $0x1738] sm:$0xf0] }
 0x809   :  { %v13755_v21 = vld [vmem:[#allocation8 + $0x10dc] sm:$0xf]  ;;  %v11839_v22 = vor.u32 %v13955_v63, %v11836_v24  ;;  %8124 = vmatpush.bf16.msrb.mxu0 %v11583_v54 }
 0x80a   :  { %v11036_v56 = vld [vmem:[#allocation8 + $0x10f8] sm:$0xf0] }
 0x80b   :  { %v13819_v34 = vld [vmem:[#allocation8 + $0x12dc] sm:$0xf]  ;;  %v11039_v30 = vor.u32 %v13755_v21, %v11036_v56  ;;  %8137 = vmatpush.bf16.msrb.mxu1 %v11839_v22  ;;  %v14880_v21 = vadd.f32 %v7883_v42, %v7871_v19  ;;  %v7846_v22 = vpop.f32.mrf.mxu3 }
 0x80c   :  { %v11292_v29 = vld [vmem:[#allocation8 + $0x12f8] sm:$0xf0] }
 0x80d   :  { %v13883_v2 = vld [vmem:[#allocation8 + $0x14dc] sm:$0xf]  ;;  %v11295_v28 = vor.u32 %v13819_v34, %v11292_v29  ;;  %8099 = vmatpush.bf16.msra.mxu3 %v11039_v30  ;;  %v7859_v34 = vpop.f32.mrf.mxu2 }
 0x80e   :  { %v11548_v0 = vld [vmem:[#allocation8 + $0x14f8] sm:$0xf0] }
 0x80f   :  { %v13947_v16 = vld [vmem:[#allocation8 + $0x16dc] sm:$0xf]  ;;  %v11551_v20 = vor.u32 %v13883_v2, %v11548_v0  ;;  %8112 = vmatpush.bf16.msrb.mxu2 %v11295_v28 }
 0x810   :  { %v11804_v61 = vld [vmem:[#allocation8 + $0x16f8] sm:$0xf0] }
 0x811   :  { %v13747_v4 = vld [vmem:[#allocation8 + $0x109c] sm:$0xf]  ;;  %v11807_v25 = vor.u32 %v13947_v16, %v11804_v61  ;;  %8125 = vmatpush.bf16.msrb.mxu0 %v11551_v20 }
 0x812   :  { %v11004_v3 = vld [vmem:[#allocation8 + $0x10b8] sm:$0xf0] }
 0x813   :  { %v13811_v9 = vld [vmem:[#allocation8 + $0x129c] sm:$0xf]  ;;  %v11007_v33 = vor.u32 %v13747_v4, %v11004_v3  ;;  %8138 = vmatpush.bf16.msrb.mxu1 %v11807_v25 }
 0x814   :  { %v11260_v47 = vld [vmem:[#allocation8 + $0x12b8] sm:$0xf0] }
 0x815   :  { %v13875_v10 = vld [vmem:[#allocation8 + $0x149c] sm:$0xf]  ;;  %v11263_v6 = vor.u32 %v13811_v9, %v11260_v47  ;;  %8100 = vmatpush.bf16.msra.mxu3 %v11007_v33 }
 0x816   :  { %v11516_v60 = vld [vmem:[#allocation8 + $0x14b8] sm:$0xf0] }
 0x817   :  { %v13939_v5 = vld [vmem:[#allocation8 + $0x169c] sm:$0xf]  ;;  %v11519_v23 = vor.u32 %v13875_v10, %v11516_v60  ;;  %8113 = vmatpush.bf16.msrb.mxu2 %v11263_v6 }
 0x818   :  { %v11772_v32 = vld [vmem:[#allocation8 + $0x16b8] sm:$0xf0] }
 0x819   :  { %v13739_v12 = vld [vmem:[#allocation8 + $0x105c] sm:$0xf]  ;;  %v11775_v17 = vor.u32 %v13939_v5, %v11772_v32  ;;  %8126 = vmatpush.bf16.msrb.mxu0 %v11519_v23 }
 0x81a   :  { %v10972_v38 = vld [vmem:[#allocation8 + $0x1078] sm:$0xf0] }
 0x81b   :  { %v13803_v26 = vld [vmem:[#allocation8 + $0x125c] sm:$0xf]  ;;  %v10975_v8 = vor.u32 %v13739_v12, %v10972_v38  ;;  %8139 = vmatpush.bf16.msrb.mxu1 %v11775_v17 }
 0x81c   :  { %v11228_v49 = vld [vmem:[#allocation8 + $0x1278] sm:$0xf0] }
 0x81d   :  { %v13867_v39 = vld [vmem:[#allocation8 + $0x145c] sm:$0xf]  ;;  %v11231_v63 = vor.u32 %v13803_v26, %v11228_v49  ;;  %8101 = vmatpush.bf16.msra.mxu3 %v10975_v8 }
 0x81e   :  { %v11484_v45 = vld [vmem:[#allocation8 + $0x1478] sm:$0xf0] }
 0x81f   :  { %v13931_v36 = vld [vmem:[#allocation8 + $0x165c] sm:$0xf]  ;;  %v11487_v56 = vor.u32 %v13867_v39, %v11484_v45  ;;  %8114 = vmatpush.bf16.msrb.mxu2 %v11231_v63 }
 0x820   :  { %v11740_v14 = vld [vmem:[#allocation8 + $0x1678] sm:$0xf0] }
 0x821   :  { %v13731_v37 = vld [vmem:[#allocation8 + $0x101c] sm:$0xf]  ;;  %v11743_v54 = vor.u32 %v13931_v36, %v11740_v14  ;;  %8127 = vmatpush.bf16.msrb.mxu0 %v11487_v56 }
 0x822   :  { %v10940_v24 = vld [vmem:[#allocation8 + $0x1038] sm:$0xf0] }
 0x823   :  { %v13795_v46 = vld [vmem:[#allocation8 + $0x121c] sm:$0xf]  ;;  %v10943_v3 = vor.u32 %v13731_v37, %v10940_v24  ;;  %8140 = vmatpush.bf16.msrb.mxu1 %v11743_v54 }
 0x824   :  { %v11196_v7 = vld [vmem:[#allocation8 + $0x1238] sm:$0xf0] }
 0x825   :  { %v13859_v41 = vld [vmem:[#allocation8 + $0x141c] sm:$0xf]  ;;  %v11199_v42 = vor.u32 %v13795_v46, %v11196_v7  ;;  %8102 = vmatpush.bf16.msra.mxu3 %v10943_v3 }
 0x826   :  { %v11452_v29 = vld [vmem:[#allocation8 + $0x1438] sm:$0xf0] }
 0x827   :  { %v13923_v2 = vld [vmem:[#allocation8 + $0x161c] sm:$0xf]  ;;  %v11455_v1 = vor.u32 %v13859_v41, %v11452_v29  ;;  %8115 = vmatpush.bf16.msrb.mxu2 %v11199_v42 }
 0x828   :  { %v11708_v0 = vld [vmem:[#allocation8 + $0x1638] sm:$0xf0]  ;;  %8103 = vmatmul.bf16.vlgmr.msra.gmra.mxu3 %v14661_v51 }
 0x829   :  { %v14043_v16 = vld [vmem:[#allocation8 + $0x19dc] sm:$0xf]  ;;  %v11711_v9 = vor.u32 %v13923_v2, %v11708_v0  ;;  %8128 = vmatpush.bf16.msrb.mxu0 %v11455_v1 }
 0x82a   :  { %v12188_v61 = vld [vmem:[#allocation8 + $0x19f8] sm:$0xf0]  ;;  %8116 = vmatmul.bf16.vlgmr.msrb.gmra.mxu2 %v14663_v52 }
 0x82b   :  { %v14107_v30 = vld [vmem:[#allocation8 + $0x1bdc] sm:$0xf]  ;;  %v12191_v47 = vor.u32 %v14043_v16, %v12188_v61  ;;  %8141 = vmatpush.bf16.msrb.mxu1 %v11711_v9 }
 0x82c   :  { %v12444_v28 = vld [vmem:[#allocation8 + $0x1bf8] sm:$0xf0]  ;;  %8129 = vmatmul.bf16.vlgmr.msrb.gmra.mxu0 %v14665_v57  ;;  %v7922_v57 = vpop.f32.mrf.mxu0 }
 0x82d   :  { %v14171_v4 = vld [vmem:[#allocation8 + $0x1ddc] sm:$0xf]  ;;  %v12447_v10 = vor.u32 %v14107_v30, %v12444_v28  ;;  %8147 = vmatpush.bf16.msrb.mxu3 %v12191_v47 }
 0x82e   :  { %v12700_v20 = vld [vmem:[#allocation8 + $0x1df8] sm:$0xf0]  ;;  %8142 = vmatmul.bf16.vlgmr.msrb.gmra.mxu1 %v14667_v58  ;;  %v7935_v58 = vpop.f32.mrf.mxu1 }
 0x82f   :  { %v14235_v25 = vld [vmem:[#allocation8 + $0x1fdc] sm:$0xf]  ;;  %v12703_v5 = vor.u32 %v14171_v4, %v12700_v20  ;;  %8160 = vmatpush.bf16.msra.mxu2 %v12447_v10 }
 0x830   :  { %v12956_v53 = vld [vmem:[#allocation8 + $0x1ff8] sm:$0xf0] }
 0x831   :  { %v14035_v48 = vld [vmem:[#allocation8 + $0x199c] sm:$0xf]  ;;  %v12959_v32 = vor.u32 %v14235_v25, %v12956_v53  ;;  %8173 = vmatpush.bf16.msra.mxu0 %v12703_v5  ;;  %v7896_v5 = vpop.f32.mrf.mxu3 }
 0x832   :  { %v12156_v60 = vld [vmem:[#allocation8 + $0x19b8] sm:$0xf0] }
 0x833   :  { %v14099_v18 = vld [vmem:[#allocation8 + $0x1b9c] sm:$0xf]  ;;  %v12159_v38 = vor.u32 %v14035_v48, %v12156_v60  ;;  %8186 = vmatpush.bf16.msra.mxu1 %v12959_v32  ;;  %v7909_v32 = vpop.f32.mrf.mxu2 }
 0x834   :  { %v12412_v59 = vld [vmem:[#allocation8 + $0x1bb8] sm:$0xf0] }
 0x835   :  { %v14163_v27 = vld [vmem:[#allocation8 + $0x1d9c] sm:$0xf]  ;;  %v12415_v23 = vor.u32 %v14099_v18, %v12412_v59  ;;  %8148 = vmatpush.bf16.msrb.mxu3 %v12159_v38 }
 0x836   :  { %v12668_v33 = vld [vmem:[#allocation8 + $0x1db8] sm:$0xf0] }
 0x837   :  { %v14227_v6 = vld [vmem:[#allocation8 + $0x1f9c] sm:$0xf]  ;;  %v12671_v49 = vor.u32 %v14163_v27, %v12668_v33  ;;  %8161 = vmatpush.bf16.msra.mxu2 %v12415_v23  ;;  %v7897_v33 = vadd.f32 %v7896_v5, %v14880_v21  ;;  %v14253_v5 = vld [vmem:[#allocation11 + $0x68] sm:$0xff] }
 0x838   :  { %v12924_v12 = vld [vmem:[#allocation8 + $0x1fb8] sm:$0xf0] }
 0x839   :  { %v14027_v17 = vld [vmem:[#allocation8 + $0x195c] sm:$0xf]  ;;  %v12927_v39 = vor.u32 %v14227_v6, %v12924_v12  ;;  %8174 = vmatpush.bf16.msra.mxu0 %v12671_v49  ;;  %v7910_v23 = vadd.f32 %v7909_v32, %v7897_v33  ;;  %v14261_v32 = vld [vmem:[#allocation11 + $0xa8] sm:$0xff]  ;;  %v14243_v33 = vld [vmem:[#allocation11 + $0x18] sm:$0xff] }
 0x83a   :  { %v12124_v26 = vld [vmem:[#allocation8 + $0x1978] sm:$0xf0] }
 0x83b   :  { %v14091_v19 = vld [vmem:[#allocation8 + $0x1b5c] sm:$0xf]  ;;  %v12127_v63 = vor.u32 %v14027_v17, %v12124_v26  ;;  %8187 = vmatpush.bf16.msra.mxu1 %v12927_v39  ;;  %v7924_v17 = vpop.f32.mrf.mxu0  ;;  %v7937_v26 = vpop.f32.mrf.mxu1  ;;  %v7923_v21 = vadd.f32 %v7922_v57, %v7910_v23 }
 0x83c   :  { %v12380_v45 = vld [vmem:[#allocation8 + $0x1b78] sm:$0xf0] }
 0x83d   :  { %v14155_v36 = vld [vmem:[#allocation8 + $0x1d5c] sm:$0xf]  ;;  %v12383_v24 = vor.u32 %v14091_v19, %v12380_v45  ;;  %8149 = vmatpush.bf16.msrb.mxu3 %v12127_v63 }
 0x83e   :  { %v12636_v14 = vld [vmem:[#allocation8 + $0x1d78] sm:$0xf0] }
 0x83f   :  { %v14219_v37 = vld [vmem:[#allocation8 + $0x1f5c] sm:$0xf]  ;;  %v12639_v56 = vor.u32 %v14155_v36, %v12636_v14  ;;  %8162 = vmatpush.bf16.msra.mxu2 %v12383_v24 }
 0x840   :  { %v12892_v8 = vld [vmem:[#allocation8 + $0x1f78] sm:$0xf0] }
 0x841   :  { %v14019_v46 = vld [vmem:[#allocation8 + $0x191c] sm:$0xf]  ;;  %v12895_v54 = vor.u32 %v14219_v37, %v12892_v8  ;;  %8175 = vmatpush.bf16.msra.mxu0 %v12639_v56 }
 0x842   :  { %v12092_v7 = vld [vmem:[#allocation8 + $0x1938] sm:$0xf0] }
 0x843   :  { %v14083_v51 = vld [vmem:[#allocation8 + $0x1b1c] sm:$0xf]  ;;  %v12095_v2 = vor.u32 %v14019_v46, %v12092_v7  ;;  %8188 = vmatpush.bf16.msra.mxu1 %v12895_v54 }
 0x844   :  { %v12348_v22 = vld [vmem:[#allocation8 + $0x1b38] sm:$0xf0] }
 0x845   :  { %v14147_v52 = vld [vmem:[#allocation8 + $0x1d1c] sm:$0xf]  ;;  %v12351_v0 = vor.u32 %v14083_v51, %v12348_v22  ;;  %8150 = vmatpush.bf16.msrb.mxu3 %v12095_v2  ;;  %v7911_v2 = vpop.f32.mrf.mxu2 }
 0x846   :  { %v12604_v34 = vld [vmem:[#allocation8 + $0x1d38] sm:$0xf0]  ;;  %v8202_v2 = vmax.f32 %v14801_v35, 0.0  ;;  %v14285_v35 = vld [vmem:[#allocation11 + $0x168] sm:$0xff] }
 0x847   :  { %v14211_v41 = vld [vmem:[#allocation8 + $0x1f1c] sm:$0xf]  ;;  %v12607_v30 = vor.u32 %v14147_v52, %v12604_v34  ;;  %8163 = vmatpush.bf16.msra.mxu2 %v12351_v0  ;;  %v14887_v52 = vadd.f32 %v7935_v58, %v7923_v21 }
 0x848   :  { %v12860_v29 = vld [vmem:[#allocation8 + $0x1f38] sm:$0xf0] }
 0x849   :  { %v14011_v16 = vld [vmem:[#allocation8 + $0x18dc] sm:$0xf]  ;;  %v12863_v28 = vor.u32 %v14211_v41, %v12860_v29  ;;  %8176 = vmatpush.bf16.msra.mxu0 %v12607_v30  ;;  %v7898_v29 = vpop.f32.mrf.mxu3 }
 0x84a   :  { %v12060_v61 = vld [vmem:[#allocation8 + $0x18f8] sm:$0xf0]  ;;  %v14287_v29 = vld [vmem:[#allocation11 + $0x178] sm:$0xff] }
 0x84b   :  { %v14075_v4 = vld [vmem:[#allocation8 + $0x1adc] sm:$0xf]  ;;  %v12063_v1 = vor.u32 %v14011_v16, %v12060_v61  ;;  %8189 = vmatpush.bf16.msra.mxu1 %v12863_v28 }
 0x84c   :  { %v12316_v3 = vld [vmem:[#allocation8 + $0x1af8] sm:$0xf0] }
 0x84d   :  { %v14139_v42 = vld [vmem:[#allocation8 + $0x1cdc] sm:$0xf]  ;;  %v12319_v9 = vor.u32 %v14075_v4, %v12316_v3  ;;  %8151 = vmatpush.bf16.msrb.mxu3 %v12063_v1  ;;  %v14271_v1 = vld [vmem:[#allocation11 + $0xf8] sm:$0xff]  ;;  %v14899_v17 = vpop.f32.mrf.mxu2 }
 0x84e   :  { %v12572_v20 = vld [vmem:[#allocation8 + $0x1cf8] sm:$0xf0] }
 0x84f   :  { %v14203_v25 = vld [vmem:[#allocation8 + $0x1edc] sm:$0xf]  ;;  %v12575_v48 = vor.u32 %v14139_v42, %v12572_v20  ;;  %8164 = vmatpush.bf16.msra.mxu2 %v12319_v9  ;;  %v14247_v20 = vld [vmem:[#allocation11 + $0x38] sm:$0xff] }
 0x850   :  { %v12828_v53 = vld [vmem:[#allocation8 + $0x1ef8] sm:$0xf0] }
 0x851   :  { %v14003_v47 = vld [vmem:[#allocation8 + $0x189c] sm:$0xf]  ;;  %v12831_v60 = vor.u32 %v14203_v25, %v12828_v53  ;;  %8177 = vmatpush.bf16.msra.mxu0 %v12575_v48  ;;  %v14255_v25 = vld [vmem:[#allocation11 + $0x78] sm:$0xff]  ;;  %v14897_v23 = vpop.f32.mrf.mxu3 }
 0x852   :  { %v12028_v10 = vld [vmem:[#allocation8 + $0x18b8] sm:$0xf0]  ;;  %v14263_v53 = vld [vmem:[#allocation11 + $0xb8] sm:$0xff] }
 0x853   :  { %v14067_v18 = vld [vmem:[#allocation8 + $0x1a9c] sm:$0xf]  ;;  %v12031_v49 = vor.u32 %v14003_v47, %v12028_v10  ;;  %8190 = vmatpush.bf16.msra.mxu1 %v12831_v60  ;;  %v14245_v60 = vld [vmem:[#allocation11 + $0x28] sm:$0xff] }
 0x854   :  { %v12284_v59 = vld [vmem:[#allocation8 + $0x1ab8] sm:$0xf0] }
 0x855   :  { %v14131_v27 = vld [vmem:[#allocation8 + $0x1c9c] sm:$0xf]  ;;  %v12287_v39 = vor.u32 %v14067_v18, %v12284_v59  ;;  %8152 = vmatpush.bf16.msrb.mxu3 %v12031_v49  ;;  %v14269_v18 = vld [vmem:[#allocation11 + $0xe8] sm:$0xff]  ;;  %v14893_v59 = vpop.f32.mrf.mxu0 }
 0x856   :  { %v12540_v6 = vld [vmem:[#allocation8 + $0x1cb8] sm:$0xf0] }
 0x857   :  { %v14195_v12 = vld [vmem:[#allocation8 + $0x1e9c] sm:$0xf]  ;;  %v12543_v36 = vor.u32 %v14131_v27, %v12540_v6  ;;  %8165 = vmatpush.bf16.msra.mxu2 %v12287_v39  ;;  %v14895_v27 = vpop.f32.mrf.mxu1  ;;  %v14251_v6 = vld [vmem:[#allocation11 + $0x58] sm:$0xff] }
 0x858   :  { %v12796_v38 = vld [vmem:[#allocation8 + $0x1eb8] sm:$0xf0] }
 0x859   :  { %v13995_v19 = vld [vmem:[#allocation8 + $0x185c] sm:$0xf]  ;;  %v12799_v14 = vor.u32 %v14195_v12, %v12796_v38  ;;  %8178 = vmatpush.bf16.msra.mxu0 %v12543_v36  ;;  %v14259_v12 = vld [vmem:[#allocation11 + $0x98] sm:$0xff]  ;;  %v7950_v21 = vpop.f32.mrf.mxu3 }
 0x85a   :  { %v11996_v45 = vld [vmem:[#allocation8 + $0x1878] sm:$0xf0]  ;;  %v14267_v38 = vld [vmem:[#allocation11 + $0xd8] sm:$0xff] }
 0x85b   :  { %v14059_v37 = vld [vmem:[#allocation8 + $0x1a5c] sm:$0xf]  ;;  %v11999_v56 = vor.u32 %v13995_v19, %v11996_v45  ;;  %8191 = vmatpush.bf16.msra.mxu1 %v12799_v14  ;;  %v14241_v14 = vld [vmem:[#allocation11 + $0x8] sm:$0xff] }
 0x85c   :  { %v12252_v8 = vld [vmem:[#allocation8 + $0x1a78] sm:$0xf0] }
 0x85d   :  { %v14123_v63 = vld [vmem:[#allocation8 + $0x1c5c] sm:$0xf]  ;;  %v12255_v54 = vor.u32 %v14059_v37, %v12252_v8  ;;  %8153 = vmatpush.bf16.msrb.mxu3 %v11999_v56  ;;  %v7976_v26 = vpop.f32.mrf.mxu0  ;;  %v14249_v37 = vld [vmem:[#allocation11 + $0x48] sm:$0xff]  ;;  %v8199_v56 = vmax.f32 %v14710_v13, 0.0 }
 0x85e   :  { %v12508_v24 = vld [vmem:[#allocation8 + $0x1c78] sm:$0xf0]  ;;  %v14257_v8 = vld [vmem:[#allocation11 + $0x88] sm:$0xff] }
 0x85f   :  { %v14187_v46 = vld [vmem:[#allocation8 + $0x1e5c] sm:$0xf]  ;;  %v12511_v34 = vor.u32 %v14123_v63, %v12508_v24  ;;  %8166 = vmatpush.bf16.msra.mxu2 %v12255_v54  ;;  %v7989_v49 = vpop.f32.mrf.mxu1  ;;  %v14265_v63 = vld [vmem:[#allocation11 + $0xc8] sm:$0xff]  ;;  %v7963_v24 = vpop.f32.mrf.mxu2  ;;  %v14256_v54 = vld [vmem:[#allocation11 + $0x80] sm:$0xff] }
 0x860   :  { %v12764_v7 = vld [vmem:[#allocation8 + $0x1e78] sm:$0xf0] }
 0x861   :  { %v13987_v51 = vld [vmem:[#allocation8 + $0x181c] sm:$0xf]  ;;  %v12767_v41 = vor.u32 %v14187_v46, %v12764_v7  ;;  %8179 = vmatpush.bf16.msra.mxu0 %v12511_v34  ;;  %v14240_v46 = vld [vmem:[#allocation11] sm:$0xff]  ;;  %v8201_v34 = vmax.f32 %v14771_v50, 0.0  ;;  %v14277_v50 = vld [vmem:[#allocation11 + $0x128] sm:$0xff] }
 0x862   :  { %v11964_v22 = vld [vmem:[#allocation8 + $0x1838] sm:$0xf0]  ;;  %v14248_v7 = vld [vmem:[#allocation11 + $0x40] sm:$0xff] }
 0x863   :  { %v14051_v0 = vld [vmem:[#allocation8 + $0x1a1c] sm:$0xf]  ;;  %v11967_v4 = vor.u32 %v13987_v51, %v11964_v22  ;;  %8192 = vmatpush.bf16.msra.mxu1 %v12767_v41  ;;  %v14264_v51 = vld [vmem:[#allocation11 + $0xc0] sm:$0xff]  ;;  %v8200_v22 = vmax.f32 %v14741_v15, 0.0  ;;  %v14279_v41 = vld [vmem:[#allocation11 + $0x138] sm:$0xff]  ;;  %v8209_v13 = vpack.c.bf16 %v8201_v34, %v8201_v34 }
 0x864   :  { %v12220_v16 = vld [vmem:[#allocation8 + $0x1a38] sm:$0xf0]  ;;  %v14300_v34 = vld [vmem:[#allocation11 + $0x1e0] sm:$0xff] }
 0x865   :  { %v14115_v57 = vld [vmem:[#allocation8 + $0x1c1c] sm:$0xf]  ;;  %v12223_v3 = vor.u32 %v14051_v0, %v12220_v16  ;;  %8154 = vmatpush.bf16.msrb.mxu3 %v11967_v4  ;;  %v14295_v0 = vld [vmem:[#allocation11 + $0x1b8] sm:$0xff]  ;;  %v8207_v16 = vpack.c.bf16 %v8199_v56, %v8199_v56  ;;  %v14293_v4 = vld [vmem:[#allocation11 + $0x1a8] sm:$0xff] }
 0x866   :  { %v12476_v61 = vld [vmem:[#allocation8 + $0x1c38] sm:$0xf0]  ;;  %v14303_v56 = vld [vmem:[#allocation11 + $0x1f8] sm:$0xff] }
 0x867   :  { %v14179_v30 = vld [vmem:[#allocation8 + $0x1e1c] sm:$0xf]  ;;  %v12479_v58 = vor.u32 %v14115_v57, %v12476_v61  ;;  %8167 = vmatpush.bf16.msra.mxu2 %v12223_v3  ;;  %v8208_v57 = vpack.c.bf16 %v8200_v22, %v8200_v22  ;;  %v8026_v3 = vpop.f32.mrf.mxu0  ;;  %v14301_v22 = vld [vmem:[#allocation11 + $0x1e8] sm:$0xff] }
 0x868   :  { %v12732_v28 = vld [vmem:[#allocation8 + $0x1e38] sm:$0xf0]  ;;  %8155 = vmatmul.bf16.vlgmr.msrb.gmra.mxu3 %v14673_v40  ;;  %v14244_v40 = vld [vmem:[#allocation11 + $0x20] sm:$0xff] }
 0x869   :  { %v12735_v42 = vor.u32 %v14179_v30, %v12732_v28  ;;  %8180 = vmatpush.bf16.msra.mxu0 %v12479_v58  ;;  %8731 = vmatpush.bf16.msra.mxu3 %v14247_v20  ;;  %v14246_v9 = vld [vmem:[#allocation11 + $0x30] sm:$0xff]  ;;  %v8210_v28 = vpack.c.bf16 %v8202_v2, %v8202_v2  ;;  %v8039_v58 = vpop.f32.mrf.mxu1  ;;  %v14284_v20 = vld [vmem:[#allocation11 + $0x160] sm:$0xff] }
 0x86a   :  { %v14254_v47 = vld [vmem:[#allocation11 + $0x70] sm:$0xff]  ;;  %8168 = vmatmul.bf16.vlgmr.msra.gmra.mxu2 %v14675_v43  ;;  %v14252_v43 = vld [vmem:[#allocation11 + $0x60] sm:$0xff] }
 0x86b   :  { %8193 = vmatpush.bf16.msra.mxu1 %v12735_v42  ;;  %8744 = vmatpush.bf16.msrb.mxu2 %v14255_v25  ;;  %v14262_v10 = vld [vmem:[#allocation11 + $0xb0] sm:$0xff]  ;;  %v14276_v42 = vld [vmem:[#allocation11 + $0x120] sm:$0xff] }
 0x86c   :  { %v14270_v48 = vld [vmem:[#allocation11 + $0xf0] sm:$0xff]  ;;  %8181 = vmatmul.bf16.vlgmr.msra.gmra.mxu0 %v14677_v44  ;;  %v14260_v44 = vld [vmem:[#allocation11 + $0xa0] sm:$0xff] }
 0x86d   :  { %8757 = vmatpush.bf16.msrb.mxu0 %v14263_v53  ;;  %8732 = vmatpush.bf16.msra.mxu3 %v14246_v9  ;;  %v14242_v39 = vld [vmem:[#allocation11 + $0x10] sm:$0xff]  ;;  %v14292_v25 = vld [vmem:[#allocation11 + $0x1a0] sm:$0xff]  ;;  %v7949_v53 = vadd.f32 %v14897_v23, %v14887_v52  ;;  %v14275_v9 = vld [vmem:[#allocation11 + $0x118] sm:$0xff] }
 0x86e   :  { %8194 = vmatmul.bf16.vlgmr.msra.gmra.mxu1 %v14679_v55  ;;  %v14268_v55 = vld [vmem:[#allocation11 + $0xe0] sm:$0xff]  ;;  %v14250_v19 = vld [vmem:[#allocation11 + $0x50] sm:$0xff]  ;;  %v14289_v23 = vld [vmem:[#allocation11 + $0x188] sm:$0xff] }
 0x86f   :  { %8770 = vmatpush.bf16.msrb.mxu1 %v14271_v1  ;;  %8745 = vmatpush.bf16.msrb.mxu2 %v14254_v47  ;;  %v14258_v45 = vld [vmem:[#allocation11 + $0x90] sm:$0xff]  ;;  %v1406_v1 = vperm.slane %v14869_v31, 7  ;;  %v14283_v47 = vld [vmem:[#allocation11 + $0x158] sm:$0xff] }
 0x870   :  { %v14266_v36 = vld [vmem:[#allocation11 + $0xd0] sm:$0xff] }
 0x871   :  { %8758 = vmatpush.bf16.msrb.mxu0 %v14262_v10  ;;  %8733 = vmatpush.bf16.msra.mxu3 %v14245_v60  ;;  %v14278_v61 = vld [vmem:[#allocation11 + $0x130] sm:$0xff]  ;;  %v14291_v10 = vld [vmem:[#allocation11 + $0x198] sm:$0xff]  ;;  %v8013_v60 = vpop.f32.mrf.mxu2 }
 0x872   :  { %v14286_v30 = vld [vmem:[#allocation11 + $0x170] sm:$0xff] }
 0x873   :  { %8771 = vmatpush.bf16.msrb.mxu1 %v14270_v48  ;;  %8746 = vmatpush.bf16.msrb.mxu2 %v14253_v5  ;;  %v14294_v15 = vld [vmem:[#allocation11 + $0x1b0] sm:$0xff]  ;;  %v8000_v48 = vpop.f32.mrf.mxu3  ;;  %v7962_v5 = vadd.f32 %v14899_v17, %v7949_v53 }
 0x874   :  { %v14282_v52 = vld [vmem:[#allocation11 + $0x150] sm:$0xff] }
 0x875   :  { %8759 = vmatpush.bf16.msrb.mxu0 %v14261_v32  ;;  %8734 = vmatpush.bf16.msra.mxu3 %v14244_v40  ;;  %v8001_v32 = vadd.f32 %v8000_v48, %v1406_v1  ;;  %v8028_v40 = vpop.f32.mrf.mxu0  ;;  %v14290_v31 = vld [vmem:[#allocation11 + $0x190] sm:$0xff] }
 0x877   :  { %8772 = vmatpush.bf16.msrb.mxu1 %v14269_v18  ;;  %8747 = vmatpush.bf16.msrb.mxu2 %v14252_v43  ;;  %v8014_v18 = vadd.f32 %v8013_v60, %v8001_v32  ;;  %v8041_v43 = vpop.f32.mrf.mxu1 }
 0x879   :  { %8760 = vmatpush.bf16.msrb.mxu0 %v14260_v44  ;;  %8735 = vmatpush.bf16.msra.mxu3 %v14243_v33  ;;  %v14274_v44 = vld [vmem:[#allocation11 + $0x110] sm:$0xff]  ;;  %v8027_v33 = vadd.f32 %v8026_v3, %v8014_v18  ;;  %v8015_v26 = vpop.f32.mrf.mxu2 }
 0x87b   :  { %8773 = vmatpush.bf16.msrb.mxu1 %v14268_v55  ;;  %8748 = vmatpush.bf16.msrb.mxu2 %v14251_v6  ;;  %v7975_v55 = vadd.f32 %v14893_v59, %v7962_v5  ;;  %v14273_v6 = vld [vmem:[#allocation11 + $0x108] sm:$0xff]  ;;  %v8002_v17 = vpop.f32.mrf.mxu3  ;;  %v8204_v59 = vmax.f32 %v14861_v11, 0.0 }
 0x87d   :  { %8761 = vmatpush.bf16.msrb.mxu0 %v14259_v12  ;;  %8736 = vmatpush.bf16.msra.mxu3 %v14242_v39  ;;  %v14281_v12 = vld [vmem:[#allocation11 + $0x148] sm:$0xff]  ;;  %v7988_v49 = vadd.f32 %v14895_v27, %v7975_v55  ;;  %v14272_v39 = vld [vmem:[#allocation11 + $0x100] sm:$0xff]  ;;  %v8078_v27 = vpop.f32.mrf.mxu0 }
 0x87f   :  { %8774 = vmatpush.bf16.msrb.mxu1 %v14267_v38  ;;  %8749 = vmatpush.bf16.msrb.mxu2 %v14250_v19  ;;  %v8040_v38 = vadd.f32 %v8039_v58, %v8027_v33  ;;  %v14280_v19 = vld [vmem:[#allocation11 + $0x140] sm:$0xff]  ;;  %v8091_v21 = vpop.f32.mrf.mxu1 }
 0x881   :  { %8762 = vmatpush.bf16.msrb.mxu0 %v14258_v45  ;;  %8737 = vmatpush.bf16.msra.mxu3 %v14241_v14  ;;  %v8203_v45 = vmax.f32 %v14831_v62, 0.0  ;;  %v8205_v14 = vmax.f32 %v7988_v49, 0.0 }
 0x883   :  { %8775 = vmatpush.bf16.msrb.mxu1 %v14266_v36  ;;  %8750 = vmatpush.bf16.msrb.mxu2 %v14249_v37  ;;  %v14288_v36 = vld [vmem:[#allocation11 + $0x180] sm:$0xff]  ;;  %v8211_v37 = vpack.c.bf16 %v8203_v45, %v8203_v45  ;;  %v8052_v24 = vpop.f32.mrf.mxu3 }
 0x885   :  { %8763 = vmatpush.bf16.msrb.mxu0 %v14257_v8  ;;  %8738 = vmatpush.bf16.msra.mxu3 %v14240_v46  ;;  %v8212_v8 = vpack.c.bf16 %v8204_v59, %v8204_v59  ;;  %v8065_v46 = vpop.f32.mrf.mxu2 }
 0x887   :  { %8776 = vmatpush.bf16.msrb.mxu1 %v14265_v63  ;;  %8751 = vmatpush.bf16.msrb.mxu2 %v14248_v7  ;;  %v8213_v63 = vpack.c.bf16 %v8205_v14, %v8205_v14  ;;  %v8080_v7 = vpop.f32.mrf.mxu0  ;;  %v8093_v62 = vpop.f32.mrf.mxu1 }
 0x888   :  { %8739 = vmatmul.bf16.vlgmr.msra.gmra.mxu3 %v8207_v16 }
 0x889   :  { %8764 = vmatpush.bf16.msrb.mxu0 %v14256_v54  ;;  %8783 = vmatpush.bf16.msrb.mxu3 %v14279_v41  ;;  %v14299_v41 = vld [vmem:[#allocation11 + $0x1d8] sm:$0xff] }
 0x88a   :  { %8752 = vmatmul.bf16.vlgmr.msrb.gmra.mxu2 %v8208_v57  ;;  %v14298_v57 = vld [vmem:[#allocation11 + $0x1d0] sm:$0xff] }
 0x88b   :  { %8777 = vmatpush.bf16.msrb.mxu1 %v14264_v51  ;;  %8796 = vmatpush.bf16.msra.mxu2 %v14287_v29  ;;  %v8054_v11 = vpop.f32.mrf.mxu3  ;;  %v14302_v51 = vld [vmem:[#allocation11 + $0x1f0] sm:$0xff] }
 0x88c   :  { %8765 = vmatmul.bf16.vlgmr.msrb.gmra.mxu0 %v8209_v13  ;;  %v8053_v13 = vadd.f32 %v8052_v24, %v8040_v38 }
 0x88d   :  { %8809 = vmatpush.bf16.msra.mxu0 %v14295_v0  ;;  %8784 = vmatpush.bf16.msrb.mxu3 %v14278_v61  ;;  %v8067_v54 = vpop.f32.mrf.mxu2 }
 0x88e   :  { %8778 = vmatmul.bf16.vlgmr.msrb.gmra.mxu1 %v8210_v28  ;;  %v14297_v28 = vld [vmem:[#allocation11 + $0x1c8] sm:$0xff] }
 0x88f   :  { %8797 = vmatpush.bf16.msra.mxu2 %v14286_v30  ;;  %8822 = vmatpush.bf16.msra.mxu1 %v14303_v56 }
 0x891   :  { %8810 = vmatpush.bf16.msra.mxu0 %v14294_v15  ;;  %8785 = vmatpush.bf16.msrb.mxu3 %v14277_v50  ;;  %v8066_v15 = vadd.f32 %v8065_v46, %v8053_v13 }
 0x893   :  { %8798 = vmatpush.bf16.msra.mxu2 %v14285_v35  ;;  %8823 = vmatpush.bf16.msra.mxu1 %v14302_v51  ;;  %v8079_v3 = vadd.f32 %v8078_v27, %v8066_v15 }
 0x895   :  { %8811 = vmatpush.bf16.msra.mxu0 %v14293_v4  ;;  %8786 = vmatpush.bf16.msrb.mxu3 %v14276_v42  ;;  %v14296_v4 = vld [vmem:[#allocation11 + $0x1c0] sm:$0xff]  ;;  %v8092_v58 = vadd.f32 %v8091_v21, %v8079_v3 }
 0x897   :  { %8799 = vmatpush.bf16.msra.mxu2 %v14284_v20  ;;  %8824 = vmatpush.bf16.msra.mxu1 %v14301_v22 }
 0x899   :  { %8812 = vmatpush.bf16.msra.mxu0 %v14292_v25  ;;  %8787 = vmatpush.bf16.msrb.mxu3 %v14275_v9 }
 0x89b   :  { %8800 = vmatpush.bf16.msra.mxu2 %v14283_v47  ;;  %8825 = vmatpush.bf16.msra.mxu1 %v14300_v34 }
 0x89d   :  { %8813 = vmatpush.bf16.msra.mxu0 %v14291_v10  ;;  %8788 = vmatpush.bf16.msrb.mxu3 %v14274_v44 }
 0x89f   :  { %8801 = vmatpush.bf16.msra.mxu2 %v14282_v52  ;;  %8826 = vmatpush.bf16.msra.mxu1 %v14299_v41 }
 0x8a1   :  { %8814 = vmatpush.bf16.msra.mxu0 %v14290_v31  ;;  %8789 = vmatpush.bf16.msrb.mxu3 %v14273_v6  ;;  %v14320_v6 = vld [vmem:[#allocation13] ss:$0 sm:$0xff] }
 0x8a3   :  { %8802 = vmatpush.bf16.msra.mxu2 %v14281_v12  ;;  %8827 = vmatpush.bf16.msra.mxu1 %v14298_v57 }
 0x8a5   :  { %8815 = vmatpush.bf16.msra.mxu0 %v14289_v23  ;;  %8790 = vmatpush.bf16.msrb.mxu3 %v14272_v39 }
 0x8a7   :  { %8803 = vmatpush.bf16.msra.mxu2 %v14280_v19  ;;  %8828 = vmatpush.bf16.msra.mxu1 %v14297_v28 }
 0x8a8   :  { %8791 = vmatmul.bf16.vlgmr.msrb.gmra.mxu3 %v8211_v37 }
 0x8a9   :  { %8816 = vmatpush.bf16.msra.mxu0 %v14288_v36  ;;  %v8130_v29 = vpop.f32.mrf.mxu0 }
 0x8aa   :  { %8804 = vmatmul.bf16.vlgmr.msra.gmra.mxu2 %v8212_v8 }
 0x8ab   :  { %v8143_v2 = vpop.f32.mrf.mxu1  ;;  %v8104_v0 = vpop.f32.mrf.mxu3  ;;  %8829 = vmatpush.bf16.msra.mxu1 %v14296_v4 }
 0x8ac   :  { %8817 = vmatmul.bf16.vlgmr.msra.gmra.mxu0 %v8213_v63  ;;  %v8105_v42 = vadd.f32 %v8104_v0, %v8092_v58 }
 0x8ad   :  { %v8117_v16 = vpop.f32.mrf.mxu2 }
 0x8ae   :  { %v8118_v20 = vadd.f32 %v8117_v16, %v8105_v42 }
 0x8b0   :  { %v8131_v25 = vadd.f32 %v8130_v29, %v8118_v20 }
 0x8b1   :  { %v8132_v61 = vpop.f32.mrf.mxu0 }
 0x8b2   :  { %v8144_v9 = vadd.f32 %v8143_v2, %v8131_v25 }
 0x8b3   :  { %v8145_v30 = vpop.f32.mrf.mxu1  ;;  %v8106_v50 = vpop.f32.mrf.mxu3 }
 0x8b5   :  { %v8119_v35 = vpop.f32.mrf.mxu2 }
 0x8e9   :  { %v8182_v53 = vpop.f32.mrf.mxu0 }
 0x8eb   :  { %v8195_v1 = vpop.f32.mrf.mxu1  ;;  %v8156_v47 = vpop.f32.mrf.mxu3 }
 0x8ec   :  { %v8157_v48 = vadd.f32 %v8156_v47, %v8144_v9 }
 0x8ed   :  { %v8169_v10 = vpop.f32.mrf.mxu2 }
 0x8ee   :  { %v8170_v60 = vadd.f32 %v8169_v10, %v8157_v48 }
 0x8f0   :  { %v8183_v18 = vadd.f32 %v8182_v53, %v8170_v60 }
 0x8f1   :  { %v8184_v5 = vpop.f32.mrf.mxu0 }
 0x8f2   :  { %v8196_v40 = vadd.f32 %v8195_v1, %v8183_v18 }
 0x8f3   :  { %v8197_v32 = vpop.f32.mrf.mxu1  ;;  %v8158_v43 = vpop.f32.mrf.mxu3 }
 0x8f4   :  { %v8206_v52 = vmax.f32 %v8196_v40, 0.0 }
 0x8f5   :  { %v8171_v44 = vpop.f32.mrf.mxu2 }
 0x8f6   :  { %v8214_v31 = vpack.c.bf16 %v8206_v52, %v8206_v52 }
 0x8f8   :  { %8830 = vmatmul.bf16.vlgmr.msra.gmra.mxu1 %v8214_v31 }
 0x909   :  { %v8766_v55 = vpop.f32.mrf.mxu0 }
 0x90b   :  { %v8779_v33 = vpop.f32.mrf.mxu1  ;;  %v8740_v12 = vpop.f32.mrf.mxu3 }
 0x90c   :  { %v8741_v38 = vadd.f32 %v14320_v6, %v8740_v12 }
 0x90d   :  { %v8753_v23 = vpop.f32.mrf.mxu2 }
 0x90e   :  { %v8754_v17 = vadd.f32 %v8753_v23, %v8741_v38 }
 0x910   :  { %v8767_v39 = vadd.f32 %v8766_v55, %v8754_v17 }
 0x911   :  { %v8768_v26 = vpop.f32.mrf.mxu0 }
 0x912   :  { %v8780_v19 = vadd.f32 %v8779_v33, %v8767_v39 }
 0x913   :  { %v8781_v49 = vpop.f32.mrf.mxu1  ;;  %v8742_v45 = vpop.f32.mrf.mxu3 }
 0x915   :  { %v8755_v59 = vpop.f32.mrf.mxu2 }
 0x929   :  { %v8818_v36 = vpop.f32.mrf.mxu0 }
 0x92b   :  { %v8792_v14 = vpop.f32.mrf.mxu3 }
 0x92c   :  { %v8793_v8 = vadd.f32 %v8792_v14, %v8780_v19 }
 0x92d   :  { %v8805_v37 = vpop.f32.mrf.mxu2 }
 0x92e   :  { %v8806_v63 = vadd.f32 %v8805_v37, %v8793_v8 }
 0x930   :  { %v8819_v21 = vadd.f32 %v8818_v36, %v8806_v63 }
 0x931   :  { %v8820_v27 = vpop.f32.mrf.mxu0 }
 0x933   :  { %v8794_v24 = vpop.f32.mrf.mxu3 }
 0x935   :  { %v8807_v46 = vpop.f32.mrf.mxu2 }
 0x975   :  { %v8831_v7 = vpop.f32.mrf.mxu1 }
 0x976   :  { %v8832_v62 = vadd.f32 %v8831_v7, %v8819_v21 }
 0x978   :  { %8835 = vst [vmem:[#allocation14] sm:$0x3] %v8832_v62 }
 0x979   :  { %8846 = dma.vmem_to_hbm [thread:$0]  %s8842_s20, 32, %s8844_s4, [#allocation4]  }
 0x97d   :  { %v8833_v56 = vpop.f32.mrf.mxu1 }
 0x97e   :  { %14526 = dma.done.wait [#allocation4], 32  }
 0x97f   :  { %14527 = vsyncadd [#allocation4], 4294967264 }
 0x980   :  { %8851 = vsyncpa [#allocation3], 1 }
 0x981   :  { %8852 = vsyncpa [#allocation6], 1 }
 0x982   :  { %8853 = vsyncpa [#allocation9], 1 }
 0x983   :  { %8854 = vsyncpa [#allocation12], 1 }
 0x984   :  { %8855 = vsyncpa [#allocation4], 1 }

</bundles_post_ra>
